<compile_context>
chip_gen: v5e
topology: v5e:2x2
jax: 0.10.0
libtpu: 0.0.40
codegen_flags: <defaults>
</compile_context>

<pallas_src>
import math

import jax
import jax.numpy as jnp
from jax.experimental import pallas as pl
from jax.experimental.pallas import tpu as pltpu

_VMEM = pl.BlockSpec(memory_space=pltpu.MemorySpace.VMEM)
_SQRT2 = math.sqrt(2.0)
_LN_EPS = 1e-5


# ----------------------------- in-kernel math -------------------------------

def _silu(x):
    return x * (1.0 / (1.0 + jnp.exp(-x)))


def _erf(x):
    # Abramowitz & Stegun 7.1.26 rational approximation, |abs err| < 1.5e-7.
    # TODO(synk): lax.erf has no guaranteed Mosaic lowering; exact erf replaced
    # by this float32-accurate polynomial (PyTorch nn.GELU default is erf-exact).
    p = 0.3275911
    a1, a2, a3, a4, a5 = 0.254829592, -0.284496736, 1.421413741, -1.453152027, 1.061405429
    sgn = jnp.where(x >= 0, 1.0, -1.0).astype(x.dtype)
    ax = jnp.abs(x)
    t = 1.0 / (1.0 + p * ax)
    poly = ((((a5 * t + a4) * t + a3) * t + a2) * t + a1) * t
    return sgn * (1.0 - poly * jnp.exp(-ax * ax))


def _gelu(x):
    return 0.5 * x * (1.0 + _erf(x / _SQRT2))


def _layernorm(xv, gamma, beta):
    mu = jnp.mean(xv, axis=-1, keepdims=True)
    xc = xv - mu
    var = jnp.mean(xc * xc, axis=-1, keepdims=True)
    return xc * jax.lax.rsqrt(var + _LN_EPS) * gamma + beta


# ------------------------------- Pallas ops ---------------------------------

def time_embed_op(t, w1, b1, w2, b2):
    """Linear(1, D4) -> SiLU -> Linear(D4, D), fully fused.  t:(B,1) -> (B,D)."""
    B = t.shape[0]
    D4 = w1.shape[1]
    D = w2.shape[1]

    def kernel(t_ref, w1_ref, b1_ref, w2_ref, b2_ref, o_ref):
        # K == 1 contraction is a broadcasted elementwise op.
        t1 = _silu(t_ref[...] * w1_ref[...] + b1_ref[...])          # (B, D4)
        y = jnp.dot(t1, w2_ref[...], preferred_element_type=jnp.float32) + b2_ref[...]
        o_ref[...] = y.astype(o_ref.dtype)

    return pl.pallas_call(
        kernel,
        out_shape=jax.ShapeDtypeStruct((B, D), jnp.float32),
        in_specs=[_VMEM] * 5,
        out_specs=_VMEM,
    )(t, w1, b1.reshape(1, D4), w2, b2.reshape(1, D))


def transformer_block_op(x, p, num_heads):
    """Whole TransformerBlock in one kernel, gridded over batch.

    x:(B,L,D).  Computes  x + attn(LN1(x))  then  (..) + FF(LN2(..)).
    """
    B, L, D = x.shape
    F = p["ff_w1"].shape[1]
    hd = D // num_heads
    scale = hd ** -0.5

    def kernel(x_ref, g1_ref, be1_ref, wqkv_ref, bqkv_ref, wo_ref, bo_ref,
               g2_ref, be2_ref, w1_ref, bf1_ref, w2_ref, bf2_ref, o_ref):
        xv = x_ref[0]                                                # (L, D)

        # --- LayerNorm 1 (fused into the QKV matmul input) ---
        h = _layernorm(xv, g1_ref[...], be1_ref[...])

        # --- fused QKV projection: one (L,D) @ (D,3D) MXU pass ---
        qkv = jnp.dot(h, wqkv_ref[...],
                      preferred_element_type=jnp.float32) + bqkv_ref[...]

        # --- per-head scaled-dot-product attention (all heads in one body) ---
        heads = []
        for hh in range(num_heads):
            lo = hh * hd
            q = qkv[:, lo:lo + hd]
            k = qkv[:, D + lo:D + lo + hd]
            v = qkv[:, 2 * D + lo:2 * D + lo + hd]
            s = jax.lax.dot_general(q, k, (((1,), (1,)), ((), ())),
                                    preferred_element_type=jnp.float32) * scale
            m = jnp.max(s, axis=-1, keepdims=True)
            e = jnp.exp(s - m)
            # divide -> EUP reciprocal (frees the VALU slot)
            pr = e * pl.reciprocal(jnp.sum(e, axis=-1, keepdims=True), approx=True)
            heads.append(jnp.dot(pr, v, preferred_element_type=jnp.float32))
        attn = jnp.concatenate(heads, axis=-1)                       # (L, D)

        # --- output projection + residual ---
        x1 = (jnp.dot(attn, wo_ref[...], preferred_element_type=jnp.float32)
              + bo_ref[...] + xv)

        # --- LayerNorm 2 + feed-forward (GELU) + residual ---
        h2 = _layernorm(x1, g2_ref[...], be2_ref[...])
        f = _gelu(jnp.dot(h2, w1_ref[...],
                          preferred_element_type=jnp.float32) + bf1_ref[...])
        y = (jnp.dot(f, w2_ref[...], preferred_element_type=jnp.float32)
             + bf2_ref[...] + x1)
        o_ref[0] = y.astype(o_ref.dtype)

    row = lambda v: v.reshape(1, -1)
    args = [x,
            row(p["ln1_g"]), row(p["ln1_b"]),
            p["wqkv"], row(p["bqkv"]),
            p["wo"], row(p["bo"]),
            row(p["ln2_g"]), row(p["ln2_b"]),
            p["ff_w1"], row(p["ff_b1"]),
            p["ff_w2"], row(p["ff_b2"])]

    def _rep2(shape):
        return pl.BlockSpec(shape, lambda i: (0, 0))

    in_specs = ([pl.BlockSpec((1, L, D), lambda i: (i, 0, 0))]
                + [_rep2(a.shape) for a in args[1:]])

    flops_per_b = (2 * L * D * (3 * D)          # QKV
                   + num_heads * 4 * L * L * hd  # QK^T and PV
                   + 2 * L * D * D              # out proj
                   + 2 * L * D * F + 2 * L * F * D)  # FF
    transc_per_b = num_heads * L * L + L * F
    bytes_acc = 4 * (2 * B * L * D + sum(int(a.size) for a in args[1:]))

    return pl.pallas_call(
        kernel,
        out_shape=jax.ShapeDtypeStruct((B, L, D), x.dtype),
        grid=(B,),
        in_specs=in_specs,
        out_specs=pl.BlockSpec((1, L, D), lambda i: (i, 0, 0)),
        compiler_params=pltpu.CompilerParams(dimension_semantics=("parallel",)),
        cost_estimate=pl.CostEstimate(flops=B * flops_per_b,
                                      transcendentals=B * transc_per_b,
                                      bytes_accessed=bytes_acc),
    )(*args)


def conv3_silu_maxpool_op(x, w, b):
    """Conv(k=3, pad=1 along L) + SiLU + MaxPool(2), fused, gridded over batch.
    x:(B,L,Cin)  w:(3,Cin,Cout)  b:(Cout,)  ->  (B, L//2, Cout).

    The padded input is pre-split (in XLA) into even / odd rows so every
    in-kernel slice is a contiguous value slice (no strided ref loads):
      conv_out[2j]   = xpad[2j]@w0   + xpad[2j+1]@w1 + xpad[2j+2]@w2 + b
      conv_out[2j+1] = xpad[2j+1]@w0 + xpad[2j+2]@w1 + xpad[2j+3]@w2 + b
      out[j]         = max(silu(conv_out[2j]), silu(conv_out[2j+1]))
    """
    B, L, Cin = x.shape
    Cout = w.shape[-1]
    Lp = L // 2
    xpad = jnp.pad(x, ((0, 0), (1, 1), (0, 0)))                      # (B, L+2, Cin)
    x_even = xpad[:, 0::2, :]                                        # rows 0,2,..,L   -> (B, Lp+1, Cin)
    x_odd = xpad[:, 1::2, :]                                         # rows 1,3,..,L+1 -> (B, Lp+1, Cin)

    def kernel(xe_ref, xo_ref, w_ref, b_ref, o_ref):
        xe = xe_ref[0]                                               # (Lp+1, Cin)
        xo = xo_ref[0]                                               # (Lp+1, Cin)
        w0, w1, w2 = w_ref[0], w_ref[1], w_ref[2]
        bb = b_ref[...]
        x0 = xe[:Lp]          # xpad[2j]
        x1 = xo[:Lp]          # xpad[2j+1]
        x2 = xe[1:]           # xpad[2j+2]
        x3 = xo[1:]           # xpad[2j+3]
        y_even = (jnp.dot(x0, w0, preferred_element_type=jnp.float32)
                  + jnp.dot(x1, w1, preferred_element_type=jnp.float32)
                  + jnp.dot(x2, w2, preferred_element_type=jnp.float32) + bb)
        y_odd = (jnp.dot(x1, w0, preferred_element_type=jnp.float32)
                 + jnp.dot(x2, w1, preferred_element_type=jnp.float32)
                 + jnp.dot(x3, w2, preferred_element_type=jnp.float32) + bb)
        o_ref[0] = jnp.maximum(_silu(y_even), _silu(y_odd)).astype(o_ref.dtype)

    return pl.pallas_call(
        kernel,
        out_shape=jax.ShapeDtypeStruct((B, Lp, Cout), x.dtype),
        grid=(B,),
        in_specs=[pl.BlockSpec((1, Lp + 1, Cin), lambda i: (i, 0, 0)),
                  pl.BlockSpec((1, Lp + 1, Cin), lambda i: (i, 0, 0)),
                  pl.BlockSpec((3, Cin, Cout), lambda i: (0, 0, 0)),
                  pl.BlockSpec((1, Cout), lambda i: (0, 0))],
        out_specs=pl.BlockSpec((1, Lp, Cout), lambda i: (i, 0, 0)),
        compiler_params=pltpu.CompilerParams(dimension_semantics=("parallel",)),
    )(x_even, x_odd, w, b.reshape(1, Cout))


def convtranspose3_silu_op(x, w, b):
    """ConvTranspose(k=3, stride=2, pad=1, output_pad=1 along L) + SiLU.
    x:(B,Lin,Cin)  w:(3,Cin,Cout)  (w[t] == W_torch[:, :, 0, t])  ->  (B, 2*Lin, Cout).
      out[2i]   = x[i]   @ w[1] + b
      out[2i+1] = x[i+1] @ w[0] + x[i] @ w[2] + b     (x[Lin] := 0)
    Even/odd rows are lane-concatenated into a (B, Lin, 2*Cout) block so the
    (B, 2*Lin, Cout) interleave is a free contiguous reshape outside."""
    B, Lin, Cin = x.shape
    Cout = w.shape[-1]
    # single trailing zero row so the shifted operand is a plain offset slice
    xpad = jnp.pad(x, ((0, 0), (0, 1), (0, 0)))                      # (B, Lin+1, Cin)

    def kernel(x_ref, w_ref, b_ref, o_ref):
        xv = x_ref[0]                       # (Lin+1, Cin)
        xa = xv[:Lin]                       # x[i]
        xb = xv[1:]                         # x[i+1] (last row is the zero pad)
        bb = b_ref[...]
        even = jnp.dot(xa, w_ref[1], preferred_element_type=jnp.float32) + bb
        odd = (jnp.dot(xb, w_ref[0], preferred_element_type=jnp.float32)
               + jnp.dot(xa, w_ref[2], preferred_element_type=jnp.float32) + bb)
        o_ref[0] = jnp.concatenate([_silu(even), _silu(odd)],
                                   axis=-1).astype(o_ref.dtype)       # (Lin, 2*Cout)

    out = pl.pallas_call(
        kernel,
        out_shape=jax.ShapeDtypeStruct((B, Lin, 2 * Cout), x.dtype),
        grid=(B,),
        in_specs=[pl.BlockSpec((1, Lin + 1, Cin), lambda i: (i, 0, 0)),
                  pl.BlockSpec((3, Cin, Cout), lambda i: (0, 0, 0)),
                  pl.BlockSpec((1, Cout), lambda i: (0, 0))],
        out_specs=pl.BlockSpec((1, Lin, 2 * Cout), lambda i: (i, 0, 0)),
        compiler_params=pltpu.CompilerParams(dimension_semantics=("parallel",)),
    )(xpad, w, b.reshape(1, Cout))
    # contiguous (row-major) merge of (Lin, 2*Cout) -> (2*Lin, Cout): free interleave.
    return out.reshape(B, 2 * Lin, Cout)


def pointwise_linear_op(x, w, b):
    """1x1 conv == per-position linear.  x:(B,L,K) -> (B,L,N), gridded over B."""
    B, L, K = x.shape
    N = w.shape[1]

    def kernel(x_ref, w_ref, b_ref, o_ref):
        y = jnp.dot(x_ref[0], w_ref[...],
                    preferred_element_type=jnp.float32) + b_ref[...]
        o_ref[0] = y.astype(o_ref.dtype)

    return pl.pallas_call(
        kernel,
        out_shape=jax.ShapeDtypeStruct((B, L, N), x.dtype),
        grid=(B,),
        in_specs=[pl.BlockSpec((1, L, K), lambda i: (i, 0, 0)),
                  pl.BlockSpec((K, N), lambda i: (0, 0)),
                  pl.BlockSpec((1, N), lambda i: (0, 0))],
        out_specs=pl.BlockSpec((1, L, N), lambda i: (i, 0, 0)),
        compiler_params=pltpu.CompilerParams(dimension_semantics=("parallel",)),
    )(x, w, b.reshape(1, N))


# ------------------------------- full model ----------------------------------

def diffusion_unet(params, x, timesteps, num_heads=8):
    """x: (B, embed_dim, 1, L) NCHW, timesteps: (B,)  ->  (B, embed_dim, 1, L)."""
    B, D, _, L = x.shape

    # time embedding (fused Linear -> SiLU -> Linear)
    t = timesteps.reshape(B, 1).astype(jnp.float32)
    t_emb = time_embed_op(t, params["time_w1"], params["time_b1"],
                          params["time_w2"], params["time_b2"])       # (B, D)

    xs = jnp.transpose(x[:, :, 0, :], (0, 2, 1))                      # (B, L, D)
    xs = xs + t_emb[:, None, :]

    skip1 = xs                                                        # (B, L, D)
    xs = transformer_block_op(xs, params["attn1"], num_heads)

    x1 = conv3_silu_maxpool_op(xs, params["down1_w"], params["down1_b"])   # (B, L/2, 2D)
    skip2 = x1
    x1 = transformer_block_op(x1, params["attn2"], num_heads)

    x2 = conv3_silu_maxpool_op(x1, params["down2_w"], params["down2_b"])   # (B, L/4, 4D)
    x2 = transformer_block_op(x2, params["attn3"], num_heads)
    x2 = transformer_block_op(x2, params["mid"], num_heads)

    xc = jnp.concatenate([x2, x2], axis=-1)                           # (B, L/4, 8D)
    u1 = convtranspose3_silu_op(xc, params["up1_w"], params["up1_b"])  # (B, L/2, 2D)
    u1 = jnp.concatenate([u1, skip2], axis=-1)                        # (B, L/2, 4D)
    u2 = convtranspose3_silu_op(u1, params["up2_w"], params["up2_b"])  # (B, L, D)
    u2 = jnp.concatenate([u2, skip1], axis=-1)                        # (B, L, 2D)

    out = pointwise_linear_op(u2, params["final_w"], params["final_b"])    # (B, L, D)
    return jnp.transpose(out, (0, 2, 1))[:, :, None, :]               # back to NCHW


# ----------------------------- parameter init --------------------------------

def init_params(key, embed_dim):
    D = embed_dim
    keys = iter(jax.random.split(key, 64))

    def lin(fan_in, fan_out):
        k1, k2 = jax.random.split(next(keys))
        bound = 1.0 / math.sqrt(fan_in)
        w = jax.random.uniform(k1, (fan_in, fan_out), jnp.float32, -bound, bound)
        b = jax.random.uniform(k2, (fan_out,), jnp.float32, -bound, bound)
        return w, b

    def conv(cin, cout):
        k1, k2 = jax.random.split(next(keys))
        bound = 1.0 / math.sqrt(cin * 3)
        w = jax.random.uniform(k1, (3, cin, cout), jnp.float32, -bound, bound)
        b = jax.random.uniform(k2, (cout,), jnp.float32, -bound, bound)
        return w, b

    def tblock(dim, ff_dim):
        p = {}
        wq, bq = lin(dim, dim)
        wk, bk = lin(dim, dim)
        wv, bv = lin(dim, dim)
        # QKV fused at init: mathematically identical to three separate Linears.
        p["wqkv"] = jnp.concatenate([wq, wk, wv], axis=1)      # (dim, 3*dim)
        p["bqkv"] = jnp.concatenate([bq, bk, bv])              # (3*dim,)
        p["wo"], p["bo"] = lin(dim, dim)
        p["ln1_g"] = jnp.ones((dim,), jnp.float32)
        p["ln1_b"] = jnp.zeros((dim,), jnp.float32)
        p["ln2_g"] = jnp.ones((dim,), jnp.float32)
        p["ln2_b"] = jnp.zeros((dim,), jnp.float32)
        p["ff_w1"], p["ff_b1"] = lin(dim, ff_dim)
        p["ff_w2"], p["ff_b2"] = lin(ff_dim, dim)
        return p

    params = {}
    params["attn1"] = tblock(D, 4 * D)
    params["attn2"] = tblock(2 * D, 8 * D)
    params["attn3"] = tblock(4 * D, 16 * D)
    params["mid"] = tblock(4 * D, 16 * D)
    params["down1_w"], params["down1_b"] = conv(D, 2 * D)
    params["down2_w"], params["down2_b"] = conv(2 * D, 4 * D)
    params["up1_w"], params["up1_b"] = conv(8 * D, 2 * D)
    params["up2_w"], params["up2_b"] = conv(4 * D, D)
    params["final_w"], params["final_b"] = lin(2 * D, D)
    params["time_w1"], params["time_b1"] = lin(1, D // 4)
    params["time_w2"], params["time_b2"] = lin(D // 4, D)
    return params


# ----------------------------------- main ------------------------------------

if __name__ == "__main__":
    embed_dim, seq_length, num_heads, batch = 32, 16, 8, 2

    key = jax.random.PRNGKey(0)
    kp, kx, kt = jax.random.split(key, 3)
    params = init_params(kp, embed_dim)
    x = jax.random.normal(kx, (batch, embed_dim, 1, seq_length), jnp.float32)
    timesteps = jax.random.randint(kt, (batch,), 0, 1000)

    fwd = jax.jit(lambda p, xx, tt: diffusion_unet(p, xx, tt, num_heads=num_heads))
    out = fwd(params, x, timesteps)
    jax.block_until_ready(out)
    assert out.shape == (batch, embed_dim, 1, seq_length), out.shape
    assert out.dtype == jnp.float32
    print("KERNEL_OK")
</pallas_src>

<mosaic_0001>
module attributes {stable_mosaic.version = 11 : i64} {
  func.func @kernel(%arg0: memref<2x1xf32, #tpu.memory_space<vmem>>, %arg1: memref<1x8xf32, #tpu.memory_space<vmem>>, %arg2: memref<1x8xf32, #tpu.memory_space<vmem>>, %arg3: memref<8x32xf32, #tpu.memory_space<vmem>>, %arg4: memref<1x32xf32, #tpu.memory_space<vmem>>, %arg5: memref<2x32xf32, #tpu.memory_space<vmem>>) attributes {dimension_semantics = [], scalar_prefetch = 0 : i64, scratch_operands = 0 : i64, tpu.core_type = #tpu.core_type<tc>} {
    %c0 = arith.constant 0 : index
    %c0_0 = arith.constant 0 : index
    %0 = vector.load %arg0[%c0, %c0_0] : memref<2x1xf32, #tpu.memory_space<vmem>>, vector<2x1xf32>
    %c0_1 = arith.constant 0 : index
    %c0_2 = arith.constant 0 : index
    %1 = vector.load %arg1[%c0_1, %c0_2] : memref<1x8xf32, #tpu.memory_space<vmem>>, vector<1x8xf32>
    %2 = vector.broadcast %0 : vector<2x1xf32> to vector<2x8xf32>
    %3 = vector.broadcast %1 : vector<1x8xf32> to vector<2x8xf32>
    %4 = arith.mulf %2, %3 : vector<2x8xf32>
    %c0_3 = arith.constant 0 : index
    %c0_4 = arith.constant 0 : index
    %5 = vector.load %arg2[%c0_3, %c0_4] : memref<1x8xf32, #tpu.memory_space<vmem>>, vector<1x8xf32>
    %6 = vector.broadcast %5 : vector<1x8xf32> to vector<2x8xf32>
    %7 = arith.addf %4, %6 : vector<2x8xf32>
    %cst = arith.constant 0.000000e+00 : f32
    %8 = vector.broadcast %cst : f32 to vector<2x8xf32>
    %9 = arith.subf %8, %7 : vector<2x8xf32>
    %10 = math.exp %9 : vector<2x8xf32>
    %cst_5 = arith.constant 1.000000e+00 : f32
    %11 = vector.broadcast %cst_5 : f32 to vector<2x8xf32>
    %12 = arith.addf %11, %10 : vector<2x8xf32>
    %cst_6 = arith.constant 1.000000e+00 : f32
    %13 = vector.broadcast %cst_6 : f32 to vector<2x8xf32>
    %14 = arith.divf %13, %12 : vector<2x8xf32>
    %15 = arith.mulf %7, %14 : vector<2x8xf32>
    %c0_7 = arith.constant 0 : index
    %c0_8 = arith.constant 0 : index
    %16 = vector.load %arg3[%c0_7, %c0_8] : memref<8x32xf32, #tpu.memory_space<vmem>>, vector<8x32xf32>
    %cst_9 = arith.constant dense<0.000000e+00> : vector<2x32xf32>
    %17 = tpu.matmul %15, %16, %cst_9 {dimension_numbers = #tpu.dot_dimension_numbers<[1], [0], [0], [1], [0, 0, 1, 1], [], []>} : vector<2x8xf32>, vector<8x32xf32>, vector<2x32xf32> -> vector<2x32xf32>
    %c0_10 = arith.constant 0 : index
    %c0_11 = arith.constant 0 : index
    %18 = vector.load %arg4[%c0_10, %c0_11] : memref<1x32xf32, #tpu.memory_space<vmem>>, vector<1x32xf32>
    %19 = vector.broadcast %18 : vector<1x32xf32> to vector<2x32xf32>
    %20 = arith.addf %17, %19 : vector<2x32xf32>
    %c0_12 = arith.constant 0 : index
    %c0_13 = arith.constant 0 : index
    %21 = vector.load %arg5[%c0_12, %c0_13] : memref<2x32xf32, #tpu.memory_space<vmem>>, vector<2x32xf32>
    tpu.vector_store %arg5[%c0_12, %c0_13], %20 {strides = array<i32>} : memref<2x32xf32, #tpu.memory_space<vmem>>, vector<2x32xf32>,
    return
  }
}

module attributes {stable_mosaic.version = 11 : i64} {
  func.func @kernel(%arg0: i32, %arg1: memref<1x9x32xf32, #tpu.memory_space<vmem>>, %arg2: memref<1x9x32xf32, #tpu.memory_space<vmem>>, %arg3: memref<3x32x64xf32, #tpu.memory_space<vmem>>, %arg4: memref<1x64xf32, #tpu.memory_space<vmem>>, %arg5: memref<1x8x64xf32, #tpu.memory_space<vmem>>) attributes {dimension_semantics = [#tpu.dimension_semantics<parallel>], iteration_bounds = array<i64: 2>, scalar_prefetch = 0 : i64, scratch_operands = 0 : i64, tpu.core_type = #tpu.core_type<tc>, window_params = [{transform_indices = @transform_0, window_bounds = array<i64: 1, 9, 32>}, {transform_indices = @transform_1, window_bounds = array<i64: 1, 9, 32>}, {pipeline_mode = #tpu.pipeline_mode<synchronous>, transform_indices = @transform_2, window_bounds = array<i64: 3, 32, 64>}, {pipeline_mode = #tpu.pipeline_mode<synchronous>, transform_indices = @transform_3, window_bounds = array<i64: 1, 64>}, {transform_indices = @transform_4, window_bounds = array<i64: 1, 8, 64>}]} {
    %c0 = arith.constant 0 : index
    %c0_0 = arith.constant 0 : index
    %c0_1 = arith.constant 0 : index
    %0 = vector.load %arg1[%c0, %c0_0, %c0_1] : memref<1x9x32xf32, #tpu.memory_space<vmem>>, vector<1x9x32xf32>
    %1 = vector.shape_cast %0 : vector<1x9x32xf32> to vector<9x32xf32>
    %c0_2 = arith.constant 0 : index
    %c0_3 = arith.constant 0 : index
    %c0_4 = arith.constant 0 : index
    %2 = vector.load %arg2[%c0_2, %c0_3, %c0_4] : memref<1x9x32xf32, #tpu.memory_space<vmem>>, vector<1x9x32xf32>
    %3 = vector.shape_cast %2 : vector<1x9x32xf32> to vector<9x32xf32>
    %c0_5 = arith.constant 0 : index
    %c0_6 = arith.constant 0 : index
    %c0_7 = arith.constant 0 : index
    %4 = vector.load %arg3[%c0_5, %c0_6, %c0_7] : memref<3x32x64xf32, #tpu.memory_space<vmem>>, vector<1x32x64xf32>
    %5 = vector.shape_cast %4 : vector<1x32x64xf32> to vector<32x64xf32>
    %c1 = arith.constant 1 : index
    %c0_8 = arith.constant 0 : index
    %c0_9 = arith.constant 0 : index
    %6 = vector.load %arg3[%c1, %c0_8, %c0_9] : memref<3x32x64xf32, #tpu.memory_space<vmem>>, vector<1x32x64xf32>
    %7 = vector.shape_cast %6 : vector<1x32x64xf32> to vector<32x64xf32>
    %c2 = arith.constant 2 : index
    %c0_10 = arith.constant 0 : index
    %c0_11 = arith.constant 0 : index
    %8 = vector.load %arg3[%c2, %c0_10, %c0_11] : memref<3x32x64xf32, #tpu.memory_space<vmem>>, vector<1x32x64xf32>
    %9 = vector.shape_cast %8 : vector<1x32x64xf32> to vector<32x64xf32>
    %c0_12 = arith.constant 0 : index
    %c0_13 = arith.constant 0 : index
    %10 = vector.load %arg4[%c0_12, %c0_13] : memref<1x64xf32, #tpu.memory_space<vmem>>, vector<1x64xf32>
    %11 = vector.extract_strided_slice %1 {offsets = [0, 0], sizes = [8, 32], strides = [1, 1]} : vector<9x32xf32> to vector<8x32xf32>
    %12 = vector.extract_strided_slice %3 {offsets = [0, 0], sizes = [8, 32], strides = [1, 1]} : vector<9x32xf32> to vector<8x32xf32>
    %13 = vector.extract_strided_slice %1 {offsets = [1, 0], sizes = [8, 32], strides = [1, 1]} : vector<9x32xf32> to vector<8x32xf32>
    %14 = vector.extract_strided_slice %3 {offsets = [1, 0], sizes = [8, 32], strides = [1, 1]} : vector<9x32xf32> to vector<8x32xf32>
    %cst = arith.constant dense<0.000000e+00> : vector<8x64xf32>
    %15 = tpu.matmul %11, %5, %cst {dimension_numbers = #tpu.dot_dimension_numbers<[1], [0], [0], [1], [0, 0, 1, 1], [], []>} : vector<8x32xf32>, vector<32x64xf32>, vector<8x64xf32> -> vector<8x64xf32>
    %cst_14 = arith.constant dense<0.000000e+00> : vector<8x64xf32>
    %16 = tpu.matmul %12, %7, %cst_14 {dimension_numbers = #tpu.dot_dimension_numbers<[1], [0], [0], [1], [0, 0, 1, 1], [], []>} : vector<8x32xf32>, vector<32x64xf32>, vector<8x64xf32> -> vector<8x64xf32>
    %17 = arith.addf %15, %16 : vector<8x64xf32>
    %cst_15 = arith.constant dense<0.000000e+00> : vector<8x64xf32>
    %18 = tpu.matmul %13, %9, %cst_15 {dimension_numbers = #tpu.dot_dimension_numbers<[1], [0], [0], [1], [0, 0, 1, 1], [], []>} : vector<8x32xf32>, vector<32x64xf32>, vector<8x64xf32> -> vector<8x64xf32>
    %19 = arith.addf %17, %18 : vector<8x64xf32>
    %20 = vector.broadcast %10 : vector<1x64xf32> to vector<8x64xf32>
    %21 = arith.addf %19, %20 : vector<8x64xf32>
    %cst_16 = arith.constant dense<0.000000e+00> : vector<8x64xf32>
    %22 = tpu.matmul %12, %5, %cst_16 {dimension_numbers = #tpu.dot_dimension_numbers<[1], [0], [0], [1], [0, 0, 1, 1], [], []>} : vector<8x32xf32>, vector<32x64xf32>, vector<8x64xf32> -> vector<8x64xf32>
    %cst_17 = arith.constant dense<0.000000e+00> : vector<8x64xf32>
    %23 = tpu.matmul %13, %7, %cst_17 {dimension_numbers = #tpu.dot_dimension_numbers<[1], [0], [0], [1], [0, 0, 1, 1], [], []>} : vector<8x32xf32>, vector<32x64xf32>, vector<8x64xf32> -> vector<8x64xf32>
    %24 = arith.addf %22, %23 : vector<8x64xf32>
    %cst_18 = arith.constant dense<0.000000e+00> : vector<8x64xf32>
    %25 = tpu.matmul %14, %9, %cst_18 {dimension_numbers = #tpu.dot_dimension_numbers<[1], [0], [0], [1], [0, 0, 1, 1], [], []>} : vector<8x32xf32>, vector<32x64xf32>, vector<8x64xf32> -> vector<8x64xf32>
    %26 = arith.addf %24, %25 : vector<8x64xf32>
    %27 = vector.broadcast %10 : vector<1x64xf32> to vector<8x64xf32>
    %28 = arith.addf %26, %27 : vector<8x64xf32>
    %cst_19 = arith.constant 0.000000e+00 : f32
    %29 = vector.broadcast %cst_19 : f32 to vector<8x64xf32>
    %30 = arith.subf %29, %21 : vector<8x64xf32>
    %31 = math.exp %30 : vector<8x64xf32>
    %cst_20 = arith.constant 1.000000e+00 : f32
    %32 = vector.broadcast %cst_20 : f32 to vector<8x64xf32>
    %33 = arith.addf %32, %31 : vector<8x64xf32>
    %cst_21 = arith.constant 1.000000e+00 : f32
    %34 = vector.broadcast %cst_21 : f32 to vector<8x64xf32>
    %35 = arith.divf %34, %33 : vector<8x64xf32>
    %36 = arith.mulf %21, %35 : vector<8x64xf32>
    %cst_22 = arith.constant 0.000000e+00 : f32
    %37 = vector.broadcast %cst_22 : f32 to vector<8x64xf32>
    %38 = arith.subf %37, %28 : vector<8x64xf32>
    %39 = math.exp %38 : vector<8x64xf32>
    %cst_23 = arith.constant 1.000000e+00 : f32
    %40 = vector.broadcast %cst_23 : f32 to vector<8x64xf32>
    %41 = arith.addf %40, %39 : vector<8x64xf32>
    %cst_24 = arith.constant 1.000000e+00 : f32
    %42 = vector.broadcast %cst_24 : f32 to vector<8x64xf32>
    %43 = arith.divf %42, %41 : vector<8x64xf32>
    %44 = arith.mulf %28, %43 : vector<8x64xf32>
    %45 = arith.maximumf %36, %44 : vector<8x64xf32>
    %c0_25 = arith.constant 0 : index
    %c0_26 = arith.constant 0 : index
    %c0_27 = arith.constant 0 : index
    %46 = vector.load %arg5[%c0_25, %c0_26, %c0_27] : memref<1x8x64xf32, #tpu.memory_space<vmem>>, vector<1x8x64xf32>
    %47 = vector.shape_cast %46 : vector<1x8x64xf32> to vector<8x64xf32>
    %48 = vector.shape_cast %45 : vector<8x64xf32> to vector<1x8x64xf32>
    tpu.vector_store %arg5[%c0_25, %c0_26, %c0_27], %48 {strides = array<i32>} : memref<1x8x64xf32, #tpu.memory_space<vmem>>, vector<1x8x64xf32>,
    return
  }
  func.func @transform_0(%arg0: i32) -> (i32, i32, i32) {
    %c0_i32 = arith.constant 0 : i32
    %c0_i32_0 = arith.constant 0 : i32
    %c0_i32_1 = arith.constant 0 : i32
    return %arg0, %c0_i32, %c0_i32_0 : i32, i32, i32
  }
  func.func @transform_1(%arg0: i32) -> (i32, i32, i32) {
    %c0_i32 = arith.constant 0 : i32
    %c0_i32_0 = arith.constant 0 : i32
    %c0_i32_1 = arith.constant 0 : i32
    return %arg0, %c0_i32, %c0_i32_0 : i32, i32, i32
  }
  func.func @transform_2(%arg0: i32) -> (i32, i32, i32) {
    %c0_i32 = arith.constant 0 : i32
    %c0_i32_0 = arith.constant 0 : i32
    %c0_i32_1 = arith.constant 0 : i32
    %c0_i32_2 = arith.constant 0 : i32
    return %c0_i32, %c0_i32_0, %c0_i32_1 : i32, i32, i32
  }
  func.func @transform_3(%arg0: i32) -> (i32, i32) {
    %c0_i32 = arith.constant 0 : i32
    %c0_i32_0 = arith.constant 0 : i32
    %c0_i32_1 = arith.constant 0 : i32
    return %c0_i32, %c0_i32_0 : i32, i32
  }
  func.func @transform_4(%arg0: i32) -> (i32, i32, i32) {
    %c0_i32 = arith.constant 0 : i32
    %c0_i32_0 = arith.constant 0 : i32
    %c0_i32_1 = arith.constant 0 : i32
    return %arg0, %c0_i32, %c0_i32_0 : i32, i32, i32
  }
}

module attributes {stable_mosaic.version = 11 : i64} {
  func.func @kernel(%arg0: i32, %arg1: memref<1x16x32xf32, #tpu.memory_space<vmem>>, %arg2: memref<1x32xf32, #tpu.memory_space<vmem>>, %arg3: memref<1x32xf32, #tpu.memory_space<vmem>>, %arg4: memref<32x96xf32, #tpu.memory_space<vmem>>, %arg5: memref<1x96xf32, #tpu.memory_space<vmem>>, %arg6: memref<32x32xf32, #tpu.memory_space<vmem>>, %arg7: memref<1x32xf32, #tpu.memory_space<vmem>>, %arg8: memref<1x32xf32, #tpu.memory_space<vmem>>, %arg9: memref<1x32xf32, #tpu.memory_space<vmem>>, %arg10: memref<32x128xf32, #tpu.memory_space<vmem>>, %arg11: memref<1x128xf32, #tpu.memory_space<vmem>>, %arg12: memref<128x32xf32, #tpu.memory_space<vmem>>, %arg13: memref<1x32xf32, #tpu.memory_space<vmem>>, %arg14: memref<1x16x32xf32, #tpu.memory_space<vmem>>) attributes {dimension_semantics = [#tpu.dimension_semantics<parallel>], iteration_bounds = array<i64: 2>, scalar_prefetch = 0 : i64, scratch_operands = 0 : i64, tpu.core_type = #tpu.core_type<tc>, window_params = [{transform_indices = @transform_0, window_bounds = array<i64: 1, 16, 32>}, {pipeline_mode = #tpu.pipeline_mode<synchronous>, transform_indices = @transform_1, window_bounds = array<i64: 1, 32>}, {pipeline_mode = #tpu.pipeline_mode<synchronous>, transform_indices = @transform_2, window_bounds = array<i64: 1, 32>}, {pipeline_mode = #tpu.pipeline_mode<synchronous>, transform_indices = @transform_3, window_bounds = array<i64: 32, 96>}, {pipeline_mode = #tpu.pipeline_mode<synchronous>, transform_indices = @transform_4, window_bounds = array<i64: 1, 96>}, {pipeline_mode = #tpu.pipeline_mode<synchronous>, transform_indices = @transform_5, window_bounds = array<i64: 32, 32>}, {pipeline_mode = #tpu.pipeline_mode<synchronous>, transform_indices = @transform_6, window_bounds = array<i64: 1, 32>}, {pipeline_mode = #tpu.pipeline_mode<synchronous>, transform_indices = @transform_7, window_bounds = array<i64: 1, 32>}, {pipeline_mode = #tpu.pipeline_mode<synchronous>, transform_indices = @transform_8, window_bounds = array<i64: 1, 32>}, {pipeline_mode = #tpu.pipeline_mode<synchronous>, transform_indices = @transform_9, window_bounds = array<i64: 32, 128>}, {pipeline_mode = #tpu.pipeline_mode<synchronous>, transform_indices = @transform_10, window_bounds = array<i64: 1, 128>}, {pipeline_mode = #tpu.pipeline_mode<synchronous>, transform_indices = @transform_11, window_bounds = array<i64: 128, 32>}, {pipeline_mode = #tpu.pipeline_mode<synchronous>, transform_indices = @transform_12, window_bounds = array<i64: 1, 32>}, {transform_indices = @transform_13, window_bounds = array<i64: 1, 16, 32>}]} {
    %c0 = arith.constant 0 : index
    %c0_0 = arith.constant 0 : index
    %c0_1 = arith.constant 0 : index
    %0 = vector.load %arg1[%c0, %c0_0, %c0_1] : memref<1x16x32xf32, #tpu.memory_space<vmem>>, vector<1x16x32xf32>
    %1 = vector.shape_cast %0 : vector<1x16x32xf32> to vector<16x32xf32>
    %c0_2 = arith.constant 0 : index
    %c0_3 = arith.constant 0 : index
    %2 = vector.load %arg2[%c0_2, %c0_3] : memref<1x32xf32, #tpu.memory_space<vmem>>, vector<1x32xf32>
    %c0_4 = arith.constant 0 : index
    %c0_5 = arith.constant 0 : index
    %3 = vector.load %arg3[%c0_4, %c0_5] : memref<1x32xf32, #tpu.memory_space<vmem>>, vector<1x32xf32>
    %cst = arith.constant dense<0.000000e+00> : vector<16xf32>
    %4 = vector.multi_reduction <add>, %1, %cst [1] : vector<16x32xf32> to vector<16xf32>
    %5 = vector.shape_cast %4 : vector<16xf32> to vector<16x1xf32>
    %cst_6 = arith.constant 3.200000e+01 : f32
    %6 = vector.broadcast %cst_6 : f32 to vector<16x1xf32>
    %7 = arith.divf %5, %6 : vector<16x1xf32>
    %8 = vector.broadcast %7 : vector<16x1xf32> to vector<16x32xf32>
    %9 = arith.subf %1, %8 : vector<16x32xf32>
    %10 = arith.mulf %9, %9 : vector<16x32xf32>
    %cst_7 = arith.constant dense<0.000000e+00> : vector<16xf32>
    %11 = vector.multi_reduction <add>, %10, %cst_7 [1] : vector<16x32xf32> to vector<16xf32>
    %12 = vector.shape_cast %11 : vector<16xf32> to vector<16x1xf32>
    %cst_8 = arith.constant 3.200000e+01 : f32
    %13 = vector.broadcast %cst_8 : f32 to vector<16x1xf32>
    %14 = arith.divf %12, %13 : vector<16x1xf32>
    %cst_9 = arith.constant 9.99999974E-6 : f32
    %15 = vector.broadcast %cst_9 : f32 to vector<16x1xf32>
    %16 = arith.addf %14, %15 : vector<16x1xf32>
    %17 = math.rsqrt %16 : vector<16x1xf32>
    %18 = vector.broadcast %17 : vector<16x1xf32> to vector<16x32xf32>
    %19 = arith.mulf %9, %18 : vector<16x32xf32>
    %20 = vector.broadcast %2 : vector<1x32xf32> to vector<16x32xf32>
    %21 = arith.mulf %19, %20 : vector<16x32xf32>
    %22 = vector.broadcast %3 : vector<1x32xf32> to vector<16x32xf32>
    %23 = arith.addf %21, %22 : vector<16x32xf32>
    %c0_10 = arith.constant 0 : index
    %c0_11 = arith.constant 0 : index
    %24 = vector.load %arg4[%c0_10, %c0_11] : memref<32x96xf32, #tpu.memory_space<vmem>>, vector<32x96xf32>
    %cst_12 = arith.constant dense<0.000000e+00> : vector<16x96xf32>
    %25 = tpu.matmul %23, %24, %cst_12 {dimension_numbers = #tpu.dot_dimension_numbers<[1], [0], [0], [1], [0, 0, 1, 1], [], []>} : vector<16x32xf32>, vector<32x96xf32>, vector<16x96xf32> -> vector<16x96xf32>
    %c0_13 = arith.constant 0 : index
    %c0_14 = arith.constant 0 : index
    %26 = vector.load %arg5[%c0_13, %c0_14] : memref<1x96xf32, #tpu.memory_space<vmem>>, vector<1x96xf32>
    %27 = vector.broadcast %26 : vector<1x96xf32> to vector<16x96xf32>
    %28 = arith.addf %25, %27 : vector<16x96xf32>
    %29 = vector.extract_strided_slice %28 {offsets = [0, 0], sizes = [16, 4], strides = [1, 1]} : vector<16x96xf32> to vector<16x4xf32>
    %30 = vector.extract_strided_slice %28 {offsets = [0, 32], sizes = [16, 4], strides = [1, 1]} : vector<16x96xf32> to vector<16x4xf32>
    %31 = vector.extract_strided_slice %28 {offsets = [0, 64], sizes = [16, 4], strides = [1, 1]} : vector<16x96xf32> to vector<16x4xf32>
    %cst_15 = arith.constant dense<0.000000e+00> : vector<16x16xf32>
    %32 = tpu.matmul %29, %30, %cst_15 {dimension_numbers = #tpu.dot_dimension_numbers<[1], [1], [0], [0], [0, 0, 1, 0], [], []>} : vector<16x4xf32>, vector<16x4xf32>, vector<16x16xf32> -> vector<16x16xf32>
    %cst_16 = arith.constant 5.000000e-01 : f32
    %33 = vector.broadcast %cst_16 : f32 to vector<16x16xf32>
    %34 = arith.mulf %32, %33 : vector<16x16xf32>
    %cst_17 = arith.constant dense<0xFF800000> : vector<16xf32>
    %35 = vector.multi_reduction <maximumf>, %34, %cst_17 [1] : vector<16x16xf32> to vector<16xf32>
    %36 = vector.shape_cast %35 : vector<16xf32> to vector<16x1xf32>
    %37 = vector.broadcast %36 : vector<16x1xf32> to vector<16x16xf32>
    %38 = arith.subf %34, %37 : vector<16x16xf32>
    %39 = math.exp %38 : vector<16x16xf32>
    %cst_18 = arith.constant dense<0.000000e+00> : vector<16xf32>
    %40 = vector.multi_reduction <add>, %39, %cst_18 [1] : vector<16x16xf32> to vector<16xf32>
    %41 = vector.shape_cast %40 : vector<16xf32> to vector<16x1xf32>
    %42 = tpu.reciprocal %41 {approx = true} : vector<16x1xf32> -> vector<16x1xf32>
    %43 = vector.broadcast %42 : vector<16x1xf32> to vector<16x16xf32>
    %44 = arith.mulf %39, %43 : vector<16x16xf32>
    %cst_19 = arith.constant dense<0.000000e+00> : vector<16x4xf32>
    %45 = tpu.matmul %44, %31, %cst_19 {dimension_numbers = #tpu.dot_dimension_numbers<[1], [0], [0], [1], [0, 0, 1, 1], [], []>} : vector<16x16xf32>, vector<16x4xf32>, vector<16x4xf32> -> vector<16x4xf32>
    %46 = vector.extract_strided_slice %28 {offsets = [0, 4], sizes = [16, 4], strides = [1, 1]} : vector<16x96xf32> to vector<16x4xf32>
    %47 = vector.extract_strided_slice %28 {offsets = [0, 36], sizes = [16, 4], strides = [1, 1]} : vector<16x96xf32> to vector<16x4xf32>
    %48 = vector.extract_strided_slice %28 {offsets = [0, 68], sizes = [16, 4], strides = [1, 1]} : vector<16x96xf32> to vector<16x4xf32>
    %cst_20 = arith.constant dense<0.000000e+00> : vector<16x16xf32>
    %49 = tpu.matmul %46, %47, %cst_20 {dimension_numbers = #tpu.dot_dimension_numbers<[1], [1], [0], [0], [0, 0, 1, 0], [], []>} : vector<16x4xf32>, vector<16x4xf32>, vector<16x16xf32> -> vector<16x16xf32>
    %cst_21 = arith.constant 5.000000e-01 : f32
    %50 = vector.broadcast %cst_21 : f32 to vector<16x16xf32>
    %51 = arith.mulf %49, %50 : vector<16x16xf32>
    %cst_22 = arith.constant dense<0xFF800000> : vector<16xf32>
    %52 = vector.multi_reduction <maximumf>, %51, %cst_22 [1] : vector<16x16xf32> to vector<16xf32>
    %53 = vector.shape_cast %52 : vector<16xf32> to vector<16x1xf32>
    %54 = vector.broadcast %53 : vector<16x1xf32> to vector<16x16xf32>
    %55 = arith.subf %51, %54 : vector<16x16xf32>
    %56 = math.exp %55 : vector<16x16xf32>
    %cst_23 = arith.constant dense<0.000000e+00> : vector<16xf32>
    %57 = vector.multi_reduction <add>, %56, %cst_23 [1] : vector<16x16xf32> to vector<16xf32>
    %58 = vector.shape_cast %57 : vector<16xf32> to vector<16x1xf32>
    %59 = tpu.reciprocal %58 {approx = true} : vector<16x1xf32> -> vector<16x1xf32>
    %60 = vector.broadcast %59 : vector<16x1xf32> to vector<16x16xf32>
    %61 = arith.mulf %56, %60 : vector<16x16xf32>
    %cst_24 = arith.constant dense<0.000000e+00> : vector<16x4xf32>
    %62 = tpu.matmul %61, %48, %cst_24 {dimension_numbers = #tpu.dot_dimension_numbers<[1], [0], [0], [1], [0, 0, 1, 1], [], []>} : vector<16x16xf32>, vector<16x4xf32>, vector<16x4xf32> -> vector<16x4xf32>
    %63 = vector.extract_strided_slice %28 {offsets = [0, 8], sizes = [16, 4], strides = [1, 1]} : vector<16x96xf32> to vector<16x4xf32>
    %64 = vector.extract_strided_slice %28 {offsets = [0, 40], sizes = [16, 4], strides = [1, 1]} : vector<16x96xf32> to vector<16x4xf32>
    %65 = vector.extract_strided_slice %28 {offsets = [0, 72], sizes = [16, 4], strides = [1, 1]} : vector<16x96xf32> to vector<16x4xf32>
    %cst_25 = arith.constant dense<0.000000e+00> : vector<16x16xf32>
    %66 = tpu.matmul %63, %64, %cst_25 {dimension_numbers = #tpu.dot_dimension_numbers<[1], [1], [0], [0], [0, 0, 1, 0], [], []>} : vector<16x4xf32>, vector<16x4xf32>, vector<16x16xf32> -> vector<16x16xf32>
    %cst_26 = arith.constant 5.000000e-01 : f32
    %67 = vector.broadcast %cst_26 : f32 to vector<16x16xf32>
    %68 = arith.mulf %66, %67 : vector<16x16xf32>
    %cst_27 = arith.constant dense<0xFF800000> : vector<16xf32>
    %69 = vector.multi_reduction <maximumf>, %68, %cst_27 [1] : vector<16x16xf32> to vector<16xf32>
    %70 = vector.shape_cast %69 : vector<16xf32> to vector<16x1xf32>
    %71 = vector.broadcast %70 : vector<16x1xf32> to vector<16x16xf32>
    %72 = arith.subf %68, %71 : vector<16x16xf32>
    %73 = math.exp %72 : vector<16x16xf32>
    %cst_28 = arith.constant dense<0.000000e+00> : vector<16xf32>
    %74 = vector.multi_reduction <add>, %73, %cst_28 [1] : vector<16x16xf32> to vector<16xf32>
    %75 = vector.shape_cast %74 : vector<16xf32> to vector<16x1xf32>
    %76 = tpu.reciprocal %75 {approx = true} : vector<16x1xf32> -> vector<16x1xf32>
    %77 = vector.broadcast %76 : vector<16x1xf32> to vector<16x16xf32>
    %78 = arith.mulf %73, %77 : vector<16x16xf32>
    %cst_29 = arith.constant dense<0.000000e+00> : vector<16x4xf32>
    %79 = tpu.matmul %78, %65, %cst_29 {dimension_numbers = #tpu.dot_dimension_numbers<[1], [0], [0], [1], [0, 0, 1, 1], [], []>} : vector<16x16xf32>, vector<16x4xf32>, vector<16x4xf32> -> vector<16x4xf32>
    %80 = vector.extract_strided_slice %28 {offsets = [0, 12], sizes = [16, 4], strides = [1, 1]} : vector<16x96xf32> to vector<16x4xf32>
    %81 = vector.extract_strided_slice %28 {offsets = [0, 44], sizes = [16, 4], strides = [1, 1]} : vector<16x96xf32> to vector<16x4xf32>
    %82 = vector.extract_strided_slice %28 {offsets = [0, 76], sizes = [16, 4], strides = [1, 1]} : vector<16x96xf32> to vector<16x4xf32>
    %cst_30 = arith.constant dense<0.000000e+00> : vector<16x16xf32>
    %83 = tpu.matmul %80, %81, %cst_30 {dimension_numbers = #tpu.dot_dimension_numbers<[1], [1], [0], [0], [0, 0, 1, 0], [], []>} : vector<16x4xf32>, vector<16x4xf32>, vector<16x16xf32> -> vector<16x16xf32>
    %cst_31 = arith.constant 5.000000e-01 : f32
    %84 = vector.broadcast %cst_31 : f32 to vector<16x16xf32>
    %85 = arith.mulf %83, %84 : vector<16x16xf32>
    %cst_32 = arith.constant dense<0xFF800000> : vector<16xf32>
    %86 = vector.multi_reduction <maximumf>, %85, %cst_32 [1] : vector<16x16xf32> to vector<16xf32>
    %87 = vector.shape_cast %86 : vector<16xf32> to vector<16x1xf32>
    %88 = vector.broadcast %87 : vector<16x1xf32> to vector<16x16xf32>
    %89 = arith.subf %85, %88 : vector<16x16xf32>
    %90 = math.exp %89 : vector<16x16xf32>
    %cst_33 = arith.constant dense<0.000000e+00> : vector<16xf32>
    %91 = vector.multi_reduction <add>, %90, %cst_33 [1] : vector<16x16xf32> to vector<16xf32>
    %92 = vector.shape_cast %91 : vector<16xf32> to vector<16x1xf32>
    %93 = tpu.reciprocal %92 {approx = true} : vector<16x1xf32> -> vector<16x1xf32>
    %94 = vector.broadcast %93 : vector<16x1xf32> to vector<16x16xf32>
    %95 = arith.mulf %90, %94 : vector<16x16xf32>
    %cst_34 = arith.constant dense<0.000000e+00> : vector<16x4xf32>
    %96 = tpu.matmul %95, %82, %cst_34 {dimension_numbers = #tpu.dot_dimension_numbers<[1], [0], [0], [1], [0, 0, 1, 1], [], []>} : vector<16x16xf32>, vector<16x4xf32>, vector<16x4xf32> -> vector<16x4xf32>
    %97 = vector.extract_strided_slice %28 {offsets = [0, 16], sizes = [16, 4], strides = [1, 1]} : vector<16x96xf32> to vector<16x4xf32>
    %98 = vector.extract_strided_slice %28 {offsets = [0, 48], sizes = [16, 4], strides = [1, 1]} : vector<16x96xf32> to vector<16x4xf32>
    %99 = vector.extract_strided_slice %28 {offsets = [0, 80], sizes = [16, 4], strides = [1, 1]} : vector<16x96xf32> to vector<16x4xf32>
    %cst_35 = arith.constant dense<0.000000e+00> : vector<16x16xf32>
    %100 = tpu.matmul %97, %98, %cst_35 {dimension_numbers = #tpu.dot_dimension_numbers<[1], [1], [0], [0], [0, 0, 1, 0], [], []>} : vector<16x4xf32>, vector<16x4xf32>, vector<16x16xf32> -> vector<16x16xf32>
    %cst_36 = arith.constant 5.000000e-01 : f32
    %101 = vector.broadcast %cst_36 : f32 to vector<16x16xf32>
    %102 = arith.mulf %100, %101 : vector<16x16xf32>
    %cst_37 = arith.constant dense<0xFF800000> : vector<16xf32>
    %103 = vector.multi_reduction <maximumf>, %102, %cst_37 [1] : vector<16x16xf32> to vector<16xf32>
    %104 = vector.shape_cast %103 : vector<16xf32> to vector<16x1xf32>
    %105 = vector.broadcast %104 : vector<16x1xf32> to vector<16x16xf32>
    %106 = arith.subf %102, %105 : vector<16x16xf32>
    %107 = math.exp %106 : vector<16x16xf32>
    %cst_38 = arith.constant dense<0.000000e+00> : vector<16xf32>
    %108 = vector.multi_reduction <add>, %107, %cst_38 [1] : vector<16x16xf32> to vector<16xf32>
    %109 = vector.shape_cast %108 : vector<16xf32> to vector<16x1xf32>
    %110 = tpu.reciprocal %109 {approx = true} : vector<16x1xf32> -> vector<16x1xf32>
    %111 = vector.broadcast %110 : vector<16x1xf32> to vector<16x16xf32>
    %112 = arith.mulf %107, %111 : vector<16x16xf32>
    %cst_39 = arith.constant dense<0.000000e+00> : vector<16x4xf32>
    %113 = tpu.matmul %112, %99, %cst_39 {dimension_numbers = #tpu.dot_dimension_numbers<[1], [0], [0], [1], [0, 0, 1, 1], [], []>} : vector<16x16xf32>, vector<16x4xf32>, vector<16x4xf32> -> vector<16x4xf32>
    %114 = vector.extract_strided_slice %28 {offsets = [0, 20], sizes = [16, 4], strides = [1, 1]} : vector<16x96xf32> to vector<16x4xf32>
    %115 = vector.extract_strided_slice %28 {offsets = [0, 52], sizes = [16, 4], strides = [1, 1]} : vector<16x96xf32> to vector<16x4xf32>
    %116 = vector.extract_strided_slice %28 {offsets = [0, 84], sizes = [16, 4], strides = [1, 1]} : vector<16x96xf32> to vector<16x4xf32>
    %cst_40 = arith.constant dense<0.000000e+00> : vector<16x16xf32>
    %117 = tpu.matmul %114, %115, %cst_40 {dimension_numbers = #tpu.dot_dimension_numbers<[1], [1], [0], [0], [0, 0, 1, 0], [], []>} : vector<16x4xf32>, vector<16x4xf32>, vector<16x16xf32> -> vector<16x16xf32>
    %cst_41 = arith.constant 5.000000e-01 : f32
    %118 = vector.broadcast %cst_41 : f32 to vector<16x16xf32>
    %119 = arith.mulf %117, %118 : vector<16x16xf32>
    %cst_42 = arith.constant dense<0xFF800000> : vector<16xf32>
    %120 = vector.multi_reduction <maximumf>, %119, %cst_42 [1] : vector<16x16xf32> to vector<16xf32>
    %121 = vector.shape_cast %120 : vector<16xf32> to vector<16x1xf32>
    %122 = vector.broadcast %121 : vector<16x1xf32> to vector<16x16xf32>
    %123 = arith.subf %119, %122 : vector<16x16xf32>
    %124 = math.exp %123 : vector<16x16xf32>
    %cst_43 = arith.constant dense<0.000000e+00> : vector<16xf32>
    %125 = vector.multi_reduction <add>, %124, %cst_43 [1] : vector<16x16xf32> to vector<16xf32>
    %126 = vector.shape_cast %125 : vector<16xf32> to vector<16x1xf32>
    %127 = tpu.reciprocal %126 {approx = true} : vector<16x1xf32> -> vector<16x1xf32>
    %128 = vector.broadcast %127 : vector<16x1xf32> to vector<16x16xf32>
    %129 = arith.mulf %124, %128 : vector<16x16xf32>
    %cst_44 = arith.constant dense<0.000000e+00> : vector<16x4xf32>
    %130 = tpu.matmul %129, %116, %cst_44 {dimension_numbers = #tpu.dot_dimension_numbers<[1], [0], [0], [1], [0, 0, 1, 1], [], []>} : vector<16x16xf32>, vector<16x4xf32>, vector<16x4xf32> -> vector<16x4xf32>
    %131 = vector.extract_strided_slice %28 {offsets = [0, 24], sizes = [16, 4], strides = [1, 1]} : vector<16x96xf32> to vector<16x4xf32>
    %132 = vector.extract_strided_slice %28 {offsets = [0, 56], sizes = [16, 4], strides = [1, 1]} : vector<16x96xf32> to vector<16x4xf32>
    %133 = vector.extract_strided_slice %28 {offsets = [0, 88], sizes = [16, 4], strides = [1, 1]} : vector<16x96xf32> to vector<16x4xf32>
    %cst_45 = arith.constant dense<0.000000e+00> : vector<16x16xf32>
    %134 = tpu.matmul %131, %132, %cst_45 {dimension_numbers = #tpu.dot_dimension_numbers<[1], [1], [0], [0], [0, 0, 1, 0], [], []>} : vector<16x4xf32>, vector<16x4xf32>, vector<16x16xf32> -> vector<16x16xf32>
    %cst_46 = arith.constant 5.000000e-01 : f32
    %135 = vector.broadcast %cst_46 : f32 to vector<16x16xf32>
    %136 = arith.mulf %134, %135 : vector<16x16xf32>
    %cst_47 = arith.constant dense<0xFF800000> : vector<16xf32>
    %137 = vector.multi_reduction <maximumf>, %136, %cst_47 [1] : vector<16x16xf32> to vector<16xf32>
    %138 = vector.shape_cast %137 : vector<16xf32> to vector<16x1xf32>
    %139 = vector.broadcast %138 : vector<16x1xf32> to vector<16x16xf32>
    %140 = arith.subf %136, %139 : vector<16x16xf32>
    %141 = math.exp %140 : vector<16x16xf32>
    %cst_48 = arith.constant dense<0.000000e+00> : vector<16xf32>
    %142 = vector.multi_reduction <add>, %141, %cst_48 [1] : vector<16x16xf32> to vector<16xf32>
    %143 = vector.shape_cast %142 : vector<16xf32> to vector<16x1xf32>
    %144 = tpu.reciprocal %143 {approx = true} : vector<16x1xf32> -> vector<16x1xf32>
    %145 = vector.broadcast %144 : vector<16x1xf32> to vector<16x16xf32>
    %146 = arith.mulf %141, %145 : vector<16x16xf32>
    %cst_49 = arith.constant dense<0.000000e+00> : vector<16x4xf32>
    %147 = tpu.matmul %146, %133, %cst_49 {dimension_numbers = #tpu.dot_dimension_numbers<[1], [0], [0], [1], [0, 0, 1, 1], [], []>} : vector<16x16xf32>, vector<16x4xf32>, vector<16x4xf32> -> vector<16x4xf32>
    %148 = vector.extract_strided_slice %28 {offsets = [0, 28], sizes = [16, 4], strides = [1, 1]} : vector<16x96xf32> to vector<16x4xf32>
    %149 = vector.extract_strided_slice %28 {offsets = [0, 60], sizes = [16, 4], strides = [1, 1]} : vector<16x96xf32> to vector<16x4xf32>
    %150 = vector.extract_strided_slice %28 {offsets = [0, 92], sizes = [16, 4], strides = [1, 1]} : vector<16x96xf32> to vector<16x4xf32>
    %cst_50 = arith.constant dense<0.000000e+00> : vector<16x16xf32>
    %151 = tpu.matmul %148, %149, %cst_50 {dimension_numbers = #tpu.dot_dimension_numbers<[1], [1], [0], [0], [0, 0, 1, 0], [], []>} : vector<16x4xf32>, vector<16x4xf32>, vector<16x16xf32> -> vector<16x16xf32>
    %cst_51 = arith.constant 5.000000e-01 : f32
    %152 = vector.broadcast %cst_51 : f32 to vector<16x16xf32>
    %153 = arith.mulf %151, %152 : vector<16x16xf32>
    %cst_52 = arith.constant dense<0xFF800000> : vector<16xf32>
    %154 = vector.multi_reduction <maximumf>, %153, %cst_52 [1] : vector<16x16xf32> to vector<16xf32>
    %155 = vector.shape_cast %154 : vector<16xf32> to vector<16x1xf32>
    %156 = vector.broadcast %155 : vector<16x1xf32> to vector<16x16xf32>
    %157 = arith.subf %153, %156 : vector<16x16xf32>
    %158 = math.exp %157 : vector<16x16xf32>
    %cst_53 = arith.constant dense<0.000000e+00> : vector<16xf32>
    %159 = vector.multi_reduction <add>, %158, %cst_53 [1] : vector<16x16xf32> to vector<16xf32>
    %160 = vector.shape_cast %159 : vector<16xf32> to vector<16x1xf32>
    %161 = tpu.reciprocal %160 {approx = true} : vector<16x1xf32> -> vector<16x1xf32>
    %162 = vector.broadcast %161 : vector<16x1xf32> to vector<16x16xf32>
    %163 = arith.mulf %158, %162 : vector<16x16xf32>
    %cst_54 = arith.constant dense<0.000000e+00> : vector<16x4xf32>
    %164 = tpu.matmul %163, %150, %cst_54 {dimension_numbers = #tpu.dot_dimension_numbers<[1], [0], [0], [1], [0, 0, 1, 1], [], []>} : vector<16x16xf32>, vector<16x4xf32>, vector<16x4xf32> -> vector<16x4xf32>
    %165 = tpu.concatenate %45, %62, %79, %96, %113, %130, %147, %164 in 1 : vector<16x4xf32>, vector<16x4xf32>, vector<16x4xf32>, vector<16x4xf32>, vector<16x4xf32>, vector<16x4xf32>, vector<16x4xf32>, vector<16x4xf32> -> vector<16x32xf32>
    %c0_55 = arith.constant 0 : index
    %c0_56 = arith.constant 0 : index
    %166 = vector.load %arg6[%c0_55, %c0_56] : memref<32x32xf32, #tpu.memory_space<vmem>>, vector<32x32xf32>
    %cst_57 = arith.constant dense<0.000000e+00> : vector<16x32xf32>
    %167 = tpu.matmul %165, %166, %cst_57 {dimension_numbers = #tpu.dot_dimension_numbers<[1], [0], [0], [1], [0, 0, 1, 1], [], []>} : vector<16x32xf32>, vector<32x32xf32>, vector<16x32xf32> -> vector<16x32xf32>
    %c0_58 = arith.constant 0 : index
    %c0_59 = arith.constant 0 : index
    %168 = vector.load %arg7[%c0_58, %c0_59] : memref<1x32xf32, #tpu.memory_space<vmem>>, vector<1x32xf32>
    %169 = vector.broadcast %168 : vector<1x32xf32> to vector<16x32xf32>
    %170 = arith.addf %167, %169 : vector<16x32xf32>
    %171 = arith.addf %170, %1 : vector<16x32xf32>
    %c0_60 = arith.constant 0 : index
    %c0_61 = arith.constant 0 : index
    %172 = vector.load %arg8[%c0_60, %c0_61] : memref<1x32xf32, #tpu.memory_space<vmem>>, vector<1x32xf32>
    %c0_62 = arith.constant 0 : index
    %c0_63 = arith.constant 0 : index
    %173 = vector.load %arg9[%c0_62, %c0_63] : memref<1x32xf32, #tpu.memory_space<vmem>>, vector<1x32xf32>
    %cst_64 = arith.constant dense<0.000000e+00> : vector<16xf32>
    %174 = vector.multi_reduction <add>, %171, %cst_64 [1] : vector<16x32xf32> to vector<16xf32>
    %175 = vector.shape_cast %174 : vector<16xf32> to vector<16x1xf32>
    %cst_65 = arith.constant 3.200000e+01 : f32
    %176 = vector.broadcast %cst_65 : f32 to vector<16x1xf32>
    %177 = arith.divf %175, %176 : vector<16x1xf32>
    %178 = vector.broadcast %177 : vector<16x1xf32> to vector<16x32xf32>
    %179 = arith.subf %171, %178 : vector<16x32xf32>
    %180 = arith.mulf %179, %179 : vector<16x32xf32>
    %cst_66 = arith.constant dense<0.000000e+00> : vector<16xf32>
    %181 = vector.multi_reduction <add>, %180, %cst_66 [1] : vector<16x32xf32> to vector<16xf32>
    %182 = vector.shape_cast %181 : vector<16xf32> to vector<16x1xf32>
    %cst_67 = arith.constant 3.200000e+01 : f32
    %183 = vector.broadcast %cst_67 : f32 to vector<16x1xf32>
    %184 = arith.divf %182, %183 : vector<16x1xf32>
    %cst_68 = arith.constant 9.99999974E-6 : f32
    %185 = vector.broadcast %cst_68 : f32 to vector<16x1xf32>
    %186 = arith.addf %184, %185 : vector<16x1xf32>
    %187 = math.rsqrt %186 : vector<16x1xf32>
    %188 = vector.broadcast %187 : vector<16x1xf32> to vector<16x32xf32>
    %189 = arith.mulf %179, %188 : vector<16x32xf32>
    %190 = vector.broadcast %172 : vector<1x32xf32> to vector<16x32xf32>
    %191 = arith.mulf %189, %190 : vector<16x32xf32>
    %192 = vector.broadcast %173 : vector<1x32xf32> to vector<16x32xf32>
    %193 = arith.addf %191, %192 : vector<16x32xf32>
    %c0_69 = arith.constant 0 : index
    %c0_70 = arith.constant 0 : index
    %194 = vector.load %arg10[%c0_69, %c0_70] : memref<32x128xf32, #tpu.memory_space<vmem>>, vector<32x128xf32>
    %cst_71 = arith.constant dense<0.000000e+00> : vector<16x128xf32>
    %195 = tpu.matmul %193, %194, %cst_71 {dimension_numbers = #tpu.dot_dimension_numbers<[1], [0], [0], [1], [0, 0, 1, 1], [], []>} : vector<16x32xf32>, vector<32x128xf32>, vector<16x128xf32> -> vector<16x128xf32>
    %c0_72 = arith.constant 0 : index
    %c0_73 = arith.constant 0 : index
    %196 = vector.load %arg11[%c0_72, %c0_73] : memref<1x128xf32, #tpu.memory_space<vmem>>, vector<1x128xf32>
    %197 = vector.broadcast %196 : vector<1x128xf32> to vector<16x128xf32>
    %198 = arith.addf %195, %197 : vector<16x128xf32>
    %cst_74 = arith.constant 5.000000e-01 : f32
    %199 = vector.broadcast %cst_74 : f32 to vector<16x128xf32>
    %200 = arith.mulf %199, %198 : vector<16x128xf32>
    %cst_75 = arith.constant 1.41421354 : f32
    %201 = vector.broadcast %cst_75 : f32 to vector<16x128xf32>
    %202 = arith.divf %198, %201 : vector<16x128xf32>
    %cst_76 = arith.constant 0.000000e+00 : f32
    %203 = vector.broadcast %cst_76 : f32 to vector<16x128xf32>
    %204 = arith.cmpf oge, %202, %203 : vector<16x128xf32>
    %cst_77 = arith.constant 1.000000e+00 : f32
    %cst_78 = arith.constant -1.000000e+00 : f32
    %205 = vector.broadcast %cst_77 : f32 to vector<16x128xf32>
    %206 = vector.broadcast %cst_78 : f32 to vector<16x128xf32>
    %207 = arith.select %204, %205, %206 : vector<16x128xi1>, vector<16x128xf32>
    %208 = math.absf %202 : vector<16x128xf32>
    %cst_79 = arith.constant 0.327591091 : f32
    %209 = vector.broadcast %cst_79 : f32 to vector<16x128xf32>
    %210 = arith.mulf %209, %208 : vector<16x128xf32>
    %cst_80 = arith.constant 1.000000e+00 : f32
    %211 = vector.broadcast %cst_80 : f32 to vector<16x128xf32>
    %212 = arith.addf %211, %210 : vector<16x128xf32>
    %cst_81 = arith.constant 1.000000e+00 : f32
    %213 = vector.broadcast %cst_81 : f32 to vector<16x128xf32>
    %214 = arith.divf %213, %212 : vector<16x128xf32>
    %cst_82 = arith.constant 1.06140542 : f32
    %215 = vector.broadcast %cst_82 : f32 to vector<16x128xf32>
    %216 = arith.mulf %215, %214 : vector<16x128xf32>
    %cst_83 = arith.constant -1.45315206 : f32
    %217 = vector.broadcast %cst_83 : f32 to vector<16x128xf32>
    %218 = arith.addf %216, %217 : vector<16x128xf32>
    %219 = arith.mulf %218, %214 : vector<16x128xf32>
    %cst_84 = arith.constant 1.42141378 : f32
    %220 = vector.broadcast %cst_84 : f32 to vector<16x128xf32>
    %221 = arith.addf %219, %220 : vector<16x128xf32>
    %222 = arith.mulf %221, %214 : vector<16x128xf32>
    %cst_85 = arith.constant -0.284496725 : f32
    %223 = vector.broadcast %cst_85 : f32 to vector<16x128xf32>
    %224 = arith.addf %222, %223 : vector<16x128xf32>
    %225 = arith.mulf %224, %214 : vector<16x128xf32>
    %cst_86 = arith.constant 0.254829586 : f32
    %226 = vector.broadcast %cst_86 : f32 to vector<16x128xf32>
    %227 = arith.addf %225, %226 : vector<16x128xf32>
    %228 = arith.mulf %227, %214 : vector<16x128xf32>
    %cst_87 = arith.constant 0.000000e+00 : f32
    %229 = vector.broadcast %cst_87 : f32 to vector<16x128xf32>
    %230 = arith.subf %229, %208 : vector<16x128xf32>
    %231 = arith.mulf %230, %208 : vector<16x128xf32>
    %232 = math.exp %231 : vector<16x128xf32>
    %233 = arith.mulf %228, %232 : vector<16x128xf32>
    %cst_88 = arith.constant 1.000000e+00 : f32
    %234 = vector.broadcast %cst_88 : f32 to vector<16x128xf32>
    %235 = arith.subf %234, %233 : vector<16x128xf32>
    %236 = arith.mulf %207, %235 : vector<16x128xf32>
    %cst_89 = arith.constant 1.000000e+00 : f32
    %237 = vector.broadcast %cst_89 : f32 to vector<16x128xf32>
    %238 = arith.addf %237, %236 : vector<16x128xf32>
    %239 = arith.mulf %200, %238 : vector<16x128xf32>
    %c0_90 = arith.constant 0 : index
    %c0_91 = arith.constant 0 : index
    %240 = vector.load %arg12[%c0_90, %c0_91] : memref<128x32xf32, #tpu.memory_space<vmem>>, vector<128x32xf32>
    %cst_92 = arith.constant dense<0.000000e+00> : vector<16x32xf32>
    %241 = tpu.matmul %239, %240, %cst_92 {dimension_numbers = #tpu.dot_dimension_numbers<[1], [0], [0], [1], [0, 0, 1, 1], [], []>} : vector<16x128xf32>, vector<128x32xf32>, vector<16x32xf32> -> vector<16x32xf32>
    %c0_93 = arith.constant 0 : index
    %c0_94 = arith.constant 0 : index
    %242 = vector.load %arg13[%c0_93, %c0_94] : memref<1x32xf32, #tpu.memory_space<vmem>>, vector<1x32xf32>
    %243 = vector.broadcast %242 : vector<1x32xf32> to vector<16x32xf32>
    %244 = arith.addf %241, %243 : vector<16x32xf32>
    %245 = arith.addf %244, %171 : vector<16x32xf32>
    %c0_95 = arith.constant 0 : index
    %c0_96 = arith.constant 0 : index
    %c0_97 = arith.constant 0 : index
    %246 = vector.load %arg14[%c0_95, %c0_96, %c0_97] : memref<1x16x32xf32, #tpu.memory_space<vmem>>, vector<1x16x32xf32>
    %247 = vector.shape_cast %246 : vector<1x16x32xf32> to vector<16x32xf32>
    %248 = vector.shape_cast %245 : vector<16x32xf32> to vector<1x16x32xf32>
    tpu.vector_store %arg14[%c0_95, %c0_96, %c0_97], %248 {strides = array<i32>} : memref<1x16x32xf32, #tpu.memory_space<vmem>>, vector<1x16x32xf32>,
    return
  }
  func.func @transform_0(%arg0: i32) -> (i32, i32, i32) {
    %c0_i32 = arith.constant 0 : i32
    %c0_i32_0 = arith.constant 0 : i32
    %c0_i32_1 = arith.constant 0 : i32
    return %arg0, %c0_i32, %c0_i32_0 : i32, i32, i32
  }
  func.func @transform_1(%arg0: i32) -> (i32, i32) {
    %c0_i32 = arith.constant 0 : i32
    %c0_i32_0 = arith.constant 0 : i32
    %c0_i32_1 = arith.constant 0 : i32
    return %c0_i32, %c0_i32_0 : i32, i32
  }
  func.func @transform_2(%arg0: i32) -> (i32, i32) {
    %c0_i32 = arith.constant 0 : i32
    %c0_i32_0 = arith.constant 0 : i32
    %c0_i32_1 = arith.constant 0 : i32
    return %c0_i32, %c0_i32_0 : i32, i32
  }
  func.func @transform_3(%arg0: i32) -> (i32, i32) {
    %c0_i32 = arith.constant 0 : i32
    %c0_i32_0 = arith.constant 0 : i32
    %c0_i32_1 = arith.constant 0 : i32
    return %c0_i32, %c0_i32_0 : i32, i32
  }
  func.func @transform_4(%arg0: i32) -> (i32, i32) {
    %c0_i32 = arith.constant 0 : i32
    %c0_i32_0 = arith.constant 0 : i32
    %c0_i32_1 = arith.constant 0 : i32
    return %c0_i32, %c0_i32_0 : i32, i32
  }
  func.func @transform_5(%arg0: i32) -> (i32, i32) {
    %c0_i32 = arith.constant 0 : i32
    %c0_i32_0 = arith.constant 0 : i32
    %c0_i32_1 = arith.constant 0 : i32
    return %c0_i32, %c0_i32_0 : i32, i32
  }
  func.func @transform_6(%arg0: i32) -> (i32, i32) {
    %c0_i32 = arith.constant 0 : i32
    %c0_i32_0 = arith.constant 0 : i32
    %c0_i32_1 = arith.constant 0 : i32
    return %c0_i32, %c0_i32_0 : i32, i32
  }
  func.func @transform_7(%arg0: i32) -> (i32, i32) {
    %c0_i32 = arith.constant 0 : i32
    %c0_i32_0 = arith.constant 0 : i32
    %c0_i32_1 = arith.constant 0 : i32
    return %c0_i32, %c0_i32_0 : i32, i32
  }
  func.func @transform_8(%arg0: i32) -> (i32, i32) {
    %c0_i32 = arith.constant 0 : i32
    %c0_i32_0 = arith.constant 0 : i32
    %c0_i32_1 = arith.constant 0 : i32
    return %c0_i32, %c0_i32_0 : i32, i32
  }
  func.func @transform_9(%arg0: i32) -> (i32, i32) {
    %c0_i32 = arith.constant 0 : i32
    %c0_i32_0 = arith.constant 0 : i32
    %c0_i32_1 = arith.constant 0 : i32
    return %c0_i32, %c0_i32_0 : i32, i32
  }
  func.func @transform_10(%arg0: i32) -> (i32, i32) {
    %c0_i32 = arith.constant 0 : i32
    %c0_i32_0 = arith.constant 0 : i32
    %c0_i32_1 = arith.constant 0 : i32
    return %c0_i32, %c0_i32_0 : i32, i32
  }
  func.func @transform_11(%arg0: i32) -> (i32, i32) {
    %c0_i32 = arith.constant 0 : i32
    %c0_i32_0 = arith.constant 0 : i32
    %c0_i32_1 = arith.constant 0 : i32
    return %c0_i32, %c0_i32_0 : i32, i32
  }
  func.func @transform_12(%arg0: i32) -> (i32, i32) {
    %c0_i32 = arith.constant 0 : i32
    %c0_i32_0 = arith.constant 0 : i32
    %c0_i32_1 = arith.constant 0 : i32
    return %c0_i32, %c0_i32_0 : i32, i32
  }
  func.func @transform_13(%arg0: i32) -> (i32, i32, i32) {
    %c0_i32 = arith.constant 0 : i32
    %c0_i32_0 = arith.constant 0 : i32
    %c0_i32_1 = arith.constant 0 : i32
    return %arg0, %c0_i32, %c0_i32_0 : i32, i32, i32
  }
}

module attributes {stable_mosaic.version = 11 : i64} {
  func.func @kernel(%arg0: i32, %arg1: memref<1x8x64xf32, #tpu.memory_space<vmem>>, %arg2: memref<1x64xf32, #tpu.memory_space<vmem>>, %arg3: memref<1x64xf32, #tpu.memory_space<vmem>>, %arg4: memref<64x192xf32, #tpu.memory_space<vmem>>, %arg5: memref<1x192xf32, #tpu.memory_space<vmem>>, %arg6: memref<64x64xf32, #tpu.memory_space<vmem>>, %arg7: memref<1x64xf32, #tpu.memory_space<vmem>>, %arg8: memref<1x64xf32, #tpu.memory_space<vmem>>, %arg9: memref<1x64xf32, #tpu.memory_space<vmem>>, %arg10: memref<64x256xf32, #tpu.memory_space<vmem>>, %arg11: memref<1x256xf32, #tpu.memory_space<vmem>>, %arg12: memref<256x64xf32, #tpu.memory_space<vmem>>, %arg13: memref<1x64xf32, #tpu.memory_space<vmem>>, %arg14: memref<1x8x64xf32, #tpu.memory_space<vmem>>) attributes {dimension_semantics = [#tpu.dimension_semantics<parallel>], iteration_bounds = array<i64: 2>, scalar_prefetch = 0 : i64, scratch_operands = 0 : i64, tpu.core_type = #tpu.core_type<tc>, window_params = [{transform_indices = @transform_0, window_bounds = array<i64: 1, 8, 64>}, {pipeline_mode = #tpu.pipeline_mode<synchronous>, transform_indices = @transform_1, window_bounds = array<i64: 1, 64>}, {pipeline_mode = #tpu.pipeline_mode<synchronous>, transform_indices = @transform_2, window_bounds = array<i64: 1, 64>}, {pipeline_mode = #tpu.pipeline_mode<synchronous>, transform_indices = @transform_3, window_bounds = array<i64: 64, 192>}, {pipeline_mode = #tpu.pipeline_mode<synchronous>, transform_indices = @transform_4, window_bounds = array<i64: 1, 192>}, {pipeline_mode = #tpu.pipeline_mode<synchronous>, transform_indices = @transform_5, window_bounds = array<i64: 64, 64>}, {pipeline_mode = #tpu.pipeline_mode<synchronous>, transform_indices = @transform_6, window_bounds = array<i64: 1, 64>}, {pipeline_mode = #tpu.pipeline_mode<synchronous>, transform_indices = @transform_7, window_bounds = array<i64: 1, 64>}, {pipeline_mode = #tpu.pipeline_mode<synchronous>, transform_indices = @transform_8, window_bounds = array<i64: 1, 64>}, {pipeline_mode = #tpu.pipeline_mode<synchronous>, transform_indices = @transform_9, window_bounds = array<i64: 64, 256>}, {pipeline_mode = #tpu.pipeline_mode<synchronous>, transform_indices = @transform_10, window_bounds = array<i64: 1, 256>}, {pipeline_mode = #tpu.pipeline_mode<synchronous>, transform_indices = @transform_11, window_bounds = array<i64: 256, 64>}, {pipeline_mode = #tpu.pipeline_mode<synchronous>, transform_indices = @transform_12, window_bounds = array<i64: 1, 64>}, {transform_indices = @transform_13, window_bounds = array<i64: 1, 8, 64>}]} {
    %c0 = arith.constant 0 : index
    %c0_0 = arith.constant 0 : index
    %c0_1 = arith.constant 0 : index
    %0 = vector.load %arg1[%c0, %c0_0, %c0_1] : memref<1x8x64xf32, #tpu.memory_space<vmem>>, vector<1x8x64xf32>
    %1 = vector.shape_cast %0 : vector<1x8x64xf32> to vector<8x64xf32>
    %c0_2 = arith.constant 0 : index
    %c0_3 = arith.constant 0 : index
    %2 = vector.load %arg2[%c0_2, %c0_3] : memref<1x64xf32, #tpu.memory_space<vmem>>, vector<1x64xf32>
    %c0_4 = arith.constant 0 : index
    %c0_5 = arith.constant 0 : index
    %3 = vector.load %arg3[%c0_4, %c0_5] : memref<1x64xf32, #tpu.memory_space<vmem>>, vector<1x64xf32>
    %cst = arith.constant dense<0.000000e+00> : vector<8xf32>
    %4 = vector.multi_reduction <add>, %1, %cst [1] : vector<8x64xf32> to vector<8xf32>
    %5 = vector.shape_cast %4 : vector<8xf32> to vector<8x1xf32>
    %cst_6 = arith.constant 6.400000e+01 : f32
    %6 = vector.broadcast %cst_6 : f32 to vector<8x1xf32>
    %7 = arith.divf %5, %6 : vector<8x1xf32>
    %8 = vector.broadcast %7 : vector<8x1xf32> to vector<8x64xf32>
    %9 = arith.subf %1, %8 : vector<8x64xf32>
    %10 = arith.mulf %9, %9 : vector<8x64xf32>
    %cst_7 = arith.constant dense<0.000000e+00> : vector<8xf32>
    %11 = vector.multi_reduction <add>, %10, %cst_7 [1] : vector<8x64xf32> to vector<8xf32>
    %12 = vector.shape_cast %11 : vector<8xf32> to vector<8x1xf32>
    %cst_8 = arith.constant 6.400000e+01 : f32
    %13 = vector.broadcast %cst_8 : f32 to vector<8x1xf32>
    %14 = arith.divf %12, %13 : vector<8x1xf32>
    %cst_9 = arith.constant 9.99999974E-6 : f32
    %15 = vector.broadcast %cst_9 : f32 to vector<8x1xf32>
    %16 = arith.addf %14, %15 : vector<8x1xf32>
    %17 = math.rsqrt %16 : vector<8x1xf32>
    %18 = vector.broadcast %17 : vector<8x1xf32> to vector<8x64xf32>
    %19 = arith.mulf %9, %18 : vector<8x64xf32>
    %20 = vector.broadcast %2 : vector<1x64xf32> to vector<8x64xf32>
    %21 = arith.mulf %19, %20 : vector<8x64xf32>
    %22 = vector.broadcast %3 : vector<1x64xf32> to vector<8x64xf32>
    %23 = arith.addf %21, %22 : vector<8x64xf32>
    %c0_10 = arith.constant 0 : index
    %c0_11 = arith.constant 0 : index
    %24 = vector.load %arg4[%c0_10, %c0_11] : memref<64x192xf32, #tpu.memory_space<vmem>>, vector<64x192xf32>
    %cst_12 = arith.constant dense<0.000000e+00> : vector<8x192xf32>
    %25 = tpu.matmul %23, %24, %cst_12 {dimension_numbers = #tpu.dot_dimension_numbers<[1], [0], [0], [1], [0, 0, 1, 1], [], []>} : vector<8x64xf32>, vector<64x192xf32>, vector<8x192xf32> -> vector<8x192xf32>
    %c0_13 = arith.constant 0 : index
    %c0_14 = arith.constant 0 : index
    %26 = vector.load %arg5[%c0_13, %c0_14] : memref<1x192xf32, #tpu.memory_space<vmem>>, vector<1x192xf32>
    %27 = vector.broadcast %26 : vector<1x192xf32> to vector<8x192xf32>
    %28 = arith.addf %25, %27 : vector<8x192xf32>
    %29 = vector.extract_strided_slice %28 {offsets = [0, 0], sizes = [8, 8], strides = [1, 1]} : vector<8x192xf32> to vector<8x8xf32>
    %30 = vector.extract_strided_slice %28 {offsets = [0, 64], sizes = [8, 8], strides = [1, 1]} : vector<8x192xf32> to vector<8x8xf32>
    %31 = vector.extract_strided_slice %28 {offsets = [0, 128], sizes = [8, 8], strides = [1, 1]} : vector<8x192xf32> to vector<8x8xf32>
    %cst_15 = arith.constant dense<0.000000e+00> : vector<8x8xf32>
    %32 = tpu.matmul %29, %30, %cst_15 {dimension_numbers = #tpu.dot_dimension_numbers<[1], [1], [0], [0], [0, 0, 1, 0], [], []>} : vector<8x8xf32>, vector<8x8xf32>, vector<8x8xf32> -> vector<8x8xf32>
    %cst_16 = arith.constant 0.353553385 : f32
    %33 = vector.broadcast %cst_16 : f32 to vector<8x8xf32>
    %34 = arith.mulf %32, %33 : vector<8x8xf32>
    %cst_17 = arith.constant dense<0xFF800000> : vector<8xf32>
    %35 = vector.multi_reduction <maximumf>, %34, %cst_17 [1] : vector<8x8xf32> to vector<8xf32>
    %36 = vector.shape_cast %35 : vector<8xf32> to vector<8x1xf32>
    %37 = vector.broadcast %36 : vector<8x1xf32> to vector<8x8xf32>
    %38 = arith.subf %34, %37 : vector<8x8xf32>
    %39 = math.exp %38 : vector<8x8xf32>
    %cst_18 = arith.constant dense<0.000000e+00> : vector<8xf32>
    %40 = vector.multi_reduction <add>, %39, %cst_18 [1] : vector<8x8xf32> to vector<8xf32>
    %41 = vector.shape_cast %40 : vector<8xf32> to vector<8x1xf32>
    %42 = tpu.reciprocal %41 {approx = true} : vector<8x1xf32> -> vector<8x1xf32>
    %43 = vector.broadcast %42 : vector<8x1xf32> to vector<8x8xf32>
    %44 = arith.mulf %39, %43 : vector<8x8xf32>
    %cst_19 = arith.constant dense<0.000000e+00> : vector<8x8xf32>
    %45 = tpu.matmul %44, %31, %cst_19 {dimension_numbers = #tpu.dot_dimension_numbers<[1], [0], [0], [1], [0, 0, 1, 1], [], []>} : vector<8x8xf32>, vector<8x8xf32>, vector<8x8xf32> -> vector<8x8xf32>
    %46 = vector.extract_strided_slice %28 {offsets = [0, 8], sizes = [8, 8], strides = [1, 1]} : vector<8x192xf32> to vector<8x8xf32>
    %47 = vector.extract_strided_slice %28 {offsets = [0, 72], sizes = [8, 8], strides = [1, 1]} : vector<8x192xf32> to vector<8x8xf32>
    %48 = vector.extract_strided_slice %28 {offsets = [0, 136], sizes = [8, 8], strides = [1, 1]} : vector<8x192xf32> to vector<8x8xf32>
    %cst_20 = arith.constant dense<0.000000e+00> : vector<8x8xf32>
    %49 = tpu.matmul %46, %47, %cst_20 {dimension_numbers = #tpu.dot_dimension_numbers<[1], [1], [0], [0], [0, 0, 1, 0], [], []>} : vector<8x8xf32>, vector<8x8xf32>, vector<8x8xf32> -> vector<8x8xf32>
    %cst_21 = arith.constant 0.353553385 : f32
    %50 = vector.broadcast %cst_21 : f32 to vector<8x8xf32>
    %51 = arith.mulf %49, %50 : vector<8x8xf32>
    %cst_22 = arith.constant dense<0xFF800000> : vector<8xf32>
    %52 = vector.multi_reduction <maximumf>, %51, %cst_22 [1] : vector<8x8xf32> to vector<8xf32>
    %53 = vector.shape_cast %52 : vector<8xf32> to vector<8x1xf32>
    %54 = vector.broadcast %53 : vector<8x1xf32> to vector<8x8xf32>
    %55 = arith.subf %51, %54 : vector<8x8xf32>
    %56 = math.exp %55 : vector<8x8xf32>
    %cst_23 = arith.constant dense<0.000000e+00> : vector<8xf32>
    %57 = vector.multi_reduction <add>, %56, %cst_23 [1] : vector<8x8xf32> to vector<8xf32>
    %58 = vector.shape_cast %57 : vector<8xf32> to vector<8x1xf32>
    %59 = tpu.reciprocal %58 {approx = true} : vector<8x1xf32> -> vector<8x1xf32>
    %60 = vector.broadcast %59 : vector<8x1xf32> to vector<8x8xf32>
    %61 = arith.mulf %56, %60 : vector<8x8xf32>
    %cst_24 = arith.constant dense<0.000000e+00> : vector<8x8xf32>
    %62 = tpu.matmul %61, %48, %cst_24 {dimension_numbers = #tpu.dot_dimension_numbers<[1], [0], [0], [1], [0, 0, 1, 1], [], []>} : vector<8x8xf32>, vector<8x8xf32>, vector<8x8xf32> -> vector<8x8xf32>
    %63 = vector.extract_strided_slice %28 {offsets = [0, 16], sizes = [8, 8], strides = [1, 1]} : vector<8x192xf32> to vector<8x8xf32>
    %64 = vector.extract_strided_slice %28 {offsets = [0, 80], sizes = [8, 8], strides = [1, 1]} : vector<8x192xf32> to vector<8x8xf32>
    %65 = vector.extract_strided_slice %28 {offsets = [0, 144], sizes = [8, 8], strides = [1, 1]} : vector<8x192xf32> to vector<8x8xf32>
    %cst_25 = arith.constant dense<0.000000e+00> : vector<8x8xf32>
    %66 = tpu.matmul %63, %64, %cst_25 {dimension_numbers = #tpu.dot_dimension_numbers<[1], [1], [0], [0], [0, 0, 1, 0], [], []>} : vector<8x8xf32>, vector<8x8xf32>, vector<8x8xf32> -> vector<8x8xf32>
    %cst_26 = arith.constant 0.353553385 : f32
    %67 = vector.broadcast %cst_26 : f32 to vector<8x8xf32>
    %68 = arith.mulf %66, %67 : vector<8x8xf32>
    %cst_27 = arith.constant dense<0xFF800000> : vector<8xf32>
    %69 = vector.multi_reduction <maximumf>, %68, %cst_27 [1] : vector<8x8xf32> to vector<8xf32>
    %70 = vector.shape_cast %69 : vector<8xf32> to vector<8x1xf32>
    %71 = vector.broadcast %70 : vector<8x1xf32> to vector<8x8xf32>
    %72 = arith.subf %68, %71 : vector<8x8xf32>
    %73 = math.exp %72 : vector<8x8xf32>
    %cst_28 = arith.constant dense<0.000000e+00> : vector<8xf32>
    %74 = vector.multi_reduction <add>, %73, %cst_28 [1] : vector<8x8xf32> to vector<8xf32>
    %75 = vector.shape_cast %74 : vector<8xf32> to vector<8x1xf32>
    %76 = tpu.reciprocal %75 {approx = true} : vector<8x1xf32> -> vector<8x1xf32>
    %77 = vector.broadcast %76 : vector<8x1xf32> to vector<8x8xf32>
    %78 = arith.mulf %73, %77 : vector<8x8xf32>
    %cst_29 = arith.constant dense<0.000000e+00> : vector<8x8xf32>
    %79 = tpu.matmul %78, %65, %cst_29 {dimension_numbers = #tpu.dot_dimension_numbers<[1], [0], [0], [1], [0, 0, 1, 1], [], []>} : vector<8x8xf32>, vector<8x8xf32>, vector<8x8xf32> -> vector<8x8xf32>
    %80 = vector.extract_strided_slice %28 {offsets = [0, 24], sizes = [8, 8], strides = [1, 1]} : vector<8x192xf32> to vector<8x8xf32>
    %81 = vector.extract_strided_slice %28 {offsets = [0, 88], sizes = [8, 8], strides = [1, 1]} : vector<8x192xf32> to vector<8x8xf32>
    %82 = vector.extract_strided_slice %28 {offsets = [0, 152], sizes = [8, 8], strides = [1, 1]} : vector<8x192xf32> to vector<8x8xf32>
    %cst_30 = arith.constant dense<0.000000e+00> : vector<8x8xf32>
    %83 = tpu.matmul %80, %81, %cst_30 {dimension_numbers = #tpu.dot_dimension_numbers<[1], [1], [0], [0], [0, 0, 1, 0], [], []>} : vector<8x8xf32>, vector<8x8xf32>, vector<8x8xf32> -> vector<8x8xf32>
    %cst_31 = arith.constant 0.353553385 : f32
    %84 = vector.broadcast %cst_31 : f32 to vector<8x8xf32>
    %85 = arith.mulf %83, %84 : vector<8x8xf32>
    %cst_32 = arith.constant dense<0xFF800000> : vector<8xf32>
    %86 = vector.multi_reduction <maximumf>, %85, %cst_32 [1] : vector<8x8xf32> to vector<8xf32>
    %87 = vector.shape_cast %86 : vector<8xf32> to vector<8x1xf32>
    %88 = vector.broadcast %87 : vector<8x1xf32> to vector<8x8xf32>
    %89 = arith.subf %85, %88 : vector<8x8xf32>
    %90 = math.exp %89 : vector<8x8xf32>
    %cst_33 = arith.constant dense<0.000000e+00> : vector<8xf32>
    %91 = vector.multi_reduction <add>, %90, %cst_33 [1] : vector<8x8xf32> to vector<8xf32>
    %92 = vector.shape_cast %91 : vector<8xf32> to vector<8x1xf32>
    %93 = tpu.reciprocal %92 {approx = true} : vector<8x1xf32> -> vector<8x1xf32>
    %94 = vector.broadcast %93 : vector<8x1xf32> to vector<8x8xf32>
    %95 = arith.mulf %90, %94 : vector<8x8xf32>
    %cst_34 = arith.constant dense<0.000000e+00> : vector<8x8xf32>
    %96 = tpu.matmul %95, %82, %cst_34 {dimension_numbers = #tpu.dot_dimension_numbers<[1], [0], [0], [1], [0, 0, 1, 1], [], []>} : vector<8x8xf32>, vector<8x8xf32>, vector<8x8xf32> -> vector<8x8xf32>
    %97 = vector.extract_strided_slice %28 {offsets = [0, 32], sizes = [8, 8], strides = [1, 1]} : vector<8x192xf32> to vector<8x8xf32>
    %98 = vector.extract_strided_slice %28 {offsets = [0, 96], sizes = [8, 8], strides = [1, 1]} : vector<8x192xf32> to vector<8x8xf32>
    %99 = vector.extract_strided_slice %28 {offsets = [0, 160], sizes = [8, 8], strides = [1, 1]} : vector<8x192xf32> to vector<8x8xf32>
    %cst_35 = arith.constant dense<0.000000e+00> : vector<8x8xf32>
    %100 = tpu.matmul %97, %98, %cst_35 {dimension_numbers = #tpu.dot_dimension_numbers<[1], [1], [0], [0], [0, 0, 1, 0], [], []>} : vector<8x8xf32>, vector<8x8xf32>, vector<8x8xf32> -> vector<8x8xf32>
    %cst_36 = arith.constant 0.353553385 : f32
    %101 = vector.broadcast %cst_36 : f32 to vector<8x8xf32>
    %102 = arith.mulf %100, %101 : vector<8x8xf32>
    %cst_37 = arith.constant dense<0xFF800000> : vector<8xf32>
    %103 = vector.multi_reduction <maximumf>, %102, %cst_37 [1] : vector<8x8xf32> to vector<8xf32>
    %104 = vector.shape_cast %103 : vector<8xf32> to vector<8x1xf32>
    %105 = vector.broadcast %104 : vector<8x1xf32> to vector<8x8xf32>
    %106 = arith.subf %102, %105 : vector<8x8xf32>
    %107 = math.exp %106 : vector<8x8xf32>
    %cst_38 = arith.constant dense<0.000000e+00> : vector<8xf32>
    %108 = vector.multi_reduction <add>, %107, %cst_38 [1] : vector<8x8xf32> to vector<8xf32>
    %109 = vector.shape_cast %108 : vector<8xf32> to vector<8x1xf32>
    %110 = tpu.reciprocal %109 {approx = true} : vector<8x1xf32> -> vector<8x1xf32>
    %111 = vector.broadcast %110 : vector<8x1xf32> to vector<8x8xf32>
    %112 = arith.mulf %107, %111 : vector<8x8xf32>
    %cst_39 = arith.constant dense<0.000000e+00> : vector<8x8xf32>
    %113 = tpu.matmul %112, %99, %cst_39 {dimension_numbers = #tpu.dot_dimension_numbers<[1], [0], [0], [1], [0, 0, 1, 1], [], []>} : vector<8x8xf32>, vector<8x8xf32>, vector<8x8xf32> -> vector<8x8xf32>
    %114 = vector.extract_strided_slice %28 {offsets = [0, 40], sizes = [8, 8], strides = [1, 1]} : vector<8x192xf32> to vector<8x8xf32>
    %115 = vector.extract_strided_slice %28 {offsets = [0, 104], sizes = [8, 8], strides = [1, 1]} : vector<8x192xf32> to vector<8x8xf32>
    %116 = vector.extract_strided_slice %28 {offsets = [0, 168], sizes = [8, 8], strides = [1, 1]} : vector<8x192xf32> to vector<8x8xf32>
    %cst_40 = arith.constant dense<0.000000e+00> : vector<8x8xf32>
    %117 = tpu.matmul %114, %115, %cst_40 {dimension_numbers = #tpu.dot_dimension_numbers<[1], [1], [0], [0], [0, 0, 1, 0], [], []>} : vector<8x8xf32>, vector<8x8xf32>, vector<8x8xf32> -> vector<8x8xf32>
    %cst_41 = arith.constant 0.353553385 : f32
    %118 = vector.broadcast %cst_41 : f32 to vector<8x8xf32>
    %119 = arith.mulf %117, %118 : vector<8x8xf32>
    %cst_42 = arith.constant dense<0xFF800000> : vector<8xf32>
    %120 = vector.multi_reduction <maximumf>, %119, %cst_42 [1] : vector<8x8xf32> to vector<8xf32>
    %121 = vector.shape_cast %120 : vector<8xf32> to vector<8x1xf32>
    %122 = vector.broadcast %121 : vector<8x1xf32> to vector<8x8xf32>
    %123 = arith.subf %119, %122 : vector<8x8xf32>
    %124 = math.exp %123 : vector<8x8xf32>
    %cst_43 = arith.constant dense<0.000000e+00> : vector<8xf32>
    %125 = vector.multi_reduction <add>, %124, %cst_43 [1] : vector<8x8xf32> to vector<8xf32>
    %126 = vector.shape_cast %125 : vector<8xf32> to vector<8x1xf32>
    %127 = tpu.reciprocal %126 {approx = true} : vector<8x1xf32> -> vector<8x1xf32>
    %128 = vector.broadcast %127 : vector<8x1xf32> to vector<8x8xf32>
    %129 = arith.mulf %124, %128 : vector<8x8xf32>
    %cst_44 = arith.constant dense<0.000000e+00> : vector<8x8xf32>
    %130 = tpu.matmul %129, %116, %cst_44 {dimension_numbers = #tpu.dot_dimension_numbers<[1], [0], [0], [1], [0, 0, 1, 1], [], []>} : vector<8x8xf32>, vector<8x8xf32>, vector<8x8xf32> -> vector<8x8xf32>
    %131 = vector.extract_strided_slice %28 {offsets = [0, 48], sizes = [8, 8], strides = [1, 1]} : vector<8x192xf32> to vector<8x8xf32>
    %132 = vector.extract_strided_slice %28 {offsets = [0, 112], sizes = [8, 8], strides = [1, 1]} : vector<8x192xf32> to vector<8x8xf32>
    %133 = vector.extract_strided_slice %28 {offsets = [0, 176], sizes = [8, 8], strides = [1, 1]} : vector<8x192xf32> to vector<8x8xf32>
    %cst_45 = arith.constant dense<0.000000e+00> : vector<8x8xf32>
    %134 = tpu.matmul %131, %132, %cst_45 {dimension_numbers = #tpu.dot_dimension_numbers<[1], [1], [0], [0], [0, 0, 1, 0], [], []>} : vector<8x8xf32>, vector<8x8xf32>, vector<8x8xf32> -> vector<8x8xf32>
    %cst_46 = arith.constant 0.353553385 : f32
    %135 = vector.broadcast %cst_46 : f32 to vector<8x8xf32>
    %136 = arith.mulf %134, %135 : vector<8x8xf32>
    %cst_47 = arith.constant dense<0xFF800000> : vector<8xf32>
    %137 = vector.multi_reduction <maximumf>, %136, %cst_47 [1] : vector<8x8xf32> to vector<8xf32>
    %138 = vector.shape_cast %137 : vector<8xf32> to vector<8x1xf32>
    %139 = vector.broadcast %138 : vector<8x1xf32> to vector<8x8xf32>
    %140 = arith.subf %136, %139 : vector<8x8xf32>
    %141 = math.exp %140 : vector<8x8xf32>
    %cst_48 = arith.constant dense<0.000000e+00> : vector<8xf32>
    %142 = vector.multi_reduction <add>, %141, %cst_48 [1] : vector<8x8xf32> to vector<8xf32>
    %143 = vector.shape_cast %142 : vector<8xf32> to vector<8x1xf32>
    %144 = tpu.reciprocal %143 {approx = true} : vector<8x1xf32> -> vector<8x1xf32>
    %145 = vector.broadcast %144 : vector<8x1xf32> to vector<8x8xf32>
    %146 = arith.mulf %141, %145 : vector<8x8xf32>
    %cst_49 = arith.constant dense<0.000000e+00> : vector<8x8xf32>
    %147 = tpu.matmul %146, %133, %cst_49 {dimension_numbers = #tpu.dot_dimension_numbers<[1], [0], [0], [1], [0, 0, 1, 1], [], []>} : vector<8x8xf32>, vector<8x8xf32>, vector<8x8xf32> -> vector<8x8xf32>
    %148 = vector.extract_strided_slice %28 {offsets = [0, 56], sizes = [8, 8], strides = [1, 1]} : vector<8x192xf32> to vector<8x8xf32>
    %149 = vector.extract_strided_slice %28 {offsets = [0, 120], sizes = [8, 8], strides = [1, 1]} : vector<8x192xf32> to vector<8x8xf32>
    %150 = vector.extract_strided_slice %28 {offsets = [0, 184], sizes = [8, 8], strides = [1, 1]} : vector<8x192xf32> to vector<8x8xf32>
    %cst_50 = arith.constant dense<0.000000e+00> : vector<8x8xf32>
    %151 = tpu.matmul %148, %149, %cst_50 {dimension_numbers = #tpu.dot_dimension_numbers<[1], [1], [0], [0], [0, 0, 1, 0], [], []>} : vector<8x8xf32>, vector<8x8xf32>, vector<8x8xf32> -> vector<8x8xf32>
    %cst_51 = arith.constant 0.353553385 : f32
    %152 = vector.broadcast %cst_51 : f32 to vector<8x8xf32>
    %153 = arith.mulf %151, %152 : vector<8x8xf32>
    %cst_52 = arith.constant dense<0xFF800000> : vector<8xf32>
    %154 = vector.multi_reduction <maximumf>, %153, %cst_52 [1] : vector<8x8xf32> to vector<8xf32>
    %155 = vector.shape_cast %154 : vector<8xf32> to vector<8x1xf32>
    %156 = vector.broadcast %155 : vector<8x1xf32> to vector<8x8xf32>
    %157 = arith.subf %153, %156 : vector<8x8xf32>
    %158 = math.exp %157 : vector<8x8xf32>
    %cst_53 = arith.constant dense<0.000000e+00> : vector<8xf32>
    %159 = vector.multi_reduction <add>, %158, %cst_53 [1] : vector<8x8xf32> to vector<8xf32>
    %160 = vector.shape_cast %159 : vector<8xf32> to vector<8x1xf32>
    %161 = tpu.reciprocal %160 {approx = true} : vector<8x1xf32> -> vector<8x1xf32>
    %162 = vector.broadcast %161 : vector<8x1xf32> to vector<8x8xf32>
    %163 = arith.mulf %158, %162 : vector<8x8xf32>
    %cst_54 = arith.constant dense<0.000000e+00> : vector<8x8xf32>
    %164 = tpu.matmul %163, %150, %cst_54 {dimension_numbers = #tpu.dot_dimension_numbers<[1], [0], [0], [1], [0, 0, 1, 1], [], []>} : vector<8x8xf32>, vector<8x8xf32>, vector<8x8xf32> -> vector<8x8xf32>
    %165 = tpu.concatenate %45, %62, %79, %96, %113, %130, %147, %164 in 1 : vector<8x8xf32>, vector<8x8xf32>, vector<8x8xf32>, vector<8x8xf32>, vector<8x8xf32>, vector<8x8xf32>, vector<8x8xf32>, vector<8x8xf32> -> vector<8x64xf32>
    %c0_55 = arith.constant 0 : index
    %c0_56 = arith.constant 0 : index
    %166 = vector.load %arg6[%c0_55, %c0_56] : memref<64x64xf32, #tpu.memory_space<vmem>>, vector<64x64xf32>
    %cst_57 = arith.constant dense<0.000000e+00> : vector<8x64xf32>
    %167 = tpu.matmul %165, %166, %cst_57 {dimension_numbers = #tpu.dot_dimension_numbers<[1], [0], [0], [1], [0, 0, 1, 1], [], []>} : vector<8x64xf32>, vector<64x64xf32>, vector<8x64xf32> -> vector<8x64xf32>
    %c0_58 = arith.constant 0 : index
    %c0_59 = arith.constant 0 : index
    %168 = vector.load %arg7[%c0_58, %c0_59] : memref<1x64xf32, #tpu.memory_space<vmem>>, vector<1x64xf32>
    %169 = vector.broadcast %168 : vector<1x64xf32> to vector<8x64xf32>
    %170 = arith.addf %167, %169 : vector<8x64xf32>
    %171 = arith.addf %170, %1 : vector<8x64xf32>
    %c0_60 = arith.constant 0 : index
    %c0_61 = arith.constant 0 : index
    %172 = vector.load %arg8[%c0_60, %c0_61] : memref<1x64xf32, #tpu.memory_space<vmem>>, vector<1x64xf32>
    %c0_62 = arith.constant 0 : index
    %c0_63 = arith.constant 0 : index
    %173 = vector.load %arg9[%c0_62, %c0_63] : memref<1x64xf32, #tpu.memory_space<vmem>>, vector<1x64xf32>
    %cst_64 = arith.constant dense<0.000000e+00> : vector<8xf32>
    %174 = vector.multi_reduction <add>, %171, %cst_64 [1] : vector<8x64xf32> to vector<8xf32>
    %175 = vector.shape_cast %174 : vector<8xf32> to vector<8x1xf32>
    %cst_65 = arith.constant 6.400000e+01 : f32
    %176 = vector.broadcast %cst_65 : f32 to vector<8x1xf32>
    %177 = arith.divf %175, %176 : vector<8x1xf32>
    %178 = vector.broadcast %177 : vector<8x1xf32> to vector<8x64xf32>
    %179 = arith.subf %171, %178 : vector<8x64xf32>
    %180 = arith.mulf %179, %179 : vector<8x64xf32>
    %cst_66 = arith.constant dense<0.000000e+00> : vector<8xf32>
    %181 = vector.multi_reduction <add>, %180, %cst_66 [1] : vector<8x64xf32> to vector<8xf32>
    %182 = vector.shape_cast %181 : vector<8xf32> to vector<8x1xf32>
    %cst_67 = arith.constant 6.400000e+01 : f32
    %183 = vector.broadcast %cst_67 : f32 to vector<8x1xf32>
    %184 = arith.divf %182, %183 : vector<8x1xf32>
    %cst_68 = arith.constant 9.99999974E-6 : f32
    %185 = vector.broadcast %cst_68 : f32 to vector<8x1xf32>
    %186 = arith.addf %184, %185 : vector<8x1xf32>
    %187 = math.rsqrt %186 : vector<8x1xf32>
    %188 = vector.broadcast %187 : vector<8x1xf32> to vector<8x64xf32>
    %189 = arith.mulf %179, %188 : vector<8x64xf32>
    %190 = vector.broadcast %172 : vector<1x64xf32> to vector<8x64xf32>
    %191 = arith.mulf %189, %190 : vector<8x64xf32>
    %192 = vector.broadcast %173 : vector<1x64xf32> to vector<8x64xf32>
    %193 = arith.addf %191, %192 : vector<8x64xf32>
    %c0_69 = arith.constant 0 : index
    %c0_70 = arith.constant 0 : index
    %194 = vector.load %arg10[%c0_69, %c0_70] : memref<64x256xf32, #tpu.memory_space<vmem>>, vector<64x256xf32>
    %cst_71 = arith.constant dense<0.000000e+00> : vector<8x256xf32>
    %195 = tpu.matmul %193, %194, %cst_71 {dimension_numbers = #tpu.dot_dimension_numbers<[1], [0], [0], [1], [0, 0, 1, 1], [], []>} : vector<8x64xf32>, vector<64x256xf32>, vector<8x256xf32> -> vector<8x256xf32>
    %c0_72 = arith.constant 0 : index
    %c0_73 = arith.constant 0 : index
    %196 = vector.load %arg11[%c0_72, %c0_73] : memref<1x256xf32, #tpu.memory_space<vmem>>, vector<1x256xf32>
    %197 = vector.broadcast %196 : vector<1x256xf32> to vector<8x256xf32>
    %198 = arith.addf %195, %197 : vector<8x256xf32>
    %cst_74 = arith.constant 5.000000e-01 : f32
    %199 = vector.broadcast %cst_74 : f32 to vector<8x256xf32>
    %200 = arith.mulf %199, %198 : vector<8x256xf32>
    %cst_75 = arith.constant 1.41421354 : f32
    %201 = vector.broadcast %cst_75 : f32 to vector<8x256xf32>
    %202 = arith.divf %198, %201 : vector<8x256xf32>
    %cst_76 = arith.constant 0.000000e+00 : f32
    %203 = vector.broadcast %cst_76 : f32 to vector<8x256xf32>
    %204 = arith.cmpf oge, %202, %203 : vector<8x256xf32>
    %cst_77 = arith.constant 1.000000e+00 : f32
    %cst_78 = arith.constant -1.000000e+00 : f32
    %205 = vector.broadcast %cst_77 : f32 to vector<8x256xf32>
    %206 = vector.broadcast %cst_78 : f32 to vector<8x256xf32>
    %207 = arith.select %204, %205, %206 : vector<8x256xi1>, vector<8x256xf32>
    %208 = math.absf %202 : vector<8x256xf32>
    %cst_79 = arith.constant 0.327591091 : f32
    %209 = vector.broadcast %cst_79 : f32 to vector<8x256xf32>
    %210 = arith.mulf %209, %208 : vector<8x256xf32>
    %cst_80 = arith.constant 1.000000e+00 : f32
    %211 = vector.broadcast %cst_80 : f32 to vector<8x256xf32>
    %212 = arith.addf %211, %210 : vector<8x256xf32>
    %cst_81 = arith.constant 1.000000e+00 : f32
    %213 = vector.broadcast %cst_81 : f32 to vector<8x256xf32>
    %214 = arith.divf %213, %212 : vector<8x256xf32>
    %cst_82 = arith.constant 1.06140542 : f32
    %215 = vector.broadcast %cst_82 : f32 to vector<8x256xf32>
    %216 = arith.mulf %215, %214 : vector<8x256xf32>
    %cst_83 = arith.constant -1.45315206 : f32
    %217 = vector.broadcast %cst_83 : f32 to vector<8x256xf32>
    %218 = arith.addf %216, %217 : vector<8x256xf32>
    %219 = arith.mulf %218, %214 : vector<8x256xf32>
    %cst_84 = arith.constant 1.42141378 : f32
    %220 = vector.broadcast %cst_84 : f32 to vector<8x256xf32>
    %221 = arith.addf %219, %220 : vector<8x256xf32>
    %222 = arith.mulf %221, %214 : vector<8x256xf32>
    %cst_85 = arith.constant -0.284496725 : f32
    %223 = vector.broadcast %cst_85 : f32 to vector<8x256xf32>
    %224 = arith.addf %222, %223 : vector<8x256xf32>
    %225 = arith.mulf %224, %214 : vector<8x256xf32>
    %cst_86 = arith.constant 0.254829586 : f32
    %226 = vector.broadcast %cst_86 : f32 to vector<8x256xf32>
    %227 = arith.addf %225, %226 : vector<8x256xf32>
    %228 = arith.mulf %227, %214 : vector<8x256xf32>
    %cst_87 = arith.constant 0.000000e+00 : f32
    %229 = vector.broadcast %cst_87 : f32 to vector<8x256xf32>
    %230 = arith.subf %229, %208 : vector<8x256xf32>
    %231 = arith.mulf %230, %208 : vector<8x256xf32>
    %232 = math.exp %231 : vector<8x256xf32>
    %233 = arith.mulf %228, %232 : vector<8x256xf32>
    %cst_88 = arith.constant 1.000000e+00 : f32
    %234 = vector.broadcast %cst_88 : f32 to vector<8x256xf32>
    %235 = arith.subf %234, %233 : vector<8x256xf32>
    %236 = arith.mulf %207, %235 : vector<8x256xf32>
    %cst_89 = arith.constant 1.000000e+00 : f32
    %237 = vector.broadcast %cst_89 : f32 to vector<8x256xf32>
    %238 = arith.addf %237, %236 : vector<8x256xf32>
    %239 = arith.mulf %200, %238 : vector<8x256xf32>
    %c0_90 = arith.constant 0 : index
    %c0_91 = arith.constant 0 : index
    %240 = vector.load %arg12[%c0_90, %c0_91] : memref<256x64xf32, #tpu.memory_space<vmem>>, vector<256x64xf32>
    %cst_92 = arith.constant dense<0.000000e+00> : vector<8x64xf32>
    %241 = tpu.matmul %239, %240, %cst_92 {dimension_numbers = #tpu.dot_dimension_numbers<[1], [0], [0], [1], [0, 0, 1, 1], [], []>} : vector<8x256xf32>, vector<256x64xf32>, vector<8x64xf32> -> vector<8x64xf32>
    %c0_93 = arith.constant 0 : index
    %c0_94 = arith.constant 0 : index
    %242 = vector.load %arg13[%c0_93, %c0_94] : memref<1x64xf32, #tpu.memory_space<vmem>>, vector<1x64xf32>
    %243 = vector.broadcast %242 : vector<1x64xf32> to vector<8x64xf32>
    %244 = arith.addf %241, %243 : vector<8x64xf32>
    %245 = arith.addf %244, %171 : vector<8x64xf32>
    %c0_95 = arith.constant 0 : index
    %c0_96 = arith.constant 0 : index
    %c0_97 = arith.constant 0 : index
    %246 = vector.load %arg14[%c0_95, %c0_96, %c0_97] : memref<1x8x64xf32, #tpu.memory_space<vmem>>, vector<1x8x64xf32>
    %247 = vector.shape_cast %246 : vector<1x8x64xf32> to vector<8x64xf32>
    %248 = vector.shape_cast %245 : vector<8x64xf32> to vector<1x8x64xf32>
    tpu.vector_store %arg14[%c0_95, %c0_96, %c0_97], %248 {strides = array<i32>} : memref<1x8x64xf32, #tpu.memory_space<vmem>>, vector<1x8x64xf32>,
    return
  }
  func.func @transform_0(%arg0: i32) -> (i32, i32, i32) {
    %c0_i32 = arith.constant 0 : i32
    %c0_i32_0 = arith.constant 0 : i32
    %c0_i32_1 = arith.constant 0 : i32
    return %arg0, %c0_i32, %c0_i32_0 : i32, i32, i32
  }
  func.func @transform_1(%arg0: i32) -> (i32, i32) {
    %c0_i32 = arith.constant 0 : i32
    %c0_i32_0 = arith.constant 0 : i32
    %c0_i32_1 = arith.constant 0 : i32
    return %c0_i32, %c0_i32_0 : i32, i32
  }
  func.func @transform_2(%arg0: i32) -> (i32, i32) {
    %c0_i32 = arith.constant 0 : i32
    %c0_i32_0 = arith.constant 0 : i32
    %c0_i32_1 = arith.constant 0 : i32
    return %c0_i32, %c0_i32_0 : i32, i32
  }
  func.func @transform_3(%arg0: i32) -> (i32, i32) {
    %c0_i32 = arith.constant 0 : i32
    %c0_i32_0 = arith.constant 0 : i32
    %c0_i32_1 = arith.constant 0 : i32
    return %c0_i32, %c0_i32_0 : i32, i32
  }
  func.func @transform_4(%arg0: i32) -> (i32, i32) {
    %c0_i32 = arith.constant 0 : i32
    %c0_i32_0 = arith.constant 0 : i32
    %c0_i32_1 = arith.constant 0 : i32
    return %c0_i32, %c0_i32_0 : i32, i32
  }
  func.func @transform_5(%arg0: i32) -> (i32, i32) {
    %c0_i32 = arith.constant 0 : i32
    %c0_i32_0 = arith.constant 0 : i32
    %c0_i32_1 = arith.constant 0 : i32
    return %c0_i32, %c0_i32_0 : i32, i32
  }
  func.func @transform_6(%arg0: i32) -> (i32, i32) {
    %c0_i32 = arith.constant 0 : i32
    %c0_i32_0 = arith.constant 0 : i32
    %c0_i32_1 = arith.constant 0 : i32
    return %c0_i32, %c0_i32_0 : i32, i32
  }
  func.func @transform_7(%arg0: i32) -> (i32, i32) {
    %c0_i32 = arith.constant 0 : i32
    %c0_i32_0 = arith.constant 0 : i32
    %c0_i32_1 = arith.constant 0 : i32
    return %c0_i32, %c0_i32_0 : i32, i32
  }
  func.func @transform_8(%arg0: i32) -> (i32, i32) {
    %c0_i32 = arith.constant 0 : i32
    %c0_i32_0 = arith.constant 0 : i32
    %c0_i32_1 = arith.constant 0 : i32
    return %c0_i32, %c0_i32_0 : i32, i32
  }
  func.func @transform_9(%arg0: i32) -> (i32, i32) {
    %c0_i32 = arith.constant 0 : i32
    %c0_i32_0 = arith.constant 0 : i32
    %c0_i32_1 = arith.constant 0 : i32
    return %c0_i32, %c0_i32_0 : i32, i32
  }
  func.func @transform_10(%arg0: i32) -> (i32, i32) {
    %c0_i32 = arith.constant 0 : i32
    %c0_i32_0 = arith.constant 0 : i32
    %c0_i32_1 = arith.constant 0 : i32
    return %c0_i32, %c0_i32_0 : i32, i32
  }
  func.func @transform_11(%arg0: i32) -> (i32, i32) {
    %c0_i32 = arith.constant 0 : i32
    %c0_i32_0 = arith.constant 0 : i32
    %c0_i32_1 = arith.constant 0 : i32
    return %c0_i32, %c0_i32_0 : i32, i32
  }
  func.func @transform_12(%arg0: i32) -> (i32, i32) {
    %c0_i32 = arith.constant 0 : i32
    %c0_i32_0 = arith.constant 0 : i32
    %c0_i32_1 = arith.constant 0 : i32
    return %c0_i32, %c0_i32_0 : i32, i32
  }
  func.func @transform_13(%arg0: i32) -> (i32, i32, i32) {
    %c0_i32 = arith.constant 0 : i32
    %c0_i32_0 = arith.constant 0 : i32
    %c0_i32_1 = arith.constant 0 : i32
    return %arg0, %c0_i32, %c0_i32_0 : i32, i32, i32
  }
}

module attributes {stable_mosaic.version = 11 : i64} {
  func.func @kernel(%arg0: i32, %arg1: memref<1x5x64xf32, #tpu.memory_space<vmem>>, %arg2: memref<1x5x64xf32, #tpu.memory_space<vmem>>, %arg3: memref<3x64x128xf32, #tpu.memory_space<vmem>>, %arg4: memref<1x128xf32, #tpu.memory_space<vmem>>, %arg5: memref<1x4x128xf32, #tpu.memory_space<vmem>>) attributes {dimension_semantics = [#tpu.dimension_semantics<parallel>], iteration_bounds = array<i64: 2>, scalar_prefetch = 0 : i64, scratch_operands = 0 : i64, tpu.core_type = #tpu.core_type<tc>, window_params = [{transform_indices = @transform_0, window_bounds = array<i64: 1, 5, 64>}, {transform_indices = @transform_1, window_bounds = array<i64: 1, 5, 64>}, {pipeline_mode = #tpu.pipeline_mode<synchronous>, transform_indices = @transform_2, window_bounds = array<i64: 3, 64, 128>}, {pipeline_mode = #tpu.pipeline_mode<synchronous>, transform_indices = @transform_3, window_bounds = array<i64: 1, 128>}, {transform_indices = @transform_4, window_bounds = array<i64: 1, 4, 128>}]} {
    %c0 = arith.constant 0 : index
    %c0_0 = arith.constant 0 : index
    %c0_1 = arith.constant 0 : index
    %0 = vector.load %arg1[%c0, %c0_0, %c0_1] : memref<1x5x64xf32, #tpu.memory_space<vmem>>, vector<1x5x64xf32>
    %1 = vector.shape_cast %0 : vector<1x5x64xf32> to vector<5x64xf32>
    %c0_2 = arith.constant 0 : index
    %c0_3 = arith.constant 0 : index
    %c0_4 = arith.constant 0 : index
    %2 = vector.load %arg2[%c0_2, %c0_3, %c0_4] : memref<1x5x64xf32, #tpu.memory_space<vmem>>, vector<1x5x64xf32>
    %3 = vector.shape_cast %2 : vector<1x5x64xf32> to vector<5x64xf32>
    %c0_5 = arith.constant 0 : index
    %c0_6 = arith.constant 0 : index
    %c0_7 = arith.constant 0 : index
    %4 = vector.load %arg3[%c0_5, %c0_6, %c0_7] : memref<3x64x128xf32, #tpu.memory_space<vmem>>, vector<1x64x128xf32>
    %5 = vector.shape_cast %4 : vector<1x64x128xf32> to vector<64x128xf32>
    %c1 = arith.constant 1 : index
    %c0_8 = arith.constant 0 : index
    %c0_9 = arith.constant 0 : index
    %6 = vector.load %arg3[%c1, %c0_8, %c0_9] : memref<3x64x128xf32, #tpu.memory_space<vmem>>, vector<1x64x128xf32>
    %7 = vector.shape_cast %6 : vector<1x64x128xf32> to vector<64x128xf32>
    %c2 = arith.constant 2 : index
    %c0_10 = arith.constant 0 : index
    %c0_11 = arith.constant 0 : index
    %8 = vector.load %arg3[%c2, %c0_10, %c0_11] : memref<3x64x128xf32, #tpu.memory_space<vmem>>, vector<1x64x128xf32>
    %9 = vector.shape_cast %8 : vector<1x64x128xf32> to vector<64x128xf32>
    %c0_12 = arith.constant 0 : index
    %c0_13 = arith.constant 0 : index
    %10 = vector.load %arg4[%c0_12, %c0_13] : memref<1x128xf32, #tpu.memory_space<vmem>>, vector<1x128xf32>
    %11 = vector.extract_strided_slice %1 {offsets = [0, 0], sizes = [4, 64], strides = [1, 1]} : vector<5x64xf32> to vector<4x64xf32>
    %12 = vector.extract_strided_slice %3 {offsets = [0, 0], sizes = [4, 64], strides = [1, 1]} : vector<5x64xf32> to vector<4x64xf32>
    %13 = vector.extract_strided_slice %1 {offsets = [1, 0], sizes = [4, 64], strides = [1, 1]} : vector<5x64xf32> to vector<4x64xf32>
    %14 = vector.extract_strided_slice %3 {offsets = [1, 0], sizes = [4, 64], strides = [1, 1]} : vector<5x64xf32> to vector<4x64xf32>
    %cst = arith.constant dense<0.000000e+00> : vector<4x128xf32>
    %15 = tpu.matmul %11, %5, %cst {dimension_numbers = #tpu.dot_dimension_numbers<[1], [0], [0], [1], [0, 0, 1, 1], [], []>} : vector<4x64xf32>, vector<64x128xf32>, vector<4x128xf32> -> vector<4x128xf32>
    %cst_14 = arith.constant dense<0.000000e+00> : vector<4x128xf32>
    %16 = tpu.matmul %12, %7, %cst_14 {dimension_numbers = #tpu.dot_dimension_numbers<[1], [0], [0], [1], [0, 0, 1, 1], [], []>} : vector<4x64xf32>, vector<64x128xf32>, vector<4x128xf32> -> vector<4x128xf32>
    %17 = arith.addf %15, %16 : vector<4x128xf32>
    %cst_15 = arith.constant dense<0.000000e+00> : vector<4x128xf32>
    %18 = tpu.matmul %13, %9, %cst_15 {dimension_numbers = #tpu.dot_dimension_numbers<[1], [0], [0], [1], [0, 0, 1, 1], [], []>} : vector<4x64xf32>, vector<64x128xf32>, vector<4x128xf32> -> vector<4x128xf32>
    %19 = arith.addf %17, %18 : vector<4x128xf32>
    %20 = vector.broadcast %10 : vector<1x128xf32> to vector<4x128xf32>
    %21 = arith.addf %19, %20 : vector<4x128xf32>
    %cst_16 = arith.constant dense<0.000000e+00> : vector<4x128xf32>
    %22 = tpu.matmul %12, %5, %cst_16 {dimension_numbers = #tpu.dot_dimension_numbers<[1], [0], [0], [1], [0, 0, 1, 1], [], []>} : vector<4x64xf32>, vector<64x128xf32>, vector<4x128xf32> -> vector<4x128xf32>
    %cst_17 = arith.constant dense<0.000000e+00> : vector<4x128xf32>
    %23 = tpu.matmul %13, %7, %cst_17 {dimension_numbers = #tpu.dot_dimension_numbers<[1], [0], [0], [1], [0, 0, 1, 1], [], []>} : vector<4x64xf32>, vector<64x128xf32>, vector<4x128xf32> -> vector<4x128xf32>
    %24 = arith.addf %22, %23 : vector<4x128xf32>
    %cst_18 = arith.constant dense<0.000000e+00> : vector<4x128xf32>
    %25 = tpu.matmul %14, %9, %cst_18 {dimension_numbers = #tpu.dot_dimension_numbers<[1], [0], [0], [1], [0, 0, 1, 1], [], []>} : vector<4x64xf32>, vector<64x128xf32>, vector<4x128xf32> -> vector<4x128xf32>
    %26 = arith.addf %24, %25 : vector<4x128xf32>
    %27 = vector.broadcast %10 : vector<1x128xf32> to vector<4x128xf32>
    %28 = arith.addf %26, %27 : vector<4x128xf32>
    %cst_19 = arith.constant 0.000000e+00 : f32
    %29 = vector.broadcast %cst_19 : f32 to vector<4x128xf32>
    %30 = arith.subf %29, %21 : vector<4x128xf32>
    %31 = math.exp %30 : vector<4x128xf32>
    %cst_20 = arith.constant 1.000000e+00 : f32
    %32 = vector.broadcast %cst_20 : f32 to vector<4x128xf32>
    %33 = arith.addf %32, %31 : vector<4x128xf32>
    %cst_21 = arith.constant 1.000000e+00 : f32
    %34 = vector.broadcast %cst_21 : f32 to vector<4x128xf32>
    %35 = arith.divf %34, %33 : vector<4x128xf32>
    %36 = arith.mulf %21, %35 : vector<4x128xf32>
    %cst_22 = arith.constant 0.000000e+00 : f32
    %37 = vector.broadcast %cst_22 : f32 to vector<4x128xf32>
    %38 = arith.subf %37, %28 : vector<4x128xf32>
    %39 = math.exp %38 : vector<4x128xf32>
    %cst_23 = arith.constant 1.000000e+00 : f32
    %40 = vector.broadcast %cst_23 : f32 to vector<4x128xf32>
    %41 = arith.addf %40, %39 : vector<4x128xf32>
    %cst_24 = arith.constant 1.000000e+00 : f32
    %42 = vector.broadcast %cst_24 : f32 to vector<4x128xf32>
    %43 = arith.divf %42, %41 : vector<4x128xf32>
    %44 = arith.mulf %28, %43 : vector<4x128xf32>
    %45 = arith.maximumf %36, %44 : vector<4x128xf32>
    %c0_25 = arith.constant 0 : index
    %c0_26 = arith.constant 0 : index
    %c0_27 = arith.constant 0 : index
    %46 = vector.load %arg5[%c0_25, %c0_26, %c0_27] : memref<1x4x128xf32, #tpu.memory_space<vmem>>, vector<1x4x128xf32>
    %47 = vector.shape_cast %46 : vector<1x4x128xf32> to vector<4x128xf32>
    %48 = vector.shape_cast %45 : vector<4x128xf32> to vector<1x4x128xf32>
    tpu.vector_store %arg5[%c0_25, %c0_26, %c0_27], %48 {strides = array<i32>} : memref<1x4x128xf32, #tpu.memory_space<vmem>>, vector<1x4x128xf32>,
    return
  }
  func.func @transform_0(%arg0: i32) -> (i32, i32, i32) {
    %c0_i32 = arith.constant 0 : i32
    %c0_i32_0 = arith.constant 0 : i32
    %c0_i32_1 = arith.constant 0 : i32
    return %arg0, %c0_i32, %c0_i32_0 : i32, i32, i32
  }
  func.func @transform_1(%arg0: i32) -> (i32, i32, i32) {
    %c0_i32 = arith.constant 0 : i32
    %c0_i32_0 = arith.constant 0 : i32
    %c0_i32_1 = arith.constant 0 : i32
    return %arg0, %c0_i32, %c0_i32_0 : i32, i32, i32
  }
  func.func @transform_2(%arg0: i32) -> (i32, i32, i32) {
    %c0_i32 = arith.constant 0 : i32
    %c0_i32_0 = arith.constant 0 : i32
    %c0_i32_1 = arith.constant 0 : i32
    %c0_i32_2 = arith.constant 0 : i32
    return %c0_i32, %c0_i32_0, %c0_i32_1 : i32, i32, i32
  }
  func.func @transform_3(%arg0: i32) -> (i32, i32) {
    %c0_i32 = arith.constant 0 : i32
    %c0_i32_0 = arith.constant 0 : i32
    %c0_i32_1 = arith.constant 0 : i32
    return %c0_i32, %c0_i32_0 : i32, i32
  }
  func.func @transform_4(%arg0: i32) -> (i32, i32, i32) {
    %c0_i32 = arith.constant 0 : i32
    %c0_i32_0 = arith.constant 0 : i32
    %c0_i32_1 = arith.constant 0 : i32
    return %arg0, %c0_i32, %c0_i32_0 : i32, i32, i32
  }
}

module attributes {stable_mosaic.version = 11 : i64} {
  func.func @kernel(%arg0: i32, %arg1: memref<1x4x128xf32, #tpu.memory_space<vmem>>, %arg2: memref<1x128xf32, #tpu.memory_space<vmem>>, %arg3: memref<1x128xf32, #tpu.memory_space<vmem>>, %arg4: memref<128x384xf32, #tpu.memory_space<vmem>>, %arg5: memref<1x384xf32, #tpu.memory_space<vmem>>, %arg6: memref<128x128xf32, #tpu.memory_space<vmem>>, %arg7: memref<1x128xf32, #tpu.memory_space<vmem>>, %arg8: memref<1x128xf32, #tpu.memory_space<vmem>>, %arg9: memref<1x128xf32, #tpu.memory_space<vmem>>, %arg10: memref<128x512xf32, #tpu.memory_space<vmem>>, %arg11: memref<1x512xf32, #tpu.memory_space<vmem>>, %arg12: memref<512x128xf32, #tpu.memory_space<vmem>>, %arg13: memref<1x128xf32, #tpu.memory_space<vmem>>, %arg14: memref<1x4x128xf32, #tpu.memory_space<vmem>>) attributes {dimension_semantics = [#tpu.dimension_semantics<parallel>], iteration_bounds = array<i64: 2>, scalar_prefetch = 0 : i64, scratch_operands = 0 : i64, tpu.core_type = #tpu.core_type<tc>, window_params = [{transform_indices = @transform_0, window_bounds = array<i64: 1, 4, 128>}, {pipeline_mode = #tpu.pipeline_mode<synchronous>, transform_indices = @transform_1, window_bounds = array<i64: 1, 128>}, {pipeline_mode = #tpu.pipeline_mode<synchronous>, transform_indices = @transform_2, window_bounds = array<i64: 1, 128>}, {pipeline_mode = #tpu.pipeline_mode<synchronous>, transform_indices = @transform_3, window_bounds = array<i64: 128, 384>}, {pipeline_mode = #tpu.pipeline_mode<synchronous>, transform_indices = @transform_4, window_bounds = array<i64: 1, 384>}, {pipeline_mode = #tpu.pipeline_mode<synchronous>, transform_indices = @transform_5, window_bounds = array<i64: 128, 128>}, {pipeline_mode = #tpu.pipeline_mode<synchronous>, transform_indices = @transform_6, window_bounds = array<i64: 1, 128>}, {pipeline_mode = #tpu.pipeline_mode<synchronous>, transform_indices = @transform_7, window_bounds = array<i64: 1, 128>}, {pipeline_mode = #tpu.pipeline_mode<synchronous>, transform_indices = @transform_8, window_bounds = array<i64: 1, 128>}, {pipeline_mode = #tpu.pipeline_mode<synchronous>, transform_indices = @transform_9, window_bounds = array<i64: 128, 512>}, {pipeline_mode = #tpu.pipeline_mode<synchronous>, transform_indices = @transform_10, window_bounds = array<i64: 1, 512>}, {pipeline_mode = #tpu.pipeline_mode<synchronous>, transform_indices = @transform_11, window_bounds = array<i64: 512, 128>}, {pipeline_mode = #tpu.pipeline_mode<synchronous>, transform_indices = @transform_12, window_bounds = array<i64: 1, 128>}, {transform_indices = @transform_13, window_bounds = array<i64: 1, 4, 128>}]} {
    %c0 = arith.constant 0 : index
    %c0_0 = arith.constant 0 : index
    %c0_1 = arith.constant 0 : index
    %0 = vector.load %arg1[%c0, %c0_0, %c0_1] : memref<1x4x128xf32, #tpu.memory_space<vmem>>, vector<1x4x128xf32>
    %1 = vector.shape_cast %0 : vector<1x4x128xf32> to vector<4x128xf32>
    %c0_2 = arith.constant 0 : index
    %c0_3 = arith.constant 0 : index
    %2 = vector.load %arg2[%c0_2, %c0_3] : memref<1x128xf32, #tpu.memory_space<vmem>>, vector<1x128xf32>
    %c0_4 = arith.constant 0 : index
    %c0_5 = arith.constant 0 : index
    %3 = vector.load %arg3[%c0_4, %c0_5] : memref<1x128xf32, #tpu.memory_space<vmem>>, vector<1x128xf32>
    %cst = arith.constant dense<0.000000e+00> : vector<4xf32>
    %4 = vector.multi_reduction <add>, %1, %cst [1] : vector<4x128xf32> to vector<4xf32>
    %5 = vector.shape_cast %4 : vector<4xf32> to vector<4x1xf32>
    %cst_6 = arith.constant 1.280000e+02 : f32
    %6 = vector.broadcast %cst_6 : f32 to vector<4x1xf32>
    %7 = arith.divf %5, %6 : vector<4x1xf32>
    %8 = vector.broadcast %7 : vector<4x1xf32> to vector<4x128xf32>
    %9 = arith.subf %1, %8 : vector<4x128xf32>
    %10 = arith.mulf %9, %9 : vector<4x128xf32>
    %cst_7 = arith.constant dense<0.000000e+00> : vector<4xf32>
    %11 = vector.multi_reduction <add>, %10, %cst_7 [1] : vector<4x128xf32> to vector<4xf32>
    %12 = vector.shape_cast %11 : vector<4xf32> to vector<4x1xf32>
    %cst_8 = arith.constant 1.280000e+02 : f32
    %13 = vector.broadcast %cst_8 : f32 to vector<4x1xf32>
    %14 = arith.divf %12, %13 : vector<4x1xf32>
    %cst_9 = arith.constant 9.99999974E-6 : f32
    %15 = vector.broadcast %cst_9 : f32 to vector<4x1xf32>
    %16 = arith.addf %14, %15 : vector<4x1xf32>
    %17 = math.rsqrt %16 : vector<4x1xf32>
    %18 = vector.broadcast %17 : vector<4x1xf32> to vector<4x128xf32>
    %19 = arith.mulf %9, %18 : vector<4x128xf32>
    %20 = vector.broadcast %2 : vector<1x128xf32> to vector<4x128xf32>
    %21 = arith.mulf %19, %20 : vector<4x128xf32>
    %22 = vector.broadcast %3 : vector<1x128xf32> to vector<4x128xf32>
    %23 = arith.addf %21, %22 : vector<4x128xf32>
    %c0_10 = arith.constant 0 : index
    %c0_11 = arith.constant 0 : index
    %24 = vector.load %arg4[%c0_10, %c0_11] : memref<128x384xf32, #tpu.memory_space<vmem>>, vector<128x384xf32>
    %cst_12 = arith.constant dense<0.000000e+00> : vector<4x384xf32>
    %25 = tpu.matmul %23, %24, %cst_12 {dimension_numbers = #tpu.dot_dimension_numbers<[1], [0], [0], [1], [0, 0, 1, 1], [], []>} : vector<4x128xf32>, vector<128x384xf32>, vector<4x384xf32> -> vector<4x384xf32>
    %c0_13 = arith.constant 0 : index
    %c0_14 = arith.constant 0 : index
    %26 = vector.load %arg5[%c0_13, %c0_14] : memref<1x384xf32, #tpu.memory_space<vmem>>, vector<1x384xf32>
    %27 = vector.broadcast %26 : vector<1x384xf32> to vector<4x384xf32>
    %28 = arith.addf %25, %27 : vector<4x384xf32>
    %29 = vector.extract_strided_slice %28 {offsets = [0, 0], sizes = [4, 16], strides = [1, 1]} : vector<4x384xf32> to vector<4x16xf32>
    %30 = vector.extract_strided_slice %28 {offsets = [0, 128], sizes = [4, 16], strides = [1, 1]} : vector<4x384xf32> to vector<4x16xf32>
    %31 = vector.extract_strided_slice %28 {offsets = [0, 256], sizes = [4, 16], strides = [1, 1]} : vector<4x384xf32> to vector<4x16xf32>
    %cst_15 = arith.constant dense<0.000000e+00> : vector<4x4xf32>
    %32 = tpu.matmul %29, %30, %cst_15 {dimension_numbers = #tpu.dot_dimension_numbers<[1], [1], [0], [0], [0, 0, 1, 0], [], []>} : vector<4x16xf32>, vector<4x16xf32>, vector<4x4xf32> -> vector<4x4xf32>
    %cst_16 = arith.constant 2.500000e-01 : f32
    %33 = vector.broadcast %cst_16 : f32 to vector<4x4xf32>
    %34 = arith.mulf %32, %33 : vector<4x4xf32>
    %cst_17 = arith.constant dense<0xFF800000> : vector<4xf32>
    %35 = vector.multi_reduction <maximumf>, %34, %cst_17 [1] : vector<4x4xf32> to vector<4xf32>
    %36 = vector.shape_cast %35 : vector<4xf32> to vector<4x1xf32>
    %37 = vector.broadcast %36 : vector<4x1xf32> to vector<4x4xf32>
    %38 = arith.subf %34, %37 : vector<4x4xf32>
    %39 = math.exp %38 : vector<4x4xf32>
    %cst_18 = arith.constant dense<0.000000e+00> : vector<4xf32>
    %40 = vector.multi_reduction <add>, %39, %cst_18 [1] : vector<4x4xf32> to vector<4xf32>
    %41 = vector.shape_cast %40 : vector<4xf32> to vector<4x1xf32>
    %42 = tpu.reciprocal %41 {approx = true} : vector<4x1xf32> -> vector<4x1xf32>
    %43 = vector.broadcast %42 : vector<4x1xf32> to vector<4x4xf32>
    %44 = arith.mulf %39, %43 : vector<4x4xf32>
    %cst_19 = arith.constant dense<0.000000e+00> : vector<4x16xf32>
    %45 = tpu.matmul %44, %31, %cst_19 {dimension_numbers = #tpu.dot_dimension_numbers<[1], [0], [0], [1], [0, 0, 1, 1], [], []>} : vector<4x4xf32>, vector<4x16xf32>, vector<4x16xf32> -> vector<4x16xf32>
    %46 = vector.extract_strided_slice %28 {offsets = [0, 16], sizes = [4, 16], strides = [1, 1]} : vector<4x384xf32> to vector<4x16xf32>
    %47 = vector.extract_strided_slice %28 {offsets = [0, 144], sizes = [4, 16], strides = [1, 1]} : vector<4x384xf32> to vector<4x16xf32>
    %48 = vector.extract_strided_slice %28 {offsets = [0, 272], sizes = [4, 16], strides = [1, 1]} : vector<4x384xf32> to vector<4x16xf32>
    %cst_20 = arith.constant dense<0.000000e+00> : vector<4x4xf32>
    %49 = tpu.matmul %46, %47, %cst_20 {dimension_numbers = #tpu.dot_dimension_numbers<[1], [1], [0], [0], [0, 0, 1, 0], [], []>} : vector<4x16xf32>, vector<4x16xf32>, vector<4x4xf32> -> vector<4x4xf32>
    %cst_21 = arith.constant 2.500000e-01 : f32
    %50 = vector.broadcast %cst_21 : f32 to vector<4x4xf32>
    %51 = arith.mulf %49, %50 : vector<4x4xf32>
    %cst_22 = arith.constant dense<0xFF800000> : vector<4xf32>
    %52 = vector.multi_reduction <maximumf>, %51, %cst_22 [1] : vector<4x4xf32> to vector<4xf32>
    %53 = vector.shape_cast %52 : vector<4xf32> to vector<4x1xf32>
    %54 = vector.broadcast %53 : vector<4x1xf32> to vector<4x4xf32>
    %55 = arith.subf %51, %54 : vector<4x4xf32>
    %56 = math.exp %55 : vector<4x4xf32>
    %cst_23 = arith.constant dense<0.000000e+00> : vector<4xf32>
    %57 = vector.multi_reduction <add>, %56, %cst_23 [1] : vector<4x4xf32> to vector<4xf32>
    %58 = vector.shape_cast %57 : vector<4xf32> to vector<4x1xf32>
    %59 = tpu.reciprocal %58 {approx = true} : vector<4x1xf32> -> vector<4x1xf32>
    %60 = vector.broadcast %59 : vector<4x1xf32> to vector<4x4xf32>
    %61 = arith.mulf %56, %60 : vector<4x4xf32>
    %cst_24 = arith.constant dense<0.000000e+00> : vector<4x16xf32>
    %62 = tpu.matmul %61, %48, %cst_24 {dimension_numbers = #tpu.dot_dimension_numbers<[1], [0], [0], [1], [0, 0, 1, 1], [], []>} : vector<4x4xf32>, vector<4x16xf32>, vector<4x16xf32> -> vector<4x16xf32>
    %63 = vector.extract_strided_slice %28 {offsets = [0, 32], sizes = [4, 16], strides = [1, 1]} : vector<4x384xf32> to vector<4x16xf32>
    %64 = vector.extract_strided_slice %28 {offsets = [0, 160], sizes = [4, 16], strides = [1, 1]} : vector<4x384xf32> to vector<4x16xf32>
    %65 = vector.extract_strided_slice %28 {offsets = [0, 288], sizes = [4, 16], strides = [1, 1]} : vector<4x384xf32> to vector<4x16xf32>
    %cst_25 = arith.constant dense<0.000000e+00> : vector<4x4xf32>
    %66 = tpu.matmul %63, %64, %cst_25 {dimension_numbers = #tpu.dot_dimension_numbers<[1], [1], [0], [0], [0, 0, 1, 0], [], []>} : vector<4x16xf32>, vector<4x16xf32>, vector<4x4xf32> -> vector<4x4xf32>
    %cst_26 = arith.constant 2.500000e-01 : f32
    %67 = vector.broadcast %cst_26 : f32 to vector<4x4xf32>
    %68 = arith.mulf %66, %67 : vector<4x4xf32>
    %cst_27 = arith.constant dense<0xFF800000> : vector<4xf32>
    %69 = vector.multi_reduction <maximumf>, %68, %cst_27 [1] : vector<4x4xf32> to vector<4xf32>
    %70 = vector.shape_cast %69 : vector<4xf32> to vector<4x1xf32>
    %71 = vector.broadcast %70 : vector<4x1xf32> to vector<4x4xf32>
    %72 = arith.subf %68, %71 : vector<4x4xf32>
    %73 = math.exp %72 : vector<4x4xf32>
    %cst_28 = arith.constant dense<0.000000e+00> : vector<4xf32>
    %74 = vector.multi_reduction <add>, %73, %cst_28 [1] : vector<4x4xf32> to vector<4xf32>
    %75 = vector.shape_cast %74 : vector<4xf32> to vector<4x1xf32>
    %76 = tpu.reciprocal %75 {approx = true} : vector<4x1xf32> -> vector<4x1xf32>
    %77 = vector.broadcast %76 : vector<4x1xf32> to vector<4x4xf32>
    %78 = arith.mulf %73, %77 : vector<4x4xf32>
    %cst_29 = arith.constant dense<0.000000e+00> : vector<4x16xf32>
    %79 = tpu.matmul %78, %65, %cst_29 {dimension_numbers = #tpu.dot_dimension_numbers<[1], [0], [0], [1], [0, 0, 1, 1], [], []>} : vector<4x4xf32>, vector<4x16xf32>, vector<4x16xf32> -> vector<4x16xf32>
    %80 = vector.extract_strided_slice %28 {offsets = [0, 48], sizes = [4, 16], strides = [1, 1]} : vector<4x384xf32> to vector<4x16xf32>
    %81 = vector.extract_strided_slice %28 {offsets = [0, 176], sizes = [4, 16], strides = [1, 1]} : vector<4x384xf32> to vector<4x16xf32>
    %82 = vector.extract_strided_slice %28 {offsets = [0, 304], sizes = [4, 16], strides = [1, 1]} : vector<4x384xf32> to vector<4x16xf32>
    %cst_30 = arith.constant dense<0.000000e+00> : vector<4x4xf32>
    %83 = tpu.matmul %80, %81, %cst_30 {dimension_numbers = #tpu.dot_dimension_numbers<[1], [1], [0], [0], [0, 0, 1, 0], [], []>} : vector<4x16xf32>, vector<4x16xf32>, vector<4x4xf32> -> vector<4x4xf32>
    %cst_31 = arith.constant 2.500000e-01 : f32
    %84 = vector.broadcast %cst_31 : f32 to vector<4x4xf32>
    %85 = arith.mulf %83, %84 : vector<4x4xf32>
    %cst_32 = arith.constant dense<0xFF800000> : vector<4xf32>
    %86 = vector.multi_reduction <maximumf>, %85, %cst_32 [1] : vector<4x4xf32> to vector<4xf32>
    %87 = vector.shape_cast %86 : vector<4xf32> to vector<4x1xf32>
    %88 = vector.broadcast %87 : vector<4x1xf32> to vector<4x4xf32>
    %89 = arith.subf %85, %88 : vector<4x4xf32>
    %90 = math.exp %89 : vector<4x4xf32>
    %cst_33 = arith.constant dense<0.000000e+00> : vector<4xf32>
    %91 = vector.multi_reduction <add>, %90, %cst_33 [1] : vector<4x4xf32> to vector<4xf32>
    %92 = vector.shape_cast %91 : vector<4xf32> to vector<4x1xf32>
    %93 = tpu.reciprocal %92 {approx = true} : vector<4x1xf32> -> vector<4x1xf32>
    %94 = vector.broadcast %93 : vector<4x1xf32> to vector<4x4xf32>
    %95 = arith.mulf %90, %94 : vector<4x4xf32>
    %cst_34 = arith.constant dense<0.000000e+00> : vector<4x16xf32>
    %96 = tpu.matmul %95, %82, %cst_34 {dimension_numbers = #tpu.dot_dimension_numbers<[1], [0], [0], [1], [0, 0, 1, 1], [], []>} : vector<4x4xf32>, vector<4x16xf32>, vector<4x16xf32> -> vector<4x16xf32>
    %97 = vector.extract_strided_slice %28 {offsets = [0, 64], sizes = [4, 16], strides = [1, 1]} : vector<4x384xf32> to vector<4x16xf32>
    %98 = vector.extract_strided_slice %28 {offsets = [0, 192], sizes = [4, 16], strides = [1, 1]} : vector<4x384xf32> to vector<4x16xf32>
    %99 = vector.extract_strided_slice %28 {offsets = [0, 320], sizes = [4, 16], strides = [1, 1]} : vector<4x384xf32> to vector<4x16xf32>
    %cst_35 = arith.constant dense<0.000000e+00> : vector<4x4xf32>
    %100 = tpu.matmul %97, %98, %cst_35 {dimension_numbers = #tpu.dot_dimension_numbers<[1], [1], [0], [0], [0, 0, 1, 0], [], []>} : vector<4x16xf32>, vector<4x16xf32>, vector<4x4xf32> -> vector<4x4xf32>
    %cst_36 = arith.constant 2.500000e-01 : f32
    %101 = vector.broadcast %cst_36 : f32 to vector<4x4xf32>
    %102 = arith.mulf %100, %101 : vector<4x4xf32>
    %cst_37 = arith.constant dense<0xFF800000> : vector<4xf32>
    %103 = vector.multi_reduction <maximumf>, %102, %cst_37 [1] : vector<4x4xf32> to vector<4xf32>
    %104 = vector.shape_cast %103 : vector<4xf32> to vector<4x1xf32>
    %105 = vector.broadcast %104 : vector<4x1xf32> to vector<4x4xf32>
    %106 = arith.subf %102, %105 : vector<4x4xf32>
    %107 = math.exp %106 : vector<4x4xf32>
    %cst_38 = arith.constant dense<0.000000e+00> : vector<4xf32>
    %108 = vector.multi_reduction <add>, %107, %cst_38 [1] : vector<4x4xf32> to vector<4xf32>
    %109 = vector.shape_cast %108 : vector<4xf32> to vector<4x1xf32>
    %110 = tpu.reciprocal %109 {approx = true} : vector<4x1xf32> -> vector<4x1xf32>
    %111 = vector.broadcast %110 : vector<4x1xf32> to vector<4x4xf32>
    %112 = arith.mulf %107, %111 : vector<4x4xf32>
    %cst_39 = arith.constant dense<0.000000e+00> : vector<4x16xf32>
    %113 = tpu.matmul %112, %99, %cst_39 {dimension_numbers = #tpu.dot_dimension_numbers<[1], [0], [0], [1], [0, 0, 1, 1], [], []>} : vector<4x4xf32>, vector<4x16xf32>, vector<4x16xf32> -> vector<4x16xf32>
    %114 = vector.extract_strided_slice %28 {offsets = [0, 80], sizes = [4, 16], strides = [1, 1]} : vector<4x384xf32> to vector<4x16xf32>
    %115 = vector.extract_strided_slice %28 {offsets = [0, 208], sizes = [4, 16], strides = [1, 1]} : vector<4x384xf32> to vector<4x16xf32>
    %116 = vector.extract_strided_slice %28 {offsets = [0, 336], sizes = [4, 16], strides = [1, 1]} : vector<4x384xf32> to vector<4x16xf32>
    %cst_40 = arith.constant dense<0.000000e+00> : vector<4x4xf32>
    %117 = tpu.matmul %114, %115, %cst_40 {dimension_numbers = #tpu.dot_dimension_numbers<[1], [1], [0], [0], [0, 0, 1, 0], [], []>} : vector<4x16xf32>, vector<4x16xf32>, vector<4x4xf32> -> vector<4x4xf32>
    %cst_41 = arith.constant 2.500000e-01 : f32
    %118 = vector.broadcast %cst_41 : f32 to vector<4x4xf32>
    %119 = arith.mulf %117, %118 : vector<4x4xf32>
    %cst_42 = arith.constant dense<0xFF800000> : vector<4xf32>
    %120 = vector.multi_reduction <maximumf>, %119, %cst_42 [1] : vector<4x4xf32> to vector<4xf32>
    %121 = vector.shape_cast %120 : vector<4xf32> to vector<4x1xf32>
    %122 = vector.broadcast %121 : vector<4x1xf32> to vector<4x4xf32>
    %123 = arith.subf %119, %122 : vector<4x4xf32>
    %124 = math.exp %123 : vector<4x4xf32>
    %cst_43 = arith.constant dense<0.000000e+00> : vector<4xf32>
    %125 = vector.multi_reduction <add>, %124, %cst_43 [1] : vector<4x4xf32> to vector<4xf32>
    %126 = vector.shape_cast %125 : vector<4xf32> to vector<4x1xf32>
    %127 = tpu.reciprocal %126 {approx = true} : vector<4x1xf32> -> vector<4x1xf32>
    %128 = vector.broadcast %127 : vector<4x1xf32> to vector<4x4xf32>
    %129 = arith.mulf %124, %128 : vector<4x4xf32>
    %cst_44 = arith.constant dense<0.000000e+00> : vector<4x16xf32>
    %130 = tpu.matmul %129, %116, %cst_44 {dimension_numbers = #tpu.dot_dimension_numbers<[1], [0], [0], [1], [0, 0, 1, 1], [], []>} : vector<4x4xf32>, vector<4x16xf32>, vector<4x16xf32> -> vector<4x16xf32>
    %131 = vector.extract_strided_slice %28 {offsets = [0, 96], sizes = [4, 16], strides = [1, 1]} : vector<4x384xf32> to vector<4x16xf32>
    %132 = vector.extract_strided_slice %28 {offsets = [0, 224], sizes = [4, 16], strides = [1, 1]} : vector<4x384xf32> to vector<4x16xf32>
    %133 = vector.extract_strided_slice %28 {offsets = [0, 352], sizes = [4, 16], strides = [1, 1]} : vector<4x384xf32> to vector<4x16xf32>
    %cst_45 = arith.constant dense<0.000000e+00> : vector<4x4xf32>
    %134 = tpu.matmul %131, %132, %cst_45 {dimension_numbers = #tpu.dot_dimension_numbers<[1], [1], [0], [0], [0, 0, 1, 0], [], []>} : vector<4x16xf32>, vector<4x16xf32>, vector<4x4xf32> -> vector<4x4xf32>
    %cst_46 = arith.constant 2.500000e-01 : f32
    %135 = vector.broadcast %cst_46 : f32 to vector<4x4xf32>
    %136 = arith.mulf %134, %135 : vector<4x4xf32>
    %cst_47 = arith.constant dense<0xFF800000> : vector<4xf32>
    %137 = vector.multi_reduction <maximumf>, %136, %cst_47 [1] : vector<4x4xf32> to vector<4xf32>
    %138 = vector.shape_cast %137 : vector<4xf32> to vector<4x1xf32>
    %139 = vector.broadcast %138 : vector<4x1xf32> to vector<4x4xf32>
    %140 = arith.subf %136, %139 : vector<4x4xf32>
    %141 = math.exp %140 : vector<4x4xf32>
    %cst_48 = arith.constant dense<0.000000e+00> : vector<4xf32>
    %142 = vector.multi_reduction <add>, %141, %cst_48 [1] : vector<4x4xf32> to vector<4xf32>
    %143 = vector.shape_cast %142 : vector<4xf32> to vector<4x1xf32>
    %144 = tpu.reciprocal %143 {approx = true} : vector<4x1xf32> -> vector<4x1xf32>
    %145 = vector.broadcast %144 : vector<4x1xf32> to vector<4x4xf32>
    %146 = arith.mulf %141, %145 : vector<4x4xf32>
    %cst_49 = arith.constant dense<0.000000e+00> : vector<4x16xf32>
    %147 = tpu.matmul %146, %133, %cst_49 {dimension_numbers = #tpu.dot_dimension_numbers<[1], [0], [0], [1], [0, 0, 1, 1], [], []>} : vector<4x4xf32>, vector<4x16xf32>, vector<4x16xf32> -> vector<4x16xf32>
    %148 = vector.extract_strided_slice %28 {offsets = [0, 112], sizes = [4, 16], strides = [1, 1]} : vector<4x384xf32> to vector<4x16xf32>
    %149 = vector.extract_strided_slice %28 {offsets = [0, 240], sizes = [4, 16], strides = [1, 1]} : vector<4x384xf32> to vector<4x16xf32>
    %150 = vector.extract_strided_slice %28 {offsets = [0, 368], sizes = [4, 16], strides = [1, 1]} : vector<4x384xf32> to vector<4x16xf32>
    %cst_50 = arith.constant dense<0.000000e+00> : vector<4x4xf32>
    %151 = tpu.matmul %148, %149, %cst_50 {dimension_numbers = #tpu.dot_dimension_numbers<[1], [1], [0], [0], [0, 0, 1, 0], [], []>} : vector<4x16xf32>, vector<4x16xf32>, vector<4x4xf32> -> vector<4x4xf32>
    %cst_51 = arith.constant 2.500000e-01 : f32
    %152 = vector.broadcast %cst_51 : f32 to vector<4x4xf32>
    %153 = arith.mulf %151, %152 : vector<4x4xf32>
    %cst_52 = arith.constant dense<0xFF800000> : vector<4xf32>
    %154 = vector.multi_reduction <maximumf>, %153, %cst_52 [1] : vector<4x4xf32> to vector<4xf32>
    %155 = vector.shape_cast %154 : vector<4xf32> to vector<4x1xf32>
    %156 = vector.broadcast %155 : vector<4x1xf32> to vector<4x4xf32>
    %157 = arith.subf %153, %156 : vector<4x4xf32>
    %158 = math.exp %157 : vector<4x4xf32>
    %cst_53 = arith.constant dense<0.000000e+00> : vector<4xf32>
    %159 = vector.multi_reduction <add>, %158, %cst_53 [1] : vector<4x4xf32> to vector<4xf32>
    %160 = vector.shape_cast %159 : vector<4xf32> to vector<4x1xf32>
    %161 = tpu.reciprocal %160 {approx = true} : vector<4x1xf32> -> vector<4x1xf32>
    %162 = vector.broadcast %161 : vector<4x1xf32> to vector<4x4xf32>
    %163 = arith.mulf %158, %162 : vector<4x4xf32>
    %cst_54 = arith.constant dense<0.000000e+00> : vector<4x16xf32>
    %164 = tpu.matmul %163, %150, %cst_54 {dimension_numbers = #tpu.dot_dimension_numbers<[1], [0], [0], [1], [0, 0, 1, 1], [], []>} : vector<4x4xf32>, vector<4x16xf32>, vector<4x16xf32> -> vector<4x16xf32>
    %165 = tpu.concatenate %45, %62, %79, %96, %113, %130, %147, %164 in 1 : vector<4x16xf32>, vector<4x16xf32>, vector<4x16xf32>, vector<4x16xf32>, vector<4x16xf32>, vector<4x16xf32>, vector<4x16xf32>, vector<4x16xf32> -> vector<4x128xf32>
    %c0_55 = arith.constant 0 : index
    %c0_56 = arith.constant 0 : index
    %166 = vector.load %arg6[%c0_55, %c0_56] : memref<128x128xf32, #tpu.memory_space<vmem>>, vector<128x128xf32>
    %cst_57 = arith.constant dense<0.000000e+00> : vector<4x128xf32>
    %167 = tpu.matmul %165, %166, %cst_57 {dimension_numbers = #tpu.dot_dimension_numbers<[1], [0], [0], [1], [0, 0, 1, 1], [], []>} : vector<4x128xf32>, vector<128x128xf32>, vector<4x128xf32> -> vector<4x128xf32>
    %c0_58 = arith.constant 0 : index
    %c0_59 = arith.constant 0 : index
    %168 = vector.load %arg7[%c0_58, %c0_59] : memref<1x128xf32, #tpu.memory_space<vmem>>, vector<1x128xf32>
    %169 = vector.broadcast %168 : vector<1x128xf32> to vector<4x128xf32>
    %170 = arith.addf %167, %169 : vector<4x128xf32>
    %171 = arith.addf %170, %1 : vector<4x128xf32>
    %c0_60 = arith.constant 0 : index
    %c0_61 = arith.constant 0 : index
    %172 = vector.load %arg8[%c0_60, %c0_61] : memref<1x128xf32, #tpu.memory_space<vmem>>, vector<1x128xf32>
    %c0_62 = arith.constant 0 : index
    %c0_63 = arith.constant 0 : index
    %173 = vector.load %arg9[%c0_62, %c0_63] : memref<1x128xf32, #tpu.memory_space<vmem>>, vector<1x128xf32>
    %cst_64 = arith.constant dense<0.000000e+00> : vector<4xf32>
    %174 = vector.multi_reduction <add>, %171, %cst_64 [1] : vector<4x128xf32> to vector<4xf32>
    %175 = vector.shape_cast %174 : vector<4xf32> to vector<4x1xf32>
    %cst_65 = arith.constant 1.280000e+02 : f32
    %176 = vector.broadcast %cst_65 : f32 to vector<4x1xf32>
    %177 = arith.divf %175, %176 : vector<4x1xf32>
    %178 = vector.broadcast %177 : vector<4x1xf32> to vector<4x128xf32>
    %179 = arith.subf %171, %178 : vector<4x128xf32>
    %180 = arith.mulf %179, %179 : vector<4x128xf32>
    %cst_66 = arith.constant dense<0.000000e+00> : vector<4xf32>
    %181 = vector.multi_reduction <add>, %180, %cst_66 [1] : vector<4x128xf32> to vector<4xf32>
    %182 = vector.shape_cast %181 : vector<4xf32> to vector<4x1xf32>
    %cst_67 = arith.constant 1.280000e+02 : f32
    %183 = vector.broadcast %cst_67 : f32 to vector<4x1xf32>
    %184 = arith.divf %182, %183 : vector<4x1xf32>
    %cst_68 = arith.constant 9.99999974E-6 : f32
    %185 = vector.broadcast %cst_68 : f32 to vector<4x1xf32>
    %186 = arith.addf %184, %185 : vector<4x1xf32>
    %187 = math.rsqrt %186 : vector<4x1xf32>
    %188 = vector.broadcast %187 : vector<4x1xf32> to vector<4x128xf32>
    %189 = arith.mulf %179, %188 : vector<4x128xf32>
    %190 = vector.broadcast %172 : vector<1x128xf32> to vector<4x128xf32>
    %191 = arith.mulf %189, %190 : vector<4x128xf32>
    %192 = vector.broadcast %173 : vector<1x128xf32> to vector<4x128xf32>
    %193 = arith.addf %191, %192 : vector<4x128xf32>
    %c0_69 = arith.constant 0 : index
    %c0_70 = arith.constant 0 : index
    %194 = vector.load %arg10[%c0_69, %c0_70] : memref<128x512xf32, #tpu.memory_space<vmem>>, vector<128x512xf32>
    %cst_71 = arith.constant dense<0.000000e+00> : vector<4x512xf32>
    %195 = tpu.matmul %193, %194, %cst_71 {dimension_numbers = #tpu.dot_dimension_numbers<[1], [0], [0], [1], [0, 0, 1, 1], [], []>} : vector<4x128xf32>, vector<128x512xf32>, vector<4x512xf32> -> vector<4x512xf32>
    %c0_72 = arith.constant 0 : index
    %c0_73 = arith.constant 0 : index
    %196 = vector.load %arg11[%c0_72, %c0_73] : memref<1x512xf32, #tpu.memory_space<vmem>>, vector<1x512xf32>
    %197 = vector.broadcast %196 : vector<1x512xf32> to vector<4x512xf32>
    %198 = arith.addf %195, %197 : vector<4x512xf32>
    %cst_74 = arith.constant 5.000000e-01 : f32
    %199 = vector.broadcast %cst_74 : f32 to vector<4x512xf32>
    %200 = arith.mulf %199, %198 : vector<4x512xf32>
    %cst_75 = arith.constant 1.41421354 : f32
    %201 = vector.broadcast %cst_75 : f32 to vector<4x512xf32>
    %202 = arith.divf %198, %201 : vector<4x512xf32>
    %cst_76 = arith.constant 0.000000e+00 : f32
    %203 = vector.broadcast %cst_76 : f32 to vector<4x512xf32>
    %204 = arith.cmpf oge, %202, %203 : vector<4x512xf32>
    %cst_77 = arith.constant 1.000000e+00 : f32
    %cst_78 = arith.constant -1.000000e+00 : f32
    %205 = vector.broadcast %cst_77 : f32 to vector<4x512xf32>
    %206 = vector.broadcast %cst_78 : f32 to vector<4x512xf32>
    %207 = arith.select %204, %205, %206 : vector<4x512xi1>, vector<4x512xf32>
    %208 = math.absf %202 : vector<4x512xf32>
    %cst_79 = arith.constant 0.327591091 : f32
    %209 = vector.broadcast %cst_79 : f32 to vector<4x512xf32>
    %210 = arith.mulf %209, %208 : vector<4x512xf32>
    %cst_80 = arith.constant 1.000000e+00 : f32
    %211 = vector.broadcast %cst_80 : f32 to vector<4x512xf32>
    %212 = arith.addf %211, %210 : vector<4x512xf32>
    %cst_81 = arith.constant 1.000000e+00 : f32
    %213 = vector.broadcast %cst_81 : f32 to vector<4x512xf32>
    %214 = arith.divf %213, %212 : vector<4x512xf32>
    %cst_82 = arith.constant 1.06140542 : f32
    %215 = vector.broadcast %cst_82 : f32 to vector<4x512xf32>
    %216 = arith.mulf %215, %214 : vector<4x512xf32>
    %cst_83 = arith.constant -1.45315206 : f32
    %217 = vector.broadcast %cst_83 : f32 to vector<4x512xf32>
    %218 = arith.addf %216, %217 : vector<4x512xf32>
    %219 = arith.mulf %218, %214 : vector<4x512xf32>
    %cst_84 = arith.constant 1.42141378 : f32
    %220 = vector.broadcast %cst_84 : f32 to vector<4x512xf32>
    %221 = arith.addf %219, %220 : vector<4x512xf32>
    %222 = arith.mulf %221, %214 : vector<4x512xf32>
    %cst_85 = arith.constant -0.284496725 : f32
    %223 = vector.broadcast %cst_85 : f32 to vector<4x512xf32>
    %224 = arith.addf %222, %223 : vector<4x512xf32>
    %225 = arith.mulf %224, %214 : vector<4x512xf32>
    %cst_86 = arith.constant 0.254829586 : f32
    %226 = vector.broadcast %cst_86 : f32 to vector<4x512xf32>
    %227 = arith.addf %225, %226 : vector<4x512xf32>
    %228 = arith.mulf %227, %214 : vector<4x512xf32>
    %cst_87 = arith.constant 0.000000e+00 : f32
    %229 = vector.broadcast %cst_87 : f32 to vector<4x512xf32>
    %230 = arith.subf %229, %208 : vector<4x512xf32>
    %231 = arith.mulf %230, %208 : vector<4x512xf32>
    %232 = math.exp %231 : vector<4x512xf32>
    %233 = arith.mulf %228, %232 : vector<4x512xf32>
    %cst_88 = arith.constant 1.000000e+00 : f32
    %234 = vector.broadcast %cst_88 : f32 to vector<4x512xf32>
    %235 = arith.subf %234, %233 : vector<4x512xf32>
    %236 = arith.mulf %207, %235 : vector<4x512xf32>
    %cst_89 = arith.constant 1.000000e+00 : f32
    %237 = vector.broadcast %cst_89 : f32 to vector<4x512xf32>
    %238 = arith.addf %237, %236 : vector<4x512xf32>
    %239 = arith.mulf %200, %238 : vector<4x512xf32>
    %c0_90 = arith.constant 0 : index
    %c0_91 = arith.constant 0 : index
    %240 = vector.load %arg12[%c0_90, %c0_91] : memref<512x128xf32, #tpu.memory_space<vmem>>, vector<512x128xf32>
    %cst_92 = arith.constant dense<0.000000e+00> : vector<4x128xf32>
    %241 = tpu.matmul %239, %240, %cst_92 {dimension_numbers = #tpu.dot_dimension_numbers<[1], [0], [0], [1], [0, 0, 1, 1], [], []>} : vector<4x512xf32>, vector<512x128xf32>, vector<4x128xf32> -> vector<4x128xf32>
    %c0_93 = arith.constant 0 : index
    %c0_94 = arith.constant 0 : index
    %242 = vector.load %arg13[%c0_93, %c0_94] : memref<1x128xf32, #tpu.memory_space<vmem>>, vector<1x128xf32>
    %243 = vector.broadcast %242 : vector<1x128xf32> to vector<4x128xf32>
    %244 = arith.addf %241, %243 : vector<4x128xf32>
    %245 = arith.addf %244, %171 : vector<4x128xf32>
    %c0_95 = arith.constant 0 : index
    %c0_96 = arith.constant 0 : index
    %c0_97 = arith.constant 0 : index
    %246 = vector.load %arg14[%c0_95, %c0_96, %c0_97] : memref<1x4x128xf32, #tpu.memory_space<vmem>>, vector<1x4x128xf32>
    %247 = vector.shape_cast %246 : vector<1x4x128xf32> to vector<4x128xf32>
    %248 = vector.shape_cast %245 : vector<4x128xf32> to vector<1x4x128xf32>
    tpu.vector_store %arg14[%c0_95, %c0_96, %c0_97], %248 {strides = array<i32>} : memref<1x4x128xf32, #tpu.memory_space<vmem>>, vector<1x4x128xf32>,
    return
  }
  func.func @transform_0(%arg0: i32) -> (i32, i32, i32) {
    %c0_i32 = arith.constant 0 : i32
    %c0_i32_0 = arith.constant 0 : i32
    %c0_i32_1 = arith.constant 0 : i32
    return %arg0, %c0_i32, %c0_i32_0 : i32, i32, i32
  }
  func.func @transform_1(%arg0: i32) -> (i32, i32) {
    %c0_i32 = arith.constant 0 : i32
    %c0_i32_0 = arith.constant 0 : i32
    %c0_i32_1 = arith.constant 0 : i32
    return %c0_i32, %c0_i32_0 : i32, i32
  }
  func.func @transform_2(%arg0: i32) -> (i32, i32) {
    %c0_i32 = arith.constant 0 : i32
    %c0_i32_0 = arith.constant 0 : i32
    %c0_i32_1 = arith.constant 0 : i32
    return %c0_i32, %c0_i32_0 : i32, i32
  }
  func.func @transform_3(%arg0: i32) -> (i32, i32) {
    %c0_i32 = arith.constant 0 : i32
    %c0_i32_0 = arith.constant 0 : i32
    %c0_i32_1 = arith.constant 0 : i32
    return %c0_i32, %c0_i32_0 : i32, i32
  }
  func.func @transform_4(%arg0: i32) -> (i32, i32) {
    %c0_i32 = arith.constant 0 : i32
    %c0_i32_0 = arith.constant 0 : i32
    %c0_i32_1 = arith.constant 0 : i32
    return %c0_i32, %c0_i32_0 : i32, i32
  }
  func.func @transform_5(%arg0: i32) -> (i32, i32) {
    %c0_i32 = arith.constant 0 : i32
    %c0_i32_0 = arith.constant 0 : i32
    %c0_i32_1 = arith.constant 0 : i32
    return %c0_i32, %c0_i32_0 : i32, i32
  }
  func.func @transform_6(%arg0: i32) -> (i32, i32) {
    %c0_i32 = arith.constant 0 : i32
    %c0_i32_0 = arith.constant 0 : i32
    %c0_i32_1 = arith.constant 0 : i32
    return %c0_i32, %c0_i32_0 : i32, i32
  }
  func.func @transform_7(%arg0: i32) -> (i32, i32) {
    %c0_i32 = arith.constant 0 : i32
    %c0_i32_0 = arith.constant 0 : i32
    %c0_i32_1 = arith.constant 0 : i32
    return %c0_i32, %c0_i32_0 : i32, i32
  }
  func.func @transform_8(%arg0: i32) -> (i32, i32) {
    %c0_i32 = arith.constant 0 : i32
    %c0_i32_0 = arith.constant 0 : i32
    %c0_i32_1 = arith.constant 0 : i32
    return %c0_i32, %c0_i32_0 : i32, i32
  }
  func.func @transform_9(%arg0: i32) -> (i32, i32) {
    %c0_i32 = arith.constant 0 : i32
    %c0_i32_0 = arith.constant 0 : i32
    %c0_i32_1 = arith.constant 0 : i32
    return %c0_i32, %c0_i32_0 : i32, i32
  }
  func.func @transform_10(%arg0: i32) -> (i32, i32) {
    %c0_i32 = arith.constant 0 : i32
    %c0_i32_0 = arith.constant 0 : i32
    %c0_i32_1 = arith.constant 0 : i32
    return %c0_i32, %c0_i32_0 : i32, i32
  }
  func.func @transform_11(%arg0: i32) -> (i32, i32) {
    %c0_i32 = arith.constant 0 : i32
    %c0_i32_0 = arith.constant 0 : i32
    %c0_i32_1 = arith.constant 0 : i32
    return %c0_i32, %c0_i32_0 : i32, i32
  }
  func.func @transform_12(%arg0: i32) -> (i32, i32) {
    %c0_i32 = arith.constant 0 : i32
    %c0_i32_0 = arith.constant 0 : i32
    %c0_i32_1 = arith.constant 0 : i32
    return %c0_i32, %c0_i32_0 : i32, i32
  }
  func.func @transform_13(%arg0: i32) -> (i32, i32, i32) {
    %c0_i32 = arith.constant 0 : i32
    %c0_i32_0 = arith.constant 0 : i32
    %c0_i32_1 = arith.constant 0 : i32
    return %arg0, %c0_i32, %c0_i32_0 : i32, i32, i32
  }
}

module attributes {stable_mosaic.version = 11 : i64} {
  func.func @kernel(%arg0: i32, %arg1: memref<1x4x128xf32, #tpu.memory_space<vmem>>, %arg2: memref<1x128xf32, #tpu.memory_space<vmem>>, %arg3: memref<1x128xf32, #tpu.memory_space<vmem>>, %arg4: memref<128x384xf32, #tpu.memory_space<vmem>>, %arg5: memref<1x384xf32, #tpu.memory_space<vmem>>, %arg6: memref<128x128xf32, #tpu.memory_space<vmem>>, %arg7: memref<1x128xf32, #tpu.memory_space<vmem>>, %arg8: memref<1x128xf32, #tpu.memory_space<vmem>>, %arg9: memref<1x128xf32, #tpu.memory_space<vmem>>, %arg10: memref<128x512xf32, #tpu.memory_space<vmem>>, %arg11: memref<1x512xf32, #tpu.memory_space<vmem>>, %arg12: memref<512x128xf32, #tpu.memory_space<vmem>>, %arg13: memref<1x128xf32, #tpu.memory_space<vmem>>, %arg14: memref<1x4x128xf32, #tpu.memory_space<vmem>>) attributes {dimension_semantics = [#tpu.dimension_semantics<parallel>], iteration_bounds = array<i64: 2>, scalar_prefetch = 0 : i64, scratch_operands = 0 : i64, tpu.core_type = #tpu.core_type<tc>, window_params = [{transform_indices = @transform_0, window_bounds = array<i64: 1, 4, 128>}, {pipeline_mode = #tpu.pipeline_mode<synchronous>, transform_indices = @transform_1, window_bounds = array<i64: 1, 128>}, {pipeline_mode = #tpu.pipeline_mode<synchronous>, transform_indices = @transform_2, window_bounds = array<i64: 1, 128>}, {pipeline_mode = #tpu.pipeline_mode<synchronous>, transform_indices = @transform_3, window_bounds = array<i64: 128, 384>}, {pipeline_mode = #tpu.pipeline_mode<synchronous>, transform_indices = @transform_4, window_bounds = array<i64: 1, 384>}, {pipeline_mode = #tpu.pipeline_mode<synchronous>, transform_indices = @transform_5, window_bounds = array<i64: 128, 128>}, {pipeline_mode = #tpu.pipeline_mode<synchronous>, transform_indices = @transform_6, window_bounds = array<i64: 1, 128>}, {pipeline_mode = #tpu.pipeline_mode<synchronous>, transform_indices = @transform_7, window_bounds = array<i64: 1, 128>}, {pipeline_mode = #tpu.pipeline_mode<synchronous>, transform_indices = @transform_8, window_bounds = array<i64: 1, 128>}, {pipeline_mode = #tpu.pipeline_mode<synchronous>, transform_indices = @transform_9, window_bounds = array<i64: 128, 512>}, {pipeline_mode = #tpu.pipeline_mode<synchronous>, transform_indices = @transform_10, window_bounds = array<i64: 1, 512>}, {pipeline_mode = #tpu.pipeline_mode<synchronous>, transform_indices = @transform_11, window_bounds = array<i64: 512, 128>}, {pipeline_mode = #tpu.pipeline_mode<synchronous>, transform_indices = @transform_12, window_bounds = array<i64: 1, 128>}, {transform_indices = @transform_13, window_bounds = array<i64: 1, 4, 128>}]} {
    %c0 = arith.constant 0 : index
    %c0_0 = arith.constant 0 : index
    %c0_1 = arith.constant 0 : index
    %0 = vector.load %arg1[%c0, %c0_0, %c0_1] : memref<1x4x128xf32, #tpu.memory_space<vmem>>, vector<1x4x128xf32>
    %1 = vector.shape_cast %0 : vector<1x4x128xf32> to vector<4x128xf32>
    %c0_2 = arith.constant 0 : index
    %c0_3 = arith.constant 0 : index
    %2 = vector.load %arg2[%c0_2, %c0_3] : memref<1x128xf32, #tpu.memory_space<vmem>>, vector<1x128xf32>
    %c0_4 = arith.constant 0 : index
    %c0_5 = arith.constant 0 : index
    %3 = vector.load %arg3[%c0_4, %c0_5] : memref<1x128xf32, #tpu.memory_space<vmem>>, vector<1x128xf32>
    %cst = arith.constant dense<0.000000e+00> : vector<4xf32>
    %4 = vector.multi_reduction <add>, %1, %cst [1] : vector<4x128xf32> to vector<4xf32>
    %5 = vector.shape_cast %4 : vector<4xf32> to vector<4x1xf32>
    %cst_6 = arith.constant 1.280000e+02 : f32
    %6 = vector.broadcast %cst_6 : f32 to vector<4x1xf32>
    %7 = arith.divf %5, %6 : vector<4x1xf32>
    %8 = vector.broadcast %7 : vector<4x1xf32> to vector<4x128xf32>
    %9 = arith.subf %1, %8 : vector<4x128xf32>
    %10 = arith.mulf %9, %9 : vector<4x128xf32>
    %cst_7 = arith.constant dense<0.000000e+00> : vector<4xf32>
    %11 = vector.multi_reduction <add>, %10, %cst_7 [1] : vector<4x128xf32> to vector<4xf32>
    %12 = vector.shape_cast %11 : vector<4xf32> to vector<4x1xf32>
    %cst_8 = arith.constant 1.280000e+02 : f32
    %13 = vector.broadcast %cst_8 : f32 to vector<4x1xf32>
    %14 = arith.divf %12, %13 : vector<4x1xf32>
    %cst_9 = arith.constant 9.99999974E-6 : f32
    %15 = vector.broadcast %cst_9 : f32 to vector<4x1xf32>
    %16 = arith.addf %14, %15 : vector<4x1xf32>
    %17 = math.rsqrt %16 : vector<4x1xf32>
    %18 = vector.broadcast %17 : vector<4x1xf32> to vector<4x128xf32>
    %19 = arith.mulf %9, %18 : vector<4x128xf32>
    %20 = vector.broadcast %2 : vector<1x128xf32> to vector<4x128xf32>
    %21 = arith.mulf %19, %20 : vector<4x128xf32>
    %22 = vector.broadcast %3 : vector<1x128xf32> to vector<4x128xf32>
    %23 = arith.addf %21, %22 : vector<4x128xf32>
    %c0_10 = arith.constant 0 : index
    %c0_11 = arith.constant 0 : index
    %24 = vector.load %arg4[%c0_10, %c0_11] : memref<128x384xf32, #tpu.memory_space<vmem>>, vector<128x384xf32>
    %cst_12 = arith.constant dense<0.000000e+00> : vector<4x384xf32>
    %25 = tpu.matmul %23, %24, %cst_12 {dimension_numbers = #tpu.dot_dimension_numbers<[1], [0], [0], [1], [0, 0, 1, 1], [], []>} : vector<4x128xf32>, vector<128x384xf32>, vector<4x384xf32> -> vector<4x384xf32>
    %c0_13 = arith.constant 0 : index
    %c0_14 = arith.constant 0 : index
    %26 = vector.load %arg5[%c0_13, %c0_14] : memref<1x384xf32, #tpu.memory_space<vmem>>, vector<1x384xf32>
    %27 = vector.broadcast %26 : vector<1x384xf32> to vector<4x384xf32>
    %28 = arith.addf %25, %27 : vector<4x384xf32>
    %29 = vector.extract_strided_slice %28 {offsets = [0, 0], sizes = [4, 16], strides = [1, 1]} : vector<4x384xf32> to vector<4x16xf32>
    %30 = vector.extract_strided_slice %28 {offsets = [0, 128], sizes = [4, 16], strides = [1, 1]} : vector<4x384xf32> to vector<4x16xf32>
    %31 = vector.extract_strided_slice %28 {offsets = [0, 256], sizes = [4, 16], strides = [1, 1]} : vector<4x384xf32> to vector<4x16xf32>
    %cst_15 = arith.constant dense<0.000000e+00> : vector<4x4xf32>
    %32 = tpu.matmul %29, %30, %cst_15 {dimension_numbers = #tpu.dot_dimension_numbers<[1], [1], [0], [0], [0, 0, 1, 0], [], []>} : vector<4x16xf32>, vector<4x16xf32>, vector<4x4xf32> -> vector<4x4xf32>
    %cst_16 = arith.constant 2.500000e-01 : f32
    %33 = vector.broadcast %cst_16 : f32 to vector<4x4xf32>
    %34 = arith.mulf %32, %33 : vector<4x4xf32>
    %cst_17 = arith.constant dense<0xFF800000> : vector<4xf32>
    %35 = vector.multi_reduction <maximumf>, %34, %cst_17 [1] : vector<4x4xf32> to vector<4xf32>
    %36 = vector.shape_cast %35 : vector<4xf32> to vector<4x1xf32>
    %37 = vector.broadcast %36 : vector<4x1xf32> to vector<4x4xf32>
    %38 = arith.subf %34, %37 : vector<4x4xf32>
    %39 = math.exp %38 : vector<4x4xf32>
    %cst_18 = arith.constant dense<0.000000e+00> : vector<4xf32>
    %40 = vector.multi_reduction <add>, %39, %cst_18 [1] : vector<4x4xf32> to vector<4xf32>
    %41 = vector.shape_cast %40 : vector<4xf32> to vector<4x1xf32>
    %42 = tpu.reciprocal %41 {approx = true} : vector<4x1xf32> -> vector<4x1xf32>
    %43 = vector.broadcast %42 : vector<4x1xf32> to vector<4x4xf32>
    %44 = arith.mulf %39, %43 : vector<4x4xf32>
    %cst_19 = arith.constant dense<0.000000e+00> : vector<4x16xf32>
    %45 = tpu.matmul %44, %31, %cst_19 {dimension_numbers = #tpu.dot_dimension_numbers<[1], [0], [0], [1], [0, 0, 1, 1], [], []>} : vector<4x4xf32>, vector<4x16xf32>, vector<4x16xf32> -> vector<4x16xf32>
    %46 = vector.extract_strided_slice %28 {offsets = [0, 16], sizes = [4, 16], strides = [1, 1]} : vector<4x384xf32> to vector<4x16xf32>
    %47 = vector.extract_strided_slice %28 {offsets = [0, 144], sizes = [4, 16], strides = [1, 1]} : vector<4x384xf32> to vector<4x16xf32>
    %48 = vector.extract_strided_slice %28 {offsets = [0, 272], sizes = [4, 16], strides = [1, 1]} : vector<4x384xf32> to vector<4x16xf32>
    %cst_20 = arith.constant dense<0.000000e+00> : vector<4x4xf32>
    %49 = tpu.matmul %46, %47, %cst_20 {dimension_numbers = #tpu.dot_dimension_numbers<[1], [1], [0], [0], [0, 0, 1, 0], [], []>} : vector<4x16xf32>, vector<4x16xf32>, vector<4x4xf32> -> vector<4x4xf32>
    %cst_21 = arith.constant 2.500000e-01 : f32
    %50 = vector.broadcast %cst_21 : f32 to vector<4x4xf32>
    %51 = arith.mulf %49, %50 : vector<4x4xf32>
    %cst_22 = arith.constant dense<0xFF800000> : vector<4xf32>
    %52 = vector.multi_reduction <maximumf>, %51, %cst_22 [1] : vector<4x4xf32> to vector<4xf32>
    %53 = vector.shape_cast %52 : vector<4xf32> to vector<4x1xf32>
    %54 = vector.broadcast %53 : vector<4x1xf32> to vector<4x4xf32>
    %55 = arith.subf %51, %54 : vector<4x4xf32>
    %56 = math.exp %55 : vector<4x4xf32>
    %cst_23 = arith.constant dense<0.000000e+00> : vector<4xf32>
    %57 = vector.multi_reduction <add>, %56, %cst_23 [1] : vector<4x4xf32> to vector<4xf32>
    %58 = vector.shape_cast %57 : vector<4xf32> to vector<4x1xf32>
    %59 = tpu.reciprocal %58 {approx = true} : vector<4x1xf32> -> vector<4x1xf32>
    %60 = vector.broadcast %59 : vector<4x1xf32> to vector<4x4xf32>
    %61 = arith.mulf %56, %60 : vector<4x4xf32>
    %cst_24 = arith.constant dense<0.000000e+00> : vector<4x16xf32>
    %62 = tpu.matmul %61, %48, %cst_24 {dimension_numbers = #tpu.dot_dimension_numbers<[1], [0], [0], [1], [0, 0, 1, 1], [], []>} : vector<4x4xf32>, vector<4x16xf32>, vector<4x16xf32> -> vector<4x16xf32>
    %63 = vector.extract_strided_slice %28 {offsets = [0, 32], sizes = [4, 16], strides = [1, 1]} : vector<4x384xf32> to vector<4x16xf32>
    %64 = vector.extract_strided_slice %28 {offsets = [0, 160], sizes = [4, 16], strides = [1, 1]} : vector<4x384xf32> to vector<4x16xf32>
    %65 = vector.extract_strided_slice %28 {offsets = [0, 288], sizes = [4, 16], strides = [1, 1]} : vector<4x384xf32> to vector<4x16xf32>
    %cst_25 = arith.constant dense<0.000000e+00> : vector<4x4xf32>
    %66 = tpu.matmul %63, %64, %cst_25 {dimension_numbers = #tpu.dot_dimension_numbers<[1], [1], [0], [0], [0, 0, 1, 0], [], []>} : vector<4x16xf32>, vector<4x16xf32>, vector<4x4xf32> -> vector<4x4xf32>
    %cst_26 = arith.constant 2.500000e-01 : f32
    %67 = vector.broadcast %cst_26 : f32 to vector<4x4xf32>
    %68 = arith.mulf %66, %67 : vector<4x4xf32>
    %cst_27 = arith.constant dense<0xFF800000> : vector<4xf32>
    %69 = vector.multi_reduction <maximumf>, %68, %cst_27 [1] : vector<4x4xf32> to vector<4xf32>
    %70 = vector.shape_cast %69 : vector<4xf32> to vector<4x1xf32>
    %71 = vector.broadcast %70 : vector<4x1xf32> to vector<4x4xf32>
    %72 = arith.subf %68, %71 : vector<4x4xf32>
    %73 = math.exp %72 : vector<4x4xf32>
    %cst_28 = arith.constant dense<0.000000e+00> : vector<4xf32>
    %74 = vector.multi_reduction <add>, %73, %cst_28 [1] : vector<4x4xf32> to vector<4xf32>
    %75 = vector.shape_cast %74 : vector<4xf32> to vector<4x1xf32>
    %76 = tpu.reciprocal %75 {approx = true} : vector<4x1xf32> -> vector<4x1xf32>
    %77 = vector.broadcast %76 : vector<4x1xf32> to vector<4x4xf32>
    %78 = arith.mulf %73, %77 : vector<4x4xf32>
    %cst_29 = arith.constant dense<0.000000e+00> : vector<4x16xf32>
    %79 = tpu.matmul %78, %65, %cst_29 {dimension_numbers = #tpu.dot_dimension_numbers<[1], [0], [0], [1], [0, 0, 1, 1], [], []>} : vector<4x4xf32>, vector<4x16xf32>, vector<4x16xf32> -> vector<4x16xf32>
    %80 = vector.extract_strided_slice %28 {offsets = [0, 48], sizes = [4, 16], strides = [1, 1]} : vector<4x384xf32> to vector<4x16xf32>
    %81 = vector.extract_strided_slice %28 {offsets = [0, 176], sizes = [4, 16], strides = [1, 1]} : vector<4x384xf32> to vector<4x16xf32>
    %82 = vector.extract_strided_slice %28 {offsets = [0, 304], sizes = [4, 16], strides = [1, 1]} : vector<4x384xf32> to vector<4x16xf32>
    %cst_30 = arith.constant dense<0.000000e+00> : vector<4x4xf32>
    %83 = tpu.matmul %80, %81, %cst_30 {dimension_numbers = #tpu.dot_dimension_numbers<[1], [1], [0], [0], [0, 0, 1, 0], [], []>} : vector<4x16xf32>, vector<4x16xf32>, vector<4x4xf32> -> vector<4x4xf32>
    %cst_31 = arith.constant 2.500000e-01 : f32
    %84 = vector.broadcast %cst_31 : f32 to vector<4x4xf32>
    %85 = arith.mulf %83, %84 : vector<4x4xf32>
    %cst_32 = arith.constant dense<0xFF800000> : vector<4xf32>
    %86 = vector.multi_reduction <maximumf>, %85, %cst_32 [1] : vector<4x4xf32> to vector<4xf32>
    %87 = vector.shape_cast %86 : vector<4xf32> to vector<4x1xf32>
    %88 = vector.broadcast %87 : vector<4x1xf32> to vector<4x4xf32>
    %89 = arith.subf %85, %88 : vector<4x4xf32>
    %90 = math.exp %89 : vector<4x4xf32>
    %cst_33 = arith.constant dense<0.000000e+00> : vector<4xf32>
    %91 = vector.multi_reduction <add>, %90, %cst_33 [1] : vector<4x4xf32> to vector<4xf32>
    %92 = vector.shape_cast %91 : vector<4xf32> to vector<4x1xf32>
    %93 = tpu.reciprocal %92 {approx = true} : vector<4x1xf32> -> vector<4x1xf32>
    %94 = vector.broadcast %93 : vector<4x1xf32> to vector<4x4xf32>
    %95 = arith.mulf %90, %94 : vector<4x4xf32>
    %cst_34 = arith.constant dense<0.000000e+00> : vector<4x16xf32>
    %96 = tpu.matmul %95, %82, %cst_34 {dimension_numbers = #tpu.dot_dimension_numbers<[1], [0], [0], [1], [0, 0, 1, 1], [], []>} : vector<4x4xf32>, vector<4x16xf32>, vector<4x16xf32> -> vector<4x16xf32>
    %97 = vector.extract_strided_slice %28 {offsets = [0, 64], sizes = [4, 16], strides = [1, 1]} : vector<4x384xf32> to vector<4x16xf32>
    %98 = vector.extract_strided_slice %28 {offsets = [0, 192], sizes = [4, 16], strides = [1, 1]} : vector<4x384xf32> to vector<4x16xf32>
    %99 = vector.extract_strided_slice %28 {offsets = [0, 320], sizes = [4, 16], strides = [1, 1]} : vector<4x384xf32> to vector<4x16xf32>
    %cst_35 = arith.constant dense<0.000000e+00> : vector<4x4xf32>
    %100 = tpu.matmul %97, %98, %cst_35 {dimension_numbers = #tpu.dot_dimension_numbers<[1], [1], [0], [0], [0, 0, 1, 0], [], []>} : vector<4x16xf32>, vector<4x16xf32>, vector<4x4xf32> -> vector<4x4xf32>
    %cst_36 = arith.constant 2.500000e-01 : f32
    %101 = vector.broadcast %cst_36 : f32 to vector<4x4xf32>
    %102 = arith.mulf %100, %101 : vector<4x4xf32>
    %cst_37 = arith.constant dense<0xFF800000> : vector<4xf32>
    %103 = vector.multi_reduction <maximumf>, %102, %cst_37 [1] : vector<4x4xf32> to vector<4xf32>
    %104 = vector.shape_cast %103 : vector<4xf32> to vector<4x1xf32>
    %105 = vector.broadcast %104 : vector<4x1xf32> to vector<4x4xf32>
    %106 = arith.subf %102, %105 : vector<4x4xf32>
    %107 = math.exp %106 : vector<4x4xf32>
    %cst_38 = arith.constant dense<0.000000e+00> : vector<4xf32>
    %108 = vector.multi_reduction <add>, %107, %cst_38 [1] : vector<4x4xf32> to vector<4xf32>
    %109 = vector.shape_cast %108 : vector<4xf32> to vector<4x1xf32>
    %110 = tpu.reciprocal %109 {approx = true} : vector<4x1xf32> -> vector<4x1xf32>
    %111 = vector.broadcast %110 : vector<4x1xf32> to vector<4x4xf32>
    %112 = arith.mulf %107, %111 : vector<4x4xf32>
    %cst_39 = arith.constant dense<0.000000e+00> : vector<4x16xf32>
    %113 = tpu.matmul %112, %99, %cst_39 {dimension_numbers = #tpu.dot_dimension_numbers<[1], [0], [0], [1], [0, 0, 1, 1], [], []>} : vector<4x4xf32>, vector<4x16xf32>, vector<4x16xf32> -> vector<4x16xf32>
    %114 = vector.extract_strided_slice %28 {offsets = [0, 80], sizes = [4, 16], strides = [1, 1]} : vector<4x384xf32> to vector<4x16xf32>
    %115 = vector.extract_strided_slice %28 {offsets = [0, 208], sizes = [4, 16], strides = [1, 1]} : vector<4x384xf32> to vector<4x16xf32>
    %116 = vector.extract_strided_slice %28 {offsets = [0, 336], sizes = [4, 16], strides = [1, 1]} : vector<4x384xf32> to vector<4x16xf32>
    %cst_40 = arith.constant dense<0.000000e+00> : vector<4x4xf32>
    %117 = tpu.matmul %114, %115, %cst_40 {dimension_numbers = #tpu.dot_dimension_numbers<[1], [1], [0], [0], [0, 0, 1, 0], [], []>} : vector<4x16xf32>, vector<4x16xf32>, vector<4x4xf32> -> vector<4x4xf32>
    %cst_41 = arith.constant 2.500000e-01 : f32
    %118 = vector.broadcast %cst_41 : f32 to vector<4x4xf32>
    %119 = arith.mulf %117, %118 : vector<4x4xf32>
    %cst_42 = arith.constant dense<0xFF800000> : vector<4xf32>
    %120 = vector.multi_reduction <maximumf>, %119, %cst_42 [1] : vector<4x4xf32> to vector<4xf32>
    %121 = vector.shape_cast %120 : vector<4xf32> to vector<4x1xf32>
    %122 = vector.broadcast %121 : vector<4x1xf32> to vector<4x4xf32>
    %123 = arith.subf %119, %122 : vector<4x4xf32>
    %124 = math.exp %123 : vector<4x4xf32>
    %cst_43 = arith.constant dense<0.000000e+00> : vector<4xf32>
    %125 = vector.multi_reduction <add>, %124, %cst_43 [1] : vector<4x4xf32> to vector<4xf32>
    %126 = vector.shape_cast %125 : vector<4xf32> to vector<4x1xf32>
    %127 = tpu.reciprocal %126 {approx = true} : vector<4x1xf32> -> vector<4x1xf32>
    %128 = vector.broadcast %127 : vector<4x1xf32> to vector<4x4xf32>
    %129 = arith.mulf %124, %128 : vector<4x4xf32>
    %cst_44 = arith.constant dense<0.000000e+00> : vector<4x16xf32>
    %130 = tpu.matmul %129, %116, %cst_44 {dimension_numbers = #tpu.dot_dimension_numbers<[1], [0], [0], [1], [0, 0, 1, 1], [], []>} : vector<4x4xf32>, vector<4x16xf32>, vector<4x16xf32> -> vector<4x16xf32>
    %131 = vector.extract_strided_slice %28 {offsets = [0, 96], sizes = [4, 16], strides = [1, 1]} : vector<4x384xf32> to vector<4x16xf32>
    %132 = vector.extract_strided_slice %28 {offsets = [0, 224], sizes = [4, 16], strides = [1, 1]} : vector<4x384xf32> to vector<4x16xf32>
    %133 = vector.extract_strided_slice %28 {offsets = [0, 352], sizes = [4, 16], strides = [1, 1]} : vector<4x384xf32> to vector<4x16xf32>
    %cst_45 = arith.constant dense<0.000000e+00> : vector<4x4xf32>
    %134 = tpu.matmul %131, %132, %cst_45 {dimension_numbers = #tpu.dot_dimension_numbers<[1], [1], [0], [0], [0, 0, 1, 0], [], []>} : vector<4x16xf32>, vector<4x16xf32>, vector<4x4xf32> -> vector<4x4xf32>
    %cst_46 = arith.constant 2.500000e-01 : f32
    %135 = vector.broadcast %cst_46 : f32 to vector<4x4xf32>
    %136 = arith.mulf %134, %135 : vector<4x4xf32>
    %cst_47 = arith.constant dense<0xFF800000> : vector<4xf32>
    %137 = vector.multi_reduction <maximumf>, %136, %cst_47 [1] : vector<4x4xf32> to vector<4xf32>
    %138 = vector.shape_cast %137 : vector<4xf32> to vector<4x1xf32>
    %139 = vector.broadcast %138 : vector<4x1xf32> to vector<4x4xf32>
    %140 = arith.subf %136, %139 : vector<4x4xf32>
    %141 = math.exp %140 : vector<4x4xf32>
    %cst_48 = arith.constant dense<0.000000e+00> : vector<4xf32>
    %142 = vector.multi_reduction <add>, %141, %cst_48 [1] : vector<4x4xf32> to vector<4xf32>
    %143 = vector.shape_cast %142 : vector<4xf32> to vector<4x1xf32>
    %144 = tpu.reciprocal %143 {approx = true} : vector<4x1xf32> -> vector<4x1xf32>
    %145 = vector.broadcast %144 : vector<4x1xf32> to vector<4x4xf32>
    %146 = arith.mulf %141, %145 : vector<4x4xf32>
    %cst_49 = arith.constant dense<0.000000e+00> : vector<4x16xf32>
    %147 = tpu.matmul %146, %133, %cst_49 {dimension_numbers = #tpu.dot_dimension_numbers<[1], [0], [0], [1], [0, 0, 1, 1], [], []>} : vector<4x4xf32>, vector<4x16xf32>, vector<4x16xf32> -> vector<4x16xf32>
    %148 = vector.extract_strided_slice %28 {offsets = [0, 112], sizes = [4, 16], strides = [1, 1]} : vector<4x384xf32> to vector<4x16xf32>
    %149 = vector.extract_strided_slice %28 {offsets = [0, 240], sizes = [4, 16], strides = [1, 1]} : vector<4x384xf32> to vector<4x16xf32>
    %150 = vector.extract_strided_slice %28 {offsets = [0, 368], sizes = [4, 16], strides = [1, 1]} : vector<4x384xf32> to vector<4x16xf32>
    %cst_50 = arith.constant dense<0.000000e+00> : vector<4x4xf32>
    %151 = tpu.matmul %148, %149, %cst_50 {dimension_numbers = #tpu.dot_dimension_numbers<[1], [1], [0], [0], [0, 0, 1, 0], [], []>} : vector<4x16xf32>, vector<4x16xf32>, vector<4x4xf32> -> vector<4x4xf32>
    %cst_51 = arith.constant 2.500000e-01 : f32
    %152 = vector.broadcast %cst_51 : f32 to vector<4x4xf32>
    %153 = arith.mulf %151, %152 : vector<4x4xf32>
    %cst_52 = arith.constant dense<0xFF800000> : vector<4xf32>
    %154 = vector.multi_reduction <maximumf>, %153, %cst_52 [1] : vector<4x4xf32> to vector<4xf32>
    %155 = vector.shape_cast %154 : vector<4xf32> to vector<4x1xf32>
    %156 = vector.broadcast %155 : vector<4x1xf32> to vector<4x4xf32>
    %157 = arith.subf %153, %156 : vector<4x4xf32>
    %158 = math.exp %157 : vector<4x4xf32>
    %cst_53 = arith.constant dense<0.000000e+00> : vector<4xf32>
    %159 = vector.multi_reduction <add>, %158, %cst_53 [1] : vector<4x4xf32> to vector<4xf32>
    %160 = vector.shape_cast %159 : vector<4xf32> to vector<4x1xf32>
    %161 = tpu.reciprocal %160 {approx = true} : vector<4x1xf32> -> vector<4x1xf32>
    %162 = vector.broadcast %161 : vector<4x1xf32> to vector<4x4xf32>
    %163 = arith.mulf %158, %162 : vector<4x4xf32>
    %cst_54 = arith.constant dense<0.000000e+00> : vector<4x16xf32>
    %164 = tpu.matmul %163, %150, %cst_54 {dimension_numbers = #tpu.dot_dimension_numbers<[1], [0], [0], [1], [0, 0, 1, 1], [], []>} : vector<4x4xf32>, vector<4x16xf32>, vector<4x16xf32> -> vector<4x16xf32>
    %165 = tpu.concatenate %45, %62, %79, %96, %113, %130, %147, %164 in 1 : vector<4x16xf32>, vector<4x16xf32>, vector<4x16xf32>, vector<4x16xf32>, vector<4x16xf32>, vector<4x16xf32>, vector<4x16xf32>, vector<4x16xf32> -> vector<4x128xf32>
    %c0_55 = arith.constant 0 : index
    %c0_56 = arith.constant 0 : index
    %166 = vector.load %arg6[%c0_55, %c0_56] : memref<128x128xf32, #tpu.memory_space<vmem>>, vector<128x128xf32>
    %cst_57 = arith.constant dense<0.000000e+00> : vector<4x128xf32>
    %167 = tpu.matmul %165, %166, %cst_57 {dimension_numbers = #tpu.dot_dimension_numbers<[1], [0], [0], [1], [0, 0, 1, 1], [], []>} : vector<4x128xf32>, vector<128x128xf32>, vector<4x128xf32> -> vector<4x128xf32>
    %c0_58 = arith.constant 0 : index
    %c0_59 = arith.constant 0 : index
    %168 = vector.load %arg7[%c0_58, %c0_59] : memref<1x128xf32, #tpu.memory_space<vmem>>, vector<1x128xf32>
    %169 = vector.broadcast %168 : vector<1x128xf32> to vector<4x128xf32>
    %170 = arith.addf %167, %169 : vector<4x128xf32>
    %171 = arith.addf %170, %1 : vector<4x128xf32>
    %c0_60 = arith.constant 0 : index
    %c0_61 = arith.constant 0 : index
    %172 = vector.load %arg8[%c0_60, %c0_61] : memref<1x128xf32, #tpu.memory_space<vmem>>, vector<1x128xf32>
    %c0_62 = arith.constant 0 : index
    %c0_63 = arith.constant 0 : index
    %173 = vector.load %arg9[%c0_62, %c0_63] : memref<1x128xf32, #tpu.memory_space<vmem>>, vector<1x128xf32>
    %cst_64 = arith.constant dense<0.000000e+00> : vector<4xf32>
    %174 = vector.multi_reduction <add>, %171, %cst_64 [1] : vector<4x128xf32> to vector<4xf32>
    %175 = vector.shape_cast %174 : vector<4xf32> to vector<4x1xf32>
    %cst_65 = arith.constant 1.280000e+02 : f32
    %176 = vector.broadcast %cst_65 : f32 to vector<4x1xf32>
    %177 = arith.divf %175, %176 : vector<4x1xf32>
    %178 = vector.broadcast %177 : vector<4x1xf32> to vector<4x128xf32>
    %179 = arith.subf %171, %178 : vector<4x128xf32>
    %180 = arith.mulf %179, %179 : vector<4x128xf32>
    %cst_66 = arith.constant dense<0.000000e+00> : vector<4xf32>
    %181 = vector.multi_reduction <add>, %180, %cst_66 [1] : vector<4x128xf32> to vector<4xf32>
    %182 = vector.shape_cast %181 : vector<4xf32> to vector<4x1xf32>
    %cst_67 = arith.constant 1.280000e+02 : f32
    %183 = vector.broadcast %cst_67 : f32 to vector<4x1xf32>
    %184 = arith.divf %182, %183 : vector<4x1xf32>
    %cst_68 = arith.constant 9.99999974E-6 : f32
    %185 = vector.broadcast %cst_68 : f32 to vector<4x1xf32>
    %186 = arith.addf %184, %185 : vector<4x1xf32>
    %187 = math.rsqrt %186 : vector<4x1xf32>
    %188 = vector.broadcast %187 : vector<4x1xf32> to vector<4x128xf32>
    %189 = arith.mulf %179, %188 : vector<4x128xf32>
    %190 = vector.broadcast %172 : vector<1x128xf32> to vector<4x128xf32>
    %191 = arith.mulf %189, %190 : vector<4x128xf32>
    %192 = vector.broadcast %173 : vector<1x128xf32> to vector<4x128xf32>
    %193 = arith.addf %191, %192 : vector<4x128xf32>
    %c0_69 = arith.constant 0 : index
    %c0_70 = arith.constant 0 : index
    %194 = vector.load %arg10[%c0_69, %c0_70] : memref<128x512xf32, #tpu.memory_space<vmem>>, vector<128x512xf32>
    %cst_71 = arith.constant dense<0.000000e+00> : vector<4x512xf32>
    %195 = tpu.matmul %193, %194, %cst_71 {dimension_numbers = #tpu.dot_dimension_numbers<[1], [0], [0], [1], [0, 0, 1, 1], [], []>} : vector<4x128xf32>, vector<128x512xf32>, vector<4x512xf32> -> vector<4x512xf32>
    %c0_72 = arith.constant 0 : index
    %c0_73 = arith.constant 0 : index
    %196 = vector.load %arg11[%c0_72, %c0_73] : memref<1x512xf32, #tpu.memory_space<vmem>>, vector<1x512xf32>
    %197 = vector.broadcast %196 : vector<1x512xf32> to vector<4x512xf32>
    %198 = arith.addf %195, %197 : vector<4x512xf32>
    %cst_74 = arith.constant 5.000000e-01 : f32
    %199 = vector.broadcast %cst_74 : f32 to vector<4x512xf32>
    %200 = arith.mulf %199, %198 : vector<4x512xf32>
    %cst_75 = arith.constant 1.41421354 : f32
    %201 = vector.broadcast %cst_75 : f32 to vector<4x512xf32>
    %202 = arith.divf %198, %201 : vector<4x512xf32>
    %cst_76 = arith.constant 0.000000e+00 : f32
    %203 = vector.broadcast %cst_76 : f32 to vector<4x512xf32>
    %204 = arith.cmpf oge, %202, %203 : vector<4x512xf32>
    %cst_77 = arith.constant 1.000000e+00 : f32
    %cst_78 = arith.constant -1.000000e+00 : f32
    %205 = vector.broadcast %cst_77 : f32 to vector<4x512xf32>
    %206 = vector.broadcast %cst_78 : f32 to vector<4x512xf32>
    %207 = arith.select %204, %205, %206 : vector<4x512xi1>, vector<4x512xf32>
    %208 = math.absf %202 : vector<4x512xf32>
    %cst_79 = arith.constant 0.327591091 : f32
    %209 = vector.broadcast %cst_79 : f32 to vector<4x512xf32>
    %210 = arith.mulf %209, %208 : vector<4x512xf32>
    %cst_80 = arith.constant 1.000000e+00 : f32
    %211 = vector.broadcast %cst_80 : f32 to vector<4x512xf32>
    %212 = arith.addf %211, %210 : vector<4x512xf32>
    %cst_81 = arith.constant 1.000000e+00 : f32
    %213 = vector.broadcast %cst_81 : f32 to vector<4x512xf32>
    %214 = arith.divf %213, %212 : vector<4x512xf32>
    %cst_82 = arith.constant 1.06140542 : f32
    %215 = vector.broadcast %cst_82 : f32 to vector<4x512xf32>
    %216 = arith.mulf %215, %214 : vector<4x512xf32>
    %cst_83 = arith.constant -1.45315206 : f32
    %217 = vector.broadcast %cst_83 : f32 to vector<4x512xf32>
    %218 = arith.addf %216, %217 : vector<4x512xf32>
    %219 = arith.mulf %218, %214 : vector<4x512xf32>
    %cst_84 = arith.constant 1.42141378 : f32
    %220 = vector.broadcast %cst_84 : f32 to vector<4x512xf32>
    %221 = arith.addf %219, %220 : vector<4x512xf32>
    %222 = arith.mulf %221, %214 : vector<4x512xf32>
    %cst_85 = arith.constant -0.284496725 : f32
    %223 = vector.broadcast %cst_85 : f32 to vector<4x512xf32>
    %224 = arith.addf %222, %223 : vector<4x512xf32>
    %225 = arith.mulf %224, %214 : vector<4x512xf32>
    %cst_86 = arith.constant 0.254829586 : f32
    %226 = vector.broadcast %cst_86 : f32 to vector<4x512xf32>
    %227 = arith.addf %225, %226 : vector<4x512xf32>
    %228 = arith.mulf %227, %214 : vector<4x512xf32>
    %cst_87 = arith.constant 0.000000e+00 : f32
    %229 = vector.broadcast %cst_87 : f32 to vector<4x512xf32>
    %230 = arith.subf %229, %208 : vector<4x512xf32>
    %231 = arith.mulf %230, %208 : vector<4x512xf32>
    %232 = math.exp %231 : vector<4x512xf32>
    %233 = arith.mulf %228, %232 : vector<4x512xf32>
    %cst_88 = arith.constant 1.000000e+00 : f32
    %234 = vector.broadcast %cst_88 : f32 to vector<4x512xf32>
    %235 = arith.subf %234, %233 : vector<4x512xf32>
    %236 = arith.mulf %207, %235 : vector<4x512xf32>
    %cst_89 = arith.constant 1.000000e+00 : f32
    %237 = vector.broadcast %cst_89 : f32 to vector<4x512xf32>
    %238 = arith.addf %237, %236 : vector<4x512xf32>
    %239 = arith.mulf %200, %238 : vector<4x512xf32>
    %c0_90 = arith.constant 0 : index
    %c0_91 = arith.constant 0 : index
    %240 = vector.load %arg12[%c0_90, %c0_91] : memref<512x128xf32, #tpu.memory_space<vmem>>, vector<512x128xf32>
    %cst_92 = arith.constant dense<0.000000e+00> : vector<4x128xf32>
    %241 = tpu.matmul %239, %240, %cst_92 {dimension_numbers = #tpu.dot_dimension_numbers<[1], [0], [0], [1], [0, 0, 1, 1], [], []>} : vector<4x512xf32>, vector<512x128xf32>, vector<4x128xf32> -> vector<4x128xf32>
    %c0_93 = arith.constant 0 : index
    %c0_94 = arith.constant 0 : index
    %242 = vector.load %arg13[%c0_93, %c0_94] : memref<1x128xf32, #tpu.memory_space<vmem>>, vector<1x128xf32>
    %243 = vector.broadcast %242 : vector<1x128xf32> to vector<4x128xf32>
    %244 = arith.addf %241, %243 : vector<4x128xf32>
    %245 = arith.addf %244, %171 : vector<4x128xf32>
    %c0_95 = arith.constant 0 : index
    %c0_96 = arith.constant 0 : index
    %c0_97 = arith.constant 0 : index
    %246 = vector.load %arg14[%c0_95, %c0_96, %c0_97] : memref<1x4x128xf32, #tpu.memory_space<vmem>>, vector<1x4x128xf32>
    %247 = vector.shape_cast %246 : vector<1x4x128xf32> to vector<4x128xf32>
    %248 = vector.shape_cast %245 : vector<4x128xf32> to vector<1x4x128xf32>
    tpu.vector_store %arg14[%c0_95, %c0_96, %c0_97], %248 {strides = array<i32>} : memref<1x4x128xf32, #tpu.memory_space<vmem>>, vector<1x4x128xf32>,
    return
  }
  func.func @transform_0(%arg0: i32) -> (i32, i32, i32) {
    %c0_i32 = arith.constant 0 : i32
    %c0_i32_0 = arith.constant 0 : i32
    %c0_i32_1 = arith.constant 0 : i32
    return %arg0, %c0_i32, %c0_i32_0 : i32, i32, i32
  }
  func.func @transform_1(%arg0: i32) -> (i32, i32) {
    %c0_i32 = arith.constant 0 : i32
    %c0_i32_0 = arith.constant 0 : i32
    %c0_i32_1 = arith.constant 0 : i32
    return %c0_i32, %c0_i32_0 : i32, i32
  }
  func.func @transform_2(%arg0: i32) -> (i32, i32) {
    %c0_i32 = arith.constant 0 : i32
    %c0_i32_0 = arith.constant 0 : i32
    %c0_i32_1 = arith.constant 0 : i32
    return %c0_i32, %c0_i32_0 : i32, i32
  }
  func.func @transform_3(%arg0: i32) -> (i32, i32) {
    %c0_i32 = arith.constant 0 : i32
    %c0_i32_0 = arith.constant 0 : i32
    %c0_i32_1 = arith.constant 0 : i32
    return %c0_i32, %c0_i32_0 : i32, i32
  }
  func.func @transform_4(%arg0: i32) -> (i32, i32) {
    %c0_i32 = arith.constant 0 : i32
    %c0_i32_0 = arith.constant 0 : i32
    %c0_i32_1 = arith.constant 0 : i32
    return %c0_i32, %c0_i32_0 : i32, i32
  }
  func.func @transform_5(%arg0: i32) -> (i32, i32) {
    %c0_i32 = arith.constant 0 : i32
    %c0_i32_0 = arith.constant 0 : i32
    %c0_i32_1 = arith.constant 0 : i32
    return %c0_i32, %c0_i32_0 : i32, i32
  }
  func.func @transform_6(%arg0: i32) -> (i32, i32) {
    %c0_i32 = arith.constant 0 : i32
    %c0_i32_0 = arith.constant 0 : i32
    %c0_i32_1 = arith.constant 0 : i32
    return %c0_i32, %c0_i32_0 : i32, i32
  }
  func.func @transform_7(%arg0: i32) -> (i32, i32) {
    %c0_i32 = arith.constant 0 : i32
    %c0_i32_0 = arith.constant 0 : i32
    %c0_i32_1 = arith.constant 0 : i32
    return %c0_i32, %c0_i32_0 : i32, i32
  }
  func.func @transform_8(%arg0: i32) -> (i32, i32) {
    %c0_i32 = arith.constant 0 : i32
    %c0_i32_0 = arith.constant 0 : i32
    %c0_i32_1 = arith.constant 0 : i32
    return %c0_i32, %c0_i32_0 : i32, i32
  }
  func.func @transform_9(%arg0: i32) -> (i32, i32) {
    %c0_i32 = arith.constant 0 : i32
    %c0_i32_0 = arith.constant 0 : i32
    %c0_i32_1 = arith.constant 0 : i32
    return %c0_i32, %c0_i32_0 : i32, i32
  }
  func.func @transform_10(%arg0: i32) -> (i32, i32) {
    %c0_i32 = arith.constant 0 : i32
    %c0_i32_0 = arith.constant 0 : i32
    %c0_i32_1 = arith.constant 0 : i32
    return %c0_i32, %c0_i32_0 : i32, i32
  }
  func.func @transform_11(%arg0: i32) -> (i32, i32) {
    %c0_i32 = arith.constant 0 : i32
    %c0_i32_0 = arith.constant 0 : i32
    %c0_i32_1 = arith.constant 0 : i32
    return %c0_i32, %c0_i32_0 : i32, i32
  }
  func.func @transform_12(%arg0: i32) -> (i32, i32) {
    %c0_i32 = arith.constant 0 : i32
    %c0_i32_0 = arith.constant 0 : i32
    %c0_i32_1 = arith.constant 0 : i32
    return %c0_i32, %c0_i32_0 : i32, i32
  }
  func.func @transform_13(%arg0: i32) -> (i32, i32, i32) {
    %c0_i32 = arith.constant 0 : i32
    %c0_i32_0 = arith.constant 0 : i32
    %c0_i32_1 = arith.constant 0 : i32
    return %arg0, %c0_i32, %c0_i32_0 : i32, i32, i32
  }
}

module attributes {stable_mosaic.version = 11 : i64} {
  func.func @kernel(%arg0: i32, %arg1: memref<1x5x256xf32, #tpu.memory_space<vmem>>, %arg2: memref<3x256x64xf32, #tpu.memory_space<vmem>>, %arg3: memref<1x64xf32, #tpu.memory_space<vmem>>, %arg4: memref<1x4x128xf32, #tpu.memory_space<vmem>>) attributes {dimension_semantics = [#tpu.dimension_semantics<parallel>], iteration_bounds = array<i64: 2>, scalar_prefetch = 0 : i64, scratch_operands = 0 : i64, tpu.core_type = #tpu.core_type<tc>, window_params = [{transform_indices = @transform_0, window_bounds = array<i64: 1, 5, 256>}, {pipeline_mode = #tpu.pipeline_mode<synchronous>, transform_indices = @transform_1, window_bounds = array<i64: 3, 256, 64>}, {pipeline_mode = #tpu.pipeline_mode<synchronous>, transform_indices = @transform_2, window_bounds = array<i64: 1, 64>}, {transform_indices = @transform_3, window_bounds = array<i64: 1, 4, 128>}]} {
    %c0 = arith.constant 0 : index
    %c0_0 = arith.constant 0 : index
    %c0_1 = arith.constant 0 : index
    %0 = vector.load %arg1[%c0, %c0_0, %c0_1] : memref<1x5x256xf32, #tpu.memory_space<vmem>>, vector<1x5x256xf32>
    %1 = vector.shape_cast %0 : vector<1x5x256xf32> to vector<5x256xf32>
    %2 = vector.extract_strided_slice %1 {offsets = [0, 0], sizes = [4, 256], strides = [1, 1]} : vector<5x256xf32> to vector<4x256xf32>
    %3 = vector.extract_strided_slice %1 {offsets = [1, 0], sizes = [4, 256], strides = [1, 1]} : vector<5x256xf32> to vector<4x256xf32>
    %c0_2 = arith.constant 0 : index
    %c0_3 = arith.constant 0 : index
    %4 = vector.load %arg3[%c0_2, %c0_3] : memref<1x64xf32, #tpu.memory_space<vmem>>, vector<1x64xf32>
    %c1 = arith.constant 1 : index
    %c0_4 = arith.constant 0 : index
    %c0_5 = arith.constant 0 : index
    %5 = vector.load %arg2[%c1, %c0_4, %c0_5] : memref<3x256x64xf32, #tpu.memory_space<vmem>>, vector<1x256x64xf32>
    %6 = vector.shape_cast %5 : vector<1x256x64xf32> to vector<256x64xf32>
    %cst = arith.constant dense<0.000000e+00> : vector<4x64xf32>
    %7 = tpu.matmul %2, %6, %cst {dimension_numbers = #tpu.dot_dimension_numbers<[1], [0], [0], [1], [0, 0, 1, 1], [], []>} : vector<4x256xf32>, vector<256x64xf32>, vector<4x64xf32> -> vector<4x64xf32>
    %8 = vector.broadcast %4 : vector<1x64xf32> to vector<4x64xf32>
    %9 = arith.addf %7, %8 : vector<4x64xf32>
    %c0_6 = arith.constant 0 : index
    %c0_7 = arith.constant 0 : index
    %c0_8 = arith.constant 0 : index
    %10 = vector.load %arg2[%c0_6, %c0_7, %c0_8] : memref<3x256x64xf32, #tpu.memory_space<vmem>>, vector<1x256x64xf32>
    %11 = vector.shape_cast %10 : vector<1x256x64xf32> to vector<256x64xf32>
    %cst_9 = arith.constant dense<0.000000e+00> : vector<4x64xf32>
    %12 = tpu.matmul %3, %11, %cst_9 {dimension_numbers = #tpu.dot_dimension_numbers<[1], [0], [0], [1], [0, 0, 1, 1], [], []>} : vector<4x256xf32>, vector<256x64xf32>, vector<4x64xf32> -> vector<4x64xf32>
    %c2 = arith.constant 2 : index
    %c0_10 = arith.constant 0 : index
    %c0_11 = arith.constant 0 : index
    %13 = vector.load %arg2[%c2, %c0_10, %c0_11] : memref<3x256x64xf32, #tpu.memory_space<vmem>>, vector<1x256x64xf32>
    %14 = vector.shape_cast %13 : vector<1x256x64xf32> to vector<256x64xf32>
    %cst_12 = arith.constant dense<0.000000e+00> : vector<4x64xf32>
    %15 = tpu.matmul %2, %14, %cst_12 {dimension_numbers = #tpu.dot_dimension_numbers<[1], [0], [0], [1], [0, 0, 1, 1], [], []>} : vector<4x256xf32>, vector<256x64xf32>, vector<4x64xf32> -> vector<4x64xf32>
    %16 = arith.addf %12, %15 : vector<4x64xf32>
    %17 = vector.broadcast %4 : vector<1x64xf32> to vector<4x64xf32>
    %18 = arith.addf %16, %17 : vector<4x64xf32>
    %cst_13 = arith.constant 0.000000e+00 : f32
    %19 = vector.broadcast %cst_13 : f32 to vector<4x64xf32>
    %20 = arith.subf %19, %9 : vector<4x64xf32>
    %21 = math.exp %20 : vector<4x64xf32>
    %cst_14 = arith.constant 1.000000e+00 : f32
    %22 = vector.broadcast %cst_14 : f32 to vector<4x64xf32>
    %23 = arith.addf %22, %21 : vector<4x64xf32>
    %cst_15 = arith.constant 1.000000e+00 : f32
    %24 = vector.broadcast %cst_15 : f32 to vector<4x64xf32>
    %25 = arith.divf %24, %23 : vector<4x64xf32>
    %26 = arith.mulf %9, %25 : vector<4x64xf32>
    %cst_16 = arith.constant 0.000000e+00 : f32
    %27 = vector.broadcast %cst_16 : f32 to vector<4x64xf32>
    %28 = arith.subf %27, %18 : vector<4x64xf32>
    %29 = math.exp %28 : vector<4x64xf32>
    %cst_17 = arith.constant 1.000000e+00 : f32
    %30 = vector.broadcast %cst_17 : f32 to vector<4x64xf32>
    %31 = arith.addf %30, %29 : vector<4x64xf32>
    %cst_18 = arith.constant 1.000000e+00 : f32
    %32 = vector.broadcast %cst_18 : f32 to vector<4x64xf32>
    %33 = arith.divf %32, %31 : vector<4x64xf32>
    %34 = arith.mulf %18, %33 : vector<4x64xf32>
    %35 = tpu.concatenate %26, %34 in 1 : vector<4x64xf32>, vector<4x64xf32> -> vector<4x128xf32>
    %c0_19 = arith.constant 0 : index
    %c0_20 = arith.constant 0 : index
    %c0_21 = arith.constant 0 : index
    %36 = vector.load %arg4[%c0_19, %c0_20, %c0_21] : memref<1x4x128xf32, #tpu.memory_space<vmem>>, vector<1x4x128xf32>
    %37 = vector.shape_cast %36 : vector<1x4x128xf32> to vector<4x128xf32>
    %38 = vector.shape_cast %35 : vector<4x128xf32> to vector<1x4x128xf32>
    tpu.vector_store %arg4[%c0_19, %c0_20, %c0_21], %38 {strides = array<i32>} : memref<1x4x128xf32, #tpu.memory_space<vmem>>, vector<1x4x128xf32>,
    return
  }
  func.func @transform_0(%arg0: i32) -> (i32, i32, i32) {
    %c0_i32 = arith.constant 0 : i32
    %c0_i32_0 = arith.constant 0 : i32
    %c0_i32_1 = arith.constant 0 : i32
    return %arg0, %c0_i32, %c0_i32_0 : i32, i32, i32
  }
  func.func @transform_1(%arg0: i32) -> (i32, i32, i32) {
    %c0_i32 = arith.constant 0 : i32
    %c0_i32_0 = arith.constant 0 : i32
    %c0_i32_1 = arith.constant 0 : i32
    %c0_i32_2 = arith.constant 0 : i32
    return %c0_i32, %c0_i32_0, %c0_i32_1 : i32, i32, i32
  }
  func.func @transform_2(%arg0: i32) -> (i32, i32) {
    %c0_i32 = arith.constant 0 : i32
    %c0_i32_0 = arith.constant 0 : i32
    %c0_i32_1 = arith.constant 0 : i32
    return %c0_i32, %c0_i32_0 : i32, i32
  }
  func.func @transform_3(%arg0: i32) -> (i32, i32, i32) {
    %c0_i32 = arith.constant 0 : i32
    %c0_i32_0 = arith.constant 0 : i32
    %c0_i32_1 = arith.constant 0 : i32
    return %arg0, %c0_i32, %c0_i32_0 : i32, i32, i32
  }
}

module attributes {stable_mosaic.version = 11 : i64} {
  func.func @kernel(%arg0: i32, %arg1: memref<1x9x128xf32, #tpu.memory_space<vmem>>, %arg2: memref<3x128x32xf32, #tpu.memory_space<vmem>>, %arg3: memref<1x32xf32, #tpu.memory_space<vmem>>, %arg4: memref<1x8x64xf32, #tpu.memory_space<vmem>>) attributes {dimension_semantics = [#tpu.dimension_semantics<parallel>], iteration_bounds = array<i64: 2>, scalar_prefetch = 0 : i64, scratch_operands = 0 : i64, tpu.core_type = #tpu.core_type<tc>, window_params = [{transform_indices = @transform_0, window_bounds = array<i64: 1, 9, 128>}, {pipeline_mode = #tpu.pipeline_mode<synchronous>, transform_indices = @transform_1, window_bounds = array<i64: 3, 128, 32>}, {pipeline_mode = #tpu.pipeline_mode<synchronous>, transform_indices = @transform_2, window_bounds = array<i64: 1, 32>}, {transform_indices = @transform_3, window_bounds = array<i64: 1, 8, 64>}]} {
    %c0 = arith.constant 0 : index
    %c0_0 = arith.constant 0 : index
    %c0_1 = arith.constant 0 : index
    %0 = vector.load %arg1[%c0, %c0_0, %c0_1] : memref<1x9x128xf32, #tpu.memory_space<vmem>>, vector<1x9x128xf32>
    %1 = vector.shape_cast %0 : vector<1x9x128xf32> to vector<9x128xf32>
    %2 = vector.extract_strided_slice %1 {offsets = [0, 0], sizes = [8, 128], strides = [1, 1]} : vector<9x128xf32> to vector<8x128xf32>
    %3 = vector.extract_strided_slice %1 {offsets = [1, 0], sizes = [8, 128], strides = [1, 1]} : vector<9x128xf32> to vector<8x128xf32>
    %c0_2 = arith.constant 0 : index
    %c0_3 = arith.constant 0 : index
    %4 = vector.load %arg3[%c0_2, %c0_3] : memref<1x32xf32, #tpu.memory_space<vmem>>, vector<1x32xf32>
    %c1 = arith.constant 1 : index
    %c0_4 = arith.constant 0 : index
    %c0_5 = arith.constant 0 : index
    %5 = vector.load %arg2[%c1, %c0_4, %c0_5] : memref<3x128x32xf32, #tpu.memory_space<vmem>>, vector<1x128x32xf32>
    %6 = vector.shape_cast %5 : vector<1x128x32xf32> to vector<128x32xf32>
    %cst = arith.constant dense<0.000000e+00> : vector<8x32xf32>
    %7 = tpu.matmul %2, %6, %cst {dimension_numbers = #tpu.dot_dimension_numbers<[1], [0], [0], [1], [0, 0, 1, 1], [], []>} : vector<8x128xf32>, vector<128x32xf32>, vector<8x32xf32> -> vector<8x32xf32>
    %8 = vector.broadcast %4 : vector<1x32xf32> to vector<8x32xf32>
    %9 = arith.addf %7, %8 : vector<8x32xf32>
    %c0_6 = arith.constant 0 : index
    %c0_7 = arith.constant 0 : index
    %c0_8 = arith.constant 0 : index
    %10 = vector.load %arg2[%c0_6, %c0_7, %c0_8] : memref<3x128x32xf32, #tpu.memory_space<vmem>>, vector<1x128x32xf32>
    %11 = vector.shape_cast %10 : vector<1x128x32xf32> to vector<128x32xf32>
    %cst_9 = arith.constant dense<0.000000e+00> : vector<8x32xf32>
    %12 = tpu.matmul %3, %11, %cst_9 {dimension_numbers = #tpu.dot_dimension_numbers<[1], [0], [0], [1], [0, 0, 1, 1], [], []>} : vector<8x128xf32>, vector<128x32xf32>, vector<8x32xf32> -> vector<8x32xf32>
    %c2 = arith.constant 2 : index
    %c0_10 = arith.constant 0 : index
    %c0_11 = arith.constant 0 : index
    %13 = vector.load %arg2[%c2, %c0_10, %c0_11] : memref<3x128x32xf32, #tpu.memory_space<vmem>>, vector<1x128x32xf32>
    %14 = vector.shape_cast %13 : vector<1x128x32xf32> to vector<128x32xf32>
    %cst_12 = arith.constant dense<0.000000e+00> : vector<8x32xf32>
    %15 = tpu.matmul %2, %14, %cst_12 {dimension_numbers = #tpu.dot_dimension_numbers<[1], [0], [0], [1], [0, 0, 1, 1], [], []>} : vector<8x128xf32>, vector<128x32xf32>, vector<8x32xf32> -> vector<8x32xf32>
    %16 = arith.addf %12, %15 : vector<8x32xf32>
    %17 = vector.broadcast %4 : vector<1x32xf32> to vector<8x32xf32>
    %18 = arith.addf %16, %17 : vector<8x32xf32>
    %cst_13 = arith.constant 0.000000e+00 : f32
    %19 = vector.broadcast %cst_13 : f32 to vector<8x32xf32>
    %20 = arith.subf %19, %9 : vector<8x32xf32>
    %21 = math.exp %20 : vector<8x32xf32>
    %cst_14 = arith.constant 1.000000e+00 : f32
    %22 = vector.broadcast %cst_14 : f32 to vector<8x32xf32>
    %23 = arith.addf %22, %21 : vector<8x32xf32>
    %cst_15 = arith.constant 1.000000e+00 : f32
    %24 = vector.broadcast %cst_15 : f32 to vector<8x32xf32>
    %25 = arith.divf %24, %23 : vector<8x32xf32>
    %26 = arith.mulf %9, %25 : vector<8x32xf32>
    %cst_16 = arith.constant 0.000000e+00 : f32
    %27 = vector.broadcast %cst_16 : f32 to vector<8x32xf32>
    %28 = arith.subf %27, %18 : vector<8x32xf32>
    %29 = math.exp %28 : vector<8x32xf32>
    %cst_17 = arith.constant 1.000000e+00 : f32
    %30 = vector.broadcast %cst_17 : f32 to vector<8x32xf32>
    %31 = arith.addf %30, %29 : vector<8x32xf32>
    %cst_18 = arith.constant 1.000000e+00 : f32
    %32 = vector.broadcast %cst_18 : f32 to vector<8x32xf32>
    %33 = arith.divf %32, %31 : vector<8x32xf32>
    %34 = arith.mulf %18, %33 : vector<8x32xf32>
    %35 = tpu.concatenate %26, %34 in 1 : vector<8x32xf32>, vector<8x32xf32> -> vector<8x64xf32>
    %c0_19 = arith.constant 0 : index
    %c0_20 = arith.constant 0 : index
    %c0_21 = arith.constant 0 : index
    %36 = vector.load %arg4[%c0_19, %c0_20, %c0_21] : memref<1x8x64xf32, #tpu.memory_space<vmem>>, vector<1x8x64xf32>
    %37 = vector.shape_cast %36 : vector<1x8x64xf32> to vector<8x64xf32>
    %38 = vector.shape_cast %35 : vector<8x64xf32> to vector<1x8x64xf32>
    tpu.vector_store %arg4[%c0_19, %c0_20, %c0_21], %38 {strides = array<i32>} : memref<1x8x64xf32, #tpu.memory_space<vmem>>, vector<1x8x64xf32>,
    return
  }
  func.func @transform_0(%arg0: i32) -> (i32, i32, i32) {
    %c0_i32 = arith.constant 0 : i32
    %c0_i32_0 = arith.constant 0 : i32
    %c0_i32_1 = arith.constant 0 : i32
    return %arg0, %c0_i32, %c0_i32_0 : i32, i32, i32
  }
  func.func @transform_1(%arg0: i32) -> (i32, i32, i32) {
    %c0_i32 = arith.constant 0 : i32
    %c0_i32_0 = arith.constant 0 : i32
    %c0_i32_1 = arith.constant 0 : i32
    %c0_i32_2 = arith.constant 0 : i32
    return %c0_i32, %c0_i32_0, %c0_i32_1 : i32, i32, i32
  }
  func.func @transform_2(%arg0: i32) -> (i32, i32) {
    %c0_i32 = arith.constant 0 : i32
    %c0_i32_0 = arith.constant 0 : i32
    %c0_i32_1 = arith.constant 0 : i32
    return %c0_i32, %c0_i32_0 : i32, i32
  }
  func.func @transform_3(%arg0: i32) -> (i32, i32, i32) {
    %c0_i32 = arith.constant 0 : i32
    %c0_i32_0 = arith.constant 0 : i32
    %c0_i32_1 = arith.constant 0 : i32
    return %arg0, %c0_i32, %c0_i32_0 : i32, i32, i32
  }
}

module attributes {stable_mosaic.version = 11 : i64} {
  func.func @kernel(%arg0: i32, %arg1: memref<1x16x64xf32, #tpu.memory_space<vmem>>, %arg2: memref<64x32xf32, #tpu.memory_space<vmem>>, %arg3: memref<1x32xf32, #tpu.memory_space<vmem>>, %arg4: memref<1x16x32xf32, #tpu.memory_space<vmem>>) attributes {dimension_semantics = [#tpu.dimension_semantics<parallel>], iteration_bounds = array<i64: 2>, scalar_prefetch = 0 : i64, scratch_operands = 0 : i64, tpu.core_type = #tpu.core_type<tc>, window_params = [{transform_indices = @transform_0, window_bounds = array<i64: 1, 16, 64>}, {pipeline_mode = #tpu.pipeline_mode<synchronous>, transform_indices = @transform_1, window_bounds = array<i64: 64, 32>}, {pipeline_mode = #tpu.pipeline_mode<synchronous>, transform_indices = @transform_2, window_bounds = array<i64: 1, 32>}, {transform_indices = @transform_3, window_bounds = array<i64: 1, 16, 32>}]} {
    %c0 = arith.constant 0 : index
    %c0_0 = arith.constant 0 : index
    %c0_1 = arith.constant 0 : index
    %0 = vector.load %arg1[%c0, %c0_0, %c0_1] : memref<1x16x64xf32, #tpu.memory_space<vmem>>, vector<1x16x64xf32>
    %1 = vector.shape_cast %0 : vector<1x16x64xf32> to vector<16x64xf32>
    %c0_2 = arith.constant 0 : index
    %c0_3 = arith.constant 0 : index
    %2 = vector.load %arg2[%c0_2, %c0_3] : memref<64x32xf32, #tpu.memory_space<vmem>>, vector<64x32xf32>
    %cst = arith.constant dense<0.000000e+00> : vector<16x32xf32>
    %3 = tpu.matmul %1, %2, %cst {dimension_numbers = #tpu.dot_dimension_numbers<[1], [0], [0], [1], [0, 0, 1, 1], [], []>} : vector<16x64xf32>, vector<64x32xf32>, vector<16x32xf32> -> vector<16x32xf32>
    %c0_4 = arith.constant 0 : index
    %c0_5 = arith.constant 0 : index
    %4 = vector.load %arg3[%c0_4, %c0_5] : memref<1x32xf32, #tpu.memory_space<vmem>>, vector<1x32xf32>
    %5 = vector.broadcast %4 : vector<1x32xf32> to vector<16x32xf32>
    %6 = arith.addf %3, %5 : vector<16x32xf32>
    %c0_6 = arith.constant 0 : index
    %c0_7 = arith.constant 0 : index
    %c0_8 = arith.constant 0 : index
    %7 = vector.load %arg4[%c0_6, %c0_7, %c0_8] : memref<1x16x32xf32, #tpu.memory_space<vmem>>, vector<1x16x32xf32>
    %8 = vector.shape_cast %7 : vector<1x16x32xf32> to vector<16x32xf32>
    %9 = vector.shape_cast %6 : vector<16x32xf32> to vector<1x16x32xf32>
    tpu.vector_store %arg4[%c0_6, %c0_7, %c0_8], %9 {strides = array<i32>} : memref<1x16x32xf32, #tpu.memory_space<vmem>>, vector<1x16x32xf32>,
    return
  }
  func.func @transform_0(%arg0: i32) -> (i32, i32, i32) {
    %c0_i32 = arith.constant 0 : i32
    %c0_i32_0 = arith.constant 0 : i32
    %c0_i32_1 = arith.constant 0 : i32
    return %arg0, %c0_i32, %c0_i32_0 : i32, i32, i32
  }
  func.func @transform_1(%arg0: i32) -> (i32, i32) {
    %c0_i32 = arith.constant 0 : i32
    %c0_i32_0 = arith.constant 0 : i32
    %c0_i32_1 = arith.constant 0 : i32
    return %c0_i32, %c0_i32_0 : i32, i32
  }
  func.func @transform_2(%arg0: i32) -> (i32, i32) {
    %c0_i32 = arith.constant 0 : i32
    %c0_i32_0 = arith.constant 0 : i32
    %c0_i32_1 = arith.constant 0 : i32
    return %c0_i32, %c0_i32_0 : i32, i32
  }
  func.func @transform_3(%arg0: i32) -> (i32, i32, i32) {
    %c0_i32 = arith.constant 0 : i32
    %c0_i32_0 = arith.constant 0 : i32
    %c0_i32_1 = arith.constant 0 : i32
    return %arg0, %c0_i32, %c0_i32_0 : i32, i32, i32
  }
}

</mosaic_0001>

<bundles_post_ra>
// kernel: _lambda_.10
= control target key start
LH: loop header
LB: loop body
LE: loop exit
PB: predicated region body
PF: predicated region fallthrough
CT: control target
= control target key end

     0   :  { %10 = vsyncpa [#allocation3], 0  ;;  %s236_s0 = inlined_call_operand.vmem [shape: f32[2,1], index: 0, kind: input, shape index: {}]   ;;  %s237_s1 = inlined_call_operand.vmem [shape: f32[1,8], index: 1, kind: input, shape index: {}]   ;;  %s238_s2 = inlined_call_operand.vmem [shape: f32[1,8], index: 2, kind: input, shape index: {}]   ;;  %s239_s3 = inlined_call_operand.hbm [shape: f32[8,32], index: 3, kind: input, shape index: {}]   ;;  %s240_s4 = inlined_call_operand.hbm [shape: f32[1,32], index: 4, kind: input, shape index: {}]   ;;  %s241_s5 = inlined_call_operand.vmem [shape: f32[2,32], index: 5, kind: output, shape index: {}]  }
   0x1   :  { %s23_s20 = sshll.u32 %s239_s3, 4  ;;  %s24_s20 = int_to_ptr.hbm [resolvable:$true] %s23_s20 }
   0x2   :  { %11 = vsyncpa [#allocation5], 0  ;;  %s185_s21 = smov [#allocation2]   ;;  %s34_s25 = sshll.u32 %s240_s4, 4  ;;  %s35_s25 = int_to_ptr.hbm [resolvable:$true] %s34_s25 }
   0x3   :  { %s25_s22 = sshll.u32 %s185_s21, 4  ;;  %s186_s26 = smov [#allocation4]   ;;  %s26_s22 = int_to_ptr.vmem [resolvable:$true] %s25_s22 }
   0x4   :  { %28 = dma.hbm_to_vmem [thread:$0]  %s24_s20, 128, %s26_s22, [#allocation3]  }
   0x5   :  { %s36_s27 = sshll.u32 %s186_s26, 4  ;;  %s37_s27 = int_to_ptr.vmem [resolvable:$true] %s36_s27 }
   0x6   :  { %39 = dma.hbm_to_vmem [thread:$0]  %s35_s25, 16, %s37_s27, [#allocation5]  }
   0x7   :  { %181 = dma.done.wait [#allocation3], 128  }
   0x8   :  { %182 = vsyncadd [#allocation3], 4294967168 }
   0x9   :  { %183 = dma.done.wait [#allocation5], 16  }
   0xa   :  { %184 = vsyncadd [#allocation5], 4294967280  ;;  %v187_v0 = vmov 0   ;;  %v48_v1 = vld [vmem:[%s236_s0] sm:$0x3]  ;;  %vm89_vm4 = vcmask 64512  }
   0xb   :  { %125 = vset.pattern.permute.xlu0 %v187_v0  ;;  %v84_v2 = vld [vmem:[#allocation2] sm:$0xff]  ;;  %v128_v23 = vld [vmem:[#allocation4] ss:$0 sm:$0xff]  ;;  %vm113_vm5 = vcmask 254976  }
   0xc   :  { %52 = vperm.xlu0 %125, %v48_v1   ;;  %108 = vmatpush.msra.mxu0 %v84_v2  ;;  %v126_v3 = vld [vmem:[%s237_s1] ss:$0 sm:$0xff] }
   0xd   :  { %v127_v4 = vld [vmem:[%s238_s2] ss:$0 sm:$0xff] }
  0x7e   :  { %v53_v5 = vpop.permute.xlu0 %52 }
  0x7f   :  { %v58_v6 = vmul.f32 %v126_v3, %v53_v5 }
  0x81   :  { %v63_v7 = vadd.f32 %v127_v4, %v58_v6 }
  0x83   :  { %v64_v8 = vsub.f32 0.0, %v63_v7 }
  0x85   :  { %v65_v9 = vmul.f32 1.442695, %v64_v8 }
  0x87   :  { %129 = vpow2.f32 %v65_v9 }
  0x8d   :  { %v130_v10 = vpop.eup %129 }
  0x8e   :  { %v67_v11 = vadd.f32 1.0, %v130_v10 }
  0x90   :  { %131 = vrcp.f32 %v67_v11  ;;  %v79_v15 = vand.u32 2147483648, %v67_v11  ;;  %v77_v17 = vand.u32 2147483647, %v67_v11  ;;  %vm73_vm1 = vweird.f32 %v67_v11 }
  0x92   :  { %v80_v19 = vor.u32 1.1754944e-38, %v79_v15  ;;  %vm78_vm3 = vcmp.eq.f32.partialorder %v77_v17, 8.507059e+37 }
  0x96   :  { %v132_v12 = vpop.eup %131 }
  0x97   :  { %v69_v13 = vmul.f32 %v132_v12, %v67_v11  ;;  %vm74_vm0 = vweird.f32 %v132_v12 }
  0x98   :  { %vm75_vm2 = vmor %vm73_vm1, %vm74_vm0 }
  0x99   :  { %v70_v14 = vsub.f32 1.0, %v69_v13 }
  0x9b   :  { %v71_v16 = vmul.f32 %v132_v12, %v70_v14 }
  0x9d   :  { %v72_v18 = vadd.f32 %v132_v12, %v71_v16 }
  0x9f   :  { %v76_v20 = vsel %vm75_vm2, %v132_v12, %v72_v18 }
  0xa0   :  { %v81_v21 = vsel %vm78_vm3, %v80_v19, %v76_v20 }
  0xa1   :  { %v83_v22 = vmul.f32 %v81_v21, %v63_v7 }
  0xa3   :  { %121 = vmatmul.msk.f32.vlgmr.msra.gmra.mxu0 %vm89_vm4, %v83_v22 }
 0x120   :  { %v110_v24 = vpop.f32.mrf.mxu0 }
 0x121   :  { %v111_v25 = vadd.f32 %v128_v23, %v110_v24 }
 0x123   :  { %114 = vst.msk [vmem:[%s241_s5] sm:$0x3] %vm113_vm5, %v111_v25 }
 0x124   :  { %119 = vsyncpa [#allocation3], 1 }
 0x125   :  { %120 = vsyncpa [#allocation5], 1 }

// kernel: _lambda_.12
= control target key start
LH: loop header
LB: loop body
LE: loop exit
PB: predicated region body
PF: predicated region fallthrough
CT: control target
= control target key end

     0   :  { %9 = vsyncpa [#allocation3], 0  ;;  %s764_s0 = inlined_call_operand.vmem [shape: f32[2,9,32], index: 0, kind: input, shape index: {}]   ;;  %s765_s1 = inlined_call_operand.vmem [shape: f32[2,9,32], index: 1, kind: input, shape index: {}]   ;;  %s766_s2 = inlined_call_operand.hbm [shape: f32[3,32,64], index: 2, kind: input, shape index: {}]   ;;  %s767_s3 = inlined_call_operand.hbm [shape: f32[1,64], index: 3, kind: input, shape index: {}]   ;;  %s768_s4 = inlined_call_operand.vmem [shape: f32[2,8,64], index: 4, kind: output, shape index: {}]  }
   0x1   :  { %10 = vsyncpa [#allocation5], 0  ;;  %s713_s15 = smov 0  }
   0x2 LB: > { %s152_s18 = sshll.u32 %s766_s2, 4  ;;  %s544_s19 = sadd.s32 4294967295, %s682_s15   ;;  %s682_s15 = sphi %s713_s15, %s16_s15   ;;  %s153_s18 = int_to_ptr.hbm [resolvable:$true] %s152_s18 }
   0x3   : > { %p546_p0 = scmp.ge.s32.totalorder %s682_s15, 1  ;;  %p141_p1 = scmp.lt.s32.totalorder %s682_s15, 3 }
   0x4   : > { %p583_p2 = scmp.eq.s32.totalorder %s544_s19, 0  ;;  %s684_s21 = smov [#allocation2]  }
   0x5   : > { %p724_p3 = pnand %p546_p0, %p141_p1  ;;  %s154_s22 = sshll.u32 %s684_s21, 4  ;;  %s155_s22 = int_to_ptr.vmem [resolvable:$true] %s154_s22 }
   0x6   : > { %s167_s25 = sshll.u32 %s767_s3, 4  ;;  %s685_s26 = smov [#allocation4]   ;;  %s168_s25 = int_to_ptr.hbm [resolvable:$true] %s167_s25 }
   0x7   : > { %p576_p4 = pneg %p724_p3  ;;  %s169_s27 = sshll.u32 %s685_s26, 4  ;;  %s170_s27 = int_to_ptr.vmem [resolvable:$true] %s169_s27 }
   0x8   : > { %s686_s28 = smov 128   ;;  %s687_s29 = smov 8  }
   0x9   : > { %p577_p5 = pnand %p583_p2, %p576_p4  ;;  %198 = sbr.rel (%p724_p3) target bundleno = 202 (0xca), region = 36 }
   0xb   : > { %579 = dma.hbm_to_vmem [thread:$0]  (!%p577_p5), %s153_s18, 1536, %s155_s22, [#allocation3], %s686_s28, %s686_s28, %s687_s29  }
   0xc   : > { %582 = dma.hbm_to_vmem [thread:$0]  (!%p577_p5), %s168_s25, 16, %s170_s27, [#allocation5]  }
   0xe   : > { %673 = dma.done.wait (%p583_p2), [#allocation3], 1536  }
   0xf   : > { %675 = vsyncadd (%p583_p2), [#allocation3], 4294965760 }
  0x10   : > { %677 = dma.done.wait (%p583_p2), [#allocation5], 16  }
  0x11   : > { %679 = vsyncadd (%p583_p2), [#allocation5], 4294967280  ;;  %p234_p6 = scmp.lt.s32.totalorder %s544_s19, 1  ;;  %v260_v0 = vld [vmem:[#allocation2 + $0x38] sm:$0xff]  ;;  %v259_v3 = vld [vmem:[#allocation2 + $0x30] sm:$0xff]  ;;  %vm267_vm0 = vcmask 261120  }
  0x12   : > { %v255_v1 = vld [vmem:[#allocation2 + $0x18] sm:$0xff]  ;;  %283 = vmatpush.msra.mxu0 %v260_v0  ;;  %v254_v4 = vld [vmem:[#allocation2 + $0x10] sm:$0xff]  ;;  %358 = vmatpush.msra.mxu3 %v260_v0  ;;  %v258_v6 = vld [vmem:[#allocation2 + $0x28] sm:$0xff]  ;;  %vm315_vm1 = vcmask 1046528   ;;  %vm455_vm10 = vcmask 523264  }
  0x13   : > { %s771_s19 = smov (!%p234_p6, %s544_s19), 1  ;;  %v265_v2 = vld [vmem:[#allocation2 + $0x58] sm:$0xff]  ;;  %306 = vmatpush.msra.mxu1 %v255_v1  ;;  %v264_v5 = vld [vmem:[#allocation2 + $0x50] sm:$0xff]  ;;  %v253_v7 = vld [vmem:[#allocation2 + $0x8] sm:$0xff] }
  0x14   : > { %s566_s30 = sshll.u32 %s771_s19, 4  ;;  %333 = vmatpush.msra.mxu2 %v265_v2  ;;  %284 = vmatpush.msra.mxu0 %v259_v3  ;;  %v263_v8 = vld [vmem:[#allocation2 + $0x48] sm:$0xff]  ;;  %v257_v9 = vld [vmem:[#allocation2 + $0x20] sm:$0xff]  ;;  %s557_s11 = sshll.u32 %s771_s19, 3 }
  0x15   : > { %s238_s7 = scalar_lea.vmem %s764_s0, %s566_s30  ;;  %s243_s10 = scalar_lea.vmem %s765_s1, %s566_s30  ;;  %307 = vmatpush.msra.mxu1 %v254_v4  ;;  %359 = vmatpush.msra.mxu3 %v259_v3  ;;  %v252_v10 = vld [vmem:[#allocation2] sm:$0xff] }
  0x16   : > { %334 = vmatpush.msra.mxu2 %v264_v5  ;;  %v248_v11 = vld [vmem:[%s238_s7] sm:$0xff]  ;;  %285 = vmatpush.msra.mxu0 %v258_v6  ;;  %v249_v14 = vld [vmem:[%s238_s7 + $0x8] sm:$0x1]  ;;  %s247_s14 = scalar_lea.vmem %s768_s4, %s557_s11 }
  0x17   : > { %308 = vmatpush.msra.mxu1 %v253_v7  ;;  %v262_v12 = vld [vmem:[#allocation2 + $0x40] sm:$0xff]  ;;  %v316_v15 = vrot.slane %v248_v11, 1  ;;  %360 = vmatpush.msra.mxu3 %v258_v6  ;;  %v317_v16 = vrot.slane %v249_v14, 1  ;;  %v251_v17 = vld [vmem:[%s243_s10 + $0x8] sm:$0x1] }
  0x18   : > { %v250_v13 = vld [vmem:[%s243_s10] sm:$0xff]  ;;  %335 = vmatpush.msra.mxu2 %v263_v8  ;;  %286 = vmatpush.msra.mxu0 %v257_v9  ;;  %v388_v20 = vrot.slane %v251_v17, 1 }
  0x19   : > { %309 = vmatpush.msra.mxu1 %v252_v10  ;;  %558 = vmatmul.msk.f32.vlgmr.msra.gmra.mxu0 %vm267_vm0, %v250_v13  ;;  %v318_v18 = vsel %vm315_vm1, %v316_v15, %v317_v16  ;;  %v387_v19 = vrot.slane %v250_v13, 1  ;;  %v599_v25 = vld [vmem:[#allocation4] ss:$0 sm:$0xff] }
  0x1a   : > { %336 = vmatpush.msra.mxu2 %v262_v12  ;;  %559 = vmatmul.msk.f32.vlgmr.msra.gmra.mxu1 %vm267_vm0, %v248_v11 }
  0x1b   : > { %560 = vmatmul.msk.f32.vlgmr.msra.gmra.mxu2 %vm267_vm0, %v318_v18  ;;  %378 = vmatpush.msrb.mxu0 %v255_v1  ;;  %v389_v21 = vsel %vm315_vm1, %v387_v19, %v388_v20 }
  0x1c   : > { %361 = vmatpush.msra.mxu3 %v257_v9  ;;  %404 = vmatpush.msrb.mxu1 %v265_v2 }
  0x1d   : > { %561 = vmatmul.msk.f32.vlgmr.msra.gmra.mxu3 %vm267_vm0, %v318_v18  ;;  %379 = vmatpush.msrb.mxu0 %v254_v4 }
  0x1e   : > { %405 = vmatpush.msrb.mxu1 %v264_v5 }
  0x1f   : > { %380 = vmatpush.msrb.mxu0 %v253_v7 }
  0x20   : > { %406 = vmatpush.msrb.mxu1 %v263_v8 }
  0x21   : > { %381 = vmatpush.msrb.mxu0 %v252_v10 }
  0x22   : > { %562 = vmatmul.msk.f32.vlgmr.msrb.gmra.mxu0 %vm267_vm0, %v250_v13  ;;  %407 = vmatpush.msrb.mxu1 %v262_v12 }
  0x23   : > { %563 = vmatmul.msk.f32.vlgmr.msrb.gmra.mxu1 %vm267_vm0, %v389_v21 }
  0x96   : > { %v288_v22 = vpop.f32.mrf.mxu0 }
  0x97   : > { %v311_v23 = vpop.f32.mrf.mxu1 }
  0x98   : > { %v312_v24 = vadd.f32 %v311_v23, %v288_v22 }
  0x9e   : > { %v338_v26 = vpop.f32.mrf.mxu2 }
  0x9f   : > { %v341_v27 = vadd.f32 %v338_v26, %v312_v24  ;;  %v383_v29 = vpop.f32.mrf.mxu0 }
  0xa0   : > { %v363_v28 = vpop.f32.mrf.mxu3  ;;  %v409_v32 = vpop.f32.mrf.mxu1 }
  0xa1   : > { %v345_v30 = vadd.f32 %v599_v25, %v341_v27  ;;  %v384_v31 = vadd.f32 %v383_v29, %v363_v28 }
  0xa3   : > { %v414_v33 = vsub.f32 0.0, %v345_v30  ;;  %v412_v34 = vadd.f32 %v409_v32, %v384_v31 }
  0xa5   : > { %v415_v35 = vmul.f32 1.442695, %v414_v33  ;;  %v413_v36 = vadd.f32 %v599_v25, %v412_v34 }
  0xa7   : > { %600 = vpow2.f32 %v415_v35  ;;  %v434_v37 = vsub.f32 0.0, %v413_v36 }
  0xa9   : > { %v435_v38 = vmul.f32 1.442695, %v434_v37 }
  0xab   : > { %602 = vpow2.f32 %v435_v38 }
  0xad   : > { %v601_v39 = vpop.eup %600 }
  0xae   : > { %v417_v40 = vadd.f32 1.0, %v601_v39 }
  0xb0   : > { %604 = vrcp.f32 %v417_v40  ;;  %v429_v49 = vand.u32 2147483648, %v417_v40  ;;  %vm423_vm3 = vweird.f32 %v417_v40  ;;  %v427_v51 = vand.u32 2147483647, %v417_v40 }
  0xb1   : > { %v603_v41 = vpop.eup %602 }
  0xb2   : > { %v437_v42 = vadd.f32 1.0, %v603_v41  ;;  %v430_v57 = vor.u32 1.1754944e-38, %v429_v49  ;;  %vm428_vm6 = vcmp.eq.f32.partialorder %v427_v51, 8.507059e+37 }
  0xb4   : > { %606 = vrcp.f32 %v437_v42  ;;  %v449_v53 = vand.u32 2147483648, %v437_v42  ;;  %v447_v56 = vand.u32 2147483647, %v437_v42  ;;  %vm443_vm7 = vweird.f32 %v437_v42 }
  0xb6   : > { %v605_v43 = vpop.eup %604  ;;  %v450_v60 = vor.u32 1.1754944e-38, %v449_v53  ;;  %vm448_vm9 = vcmp.eq.f32.partialorder %v447_v56, 8.507059e+37 }
  0xb7   : > { %v419_v44 = vmul.f32 %v605_v43, %v417_v40  ;;  %vm424_vm2 = vweird.f32 %v605_v43 }
  0xb8   : > { %vm425_vm4 = vmor %vm423_vm3, %vm424_vm2 }
  0xb9   : > { %v420_v45 = vsub.f32 1.0, %v419_v44 }
  0xba   : > { %v607_v46 = vpop.eup %606 }
  0xbb   : > { %v421_v47 = vmul.f32 %v605_v43, %v420_v45  ;;  %v439_v48 = vmul.f32 %v607_v46, %v437_v42  ;;  %vm444_vm5 = vweird.f32 %v607_v46 }
  0xbc   : > { %vm445_vm8 = vmor %vm443_vm7, %vm444_vm5 }
  0xbd   : > { %v422_v50 = vadd.f32 %v605_v43, %v421_v47  ;;  %v440_v52 = vsub.f32 1.0, %v439_v48 }
  0xbf   : > { %v426_v54 = vsel %vm425_vm4, %v605_v43, %v422_v50  ;;  %v441_v55 = vmul.f32 %v607_v46, %v440_v52 }
  0xc0   : > { %v431_v59 = vsel %vm428_vm6, %v430_v57, %v426_v54 }
  0xc1   : > { %v442_v58 = vadd.f32 %v607_v46, %v441_v55  ;;  %v433_v63 = vmul.f32 %v431_v59, %v345_v30 }
  0xc3   : > { %v446_v61 = vsel %vm445_vm8, %v607_v46, %v442_v58 }
  0xc4   : > { %v451_v62 = vsel %vm448_vm9, %v450_v60, %v446_v61 }
  0xc5   : > { %v453_v0 = vmul.f32 %v451_v62, %v413_v36 }
  0xc7   : > { %v454_v1 = vmax.f32 %v433_v63, %v453_v0 }
  0xc9   : > { %456 = vst.msk [vmem:[%s247_s14] sm:$0xff] %vm455_vm10, %v454_v1 }
  0xca PF: > { %s16_s15 = sadd.s32 1, %s682_s15  }
  0xcb   : > { %p13_p7 = scmp.ge.s32.totalorder %s16_s15, 4  }
  0xcd   :  { %15 = sbr.rel (!%p13_p7) target bundleno = 2 (0x2), region = 80 }
  0xd2   :  { %476 = vsyncpa [#allocation3], 1 }
  0xd3   :  { %478 = vsyncpa [#allocation3 + $0x1], 1 }
  0xd4   :  { %479 = vsyncpa [#allocation5], 1 }

// kernel: _lambda_.11
= control target key start
LH: loop header
LB: loop body
LE: loop exit
PB: predicated region body
PF: predicated region fallthrough
CT: control target
= control target key end

     0   :  { %s3354_s0 = inlined_call_operand.vmem [shape: f32[2,16,32], index: 0, kind: input, shape index: {}]   ;;  %s3355_s1 = inlined_call_operand.hbm [shape: f32[1,32], index: 1, kind: input, shape index: {}]   ;;  %s3356_s2 = inlined_call_operand.hbm [shape: f32[1,32], index: 2, kind: input, shape index: {}]   ;;  %s3357_s3 = inlined_call_operand.hbm [shape: f32[32,96], index: 3, kind: input, shape index: {}]   ;;  %s3358_s4 = inlined_call_operand.hbm [shape: f32[1,96], index: 4, kind: input, shape index: {}]   ;;  %s3359_s5 = inlined_call_operand.hbm [shape: f32[32,32], index: 5, kind: input, shape index: {}]   ;;  %s3360_s6 = inlined_call_operand.hbm [shape: f32[1,32], index: 6, kind: input, shape index: {}]   ;;  %s3361_s7 = inlined_call_operand.hbm [shape: f32[1,32], index: 7, kind: input, shape index: {}]   ;;  %s3362_s8 = inlined_call_operand.hbm [shape: f32[1,32], index: 8, kind: input, shape index: {}]   ;;  %s3363_s9 = inlined_call_operand.hbm [shape: f32[32,128], index: 9, kind: input, shape index: {}]   ;;  %s3364_s10 = inlined_call_operand.hbm [shape: f32[1,128], index: 10, kind: input, shape index: {}]   ;;  %s3365_s11 = inlined_call_operand.vmem [shape: f32[128,32], index: 11, kind: input, shape index: {}]   ;;  %s3366_s12 = inlined_call_operand.hbm [shape: f32[1,32], index: 12, kind: input, shape index: {}]   ;;  %s3367_s13 = inlined_call_operand.vmem [shape: f32[2,16,32], index: 13, kind: output, shape index: {}]  }
   0x1   :  { %3368 = sst [smem:[#allocation25_spill]] %s3355_s1 }
   0x2   :  { %3369 = sst [smem:[#allocation26_spill]] %s3356_s2 }
   0x3   :  { %18 = vsyncpa [#allocation3], 0 }
   0x4   :  { %19 = vsyncpa [#allocation5], 0 }
   0x5   :  { %20 = vsyncpa [#allocation8], 0 }
   0x6   :  { %21 = vsyncpa [#allocation11], 0 }
   0x7   :  { %22 = vsyncpa [#allocation14], 0 }
   0x8   :  { %23 = vsyncpa [#allocation17], 0  ;;  %s2854_s25 = smov 0  }
   0x9 LB: > { %s3370_s2 = sld [smem:[#allocation26_spill]]  ;;  %s2863_s29 = sadd.s32 4294967295, %s2736_s25   ;;  %s2736_s25 = sphi %s2854_s25, %s29_s25  }
   0xa   : > { %p1999_p0 = scmp.ge.s32.totalorder %s2736_s25, 1  ;;  %p338_p1 = scmp.lt.s32.totalorder %s2736_s25, 3 }
   0xb   : > { %p2166_p2 = scmp.eq.s32.totalorder %s2863_s29, 0  ;;  %s2738_s14 = smov [#allocation4]  }
   0xc   : > { %p2868_p3 = pnand %p1999_p0, %p338_p1  ;;  %s364_s15 = sshll.u32 %s2738_s14, 4  ;;  %s365_s15 = int_to_ptr.vmem [resolvable:$true] %s364_s15 }
   0xd   : > { %s388_s18 = sshll.u32 %s3358_s4, 4  ;;  %s414_s21 = sshll.u32 %s3360_s6, 4  ;;  %s389_s18 = int_to_ptr.hbm [resolvable:$true] %s388_s18  ;;  %s415_s21 = int_to_ptr.hbm [resolvable:$true] %s414_s21 }
   0xe   : > { %p2132_p4 = pneg %p2868_p3  ;;  %s2739_s23 = smov [#allocation7]  }
   0xf   : > { %s362_s28 = sshll.u32 %s3370_s2, 4  ;;  %s390_s24 = sshll.u32 %s2739_s23, 4  ;;  %s363_s28 = int_to_ptr.hbm [resolvable:$true] %s362_s28  ;;  %s391_s24 = int_to_ptr.vmem [resolvable:$true] %s390_s24 }
  0x10   : > { %p2882_p5 = pnand %p2166_p2, %p2132_p4  ;;  %s2740_s26 = smov [#allocation10]  }
  0x11   : > { %s416_s27 = sshll.u32 %s2740_s26, 4  ;;  %s438_s17 = sshll.u32 %s3362_s8, 4  ;;  %s417_s27 = int_to_ptr.vmem [resolvable:$true] %s416_s27  ;;  %s439_s17 = int_to_ptr.hbm [resolvable:$true] %s438_s17 }
  0x12   : > { %2138 = dma.hbm_to_vmem [thread:$0]  (!%p2882_p5), %s363_s28, 16, %s365_s15, [#allocation5]  }
  0x13   : > { %2144 = dma.hbm_to_vmem [thread:$0]  (!%p2882_p5), %s389_s18, 16, %s391_s24, [#allocation8]  }
  0x14   : > { %2150 = dma.hbm_to_vmem [thread:$0]  (!%p2882_p5), %s415_s21, 16, %s417_s27, [#allocation11]  }
  0x15   : > { %s464_s23 = sshll.u32 %s3364_s10, 4  ;;  %s2741_s2 = smov [#allocation13]   ;;  %s465_s23 = int_to_ptr.hbm [resolvable:$true] %s464_s23 }
  0x16   : > { %s440_s28 = sshll.u32 %s2741_s2, 4  ;;  %s2742_s15 = smov [#allocation16]   ;;  %s441_s28 = int_to_ptr.vmem [resolvable:$true] %s440_s28 }
  0x17   : > { %2156 = dma.hbm_to_vmem [thread:$0]  (!%p2882_p5), %s439_s17, 16, %s441_s28, [#allocation14]  }
  0x18   : > { %s466_s18 = sshll.u32 %s2742_s15, 4  ;;  %s3373_s1 = sld [smem:[#allocation25_spill]]  ;;  %s467_s18 = int_to_ptr.vmem [resolvable:$true] %s466_s18 }
  0x19   : > { %2162 = dma.hbm_to_vmem [thread:$0]  (!%p2882_p5), %s465_s23, 16, %s467_s18, [#allocation17]  }
  0x1a   : > { %s373_s16 = sshll.u32 %s3357_s3, 4  ;;  %s2743_s2 = smov [#allocation2]   ;;  %s374_s16 = int_to_ptr.hbm [resolvable:$true] %s373_s16 }
  0x1b   : > { %s352_s19 = sshll.u32 %s2743_s2, 4  ;;  %s2744_s17 = smov [#allocation6]   ;;  %s353_s19 = int_to_ptr.vmem [resolvable:$true] %s352_s19 }
  0x1c   : > { %s375_s20 = sshll.u32 %s2744_s17, 4  ;;  %s2745_s28 = smov 128   ;;  %s376_s20 = int_to_ptr.vmem [resolvable:$true] %s375_s20 }
  0x1d   : > { %s2746_s15 = smov 8   ;;  %s399_s24 = sshll.u32 %s3359_s5, 4  ;;  %s400_s24 = int_to_ptr.hbm [resolvable:$true] %s399_s24 }
  0x1e   : > { %s350_s14 = sshll.u32 %s3373_s1, 4  ;;  %s2747_s26 = smov [#allocation9]   ;;  %s351_s14 = int_to_ptr.hbm [resolvable:$true] %s350_s14 }
  0x1f   : > { %2135 = dma.hbm_to_vmem [thread:$0]  (!%p2882_p5), %s351_s14, 16, %s353_s19, [#allocation3]  }
  0x20   : > { %2141 = dma.hbm_to_vmem [thread:$0]  (!%p2882_p5), %s374_s16, 512, %s376_s20, [#allocation5], %s2745_s28, %s2745_s28, %s2746_s15  }
  0x21   : > { %s401_s21 = sshll.u32 %s2747_s26, 4  ;;  %s426_s14 = sshll.u32 %s3361_s7, 4  ;;  %s402_s21 = int_to_ptr.vmem [resolvable:$true] %s401_s21  ;;  %s427_s14 = int_to_ptr.hbm [resolvable:$true] %s426_s14 }
  0x22   : > { %2147 = dma.hbm_to_vmem [thread:$0]  (!%p2882_p5), %s400_s24, 512, %s402_s21, [#allocation8], %s2745_s28, %s2745_s28, %s2746_s15  }
  0x23   : > { %s2748_s19 = smov [#allocation12]   ;;  %s449_s23 = sshll.u32 %s3363_s9, 4  ;;  %s450_s23 = int_to_ptr.hbm [resolvable:$true] %s449_s23 }
  0x24   : > { %s428_s17 = sshll.u32 %s2748_s19, 4  ;;  %s479_s1 = sshll.u32 %s3366_s12, 4  ;;  %s429_s17 = int_to_ptr.vmem [resolvable:$true] %s428_s17  ;;  %s480_s1 = int_to_ptr.hbm [resolvable:$true] %s479_s1 }
  0x25   : > { %2153 = dma.hbm_to_vmem [thread:$0]  (!%p2882_p5), %s427_s14, 16, %s429_s17, [#allocation11]  }
  0x26   : > { %s2749_s27 = smov [#allocation15]   ;;  %s2750_s24 = smov [#allocation18]  }
  0x27   : > { %s451_s2 = sshll.u32 %s2749_s27, 4  ;;  %s481_s21 = sshll.u32 %s2750_s24, 4  ;;  %s452_s2 = int_to_ptr.vmem [resolvable:$true] %s451_s2  ;;  %s482_s21 = int_to_ptr.vmem [resolvable:$true] %s481_s21 }
  0x28   : > { %2159 = dma.hbm_to_vmem [thread:$0]  (!%p2882_p5), %s450_s23, 512, %s452_s2, [#allocation14], %s2745_s28, %s2745_s28, %s2746_s15  }
  0x29   : > { %2165 = dma.hbm_to_vmem [thread:$0]  (!%p2882_p5), %s480_s1, 16, %s482_s21, [#allocation17]  }
  0x2a   : > { %502 = sbr.rel (%p2868_p3) target bundleno = 2498 (0x9c2), region = 72 }
  0x2f   : > { %2711 = dma.done.wait (%p2166_p2), [#allocation3], 16  }
  0x30   : > { %2713 = vsyncadd (%p2166_p2), [#allocation3], 4294967280 }
  0x31   : > { %2715 = dma.done.wait (%p2166_p2), [#allocation5], 528  }
  0x32   : > { %2717 = vsyncadd (%p2166_p2), [#allocation5], 4294966768 }
  0x33   : > { %2719 = dma.done.wait (%p2166_p2), [#allocation8], 528  }
  0x34   : > { %2721 = vsyncadd (%p2166_p2), [#allocation8], 4294966768 }
  0x35   : > { %2723 = dma.done.wait (%p2166_p2), [#allocation11], 32  }
  0x36   : > { %2725 = vsyncadd (%p2166_p2), [#allocation11], 4294967264 }
  0x37   : > { %2727 = dma.done.wait (%p2166_p2), [#allocation14], 528  }
  0x38   : > { %2729 = vsyncadd (%p2166_p2), [#allocation14], 4294966768 }
  0x39   : > { %2731 = dma.done.wait (%p2166_p2), [#allocation17], 32  }
  0x3a   : > { %2733 = vsyncadd (%p2166_p2), [#allocation17], 4294967264  ;;  %p597_p6 = scmp.lt.s32.totalorder %s2863_s29, 1  ;;  %vm611_vm0 = vcmask 261120   ;;  %v2751_v4 = vmov 32.0   ;;  %v676_v21 = vld [vmem:[#allocation6 + $0x18] sm:$0xff] }
  0x3b   : > { %2290 = vrcp.f32 %v2751_v4  ;;  %699 = vmatpush.msra.mxu0 %v676_v21  ;;  %v675_v22 = vld [vmem:[#allocation6 + $0x10] sm:$0xff]  ;;  %v674_v23 = vld [vmem:[#allocation6 + $0x8] sm:$0xff]  ;;  %v673_v24 = vld [vmem:[#allocation6] sm:$0xff]  ;;  %s2752_s15 = smov 92   ;;  %s2753_s14 = smov 96   ;;  %vm716_vm8 = vcmask 31744  }
  0x3c   : > { %s3375_s29 = smov (!%p597_p6, %s2863_s29), 1  ;;  %v2282_v39 = vld [vmem:[#allocation2] ss:$0 sm:$0xff]  ;;  %v2283_v43 = vld [vmem:[#allocation4] ss:$0 sm:$0xff]  ;;  %s2754_s19 = smov 124  }
  0x3d   : > { %s2084_s1 = sshll.u32 %s3375_s29, 4  ;;  %700 = vmatpush.msra.mxu0 %v675_v22  ;;  %v2284_v54 = vld [vmem:[#allocation7] ss:$0 sm:$0xff]  ;;  %vm750_vm9 = vcmask 130048   ;;  %s2755_s17 = smov 64   ;;  %vm1552_vm10 = vcmask 64512  }
  0x3e   : > { %s2968_s28 = scalar_lea.vmem %s3354_s0, %s2084_s1  ;;  %s2756_s16 = smov 116   ;;  %vm1555_vm11 = vcmask 97280   ;;  %vm1560_vm12 = vcmask 162816   ;;  %vm1563_vm13 = vcmask 195584   ;;  %vm1566_vm14 = vcmask 228352  }
  0x3f   : > { %v607_v0 = vld [vmem:[%s2968_s28] sm:$0xff]  ;;  %v608_v2 = vld [vmem:[%s2968_s28 + $0x8] sm:$0xff]  ;;  %701 = vmatpush.msra.mxu0 %v674_v23  ;;  %s2757_s20 = smov 88   ;;  %s2758_s23 = smov 84  }
  0x40   : > { %v612_v1 = vsel %vm611_vm0, %v607_v0, 0.0  ;;  %v615_v3 = vsel %vm611_vm0, %v608_v2, 0.0  ;;  %s2759_s18 = smov 76   ;;  %s2760_s26 = smov 80  }
  0x41   : > { %613 = vadd.xlane.f32.xlu0 %v612_v1  ;;  %v2291_v5 = vpop.eup %2290  ;;  %702 = vmatpush.msra.mxu0 %v673_v24  ;;  %s2761_s27 = smov 68   ;;  %s2762_s2 = smov 100  }
  0x42   : > { %v619_v6 = vmul.f32 32.0, %v2291_v5  ;;  %vm623_vm1 = vweird.f32 %v2291_v5  ;;  %s2763_s24 = smov 72   ;;  %s2764_s21 = smov 104  }
  0x43   : > { %s2765_s30 = smov 120   ;;  %s2766_s22 = smov 108  }
  0x44   : > { %v620_v7 = vsub.f32 1.0, %v619_v6 }
  0x46   : > { %v621_v8 = vmul.f32 %v2291_v5, %v620_v7 }
  0x48   : > { %v622_v9 = vadd.f32 %v2291_v5, %v621_v8 }
  0x49   : > { %616 = vadd.xlane.f32.xlu0 %v615_v3 }
  0x4a   : > { %v2974_v10 = vsel %vm623_vm1, %v2291_v5, %v622_v9 }
  0xb4   : > { %v614_v11 = vpop.xlane.xlu0 %613 }
  0xb5   : > { %v625_v12 = vmul.f32 %v2974_v10, %v614_v11 }
  0xb7   : > { %v627_v13 = vsub.f32 %v607_v0, %v625_v12 }
  0xb9   : > { %v629_v14 = vmul.f32 %v627_v13, %v627_v13 }
  0xbb   : > { %v631_v15 = vsel %vm611_vm0, %v629_v14, 0.0 }
  0xbc   : > { %632 = vadd.xlane.f32.xlu1 %v631_v15  ;;  %v617_v16 = vpop.xlane.xlu0 %616 }
  0xbd   : > { %v626_v17 = vmul.f32 %v2974_v10, %v617_v16 }
  0xbf   : > { %v628_v18 = vsub.f32 %v608_v2, %v626_v17 }
  0xc1   : > { %v630_v19 = vmul.f32 %v628_v18, %v628_v18 }
  0xc3   : > { %v634_v20 = vsel %vm611_vm0, %v630_v19, 0.0 }
  0xc4   : > { %635 = vadd.xlane.f32.xlu1 %v634_v20 }
 0x12f   : > { %v633_v25 = vpop.xlane.xlu1 %632 }
 0x130   : > { %v637_v26 = vmul.f32 %v633_v25, %v2974_v10 }
 0x132   : > { %v639_v27 = vadd.f32 1e-05, %v637_v26 }
 0x134   : > { %2292 = vrsqrt.f32 %v639_v27  ;;  %vm647_vm3 = vweird.f32 %v639_v27 }
 0x137   : > { %v636_v28 = vpop.xlane.xlu1 %635 }
 0x138   : > { %v638_v29 = vmul.f32 %v636_v28, %v2974_v10 }
 0x13a   : > { %v2293_v30 = vpop.eup %2292  ;;  %v640_v31 = vadd.f32 1e-05, %v638_v29 }
 0x13b   : > { %v642_v32 = vmul.f32 %v2293_v30, %v639_v27  ;;  %vm648_vm2 = vweird.f32 %v2293_v30 }
 0x13c   : > { %2294 = vrsqrt.f32 %v640_v31  ;;  %vm649_vm4 = vmor %vm647_vm3, %vm648_vm2  ;;  %vm657_vm6 = vweird.f32 %v640_v31 }
 0x13d   : > { %v643_v33 = vmul.f32 %v2293_v30, %v642_v32 }
 0x13f   : > { %v644_v34 = vmul.f32 0.5, %v643_v33 }
 0x141   : > { %v645_v35 = vsub.f32 1.5, %v644_v34 }
 0x142   : > { %v2295_v36 = vpop.eup %2294 }
 0x143   : > { %v646_v37 = vmul.f32 %v2293_v30, %v645_v35  ;;  %v652_v38 = vmul.f32 %v2295_v36, %v640_v31  ;;  %vm658_vm5 = vweird.f32 %v2295_v36 }
 0x144   : > { %vm659_vm7 = vmor %vm657_vm6, %vm658_vm5 }
 0x145   : > { %v650_v40 = vsel %vm649_vm4, %v2293_v30, %v646_v37  ;;  %v653_v41 = vmul.f32 %v2295_v36, %v652_v38 }
 0x146   : > { %v661_v42 = vmul.f32 %v650_v40, %v627_v13 }
 0x147   : > { %v654_v44 = vmul.f32 0.5, %v653_v41 }
 0x148   : > { %v666_v45 = vmul.f32 %v2282_v39, %v661_v42 }
 0x149   : > { %v655_v46 = vsub.f32 1.5, %v654_v44 }
 0x14a   : > { %v671_v47 = vadd.f32 %v2283_v43, %v666_v45 }
 0x14b   : > { %v656_v48 = vmul.f32 %v2295_v36, %v655_v46 }
 0x14c   : > { %2028 = vmatmul.msk.f32.vlgmr.msra.gmra.mxu0 %vm611_vm0, %v671_v47 }
 0x14d   : > { %v660_v49 = vsel %vm659_vm7, %v2295_v36, %v656_v48 }
 0x14e   : > { %v662_v50 = vmul.f32 %v660_v49, %v628_v18 }
 0x150   : > { %v667_v51 = vmul.f32 %v2282_v39, %v662_v50 }
 0x152   : > { %v672_v52 = vadd.f32 %v2283_v43, %v667_v51 }
 0x154   : > { %2029 = vmatmul.msk.f32.gmra.mxu0 %vm611_vm0, %v672_v52 }
 0x1c9   : > { %v704_v53 = vpop.f32.mrf.mxu0 }
 0x1ca   : > { %v2988_v57 = vadd.f32 %v2284_v54, %v704_v53 }
 0x1d1   : > { %v707_v55 = vpop.f32.mrf.mxu0 }
 0x1d2   : > { %v2984_v56 = vadd.f32 %v2284_v54, %v707_v55 }
 0x1d4   : > { %814 = vrot.lane.b32.xlu1 %v2984_v56, %s2752_s15  ;;  %714 = vrot.lane.b32.xlu2 %v2984_v56, %s2753_s14  ;;  %v3003_v3 = vpack.i.bf16 %v2988_v57, %v2984_v56 }
 0x1dc   : > { %810 = vrot.lane.b32.xlu1 %v2984_v56, %s2754_s19  ;;  %712 = vrot.lane.b32.xlu2 %v2988_v57, %s2753_s14  ;;  %s2768_s14 = smov 60  }
 0x22e   : > { %v715_v58 = vpop.permute.xlu2 %714 }
 0x22f   : > { %2030 = vmatpush.xpose.msk.msra.mxu1 %vm716_vm8, %v715_v58 }
 0x236   : > { %v713_v59 = vpop.permute.xlu2 %712 }
 0x237   : > { %2031 = vmatpush.xpose.msk.msra.mxu1 %vm716_vm8, %v713_v59 }
 0x23a   : > { %2032 = vmatmul.msk.f32.vlgmr.msra.gmra.mxu1 %vm716_vm8, %v2988_v57 }
 0x242   : > { %2033 = vmatmul.msk.f32.gmra.mxu1 %vm716_vm8, %v2984_v56 }
 0x246   : > { %v815_v60 = vpop.permute.xlu1 %814 }
 0x247   : > { %2086 = vmatpush.xpose.msk.msra.mxu3 %vm716_vm8, %v815_v60 }
 0x24e   : > { %v811_v4 = vpop.permute.xlu1 %810 }
 0x2b7   : > { %v742_v61 = vpop.f32.mrf.mxu1 }
 0x2b8   : > { %v748_v62 = vmul.f32 0.5, %v742_v61 }
 0x2ba   : > { %v751_v63 = vsel %vm750_vm9, %v748_v62, -inf }
 0x2bb   : > { %752 = vmax.xlane.f32.xlu0 %v751_v63 }
 0x2bf   : > { %v745_v0 = vpop.f32.mrf.mxu1 }
 0x2c0   : > { %v749_v1 = vmul.f32 0.5, %v745_v0 }
 0x2c2   : > { %v754_v2 = vsel %vm750_vm9, %v749_v1, -inf }
 0x2c3   : > { %755 = vmax.xlane.f32.xlu1 %v754_v2 }
 0x2cf   : > { %2243 = vrot.lane.b32.xlu0 %v3003_v3, %s2755_s17  ;;  %s2770_s17 = smov 56  }
 0x2d7   : > { %812 = vrot.lane.b32.xlu0 %v2988_v57, %s2752_s15  ;;  %s2767_s15 = smov 112  }
 0x2dc   : > { %1004 = vrot.lane.b32.xlu1 %v2988_v57, %s2756_s16 }
 0x2df   : > { %808 = vrot.lane.b32.xlu0 %v2988_v57, %s2754_s19  ;;  %s2769_s19 = smov 52  }
 0x2e4   : > { %910 = vrot.lane.b32.xlu1 %v2988_v57, %s2757_s20 }
 0x2e7   : > { %1008 = vrot.lane.b32.xlu0 %v2988_v57, %s2758_s23 }
 0x2ec   : > { %1206 = vrot.lane.b32.xlu1 %v2984_v56, %s2759_s18 }
 0x2ef   : > { %912 = vrot.lane.b32.xlu0 %v2984_v56, %s2757_s20  ;;  %s2772_s20 = smov 48  }
 0x2f7   : > { %1006 = vrot.lane.b32.xlu0 %v2984_v56, %s2756_s16  ;;  %s2771_s16 = smov 44  }
 0x2ff   : > { %1204 = vrot.lane.b32.xlu0 %v2988_v57, %s2759_s18  ;;  %s2774_s18 = smov 36  }
 0x307   : > { %1108 = vrot.lane.b32.xlu0 %v2984_v56, %s2760_s26 }
 0x30f   : > { %1402 = vrot.lane.b32.xlu0 %v2984_v56, %s2761_s27 }
 0x317   : > { %1396 = vrot.lane.b32.xlu0 %v2988_v57, %s2762_s2 }
 0x31f   : > { %1302 = vrot.lane.b32.xlu0 %v2988_v57, %s2763_s24 }
 0x327   : > { %1300 = vrot.lane.b32.xlu0 %v2984_v56, %s2764_s21 }
 0x32e   : > { %v753_v5 = vpop.xlane.xlu0 %752 }
 0x32f   : > { %v757_v6 = vsub.f32 %v748_v62, %v753_v5 }
 0x331   : > { %v759_v7 = vmul.f32 1.442695, %v757_v6 }
 0x333   : > { %2296 = vpow2.f32 %v759_v7 }
 0x336   : > { %v756_v8 = vpop.xlane.xlu1 %755 }
 0x337   : > { %v758_v9 = vsub.f32 %v749_v1, %v756_v8 }
 0x339   : > { %v2297_v11 = vpop.eup %2296  ;;  %v761_v12 = vmul.f32 1.442695, %v758_v9 }
 0x33a   : > { %v763_v13 = vsel %vm750_vm9, %v2297_v11, 0.0 }
 0x33b   : > { %2298 = vpow2.f32 %v761_v12  ;;  %764 = vadd.xlane.f32.xlu2 %v763_v13 }
 0x341   : > { %v2299_v14 = vpop.eup %2298  ;;  %v2244_v15 = vpop.permute.xlu0 %2243 }
 0x342   : > { %v766_v16 = vsel %vm750_vm9, %v2299_v14, 0.0  ;;  %v2245_v17 = vunpack.i.l.bf16 %v2244_v15  ;;  %v2246_v18 = vunpack.i.h.bf16 %v2244_v15 }
 0x343   : > { %767 = vadd.xlane.f32.xlu1 %v766_v16 }
 0x344   : > { %799 = vmatpush.msra.mxu2 %v2245_v17 }
 0x346   : > { %800 = vmatpush.msra.mxu2 %v2246_v18 }
 0x348   : > { %2036 = vmatpush.xpose.msk.msrb.mxu2 %vm716_vm8, %v815_v60 }
 0x349   : > { %v813_v19 = vpop.permute.xlu0 %812 }
 0x34a   : > { %2087 = vmatpush.xpose.msk.msra.mxu3 %vm716_vm8, %v813_v19 }
 0x34c   : > { %2037 = vmatpush.xpose.msk.msrb.mxu2 %vm716_vm8, %v813_v19 }
 0x34d   : > { %2039 = vmatmul.msk.f32.vlgmr.msra.gmra.mxu3 %vm716_vm8, %v811_v4 }
 0x34e   : > { %v1005_v22 = vpop.permute.xlu1 %1004 }
 0x351   : > { %v809_v20 = vpop.permute.xlu0 %808 }
 0x353   : > { %1010 = vrot.lane.b32.xlu2 %v2984_v56, %s2758_s23  ;;  %s2773_s23 = smov 40  }
 0x356   : > { %v911_v24 = vpop.permute.xlu1 %910 }
 0x359   : > { %v1009_v21 = vpop.permute.xlu0 %1008 }
 0x35b   : > { %906 = vrot.lane.b32.xlu2 %v2988_v57, %s2765_s30 }
 0x35c   : > { %1200 = vrot.lane.b32.xlu1 %v2988_v57, %s2766_s22 }
 0x35e   : > { %v1207_v28 = vpop.permute.xlu1 %1206 }
 0x361   : > { %v913_v23 = vpop.permute.xlu0 %912 }
 0x362   : > { %2042 = vmatpush.xpose.msk.msrb.mxu0 %vm716_vm8, %v913_v23 }
 0x363   : > { %908 = vrot.lane.b32.xlu2 %v2984_v56, %s2765_s30  ;;  %s2780_s30 = smov 20  }
 0x364   : > { %1106 = vrot.lane.b32.xlu1 %v2988_v57, %s2760_s26  ;;  %s2775_s26 = smov 8  }
 0x366   : > { %2043 = vmatpush.xpose.msk.msrb.mxu0 %vm716_vm8, %v911_v24 }
 0x369   : > { %v1007_v25 = vpop.permute.xlu0 %1006 }
 0x36b   : > { %1202 = vrot.lane.b32.xlu2 %v2984_v56, %s2766_s22  ;;  %s2781_s22 = smov 28  }
 0x36c   : > { %1102 = vrot.lane.b32.xlu1 %v2988_v57, %s2767_s15 }
 0x371   : > { %v1205_v26 = vpop.permute.xlu0 %1204 }
 0x373   : > { %1400 = vrot.lane.b32.xlu2 %v2988_v57, %s2761_s27  ;;  %s2776_s27 = smov 16  }
 0x374   : > { %1104 = vrot.lane.b32.xlu1 %v2984_v56, %s2767_s15 }
 0x379   : > { %v1109_v27 = vpop.permute.xlu0 %1108 }
 0x37a   : > { %2054 = vmatpush.xpose.msk.msra.mxu0 %vm716_vm8, %v1109_v27 }
 0x37b   : > { %1304 = vrot.lane.b32.xlu2 %v2984_v56, %s2763_s24  ;;  %s2778_s24 = smov 4  }
 0x37c   : > { %1398 = vrot.lane.b32.xlu1 %v2984_v56, %s2762_s2  ;;  %s2777_s2 = smov 24  }
 0x381   : > { %v1403_v37 = vpop.permute.xlu0 %1402 }
 0x383   : > { %1298 = vrot.lane.b32.xlu2 %v2988_v57, %s2764_s21  ;;  %s2779_s21 = smov 12  }
 0x389   : > { %v1397_v46 = vpop.permute.xlu0 %1396 }
 0x391   : > { %v1303_v49 = vpop.permute.xlu0 %1302 }
 0x399   : > { %v1301_v53 = vpop.permute.xlu0 %1300 }
 0x3ae   : > { %v765_v29 = vpop.xlane.xlu2 %764 }
 0x3af   : > { %2300 = vrcp.f32 %v765_v29 }
 0x3b5   : > { %v2301_v30 = vpop.eup %2300 }
 0x3b6   : > { %v1011_v31 = vpop.permute.xlu2 %1010  ;;  %v768_v32 = vpop.xlane.xlu1 %767  ;;  %v771_v33 = vmul.f32 %v2301_v30, %v2297_v11 }
 0x3b7   : > { %2302 = vrcp.f32 %v768_v32  ;;  %2048 = vmatpush.xpose.msk.msrb.mxu3 %vm716_vm8, %v1011_v31 }
 0x3b8   : > { %2034 = vmatmul.msk.f32.vlgmr.msra.gmra.mxu2 %vm750_vm9, %v771_v33 }
 0x3bb   : > { %2049 = vmatpush.xpose.msk.msrb.mxu3 %vm716_vm8, %v1009_v21 }
 0x3bd   : > { %v2303_v34 = vpop.eup %2302 }
 0x3be   : > { %v907_v35 = vpop.permute.xlu2 %906  ;;  %2050 = vmatmul.msk.f32.vlgmr.msrb.gmra.mxu3 %vm716_vm8, %v1005_v22  ;;  %v772_v36 = vmul.f32 %v2303_v34, %v2299_v14 }
 0x3bf   : > { %2060 = vmatpush.xpose.msk.msra.mxu3 %vm716_vm8, %v1207_v28  ;;  %2044 = vmatmul.msk.f32.vlgmr.msrb.gmra.mxu0 %vm716_vm8, %v907_v35 }
 0x3c0   : > { %2035 = vmatmul.msk.f32.gmra.mxu2 %vm750_vm9, %v772_v36 }
 0x3c3   : > { %2061 = vmatpush.xpose.msk.msra.mxu3 %vm716_vm8, %v1205_v26 }
 0x3c6   : > { %v909_v38 = vpop.permute.xlu2 %908  ;;  %2051 = vmatmul.msk.f32.gmra.mxu3 %vm716_vm8, %v1007_v25 }
 0x3c7   : > { %2072 = vmatpush.xpose.msk.msrb.mxu3 %vm716_vm8, %v1403_v37  ;;  %2045 = vmatmul.msk.f32.gmra.mxu0 %vm716_vm8, %v909_v38 }
 0x3c8   : > { %2038 = vmatmul.msk.f32.vlgmr.msrb.gmra.mxu2 %vm716_vm8, %v809_v20 }
 0x3ce   : > { %v1203_v39 = vpop.permute.xlu2 %1202  ;;  %v1201_v40 = vpop.permute.xlu1 %1200 }
 0x3cf   : > { %2062 = vmatmul.msk.f32.vlgmr.msra.gmra.mxu3 %vm716_vm8, %v1201_v40 }
 0x3d0   : > { %v844_v41 = vpop.f32.mrf.mxu3 }
 0x3d1   : > { %v848_v42 = vmul.f32 0.5, %v844_v41 }
 0x3d3   : > { %v852_v43 = vsel %vm750_vm9, %v848_v42, -inf }
 0x3d4   : > { %853 = vmax.xlane.f32.xlu2 %v852_v43 }
 0x3d6   : > { %v1401_v44 = vpop.permute.xlu2 %1400  ;;  %v1107_v45 = vpop.permute.xlu1 %1106 }
 0x3d7   : > { %2055 = vmatpush.xpose.msk.msra.mxu0 %vm716_vm8, %v1107_v45  ;;  %2063 = vmatmul.msk.f32.gmra.mxu3 %vm716_vm8, %v1203_v39 }
 0x3d8   : > { %2073 = vmatpush.xpose.msk.msrb.mxu3 %vm716_vm8, %v1401_v44 }
 0x3de   : > { %v1305_v47 = vpop.permute.xlu2 %1304  ;;  %v1103_v48 = vpop.permute.xlu1 %1102 }
 0x3df   : > { %2056 = vmatmul.msk.f32.vlgmr.msra.gmra.mxu0 %vm716_vm8, %v1103_v48  ;;  %2074 = vmatmul.msk.f32.vlgmr.msrb.gmra.mxu3 %vm716_vm8, %v1397_v46 }
 0x3e0   : > { %2066 = vmatpush.xpose.msk.msrb.mxu0 %vm716_vm8, %v1305_v47 }
 0x3e4   : > { %2067 = vmatpush.xpose.msk.msrb.mxu0 %vm716_vm8, %v1303_v49 }
 0x3e6   : > { %v1105_v50 = vpop.permute.xlu1 %1104  ;;  %v1299_v51 = vpop.permute.xlu2 %1298 }
 0x3e7   : > { %2057 = vmatmul.msk.f32.gmra.mxu0 %vm716_vm8, %v1105_v50 }
 0x3ee   : > { %v1399_v52 = vpop.permute.xlu1 %1398 }
 0x3ef   : > { %2068 = vmatmul.msk.f32.vlgmr.msrb.gmra.mxu0 %vm716_vm8, %v1299_v51  ;;  %2075 = vmatmul.msk.f32.gmra.mxu3 %vm716_vm8, %v1399_v52 }
 0x3f7   : > { %2069 = vmatmul.msk.f32.gmra.mxu0 %vm716_vm8, %v1301_v53 }
 0x43b   : > { %v3126_v33 = vpop.f32.mrf.mxu2 }
 0x43c   : > { %v939_v54 = vpop.f32.mrf.mxu0 }
 0x43d   : > { %v945_v55 = vmul.f32 0.5, %v939_v54 }
 0x43f   : > { %v947_v56 = vsel %vm750_vm9, %v945_v55, -inf }
 0x440   : > { %948 = vmax.xlane.f32.xlu2 %v947_v56 }
 0x441   : > { %v1037_v57 = vpop.f32.mrf.mxu3 }
 0x442   : > { %v1043_v58 = vmul.f32 0.5, %v1037_v57 }
 0x443   : > { %v3128_v36 = vpop.f32.mrf.mxu2 }
 0x444   : > { %v1045_v59 = vsel %vm750_vm9, %v1043_v58, -inf  ;;  %v942_v60 = vpop.f32.mrf.mxu0 }
 0x445   : > { %1046 = vmax.xlane.f32.xlu0 %v1045_v59  ;;  %v3080_v61 = vmul.f32 0.5, %v942_v60 }
 0x447   : > { %v950_v1 = vsel %vm750_vm9, %v3080_v61, -inf  ;;  %v854_v14 = vpop.xlane.xlu2 %853 }
 0x448   : > { %v856_v18 = vsub.f32 %v848_v42, %v854_v14 }
 0x449   : > { %v1040_v62 = vpop.f32.mrf.mxu3 }
 0x44a   : > { %v3082_v63 = vmul.f32 0.5, %v1040_v62  ;;  %v859_v21 = vmul.f32 1.442695, %v856_v18 }
 0x44b   : > { %v841_v42 = vpop.f32.mrf.mxu2 }
 0x44c   : > { %v1048_v0 = vsel %vm750_vm9, %v3082_v63, -inf  ;;  %2304 = vpow2.f32 %v859_v21  ;;  %v3138_v49 = vmul.f32 0.5, %v841_v42 }
 0x44d   : > { %1049 = vmax.xlane.f32.xlu1 %v1048_v0  ;;  %951 = vmax.xlane.f32.xlu0 %v950_v1 }
 0x44e   : > { %v849_v53 = vsel %vm750_vm9, %v3138_v49, -inf }
 0x452   : > { %v1233_v2 = vpop.f32.mrf.mxu3  ;;  %v3115_v27 = vpop.eup %2304 }
 0x453   : > { %v3088_v4 = vmul.f32 0.5, %v1233_v2  ;;  %v864_v30 = vsel %vm750_vm9, %v3115_v27, 0.0 }
 0x455   : > { %v1241_v5 = vsel %vm750_vm9, %v3088_v4, -inf }
 0x456   : > { %1242 = vmax.xlane.f32.xlu2 %v1241_v5 }
 0x45a   : > { %v1236_v6 = vpop.f32.mrf.mxu3 }
 0x45b   : > { %v3092_v7 = vmul.f32 0.5, %v1236_v6 }
 0x45c   : > { %v1135_v8 = vpop.f32.mrf.mxu0 }
 0x45d   : > { %v3094_v9 = vmul.f32 0.5, %v1135_v8  ;;  %v1244_v11 = vsel %vm750_vm9, %v3092_v7, -inf }
 0x45e   : > { %1245 = vmax.xlane.f32.xlu0 %v1244_v11 }
 0x45f   : > { %v1143_v12 = vsel %vm750_vm9, %v3094_v9, -inf }
 0x460   : > { %1144 = vmax.xlane.f32.xlu1 %v1143_v12 }
 0x462   : > { %v1429_v13 = vpop.f32.mrf.mxu3 }
 0x463   : > { %v3100_v15 = vmul.f32 0.5, %v1429_v13 }
 0x464   : > { %v1138_v16 = vpop.f32.mrf.mxu0 }
 0x465   : > { %v3102_v17 = vmul.f32 0.5, %v1138_v16  ;;  %v1437_v19 = vsel %vm750_vm9, %v3100_v15, -inf }
 0x467   : > { %v1146_v20 = vsel %vm750_vm9, %v3102_v17, -inf }
 0x468   : > { %1438 = vmax.xlane.f32.xlu1 %v1437_v19  ;;  %1147 = vmax.xlane.f32.xlu2 %v1146_v20 }
 0x46c   : > { %v1331_v22 = vpop.f32.mrf.mxu0 }
 0x46d   : > { %v3108_v23 = vmul.f32 0.5, %v1331_v22 }
 0x46f   : > { %v1339_v24 = vsel %vm750_vm9, %v3108_v23, -inf }
 0x470   : > { %1340 = vmax.xlane.f32.xlu2 %v1339_v24 }
 0x472   : > { %2248 = vrot.lane.b32.xlu0 %v3003_v3, %s2768_s14  ;;  %v1432_v25 = vpop.f32.mrf.mxu3  ;;  %s606_s14 = scalar_lea.vmem %s3367_s13, %s2084_s1 }
 0x473   : > { %v3113_v26 = vmul.f32 0.5, %v1432_v25 }
 0x474   : > { %v1334_v29 = vpop.f32.mrf.mxu0 }
 0x475   : > { %v1440_v28 = vsel %vm750_vm9, %v3113_v26, -inf  ;;  %v3121_v31 = vmul.f32 0.5, %v1334_v29 }
 0x476   : > { %1441 = vmax.xlane.f32.xlu1 %v1440_v28 }
 0x477   : > { %v1342_v32 = vsel %vm750_vm9, %v3121_v31, -inf }
 0x478   : > { %865 = vadd.xlane.f32.xlu2 %v864_v30 }
 0x47a   : > { %2253 = vrot.lane.b32.xlu0 %v3003_v3, %s2769_s19 }
 0x47e   : > { %1343 = vmax.xlane.f32.xlu1 %v1342_v32 }
 0x4b3   : > { %v949_v34 = vpop.xlane.xlu2 %948 }
 0x4b4   : > { %v953_v35 = vsub.f32 %v945_v55, %v949_v34 }
 0x4b6   : > { %v955_v37 = vmul.f32 1.442695, %v953_v35 }
 0x4b8   : > { %2306 = vpow2.f32 %v955_v37  ;;  %v1047_v38 = vpop.xlane.xlu0 %1046 }
 0x4b9   : > { %v1051_v39 = vsub.f32 %v1043_v58, %v1047_v38 }
 0x4bb   : > { %v1053_v40 = vmul.f32 1.442695, %v1051_v39 }
 0x4bd   : > { %2308 = vpow2.f32 %v1053_v40 }
 0x4be   : > { %v3130_v41 = vpop.eup %2306 }
 0x4bf   : > { %v959_v43 = vsel %vm750_vm9, %v3130_v41, 0.0 }
 0x4c0   : > { %v952_v44 = vpop.xlane.xlu0 %951  ;;  %960 = vadd.xlane.f32.xlu1 %v959_v43  ;;  %v1050_v45 = vpop.xlane.xlu1 %1049 }
 0x4c1   : > { %v954_v46 = vsub.f32 %v3080_v61, %v952_v44  ;;  %v1052_v47 = vsub.f32 %v3082_v63, %v1050_v45 }
 0x4c3   : > { %v3136_v48 = vpop.eup %2308  ;;  %v957_v50 = vmul.f32 1.442695, %v954_v46  ;;  %v1055_v51 = vmul.f32 1.442695, %v1052_v47 }
 0x4c4   : > { %v1057_v52 = vsel %vm750_vm9, %v3136_v48, 0.0 }
 0x4c5   : > { %2310 = vpow2.f32 %v957_v50  ;;  %1058 = vadd.xlane.f32.xlu2 %v1057_v52 }
 0x4c6   : > { %2312 = vpow2.f32 %v1055_v51 }
 0x4c8   : > { %850 = vmax.xlane.f32.xlu1 %v849_v53 }
 0x4c9   : > { %v1243_v54 = vpop.xlane.xlu2 %1242 }
 0x4ca   : > { %v1247_v55 = vsub.f32 %v3088_v4, %v1243_v54 }
 0x4cb   : > { %v3145_v56 = vpop.eup %2310 }
 0x4cc   : > { %v3147_v57 = vpop.eup %2312  ;;  %v1249_v58 = vmul.f32 1.442695, %v1247_v55  ;;  %v962_v59 = vsel %vm750_vm9, %v3145_v56, 0.0 }
 0x4cd   : > { %963 = vadd.xlane.f32.xlu0 %v962_v59  ;;  %v1060_v60 = vsel %vm750_vm9, %v3147_v57, 0.0 }
 0x4ce   : > { %2314 = vpow2.f32 %v1249_v58  ;;  %1061 = vadd.xlane.f32.xlu2 %v1060_v60 }
 0x4d1   : > { %v1246_v4 = vpop.xlane.xlu0 %1245 }
 0x4d2   : > { %v1248_v28 = vsub.f32 %v3092_v7, %v1246_v4 }
 0x4d3   : > { %v1145_v61 = vpop.xlane.xlu1 %1144 }
 0x4d4   : > { %v3153_v62 = vpop.eup %2314  ;;  %v1149_v63 = vsub.f32 %v3094_v9, %v1145_v61  ;;  %v1251_v29 = vmul.f32 1.442695, %v1248_v28 }
 0x4d5   : > { %v1253_v0 = vsel %vm750_vm9, %v3153_v62, 0.0 }
 0x4d6   : > { %v1151_v1 = vmul.f32 1.442695, %v1149_v63  ;;  %1254 = vadd.xlane.f32.xlu2 %v1253_v0 }
 0x4d8   : > { %2316 = vpow2.f32 %v1151_v1 }
 0x4db   : > { %v1148_v2 = vpop.xlane.xlu2 %1147  ;;  %v1439_v25 = vpop.xlane.xlu1 %1438 }
 0x4dc   : > { %v1150_v5 = vsub.f32 %v3102_v17, %v1148_v2  ;;  %v1443_v39 = vsub.f32 %v3100_v15, %v1439_v25 }
 0x4de   : > { %v3159_v6 = vpop.eup %2316  ;;  %v1153_v8 = vmul.f32 1.442695, %v1150_v5  ;;  %v1445_v40 = vmul.f32 1.442695, %v1443_v39 }
 0x4df   : > { %v1155_v11 = vsel %vm750_vm9, %v3159_v6, 0.0 }
 0x4e0   : > { %2318 = vpow2.f32 %v1153_v8  ;;  %1156 = vadd.xlane.f32.xlu2 %v1155_v11 }
 0x4e1   : > { %2258 = vrot.lane.b32.xlu1 %v3003_v3, %s2770_s17 }
 0x4e3   : > { %v1341_v9 = vpop.xlane.xlu2 %1340 }
 0x4e4   : > { %v1345_v12 = vsub.f32 %v3108_v23, %v1341_v9  ;;  %v2249_v13 = vpop.permute.xlu0 %2248 }
 0x4e5   : > { %v2250_v14 = vunpack.i.l.bf16 %v2249_v13  ;;  %v2251_v17 = vunpack.i.h.bf16 %v2249_v13 }
 0x4e6   : > { %v3165_v16 = vpop.eup %2318  ;;  %v1347_v18 = vmul.f32 1.442695, %v1345_v12 }
 0x4e7   : > { %897 = vmatpush.msra.mxu2 %v2250_v14  ;;  %v1158_v19 = vsel %vm750_vm9, %v3165_v16, 0.0 }
 0x4e8   : > { %2320 = vpow2.f32 %v1347_v18  ;;  %1159 = vadd.xlane.f32.xlu0 %v1158_v19 }
 0x4e9   : > { %898 = vmatpush.msra.mxu2 %v2251_v17  ;;  %v1442_v30 = vpop.xlane.xlu1 %1441  ;;  %2322 = vpow2.f32 %v1251_v29 }
 0x4ea   : > { %v1444_v32 = vsub.f32 %v3113_v26, %v1442_v30 }
 0x4eb   : > { %v3191_v44 = vpop.xlane.xlu2 %865 }
 0x4ec   : > { %v2254_v20 = vpop.permute.xlu0 %2253  ;;  %v1447_v34 = vmul.f32 1.442695, %v1444_v32 }
 0x4ed   : > { %v2255_v21 = vunpack.i.l.bf16 %v2254_v20  ;;  %v2256_v24 = vunpack.i.h.bf16 %v2254_v20 }
 0x4ee   : > { %v3169_v22 = vpop.eup %2320  ;;  %2324 = vpow2.f32 %v1447_v34 }
 0x4ef   : > { %1093 = vmatpush.msrb.mxu2 %v2255_v21  ;;  %v1351_v23 = vsel %vm750_vm9, %v3169_v22, 0.0  ;;  %v3177_v35 = vpop.eup %2322  ;;  %2326 = vpow2.f32 %v1445_v40 }
 0x4f0   : > { %1352 = vadd.xlane.f32.xlu0 %v1351_v23  ;;  %v1256_v37 = vsel %vm750_vm9, %v3177_v35, 0.0 }
 0x4f1   : > { %1094 = vmatpush.msrb.mxu2 %v2256_v24  ;;  %v1344_v43 = vpop.xlane.xlu1 %1343 }
 0x4f4   : > { %v3181_v38 = vpop.eup %2324 }
 0x4f5   : > { %v1452_v7 = vsel %vm750_vm9, %v3181_v38, 0.0  ;;  %v3186_v42 = vpop.eup %2326 }
 0x4f6   : > { %v1449_v26 = vsel %vm750_vm9, %v3186_v42, 0.0 }
 0x4f8   : > { %2263 = vrot.lane.b32.xlu2 %v3003_v3, %s2771_s16 }
 0x500   : > { %2268 = vrot.lane.b32.xlu2 %v3003_v3, %s2772_s20 }
 0x50b   : > { %1257 = vadd.xlane.f32.xlu1 %v1256_v37 }
 0x513   : > { %1453 = vadd.xlane.f32.xlu1 %v1452_v7 }
 0x529   : > { %1450 = vadd.xlane.f32.xlu2 %v1449_v26 }
 0x52c   : > { %2278 = vrot.lane.b32.xlu1 %v3003_v3, %s2773_s23 }
 0x533   : > { %v961_v45 = vpop.xlane.xlu1 %960 }
 0x538   : > { %v3193_v46 = vpop.xlane.xlu2 %1058 }
 0x53b   : > { %v851_v47 = vpop.xlane.xlu1 %850 }
 0x53c   : > { %v855_v15 = vsub.f32 %v3138_v49, %v851_v47 }
 0x53e   : > { %v857_v50 = vmul.f32 1.442695, %v855_v15 }
 0x540   : > { %2328 = vpow2.f32 %v857_v50  ;;  %v964_v55 = vpop.xlane.xlu0 %963 }
 0x541   : > { %v3196_v51 = vpop.xlane.xlu2 %1061  ;;  %2330 = vrcp.f32 %v961_v45 }
 0x542   : > { %2332 = vrcp.f32 %v964_v55 }
 0x546   : > { %v2329_v52 = vpop.eup %2328 }
 0x547   : > { %v861_v53 = vsel %vm750_vm9, %v2329_v52, 0.0  ;;  %v2331_v60 = vpop.eup %2330 }
 0x548   : > { %862 = vadd.xlane.f32.xlu0 %v861_v53  ;;  %v967_v49 = vmul.f32 %v2331_v60, %v3130_v41  ;;  %v2333_v1 = vpop.eup %2332 }
 0x549   : > { %v3199_v54 = vpop.xlane.xlu2 %1254  ;;  %v968_v2 = vmul.f32 %v2333_v1, %v3145_v56  ;;  %v1346_v56 = vsub.f32 %v3121_v31, %v1344_v43 }
 0x54b   : > { %v1349_v13 = vmul.f32 1.442695, %v1346_v56 }
 0x553   : > { %v1157_v58 = vpop.xlane.xlu2 %1156  ;;  %v2259_v59 = vpop.permute.xlu1 %2258 }
 0x554   : > { %v2260_v61 = vunpack.i.l.bf16 %v2259_v59  ;;  %v2261_v63 = vunpack.i.h.bf16 %v2259_v59  ;;  %2334 = vrcp.f32 %v1157_v58 }
 0x556   : > { %995 = vmatpush.msrb.mxu1 %v2260_v61 }
 0x558   : > { %996 = vmatpush.msrb.mxu1 %v2261_v63 }
 0x559   : > { %2046 = vmatmul.msk.f32.vlgmr.msrb.gmra.mxu1 %vm750_vm9, %v967_v49 }
 0x55a   : > { %v2335_v8 = vpop.eup %2334 }
 0x55b   : > { %v2264_v0 = vpop.permute.xlu2 %2263  ;;  %v1160_v4 = vpop.xlane.xlu0 %1159  ;;  %v1163_v41 = vmul.f32 %v2335_v8, %v3159_v6  ;;  %v1569_v8 = vld [vmem:[#allocation9] sm:$0xff] }
 0x55c   : > { %2273 = vrot.lane.b32.xlu0 %v3003_v3, %s2774_s18  ;;  %2336 = vrcp.f32 %v1160_v4  ;;  %v2265_v29 = vunpack.i.l.bf16 %v2264_v0  ;;  %v2266_v30 = vunpack.i.h.bf16 %v2264_v0  ;;  %v1571_v4 = vld [vmem:[#allocation9 + $0x10] sm:$0xff] }
 0x55d   : > { %2338 = vpow2.f32 %v1349_v13 }
 0x561   : > { %2047 = vmatmul.msk.f32.gmra.mxu1 %vm750_vm9, %v968_v2  ;;  %v1572_v2 = vld [vmem:[#allocation9 + $0x18] sm:$0xff] }
 0x562   : > { %v2337_v12 = vpop.eup %2336  ;;  %1595 = vmatpush.msra.mxu0 %v1572_v2 }
 0x563   : > { %v2269_v5 = vpop.permute.xlu2 %2268  ;;  %v1164_v3 = vmul.f32 %v2337_v12, %v3165_v16  ;;  %v3211_v14 = vpop.eup %2338 }
 0x564   : > { %v2270_v11 = vunpack.i.l.bf16 %v2269_v5  ;;  %v2271_v9 = vunpack.i.h.bf16 %v2269_v5  ;;  %v1354_v18 = vsel %vm750_vm9, %v3211_v14, 0.0  ;;  %v1353_v6 = vpop.xlane.xlu0 %1352  ;;  %v1570_v5 = vld [vmem:[#allocation9 + $0x8] sm:$0xff]  ;;  %1596 = vmatpush.msra.mxu0 %v1571_v4 }
 0x565   : > { %2340 = vrcp.f32 %v1353_v6 }
 0x566   : > { %1191 = vmatpush.msra.mxu1 %v2270_v11  ;;  %1597 = vmatpush.msra.mxu0 %v1570_v5 }
 0x568   : > { %1192 = vmatpush.msra.mxu1 %v2271_v9  ;;  %1598 = vmatpush.msra.mxu0 %v1569_v8 }
 0x569   : > { %2058 = vmatmul.msk.f32.vlgmr.msra.gmra.mxu1 %vm750_vm9, %v1163_v41 }
 0x56b   : > { %v2341_v21 = vpop.eup %2340 }
 0x56c   : > { %v1359_v23 = vmul.f32 %v2341_v21, %v3169_v22 }
 0x571   : > { %2059 = vmatmul.msk.f32.gmra.mxu1 %vm750_vm9, %v1164_v3 }
 0x57e   : > { %v1258_v17 = vpop.xlane.xlu1 %1257 }
 0x586   : > { %1355 = vadd.xlane.f32.xlu0 %v1354_v18  ;;  %v1454_v19 = vpop.xlane.xlu1 %1453 }
 0x59c   : > { %v1451_v47 = vpop.xlane.xlu2 %1450 }
 0x59e   : > { %v2279_v20 = vpop.permute.xlu1 %2278 }
 0x59f   : > { %v2280_v24 = vunpack.i.l.bf16 %v2279_v20  ;;  %v2281_v16 = vunpack.i.h.bf16 %v2279_v20 }
 0x5a1   : > { %1387 = vmatpush.msrb.mxu1 %v2280_v24 }
 0x5a3   : > { %1388 = vmatpush.msrb.mxu1 %v2281_v16 }
 0x5a4   : > { %2070 = vmatmul.msk.f32.vlgmr.msrb.gmra.mxu1 %vm750_vm9, %v1359_v23 }
 0x5bb   : > { %v863_v31 = vpop.xlane.xlu0 %862 }
 0x5bc   : > { %2342 = vrcp.f32 %v863_v31 }
 0x5bd   : > { %2344 = vrcp.f32 %v3191_v44 }
 0x5be   : > { %2346 = vrcp.f32 %v3193_v46 }
 0x5bf   : > { %2348 = vrcp.f32 %v3196_v51 }
 0x5c0   : > { %2350 = vrcp.f32 %v3199_v54 }
 0x5c1   : > { %2352 = vrcp.f32 %v1258_v17 }
 0x5c2   : > { %v2343_v25 = vpop.eup %2342  ;;  %2354 = vrcp.f32 %v1451_v47 }
 0x5c3   : > { %v869_v28 = vmul.f32 %v2343_v25, %v2329_v52  ;;  %v2345_v32 = vpop.eup %2344  ;;  %2356 = vrcp.f32 %v1454_v19 }
 0x5c4   : > { %v870_v22 = vmul.f32 %v2345_v32, %v3115_v27  ;;  %v2347_v34 = vpop.eup %2346 }
 0x5c5   : > { %2040 = vmatmul.msk.f32.vlgmr.msra.gmra.mxu2 %vm750_vm9, %v869_v28  ;;  %v1065_v7 = vmul.f32 %v2347_v34, %v3136_v48  ;;  %v2349_v43 = vpop.eup %2348 }
 0x5c6   : > { %1289 = vmatpush.msra.mxu2 %v2265_v29  ;;  %v1066_v27 = vmul.f32 %v2349_v43, %v3147_v57  ;;  %v2351_v45 = vpop.eup %2350 }
 0x5c7   : > { %v1261_v48 = vmul.f32 %v2351_v45, %v3153_v62  ;;  %v2353_v15 = vpop.eup %2352 }
 0x5c8   : > { %1290 = vmatpush.msra.mxu2 %v2266_v30  ;;  %v1262_v50 = vmul.f32 %v2353_v15, %v3177_v35  ;;  %v2355_v57 = vpop.eup %2354 }
 0x5c9   : > { %v1457_v51 = vmul.f32 %v2355_v57, %v3186_v42  ;;  %v2357_v62 = vpop.eup %2356 }
 0x5ca   : > { %v1458_v53 = vmul.f32 %v2357_v62, %v3181_v38 }
 0x5cd   : > { %2041 = vmatmul.msk.f32.gmra.mxu2 %vm750_vm9, %v870_v22 }
 0x5ce   : > { %v2274_v37 = vpop.permute.xlu0 %2273 }
 0x5cf   : > { %v2275_v39 = vunpack.i.l.bf16 %v2274_v37  ;;  %v2276_v40 = vunpack.i.h.bf16 %v2274_v37 }
 0x5d5   : > { %2052 = vmatmul.msk.f32.vlgmr.msrb.gmra.mxu2 %vm750_vm9, %v1065_v7  ;;  %v2285_v7 = vld [vmem:[#allocation10] ss:$0 sm:$0xff] }
 0x5d6   : > { %1485 = vmatpush.msrb.mxu2 %v2275_v39  ;;  %v998_v26 = vpop.f32.mrf.mxu1 }
 0x5d7   : > { %1504 = vrot.lane.b32.xlu1 %v998_v26, %s2775_s26  ;;  %v2374_v26 = vld [vmem:[%s2968_s28] sm:$0xff] }
 0x5d8   : > { %1486 = vmatpush.msrb.mxu2 %v2276_v40 }
 0x5dd   : > { %2053 = vmatmul.msk.f32.gmra.mxu2 %vm750_vm9, %v1066_v27 }
 0x5de   : > { %v1001_v44 = vpop.f32.mrf.mxu1 }
 0x5e5   : > { %2064 = vmatmul.msk.f32.vlgmr.msra.gmra.mxu2 %vm750_vm9, %v1261_v48  ;;  %v2375_v48 = vld [vmem:[%s2968_s28 + $0x8] sm:$0xff] }
 0x5e6   : > { %v1194_v46 = vpop.f32.mrf.mxu1 }
 0x5e7   : > { %1520 = vrot.lane.b32.xlu1 %v1194_v46, %s2776_s27 }
 0x5ed   : > { %2065 = vmatmul.msk.f32.gmra.mxu2 %vm750_vm9, %v1262_v50 }
 0x5ee   : > { %v1197_v35 = vpop.f32.mrf.mxu1 }
 0x5f5   : > { %2076 = vmatmul.msk.f32.vlgmr.msrb.gmra.mxu2 %vm750_vm9, %v1457_v51 }
 0x5f9   : > { %v1356_v52 = vpop.xlane.xlu0 %1355 }
 0x5fa   : > { %2358 = vrcp.f32 %v1356_v52 }
 0x5fd   : > { %2077 = vmatmul.msk.f32.gmra.mxu2 %vm750_vm9, %v1458_v53 }
 0x600   : > { %v2359_v54 = vpop.eup %2358 }
 0x601   : > { %v1360_v55 = vmul.f32 %v2359_v54, %v3211_v14 }
 0x603   : > { %2071 = vmatmul.msk.f32.gmra.mxu1 %vm750_vm9, %v1360_v55 }
 0x621   : > { %v1390_v58 = vpop.f32.mrf.mxu1 }
 0x622   : > { %1536 = vrot.lane.b32.xlu1 %v1390_v58, %s2777_s2  ;;  %v1667_v58 = vld [vmem:[#allocation15 + $0x18] sm:$0xff] }
 0x623   : > { %1690 = vmatpush.msra.mxu1 %v1667_v58  ;;  %v1792_v58 = vld [vmem:[%s3365_s11 + $0x20] sm:$0xff] }
 0x62a   : > { %1506 = vrot.lane.b32.xlu1 %v1001_v44, %s2775_s26 }
 0x648   : > { %v900_v42 = vpop.f32.mrf.mxu2 }
 0x649   : > { %1496 = vrot.lane.b32.xlu2 %v900_v42, %s2778_s24  ;;  %v1505_v11 = vpop.permute.xlu1 %1504  ;;  %v1666_v42 = vld [vmem:[#allocation15 + $0x10] sm:$0xff] }
 0x64a   : > { %1691 = vmatpush.msra.mxu1 %v1666_v42 }
 0x650   : > { %v903_v59 = vpop.f32.mrf.mxu2 }
 0x651   : > { %1498 = vrot.lane.b32.xlu2 %v903_v59, %s2778_s24  ;;  %v1665_v59 = vld [vmem:[#allocation15 + $0x8] sm:$0xff] }
 0x652   : > { %1692 = vmatpush.msra.mxu1 %v1665_v59 }
 0x658   : > { %v1096_v60 = vpop.f32.mrf.mxu2 }
 0x659   : > { %1512 = vrot.lane.b32.xlu1 %v1096_v60, %s2779_s21  ;;  %v1521_v9 = vpop.permute.xlu1 %1520  ;;  %v1664_v60 = vld [vmem:[#allocation15] sm:$0xff] }
 0x65a   : > { %1693 = vmatpush.msra.mxu1 %v1664_v60 }
 0x660   : > { %v1099_v38 = vpop.f32.mrf.mxu2 }
 0x661   : > { %1514 = vrot.lane.b32.xlu2 %v1099_v38, %s2779_s21  ;;  %1522 = vrot.lane.b32.xlu1 %v1197_v35, %s2776_s27 }
 0x668   : > { %v1292_v61 = vpop.f32.mrf.mxu2 }
 0x669   : > { %1528 = vrot.lane.b32.xlu2 %v1292_v61, %s2780_s30 }
 0x670   : > { %v1295_v63 = vpop.f32.mrf.mxu2 }
 0x671   : > { %1530 = vrot.lane.b32.xlu2 %v1295_v63, %s2780_s30 }
 0x678   : > { %v1488_v49 = vpop.f32.mrf.mxu2 }
 0x679   : > { %1544 = vrot.lane.b32.xlu0 %v1488_v49, %s2781_s22 }
 0x680   : > { %v1393_v0 = vpop.f32.mrf.mxu1  ;;  %v1491_v1 = vpop.f32.mrf.mxu2 }
 0x681   : > { %1546 = vrot.lane.b32.xlu1 %v1491_v1, %s2781_s22  ;;  %1538 = vrot.lane.b32.xlu0 %v1393_v0, %s2777_s2 }
 0x694   : > { %v1537_v12 = vpop.permute.xlu1 %1536 }
 0x69c   : > { %v1507_v56 = vpop.permute.xlu1 %1506 }
 0x6a3   : > { %v1497_v41 = vpop.permute.xlu2 %1496 }
 0x6a4   : > { %v1550_v14 = vsel %vm716_vm8, %v3126_v33, %v1497_v41 }
 0x6a5   : > { %v1553_v17 = vsel %vm1552_vm10, %v1550_v14, %v1505_v11 }
 0x6ab   : > { %v1499_v3 = vpop.permute.xlu2 %1498 }
 0x6ac   : > { %v1551_v24 = vsel %vm716_vm8, %v3128_v36, %v1499_v3 }
 0x6ad   : > { %v1554_v25 = vsel %vm1552_vm10, %v1551_v24, %v1507_v56 }
 0x6bb   : > { %v1515_v13 = vpop.permute.xlu2 %1514 }
 0x6bc   : > { %v1557_v28 = vsel %vm1555_vm11, %v1554_v25, %v1515_v13 }
 0x6c3   : > { %v1529_v20 = vpop.permute.xlu2 %1528 }
 0x6cb   : > { %v1513_v18 = vpop.permute.xlu1 %1512  ;;  %v1531_v30 = vpop.permute.xlu2 %1530 }
 0x6cc   : > { %v1556_v6 = vsel %vm1555_vm11, %v1553_v17, %v1513_v18  ;;  %v2287_v18 = vld [vmem:[#allocation13] ss:$0 sm:$0xff] }
 0x6cd   : > { %v1558_v19 = vsel %vm750_vm9, %v1556_v6, %v1521_v9 }
 0x6ce   : > { %v1561_v21 = vsel %vm1560_vm12, %v1558_v19, %v1529_v20 }
 0x6cf   : > { %v1564_v23 = vsel %vm1563_vm13, %v1561_v21, %v1537_v12  ;;  %v2286_v12 = vld [vmem:[#allocation12] ss:$0 sm:$0xff] }
 0x6d3   : > { %v1523_v16 = vpop.permute.xlu1 %1522 }
 0x6d4   : > { %v1559_v29 = vsel %vm750_vm9, %v1557_v28, %v1523_v16 }
 0x6d5   : > { %v1562_v22 = vsel %vm1560_vm12, %v1559_v29, %v1531_v30  ;;  %v1803_v30 = vld [vmem:[%s3365_s11 + $0x78] sm:$0xff] }
 0x6d6   : > { %1808 = vmatpush.msra.mxu3 %v1803_v30 }
 0x6eb   : > { %v1545_v33 = vpop.permute.xlu0 %1544 }
 0x6ec   : > { %v1567_v31 = vsel %vm1566_vm14, %v1564_v23, %v1545_v33  ;;  %v2782_v23 = vmov 1.4142135  }
 0x6ed   : > { %2078 = vmatmul.msk.f32.vlgmr.msra.gmra.mxu0 %vm611_vm0, %v1567_v31 }
 0x6f3   : > { %v1547_v32 = vpop.permute.xlu1 %1546  ;;  %v1539_v36 = vpop.permute.xlu0 %1538 }
 0x6f4   : > { %v1565_v34 = vsel %vm1563_vm13, %v1562_v22, %v1539_v36  ;;  %v1802_v22 = vld [vmem:[%s3365_s11 + $0x70] sm:$0xff]  ;;  %v2288_v36 = vld [vmem:[#allocation16] ss:$0 sm:$0xff] }
 0x6f5   : > { %v1568_v37 = vsel %vm1566_vm14, %v1565_v34, %v1547_v32  ;;  %1809 = vmatpush.msra.mxu3 %v1802_v22  ;;  %v1801_v34 = vld [vmem:[%s3365_s11 + $0x68] sm:$0xff] }
 0x6f6   : > { %2079 = vmatmul.msk.f32.gmra.mxu0 %vm611_vm0, %v1568_v37 }
 0x6f7   : > { %1810 = vmatpush.msra.mxu3 %v1801_v34 }
 0x76a   : > { %v1600_v39 = vpop.f32.mrf.mxu0 }
 0x76b   : > { %v1601_v40 = vadd.f32 %v2285_v7, %v1600_v39  ;;  %v1800_v39 = vld [vmem:[%s3365_s11 + $0x60] sm:$0xff] }
 0x76c   : > { %1811 = vmatpush.msra.mxu3 %v1800_v39 }
 0x76d   : > { %v3259_v43 = vadd.f32 %v2374_v26, %v1601_v40  ;;  %v1799_v26 = vld [vmem:[%s3365_s11 + $0x58] sm:$0xff] }
 0x76e   : > { %1812 = vmatpush.msra.mxu3 %v1799_v26 }
 0x76f   : > { %v1610_v27 = vsel %vm611_vm0, %v3259_v43, 0.0 }
 0x770   : > { %1611 = vadd.xlane.f32.xlu2 %v1610_v27 }
 0x773   : > { %v1603_v44 = vpop.f32.mrf.mxu0 }
 0x774   : > { %v1604_v45 = vadd.f32 %v2285_v7, %v1603_v44  ;;  %v1798_v44 = vld [vmem:[%s3365_s11 + $0x50] sm:$0xff] }
 0x775   : > { %1813 = vmatpush.msra.mxu3 %v1798_v44 }
 0x776   : > { %v3264_v46 = vadd.f32 %v2375_v48, %v1604_v45  ;;  %v1797_v48 = vld [vmem:[%s3365_s11 + $0x48] sm:$0xff] }
 0x777   : > { %1814 = vmatpush.msra.mxu3 %v1797_v48 }
 0x778   : > { %v1613_v47 = vsel %vm611_vm0, %v3264_v46, 0.0 }
 0x779   : > { %1614 = vadd.xlane.f32.xlu0 %v1613_v47 }
 0x7e3   : > { %v1612_v15 = vpop.xlane.xlu2 %1611 }
 0x7e4   : > { %v1616_v50 = vmul.f32 %v1612_v15, %v2974_v10  ;;  %v1796_v15 = vld [vmem:[%s3365_s11 + $0x40] sm:$0xff] }
 0x7e5   : > { %1815 = vmatpush.msra.mxu3 %v1796_v15  ;;  %v2783_v15 = vmov -1.0  }
 0x7e6   : > { %v1618_v57 = vsub.f32 %v3259_v43, %v1616_v50 }
 0x7e8   : > { %v1620_v51 = vmul.f32 %v1618_v57, %v1618_v57 }
 0x7ea   : > { %v1622_v62 = vsel %vm611_vm0, %v1620_v51, 0.0 }
 0x7eb   : > { %1623 = vadd.xlane.f32.xlu1 %v1622_v62  ;;  %v1795_v62 = vld [vmem:[%s3365_s11 + $0x38] sm:$0xff] }
 0x7ec   : > { %v1615_v52 = vpop.xlane.xlu0 %1614  ;;  %1816 = vmatpush.msra.mxu3 %v1795_v62 }
 0x7ed   : > { %v1617_v53 = vmul.f32 %v1615_v52, %v2974_v10 }
 0x7ef   : > { %v1619_v54 = vsub.f32 %v3264_v46, %v1617_v53  ;;  %v1794_v53 = vld [vmem:[%s3365_s11 + $0x30] sm:$0xff] }
 0x7f0   : > { %1817 = vmatpush.msra.mxu3 %v1794_v53 }
 0x7f1   : > { %v1621_v55 = vmul.f32 %v1619_v54, %v1619_v54 }
 0x7f3   : > { %v1625_v35 = vsel %vm611_vm0, %v1621_v55, 0.0  ;;  %v1793_v55 = vld [vmem:[%s3365_s11 + $0x28] sm:$0xff] }
 0x7f4   : > { %1626 = vadd.xlane.f32.xlu2 %v1625_v35  ;;  %1818 = vmatpush.msra.mxu3 %v1793_v55 }
 0x7f6   : > { %1819 = vmatpush.msra.mxu3 %v1792_v58 }
 0x85e   : > { %v1624_v38 = vpop.xlane.xlu1 %1623 }
 0x85f   : > { %v1628_v61 = vmul.f32 %v1624_v38, %v2974_v10  ;;  %v1791_v38 = vld [vmem:[%s3365_s11 + $0x18] sm:$0xff] }
 0x860   : > { %1820 = vmatpush.msra.mxu3 %v1791_v38 }
 0x861   : > { %v1630_v63 = vadd.f32 1e-05, %v1628_v61 }
 0x863   : > { %2360 = vrsqrt.f32 %v1630_v63  ;;  %vm1638_vm1 = vweird.f32 %v1630_v63 }
 0x867   : > { %v1627_v49 = vpop.xlane.xlu2 %1626 }
 0x868   : > { %v1629_v0 = vmul.f32 %v1627_v49, %v2974_v10 }
 0x869   : > { %v2361_v1 = vpop.eup %2360 }
 0x86a   : > { %v1633_v2 = vmul.f32 %v2361_v1, %v1630_v63  ;;  %v1631_v4 = vadd.f32 1e-05, %v1629_v0  ;;  %vm1639_vm15 = vweird.f32 %v2361_v1  ;;  %v1790_v63 = vld [vmem:[%s3365_s11 + $0x10] sm:$0xff] }
 0x86b   : > { %vm1640_vm2 = vmor %vm1638_vm1, %vm1639_vm15  ;;  %1821 = vmatpush.msra.mxu3 %v1790_v63 }
 0x86c   : > { %v1634_v5 = vmul.f32 %v2361_v1, %v1633_v2  ;;  %2362 = vrsqrt.f32 %v1631_v4  ;;  %vm1648_vm4 = vweird.f32 %v1631_v4  ;;  %v1789_v2 = vld [vmem:[%s3365_s11 + $0x8] sm:$0xff] }
 0x86d   : > { %2364 = vrcp.f32 %v2782_v23  ;;  %1822 = vmatpush.msra.mxu3 %v1789_v2 }
 0x86e   : > { %v1635_v8 = vmul.f32 0.5, %v1634_v5 }
 0x870   : > { %v1636_v11 = vsub.f32 1.5, %v1635_v8 }
 0x872   : > { %v2363_v9 = vpop.eup %2362  ;;  %v1637_v41 = vmul.f32 %v2361_v1, %v1636_v11 }
 0x873   : > { %v1643_v3 = vmul.f32 %v2363_v9, %v1631_v4  ;;  %vm1649_vm3 = vweird.f32 %v2363_v9  ;;  %v2365_v31 = vpop.eup %2364  ;;  %v1788_v4 = vld [vmem:[%s3365_s11] sm:$0xff] }
 0x874   : > { %v1641_v56 = vsel %vm1640_vm2, %v2361_v1, %v1637_v41  ;;  %vm1650_vm5 = vmor %vm1648_vm4, %vm1649_vm3  ;;  %v1704_v25 = vmul.f32 1.4142135, %v2365_v31  ;;  %vm1708_vm6 = vweird.f32 %v2365_v31  ;;  %1823 = vmatpush.msra.mxu3 %v1788_v4 }
 0x875   : > { %v1652_v13 = vmul.f32 %v1641_v56, %v1618_v57  ;;  %v1644_v14 = vmul.f32 %v2363_v9, %v1643_v3 }
 0x876   : > { %v1705_v28 = vsub.f32 1.0, %v1704_v25 }
 0x877   : > { %v1657_v17 = vmul.f32 %v2286_v12, %v1652_v13  ;;  %v1645_v10 = vmul.f32 0.5, %v1644_v14 }
 0x878   : > { %v1706_v29 = vmul.f32 %v2365_v31, %v1705_v28 }
 0x879   : > { %v1646_v6 = vsub.f32 1.5, %v1645_v10  ;;  %v1662_v19 = vadd.f32 %v2287_v18, %v1657_v17 }
 0x87a   : > { %v1707_v32 = vadd.f32 %v2365_v31, %v1706_v29 }
 0x87b   : > { %v1647_v20 = vmul.f32 %v2363_v9, %v1646_v6  ;;  %2080 = vmatmul.msk.f32.vlgmr.msra.gmra.mxu1 %vm611_vm0, %v1662_v19 }
 0x87c   : > { %v1709_v7 = vsel %vm1708_vm6, %v2365_v31, %v1707_v32 }
 0x87d   : > { %v1651_v21 = vsel %vm1650_vm5, %v2363_v9, %v1647_v20 }
 0x87e   : > { %v1653_v24 = vmul.f32 %v1651_v21, %v1619_v54 }
 0x880   : > { %v1658_v16 = vmul.f32 %v2286_v12, %v1653_v24 }
 0x882   : > { %v1663_v33 = vadd.f32 %v2287_v18, %v1658_v16 }
 0x884   : > { %2081 = vmatmul.msk.f32.gmra.mxu1 %vm611_vm0, %v1663_v33 }
 0x8f8   : > { %v1695_v37 = vpop.f32.mrf.mxu1 }
 0x8f9   : > { %v3290_v40 = vadd.f32 %v2288_v36, %v1695_v37 }
 0x8fb   : > { %v3296_v27 = vmul.f32 %v1709_v7, %v3290_v40 }
 0x8fd   : > { %v1716_v45 = vand.u32 2147483647, %v3296_v27  ;;  %vm1712_vm15 = vcmp.ge.f32.partialorder %v3296_v27, 0.0 }
 0x8ff   : > { %v1718_v47 = vmul.f32 0.3275911, %v1716_v45  ;;  %v1770_v12 = vsub.f32 0.0, %v1716_v45 }
 0x901   : > { %v1720_v50 = vadd.f32 1.0, %v1718_v47  ;;  %v1698_v57 = vpop.f32.mrf.mxu1  ;;  %v1772_v17 = vmul.f32 %v1770_v12, %v1716_v45 }
 0x902   : > { %v3308_v51 = vadd.f32 %v2288_v36, %v1698_v57 }
 0x903   : > { %2366 = vrcp.f32 %v1720_v50  ;;  %v1733_v49 = vand.u32 2147483648, %v1720_v50  ;;  %v1731_v1 = vand.u32 2147483647, %v1720_v50  ;;  %vm1727_vm8 = vweird.f32 %v1720_v50 }
 0x904   : > { %v3314_v52 = vmul.f32 %v1709_v7, %v3308_v51  ;;  %v1774_v16 = vmul.f32 1.442695, %v1772_v17 }
 0x905   : > { %v1734_v8 = vor.u32 1.1754944e-38, %v1733_v49  ;;  %vm1732_vm10 = vcmp.eq.f32.partialorder %v1731_v1, 8.507059e+37 }
 0x906   : > { %v1717_v54 = vand.u32 2147483647, %v3314_v52  ;;  %vm1713_vm1 = vcmp.ge.f32.partialorder %v3314_v52, 0.0 }
 0x908   : > { %v1719_v35 = vmul.f32 0.3275911, %v1717_v54  ;;  %v1771_v31 = vsub.f32 0.0, %v1717_v54 }
 0x909   : > { %v2367_v42 = vpop.eup %2366 }
 0x90a   : > { %v1723_v59 = vmul.f32 %v2367_v42, %v1720_v50  ;;  %v1721_v60 = vadd.f32 1.0, %v1719_v35  ;;  %vm1728_vm7 = vweird.f32 %v2367_v42  ;;  %v1773_v22 = vmul.f32 %v1771_v31, %v1717_v54 }
 0x90b   : > { %vm1729_vm9 = vmor %vm1727_vm8, %vm1728_vm7  ;;  %v1714_v50 = vsel %vm1712_vm15, 1.0, %v2783_v15  ;;  %v1701_v54 = vmul.f32 0.5, %v3290_v40 }
 0x90c   : > { %v1724_v61 = vsub.f32 1.0, %v1723_v59  ;;  %2368 = vrcp.f32 %v1721_v60  ;;  %v1748_v18 = vand.u32 2147483648, %v1721_v60  ;;  %v1746_v6 = vand.u32 2147483647, %v1721_v60 }
 0x90d   : > { %vm1742_vm12 = vweird.f32 %v1721_v60  ;;  %2370 = vpow2.f32 %v1774_v16  ;;  %v1776_v39 = vmul.f32 1.442695, %v1773_v22 }
 0x90e   : > { %v1725_v0 = vmul.f32 %v2367_v42, %v1724_v61  ;;  %v1749_v24 = vor.u32 1.1754944e-38, %v1748_v18  ;;  %vm1747_vm14 = vcmp.eq.f32.partialorder %v1746_v6, 8.507059e+37  ;;  %v1702_v61 = vmul.f32 0.5, %v3308_v51 }
 0x90f   : > { %2372 = vpow2.f32 %v1776_v39 }
 0x910   : > { %v1726_v5 = vadd.f32 %v2367_v42, %v1725_v0  ;;  %v2289_v0 = vld [vmem:[#allocation18] ss:$0 sm:$0xff] }
 0x912   : > { %v2369_v11 = vpop.eup %2368  ;;  %v1730_v9 = vsel %vm1729_vm9, %v2367_v42, %v1726_v5 }
 0x913   : > { %v1735_v41 = vsel %vm1732_vm10, %v1734_v8, %v1730_v9  ;;  %v1738_v3 = vmul.f32 %v2369_v11, %v1721_v60  ;;  %vm1743_vm11 = vweird.f32 %v2369_v11  ;;  %v2371_v26 = vpop.eup %2370  ;;  %v1715_v60 = vsel %vm1713_vm1, 1.0, %v2783_v15 }
 0x914   : > { %v1752_v56 = vmul.f32 1.0614054, %v1735_v41  ;;  %vm1744_vm13 = vmor %vm1742_vm12, %vm1743_vm11 }
 0x915   : > { %v1739_v13 = vsub.f32 1.0, %v1738_v3  ;;  %v2373_v58 = vpop.eup %2372 }
 0x916   : > { %v1754_v14 = vadd.f32 -1.4531521, %v1752_v56 }
 0x917   : > { %v1740_v10 = vmul.f32 %v2369_v11, %v1739_v13 }
 0x918   : > { %v1756_v19 = vmul.f32 %v1754_v14, %v1735_v41 }
 0x919   : > { %v1741_v20 = vadd.f32 %v2369_v11, %v1740_v10 }
 0x91a   : > { %v1758_v21 = vadd.f32 1.4214138, %v1756_v19 }
 0x91b   : > { %v1745_v33 = vsel %vm1744_vm13, %v2369_v11, %v1741_v20 }
 0x91c   : > { %v1760_v23 = vmul.f32 %v1758_v21, %v1735_v41  ;;  %v1750_v25 = vsel %vm1747_vm14, %v1749_v24, %v1745_v33 }
 0x91d   : > { %v1753_v28 = vmul.f32 1.0614054, %v1750_v25 }
 0x91e   : > { %v1762_v29 = vadd.f32 -0.28449672, %v1760_v23 }
 0x91f   : > { %v1755_v30 = vadd.f32 -1.4531521, %v1753_v28 }
 0x920   : > { %v1764_v32 = vmul.f32 %v1762_v29, %v1735_v41 }
 0x921   : > { %v1757_v36 = vmul.f32 %v1755_v30, %v1750_v25 }
 0x922   : > { %v1766_v34 = vadd.f32 0.2548296, %v1764_v32 }
 0x923   : > { %v1759_v37 = vadd.f32 1.4214138, %v1757_v36 }
 0x924   : > { %v1768_v7 = vmul.f32 %v1766_v34, %v1735_v41 }
 0x925   : > { %v1761_v44 = vmul.f32 %v1759_v37, %v1750_v25 }
 0x926   : > { %v1778_v45 = vmul.f32 %v2371_v26, %v1768_v7 }
 0x927   : > { %v1763_v48 = vadd.f32 -0.28449672, %v1761_v44 }
 0x928   : > { %v1780_v47 = vsub.f32 1.0, %v1778_v45 }
 0x929   : > { %v1765_v57 = vmul.f32 %v1763_v48, %v1750_v25 }
 0x92a   : > { %v1782_v62 = vmul.f32 %v1780_v47, %v1714_v50 }
 0x92b   : > { %v1767_v53 = vadd.f32 0.2548296, %v1765_v57 }
 0x92c   : > { %v1784_v55 = vadd.f32 1.0, %v1782_v62 }
 0x92d   : > { %v1769_v35 = vmul.f32 %v1767_v53, %v1750_v25 }
 0x92e   : > { %v1786_v42 = vmul.f32 %v1784_v55, %v1701_v54 }
 0x92f   : > { %v1779_v59 = vmul.f32 %v2373_v58, %v1769_v35 }
 0x930   : > { %1824 = vmatmul.f32.vlgmr.msra.gmra.mxu3 %v1786_v42 }
 0x931   : > { %v1781_v27 = vsub.f32 1.0, %v1779_v59 }
 0x933   : > { %v1783_v38 = vmul.f32 %v1781_v27, %v1715_v60 }
 0x935   : > { %v1785_v63 = vadd.f32 1.0, %v1783_v38 }
 0x937   : > { %v1787_v49 = vmul.f32 %v1785_v63, %v1702_v61 }
 0x939   : > { %1827 = vmatmul.f32.gmra.mxu3 %v1787_v49 }
 0x9b3   : > { %v1825_v1 = vpop.f32.mrf.mxu3 }
 0x9b4   : > { %v1826_v40 = vadd.f32 %v2289_v0, %v1825_v1 }
 0x9b6   : > { %v1831_v52 = vadd.f32 %v1826_v40, %v3259_v43 }
 0x9b8   : > { %1833 = vst.msk [vmem:[%s606_s14] sm:$0xff] %vm611_vm0, %v1831_v52 }
 0x9bc   : > { %v1828_v2 = vpop.f32.mrf.mxu3 }
 0x9bd   : > { %v1829_v4 = vadd.f32 %v2289_v0, %v1828_v2 }
 0x9bf   : > { %v1832_v5 = vadd.f32 %v1829_v4, %v3264_v46 }
 0x9c1   : > { %1834 = vst.msk [vmem:[%s606_s14 + $0x8] sm:$0xff] %vm611_vm0, %v1832_v5 }
 0x9c2 PF: > { %s29_s25 = sadd.s32 1, %s2736_s25  }
 0x9c3   : > { %p26_p7 = scmp.ge.s32.totalorder %s29_s25, 4  }
 0x9c5   :  { %28 = sbr.rel (!%p26_p7) target bundleno = 9 (0x9), region = 147 }
 0x9ca   :  { %1856 = vsyncpa [#allocation3], 1 }
 0x9cb   :  { %1858 = vsyncpa [#allocation3 + $0x1], 1 }
 0x9cc   :  { %1859 = vsyncpa [#allocation5], 1 }
 0x9cd   :  { %1860 = vsyncpa [#allocation8], 1 }
 0x9ce   :  { %1861 = vsyncpa [#allocation11], 1 }
 0x9cf   :  { %1862 = vsyncpa [#allocation14], 1 }
 0x9d0   :  { %1863 = vsyncpa [#allocation17], 1 }

// kernel: _lambda_.14
= control target key start
LH: loop header
LB: loop body
LE: loop exit
PB: predicated region body
PF: predicated region fallthrough
CT: control target
= control target key end

     0   :  { %9 = vsyncpa [#allocation3], 0  ;;  %s766_s0 = inlined_call_operand.vmem [shape: f32[2,5,64], index: 0, kind: input, shape index: {}]   ;;  %s767_s1 = inlined_call_operand.vmem [shape: f32[2,5,64], index: 1, kind: input, shape index: {}]   ;;  %s768_s2 = inlined_call_operand.hbm [shape: f32[3,64,128], index: 2, kind: input, shape index: {}]   ;;  %s769_s3 = inlined_call_operand.hbm [shape: f32[1,128], index: 3, kind: input, shape index: {}]   ;;  %s770_s4 = inlined_call_operand.vmem [shape: f32[2,4,128], index: 4, kind: output, shape index: {}]  }
   0x1   :  { %10 = vsyncpa [#allocation5], 0  ;;  %s705_s15 = smov 0  }
   0x2 LB: > { %s152_s18 = sshll.u32 %s768_s2, 4  ;;  %s540_s19 = sadd.s32 4294967295, %s674_s15   ;;  %s674_s15 = sphi %s705_s15, %s16_s15   ;;  %s153_s18 = int_to_ptr.hbm [resolvable:$true] %s152_s18 }
   0x3   : > { %p542_p0 = scmp.ge.s32.totalorder %s674_s15, 1  ;;  %p141_p1 = scmp.lt.s32.totalorder %s674_s15, 3 }
   0x4   : > { %p575_p2 = scmp.eq.s32.totalorder %s540_s19, 0  ;;  %s676_s21 = smov [#allocation2]  }
   0x5   : > { %p716_p3 = pnand %p542_p0, %p141_p1  ;;  %s154_s22 = sshll.u32 %s676_s21, 4  ;;  %s155_s22 = int_to_ptr.vmem [resolvable:$true] %s154_s22 }
   0x6   : > { %s167_s25 = sshll.u32 %s769_s3, 4  ;;  %s677_s26 = smov [#allocation4]   ;;  %s168_s25 = int_to_ptr.hbm [resolvable:$true] %s167_s25 }
   0x7   : > { %p568_p4 = pneg %p716_p3  ;;  %s169_s27 = sshll.u32 %s677_s26, 4  ;;  %s170_s27 = int_to_ptr.vmem [resolvable:$true] %s169_s27 }
   0x8   : > { %s678_s28 = smov 128   ;;  %s679_s29 = smov 8  }
   0x9   : > { %p569_p5 = pnand %p575_p2, %p568_p4  ;;  %196 = sbr.rel (%p716_p3) target bundleno = 217 (0xd9), region = 36 }
   0xb   : > { %571 = dma.hbm_to_vmem [thread:$0]  (!%p569_p5), %s153_s18, 3072, %s155_s22, [#allocation3], %s678_s28, %s678_s28, %s679_s29  }
   0xc   : > { %574 = dma.hbm_to_vmem [thread:$0]  (!%p569_p5), %s168_s25, 16, %s170_s27, [#allocation5]  }
   0xe   : > { %665 = dma.done.wait (%p575_p2), [#allocation3], 3072  }
   0xf   : > { %667 = vsyncadd (%p575_p2), [#allocation3], 4294964224 }
  0x10   : > { %669 = dma.done.wait (%p575_p2), [#allocation5], 16  }
  0x11   : > { %671 = vsyncadd (%p575_p2), [#allocation5], 4294967280  ;;  %p230_p6 = scmp.lt.s32.totalorder %s540_s19, 1  ;;  %v260_v0 = vld [vmem:[#allocation2 + $0x78] sm:$0xff]  ;;  %v259_v2 = vld [vmem:[#allocation2 + $0x70] sm:$0xff]  ;;  %vm271_vm0 = vcmask 523264  }
  0x12   : > { %v734_v1 = vld [vmem:[#allocation2 + $0xb8] sm:$0xff]  ;;  %283 = vmatpush.msra.mxu0 %v260_v0  ;;  %v737_v4 = vld [vmem:[#allocation2 + $0xb0] sm:$0xff]  ;;  %v258_v5 = vld [vmem:[#allocation2 + $0x68] sm:$0xff]  ;;  %354 = vmatpush.msra.mxu3 %v260_v0 }
  0x13   : > { %s773_s19 = smov (!%p230_p6, %s540_s19), 1  ;;  %329 = vmatpush.msra.mxu2 %v734_v1  ;;  %v251_v3 = vld [vmem:[#allocation2 + $0x38] sm:$0xff]  ;;  %v250_v6 = vld [vmem:[#allocation2 + $0x30] sm:$0xff]  ;;  %v267_v7 = vld [vmem:[#allocation2 + $0xa8] sm:$0xff] }
  0x14   : > { %306 = vmatpush.msra.mxu1 %v251_v3  ;;  %284 = vmatpush.msra.mxu0 %v259_v2  ;;  %v249_v8 = vld [vmem:[#allocation2 + $0x28] sm:$0xff]  ;;  %s549_s30 = sshll.u32 %s773_s19, 3  ;;  %v257_v9 = vld [vmem:[#allocation2 + $0x60] sm:$0xff]  ;;  %v256_v12 = vld [vmem:[#allocation2 + $0x58] sm:$0xff]  ;;  %s551_s11 = sshll.u32 %s773_s19, 2 }
  0x15   : > { %330 = vmatpush.msra.mxu2 %v737_v4  ;;  %v266_v10 = vld [vmem:[#allocation2 + $0xa0] sm:$0xff]  ;;  %355 = vmatpush.msra.mxu3 %v259_v2  ;;  %v265_v13 = vld [vmem:[#allocation2 + $0x98] sm:$0xff]  ;;  %s233_s7 = scalar_lea.vmem %s766_s0, %s549_s30  ;;  %v255_v15 = vld [vmem:[#allocation2 + $0x50] sm:$0xff]  ;;  %s237_s10 = scalar_lea.vmem %s767_s1, %s549_s30 }
  0x16   : > { %307 = vmatpush.msra.mxu1 %v250_v6  ;;  %285 = vmatpush.msra.mxu0 %v258_v5  ;;  %v248_v11 = vld [vmem:[#allocation2 + $0x20] sm:$0xff]  ;;  %v247_v14 = vld [vmem:[#allocation2 + $0x18] sm:$0xff]  ;;  %v264_v16 = vld [vmem:[#allocation2 + $0x90] sm:$0xff]  ;;  %s241_s14 = scalar_lea.vmem %s770_s4, %s551_s11 }
  0x17   : > { %331 = vmatpush.msra.mxu2 %v267_v7  ;;  %356 = vmatpush.msra.mxu3 %v258_v5  ;;  %v246_v17 = vld [vmem:[#allocation2 + $0x10] sm:$0xff]  ;;  %v242_v18 = vld [vmem:[%s233_s7] sm:$0x1f]  ;;  %v254_v19 = vld [vmem:[#allocation2 + $0x48] sm:$0xff] }
  0x18   : > { %308 = vmatpush.msra.mxu1 %v249_v8  ;;  %286 = vmatpush.msra.mxu0 %v257_v9  ;;  %v263_v20 = vld [vmem:[#allocation2 + $0x88] sm:$0xff]  ;;  %v253_v22 = vld [vmem:[#allocation2 + $0x40] sm:$0xff]  ;;  %v318_v24 = vrot.slane %v242_v18, 1 }
  0x19   : > { %332 = vmatpush.msra.mxu2 %v266_v10  ;;  %357 = vmatpush.msra.mxu3 %v257_v9  ;;  %v245_v21 = vld [vmem:[#allocation2 + $0x8] sm:$0xff]  ;;  %v262_v23 = vld [vmem:[#allocation2 + $0x80] sm:$0xff] }
  0x1a   : > { %309 = vmatpush.msra.mxu1 %v248_v11  ;;  %287 = vmatpush.msra.mxu0 %v256_v12  ;;  %v244_v25 = vld [vmem:[#allocation2] sm:$0xff] }
  0x1b   : > { %333 = vmatpush.msra.mxu2 %v265_v13  ;;  %358 = vmatpush.msra.mxu3 %v256_v12  ;;  %v243_v26 = vld [vmem:[%s237_s10] sm:$0x1f] }
  0x1c   : > { %310 = vmatpush.msra.mxu1 %v247_v14  ;;  %288 = vmatpush.msra.mxu0 %v255_v15  ;;  %v386_v27 = vrot.slane %v243_v26, 1  ;;  %v591_v31 = vld [vmem:[#allocation4] ss:$0 sm:$0xff] }
  0x1d   : > { %334 = vmatpush.msra.mxu2 %v264_v16  ;;  %359 = vmatpush.msra.mxu3 %v255_v15 }
  0x1e   : > { %311 = vmatpush.msra.mxu1 %v246_v17  ;;  %289 = vmatpush.msra.mxu0 %v254_v19 }
  0x1f   : > { %335 = vmatpush.msra.mxu2 %v263_v20  ;;  %360 = vmatpush.msra.mxu3 %v254_v19 }
  0x20   : > { %312 = vmatpush.msra.mxu1 %v245_v21  ;;  %290 = vmatpush.msra.mxu0 %v253_v22 }
  0x21   : > { %336 = vmatpush.msra.mxu2 %v262_v23  ;;  %552 = vmatmul.msk.f32.vlgmr.msra.gmra.mxu0 %vm271_vm0, %v243_v26 }
  0x22   : > { %554 = vmatmul.msk.f32.vlgmr.msra.gmra.mxu2 %vm271_vm0, %v318_v24  ;;  %374 = vmatpush.msrb.mxu0 %v251_v3 }
  0x23   : > { %313 = vmatpush.msra.mxu1 %v244_v25  ;;  %361 = vmatpush.msra.mxu3 %v253_v22 }
  0x24   : > { %375 = vmatpush.msrb.mxu0 %v250_v6  ;;  %553 = vmatmul.msk.f32.vlgmr.msra.gmra.mxu1 %vm271_vm0, %v242_v18 }
  0x25   : > { %397 = vmatpush.msrb.mxu1 %v734_v1  ;;  %555 = vmatmul.msk.f32.vlgmr.msra.gmra.mxu3 %vm271_vm0, %v318_v24 }
  0x26   : > { %376 = vmatpush.msrb.mxu0 %v249_v8 }
  0x27   : > { %398 = vmatpush.msrb.mxu1 %v737_v4 }
  0x28   : > { %377 = vmatpush.msrb.mxu0 %v248_v11 }
  0x29   : > { %399 = vmatpush.msrb.mxu1 %v267_v7 }
  0x2a   : > { %378 = vmatpush.msrb.mxu0 %v247_v14 }
  0x2b   : > { %400 = vmatpush.msrb.mxu1 %v266_v10 }
  0x2c   : > { %379 = vmatpush.msrb.mxu0 %v246_v17 }
  0x2d   : > { %401 = vmatpush.msrb.mxu1 %v265_v13 }
  0x2e   : > { %380 = vmatpush.msrb.mxu0 %v245_v21 }
  0x2f   : > { %402 = vmatpush.msrb.mxu1 %v264_v16 }
  0x30   : > { %381 = vmatpush.msrb.mxu0 %v244_v25 }
  0x31   : > { %403 = vmatpush.msrb.mxu1 %v263_v20  ;;  %556 = vmatmul.msk.f32.vlgmr.msrb.gmra.mxu0 %vm271_vm0, %v243_v26 }
  0x33   : > { %404 = vmatpush.msrb.mxu1 %v262_v23 }
  0x34   : > { %557 = vmatmul.msk.f32.vlgmr.msrb.gmra.mxu1 %vm271_vm0, %v386_v27 }
  0x9e   : > { %v292_v28 = vpop.f32.mrf.mxu0 }
  0xa1   : > { %v315_v29 = vpop.f32.mrf.mxu1 }
  0xa2   : > { %v316_v30 = vadd.f32 %v315_v29, %v292_v28 }
  0xa5   : > { %v338_v32 = vpop.f32.mrf.mxu2 }
  0xa6   : > { %v341_v33 = vadd.f32 %v338_v32, %v316_v30 }
  0xa8   : > { %v345_v34 = vadd.f32 %v591_v31, %v341_v33  ;;  %v363_v37 = vpop.f32.mrf.mxu3 }
  0xaa   : > { %v411_v35 = vsub.f32 0.0, %v345_v34 }
  0xac   : > { %v412_v36 = vmul.f32 1.442695, %v411_v35 }
  0xae   : > { %592 = vpow2.f32 %v412_v36  ;;  %v383_v38 = vpop.f32.mrf.mxu0 }
  0xaf   : > { %v384_v39 = vadd.f32 %v383_v38, %v363_v37 }
  0xb1   : > { %v406_v40 = vpop.f32.mrf.mxu1 }
  0xb2   : > { %v409_v41 = vadd.f32 %v406_v40, %v384_v39 }
  0xb4   : > { %v410_v42 = vadd.f32 %v591_v31, %v409_v41  ;;  %v593_v43 = vpop.eup %592 }
  0xb5   : > { %v414_v44 = vadd.f32 1.0, %v593_v43 }
  0xb6   : > { %v431_v45 = vsub.f32 0.0, %v410_v42 }
  0xb7   : > { %594 = vrcp.f32 %v414_v44  ;;  %v426_v56 = vand.u32 2147483648, %v414_v44  ;;  %vm420_vm2 = vweird.f32 %v414_v44  ;;  %v424_v57 = vand.u32 2147483647, %v414_v44 }
  0xb8   : > { %v432_v46 = vmul.f32 1.442695, %v431_v45 }
  0xb9   : > { %v427_v63 = vor.u32 1.1754944e-38, %v426_v56  ;;  %vm425_vm5 = vcmp.eq.f32.partialorder %v424_v57, 8.507059e+37 }
  0xba   : > { %596 = vpow2.f32 %v432_v46 }
  0xbd   : > { %v595_v47 = vpop.eup %594 }
  0xbe   : > { %v416_v48 = vmul.f32 %v595_v47, %v414_v44  ;;  %vm421_vm1 = vweird.f32 %v595_v47 }
  0xbf   : > { %vm422_vm3 = vmor %vm420_vm2, %vm421_vm1 }
  0xc0   : > { %v597_v49 = vpop.eup %596  ;;  %v417_v51 = vsub.f32 1.0, %v416_v48 }
  0xc1   : > { %v434_v50 = vadd.f32 1.0, %v597_v49 }
  0xc2   : > { %v418_v52 = vmul.f32 %v595_v47, %v417_v51 }
  0xc3   : > { %598 = vrcp.f32 %v434_v50  ;;  %v446_v59 = vand.u32 2147483648, %v434_v50  ;;  %v444_v62 = vand.u32 2147483647, %v434_v50  ;;  %vm440_vm6 = vweird.f32 %v434_v50 }
  0xc4   : > { %v419_v54 = vadd.f32 %v595_v47, %v418_v52 }
  0xc5   : > { %v447_v2 = vor.u32 1.1754944e-38, %v446_v59  ;;  %vm445_vm8 = vcmp.eq.f32.partialorder %v444_v62, 8.507059e+37 }
  0xc6   : > { %v423_v60 = vsel %vm422_vm3, %v595_v47, %v419_v54 }
  0xc7   : > { %v428_v1 = vsel %vm425_vm5, %v427_v63, %v423_v60 }
  0xc8   : > { %v430_v5 = vmul.f32 %v428_v1, %v345_v34 }
  0xc9   : > { %v599_v53 = vpop.eup %598 }
  0xca   : > { %v436_v55 = vmul.f32 %v599_v53, %v434_v50  ;;  %vm441_vm4 = vweird.f32 %v599_v53 }
  0xcb   : > { %vm442_vm7 = vmor %vm440_vm6, %vm441_vm4 }
  0xcc   : > { %v437_v58 = vsub.f32 1.0, %v436_v55 }
  0xce   : > { %v438_v61 = vmul.f32 %v599_v53, %v437_v58 }
  0xd0   : > { %v439_v0 = vadd.f32 %v599_v53, %v438_v61 }
  0xd2   : > { %v443_v3 = vsel %vm442_vm7, %v599_v53, %v439_v0 }
  0xd3   : > { %v448_v4 = vsel %vm445_vm8, %v447_v2, %v443_v3 }
  0xd4   : > { %v450_v6 = vmul.f32 %v448_v4, %v410_v42 }
  0xd6   : > { %v451_v7 = vmax.f32 %v430_v5, %v450_v6 }
  0xd8   : > { %452 = vst [vmem:[%s241_s14] sm:$0xf] %v451_v7 }
  0xd9 PF: > { %s16_s15 = sadd.s32 1, %s674_s15  }
  0xda   : > { %p13_p7 = scmp.ge.s32.totalorder %s16_s15, 4  }
  0xdc   :  { %15 = sbr.rel (!%p13_p7) target bundleno = 2 (0x2), region = 80 }
  0xe1   :  { %472 = vsyncpa [#allocation3], 1 }
  0xe2   :  { %474 = vsyncpa [#allocation3 + $0x1], 1 }
  0xe3   :  { %475 = vsyncpa [#allocation5], 1 }

// kernel: _lambda_.13
= control target key start
LH: loop header
LB: loop body
LE: loop exit
PB: predicated region body
PF: predicated region fallthrough
CT: control target
= control target key end

     0   :  { %18 = vsyncpa [#allocation3], 0  ;;  %s2171_s0 = inlined_call_operand.vmem [shape: f32[2,8,64], index: 0, kind: input, shape index: {}]   ;;  %s2172_s1 = inlined_call_operand.vmem [shape: f32[1,64], index: 1, kind: input, shape index: {}]   ;;  %s2173_s2 = inlined_call_operand.vmem [shape: f32[1,64], index: 2, kind: input, shape index: {}]   ;;  %s2174_s3 = inlined_call_operand.hbm [shape: f32[64,192], index: 3, kind: input, shape index: {}]   ;;  %s2175_s4 = inlined_call_operand.vmem [shape: f32[1,192], index: 4, kind: input, shape index: {}]   ;;  %s2176_s5 = inlined_call_operand.vmem [shape: f32[64,64], index: 5, kind: input, shape index: {}]   ;;  %s2177_s6 = inlined_call_operand.vmem [shape: f32[1,64], index: 6, kind: input, shape index: {}]   ;;  %s2178_s7 = inlined_call_operand.vmem [shape: f32[1,64], index: 7, kind: input, shape index: {}]   ;;  %s2179_s8 = inlined_call_operand.vmem [shape: f32[1,64], index: 8, kind: input, shape index: {}]   ;;  %s2180_s9 = inlined_call_operand.hbm [shape: f32[64,256], index: 9, kind: input, shape index: {}]   ;;  %s2181_s10 = inlined_call_operand.vmem [shape: f32[1,256], index: 10, kind: input, shape index: {}]   ;;  %s2182_s11 = inlined_call_operand.vmem [shape: f32[256,64], index: 11, kind: input, shape index: {}]   ;;  %s2183_s12 = inlined_call_operand.vmem [shape: f32[1,64], index: 12, kind: input, shape index: {}]   ;;  %s2184_s13 = inlined_call_operand.vmem [shape: f32[2,8,64], index: 13, kind: output, shape index: {}]  }
   0x1   :  { %19 = vsyncpa [#allocation5], 0  ;;  %s1829_s25 = smov 0  }
   0x2 LB: > { %s351_s28 = sshll.u32 %s2174_s3, 4  ;;  %s1516_s29 = sadd.s32 4294967295, %s1735_s25   ;;  %s1735_s25 = sphi %s1829_s25, %s25_s25   ;;  %s352_s28 = int_to_ptr.hbm [resolvable:$true] %s351_s28 }
   0x3   : > { %p1518_p0 = scmp.ge.s32.totalorder %s1735_s25, 1  ;;  %p334_p1 = scmp.lt.s32.totalorder %s1735_s25, 3 }
   0x4   : > { %p1573_p2 = scmp.eq.s32.totalorder %s1516_s29, 0  ;;  %s1737_s14 = smov [#allocation2]  }
   0x5   : > { %p1840_p3 = pnand %p1518_p0, %p334_p1  ;;  %s353_s15 = sshll.u32 %s1737_s14, 4  ;;  %s354_s15 = int_to_ptr.vmem [resolvable:$true] %s353_s15 }
   0x6   : > { %s380_s18 = sshll.u32 %s2180_s9, 4  ;;  %s1738_s19 = smov [#allocation4]   ;;  %s381_s18 = int_to_ptr.hbm [resolvable:$true] %s380_s18 }
   0x7   : > { %p1566_p4 = pneg %p1840_p3  ;;  %s382_s20 = sshll.u32 %s1738_s19, 4  ;;  %s383_s20 = int_to_ptr.vmem [resolvable:$true] %s382_s20 }
   0x8   : > { %s1739_s21 = smov 256   ;;  %s1740_s22 = smov 16  }
   0x9   : > { %p1567_p5 = pnand %p1573_p2, %p1566_p4  ;;  %414 = sbr.rel (%p1840_p3) target bundleno = 2382 (0x94e), region = 72 }
   0xb   : > { %1569 = dma.hbm_to_vmem [thread:$0]  (!%p1567_p5), %s352_s28, 2048, %s354_s15, [#allocation3], %s1739_s21, %s1739_s21, %s1740_s22  }
   0xc   : > { %1572 = dma.hbm_to_vmem [thread:$0]  (!%p1567_p5), %s381_s18, 2048, %s383_s20, [#allocation5], %s1739_s21, %s1739_s21, %s1740_s22  }
   0xe   : > { %1726 = dma.done.wait (%p1573_p2), [#allocation3], 2048  }
   0xf   : > { %1728 = vsyncadd (%p1573_p2), [#allocation3], 4294965248 }
  0x10   : > { %1730 = dma.done.wait (%p1573_p2), [#allocation5], 2048  }
  0x11   : > { %1732 = vsyncadd (%p1573_p2), [#allocation5], 4294965248  ;;  %p462_p6 = scmp.lt.s32.totalorder %s1516_s29, 1  ;;  %vm473_vm0 = vcmask 523264   ;;  %v1741_v2 = vmov 64.0   ;;  %v525_v14 = vld [vmem:[#allocation2 + $0x70] sm:$0xff] }
  0x12   : > { %1613 = vrcp.f32 %v1741_v2  ;;  %v526_v15 = vld [vmem:[#allocation2 + $0x78] sm:$0xff]  ;;  %544 = vmatpush.msra.mxu0 %v525_v14  ;;  %v523_v16 = vld [vmem:[#allocation2 + $0x60] sm:$0xff]  ;;  %v524_v17 = vld [vmem:[#allocation2 + $0x68] sm:$0xff]  ;;  %s1742_s18 = smov 104   ;;  %s1743_s19 = smov 64   ;;  %vm579_vm5 = vcmask 64512  }
  0x13   : > { %s2187_s29 = smov (!%p462_p6, %s1516_s29), 1  ;;  %564 = vmatpush.msra.mxu1 %v526_v15  ;;  %v521_v18 = vld [vmem:[#allocation2 + $0x50] sm:$0xff]  ;;  %v522_v19 = vld [vmem:[#allocation2 + $0x58] sm:$0xff]  ;;  %v519_v20 = vld [vmem:[#allocation2 + $0x40] sm:$0xff]  ;;  %s1744_s20 = smov 40   ;;  %vm1131_vm6 = vcmask 130048  }
  0x14   : > { %s1525_s23 = sshll.u32 %s2187_s29, 3  ;;  %545 = vmatpush.msra.mxu0 %v523_v16  ;;  %v520_v21 = vld [vmem:[#allocation2 + $0x48] sm:$0xff]  ;;  %v517_v22 = vld [vmem:[#allocation2 + $0x30] sm:$0xff]  ;;  %v518_v23 = vld [vmem:[#allocation2 + $0x38] sm:$0xff]  ;;  %s1745_s21 = smov 56   ;;  %vm1133_vm7 = vcmask 195584  }
  0x15   : > { %s465_s27 = scalar_lea.vmem %s2171_s0, %s1525_s23  ;;  %565 = vmatpush.msra.mxu1 %v524_v17  ;;  %v515_v24 = vld [vmem:[#allocation2 + $0x20] sm:$0xff]  ;;  %v516_v25 = vld [vmem:[#allocation2 + $0x28] sm:$0xff]  ;;  %v513_v26 = vld [vmem:[#allocation2 + $0x10] sm:$0xff]  ;;  %s1746_s22 = smov 48   ;;  %vm1135_vm8 = vcmask 261120   ;;  %vm1137_vm9 = vcmask 326656  }
  0x16   : > { %v1864_v0 = vld [vmem:[%s465_s27] sm:$0xff]  ;;  %546 = vmatpush.msra.mxu0 %v521_v18  ;;  %v514_v27 = vld [vmem:[#allocation2 + $0x18] sm:$0xff]  ;;  %v512_v29 = vld [vmem:[#allocation2 + $0x8] sm:$0xff]  ;;  %s1747_s24 = smov 120   ;;  %s1748_s26 = smov 16   ;;  %vm1139_vm10 = vcmask 392192  }
  0x17   : > { %v474_v1 = vsel %vm473_vm0, %v1864_v0, 0.0  ;;  %566 = vmatpush.msra.mxu1 %v522_v19  ;;  %v511_v28 = vld [vmem:[#allocation2] sm:$0xff]  ;;  %s1749_s27 = smov 112   ;;  %s1750_s28 = smov 24   ;;  %vm1141_vm11 = vcmask 457728  }
  0x18   : > { %475 = vadd.xlane.f32.xlu0 %v474_v1  ;;  %v1614_v3 = vpop.eup %1613  ;;  %547 = vmatpush.msra.mxu0 %v519_v20  ;;  %v1607_v39 = vld [vmem:[%s2172_s1] ss:$0 sm:$0xff]  ;;  %s1751_s30 = smov 32   ;;  %s1752_s14 = smov 8  }
  0x19   : > { %v478_v4 = vmul.f32 64.0, %v1614_v3  ;;  %vm482_vm1 = vweird.f32 %v1614_v3  ;;  %567 = vmatpush.msra.mxu1 %v520_v21  ;;  %v1608_v42 = vld [vmem:[%s2173_s2] ss:$0 sm:$0xff]  ;;  %s1753_s15 = smov 80   ;;  %s1754_s16 = smov 88  }
  0x1a   : > { %548 = vmatpush.msra.mxu0 %v517_v22  ;;  %v527_v45 = vld [vmem:[%s2175_s4] sm:$0x3]  ;;  %s1755_s17 = smov 96  }
  0x1b   : > { %v479_v5 = vsub.f32 1.0, %v478_v4  ;;  %568 = vmatpush.msra.mxu1 %v518_v23  ;;  %v529_v46 = vperm.slane %v527_v45, 0  ;;  %v530_v47 = vperm.slane %v527_v45, 1 }
  0x1c   : > { %549 = vmatpush.msra.mxu0 %v515_v24 }
  0x1d   : > { %v480_v6 = vmul.f32 %v1614_v3, %v479_v5  ;;  %569 = vmatpush.msra.mxu1 %v516_v25 }
  0x1e   : > { %550 = vmatpush.msra.mxu0 %v513_v26 }
  0x1f   : > { %v481_v7 = vadd.f32 %v1614_v3, %v480_v6  ;;  %570 = vmatpush.msra.mxu1 %v514_v27 }
  0x20   : > { %551 = vmatpush.msra.mxu0 %v511_v28 }
  0x21   : > { %v1868_v8 = vsel %vm482_vm1, %v1614_v3, %v481_v7  ;;  %571 = vmatpush.msra.mxu1 %v512_v29 }
  0x8b   : > { %v476_v9 = vpop.xlane.xlu0 %475 }
  0x8c   : > { %v484_v10 = vmul.f32 %v1868_v8, %v476_v9 }
  0x8e   : > { %v485_v11 = vsub.f32 %v1864_v0, %v484_v10 }
  0x90   : > { %v486_v12 = vmul.f32 %v485_v11, %v485_v11 }
  0x92   : > { %v487_v13 = vsel %vm473_vm0, %v486_v12, 0.0 }
  0x93   : > { %488 = vadd.xlane.f32.xlu0 %v487_v13 }
 0x106   : > { %v489_v30 = vpop.xlane.xlu0 %488 }
 0x107   : > { %v490_v31 = vmul.f32 %v489_v30, %v1868_v8 }
 0x109   : > { %v491_v32 = vadd.f32 1e-05, %v490_v31 }
 0x10b   : > { %1615 = vrsqrt.f32 %v491_v32  ;;  %vm498_vm3 = vweird.f32 %v491_v32 }
 0x111   : > { %v1616_v33 = vpop.eup %1615 }
 0x112   : > { %v493_v34 = vmul.f32 %v1616_v33, %v491_v32  ;;  %vm499_vm2 = vweird.f32 %v1616_v33 }
 0x113   : > { %vm500_vm4 = vmor %vm498_vm3, %vm499_vm2 }
 0x114   : > { %v494_v35 = vmul.f32 %v1616_v33, %v493_v34 }
 0x116   : > { %v495_v36 = vmul.f32 0.5, %v494_v35 }
 0x118   : > { %v496_v37 = vsub.f32 1.5, %v495_v36 }
 0x11a   : > { %v497_v38 = vmul.f32 %v1616_v33, %v496_v37 }
 0x11c   : > { %v501_v40 = vsel %vm500_vm4, %v1616_v33, %v497_v38 }
 0x11d   : > { %v502_v41 = vmul.f32 %v501_v40, %v485_v11 }
 0x11f   : > { %v506_v43 = vmul.f32 %v1607_v39, %v502_v41 }
 0x121   : > { %v510_v44 = vadd.f32 %v1608_v42, %v506_v43 }
 0x123   : > { %1527 = vmatmul.msk.f32.vlgmr.msra.gmra.mxu0 %vm473_vm0, %v510_v44  ;;  %1528 = vmatmul.msk.f32.vlgmr.msra.gmra.mxu1 %vm473_vm0, %v510_v44 }
 0x1a0   : > { %v553_v48 = vpop.f32.mrf.mxu0  ;;  %v573_v49 = vpop.f32.mrf.mxu1 }
 0x1a1   : > { %v1885_v50 = vadd.f32 %v553_v48, %v529_v46  ;;  %v1887_v51 = vadd.f32 %v573_v49, %v530_v47 }
 0x1a3   : > { %634 = vmatpush.msra.mxu3 %v1887_v51  ;;  %772 = vrot.lane.b32.xlu2 %v1885_v50, %s1742_s18 }
 0x1a4   : > { %577 = vrot.lane.b32.xlu1 %v1885_v50, %s1743_s19 }
 0x1ac   : > { %774 = vrot.lane.b32.xlu1 %v1885_v50, %s1744_s20 }
 0x1fd   : > { %v773_v54 = vpop.permute.xlu2 %772 }
 0x216   : > { %v578_v52 = vpop.permute.xlu1 %577 }
 0x217   : > { %1529 = vmatpush.xpose.msk.msra.mxu2 %vm579_vm5, %v578_v52 }
 0x21a   : > { %1530 = vmatmul.msk.f32.vlgmr.msra.gmra.mxu2 %vm579_vm5, %v1885_v50 }
 0x21e   : > { %v775_v53 = vpop.permute.xlu1 %774 }
 0x21f   : > { %1538 = vmatpush.xpose.msk.msrb.mxu0 %vm579_vm5, %v775_v53 }
 0x222   : > { %1539 = vmatmul.msk.f32.vlgmr.msrb.gmra.mxu0 %vm579_vm5, %v773_v54 }
 0x29d   : > { %v601_v55 = vpop.f32.mrf.mxu2 }
 0x29e   : > { %v604_v56 = vmul.f32 0.35355338, %v601_v55 }
 0x29f   : > { %v797_v57 = vpop.f32.mrf.mxu0 }
 0x2a0   : > { %v800_v58 = vmul.f32 0.35355338, %v797_v57  ;;  %v605_v59 = vsel %vm579_vm5, %v604_v56, -inf }
 0x2a1   : > { %606 = vmax.xlane.f32.xlu2 %v605_v59 }
 0x2a2   : > { %v801_v60 = vsel %vm579_vm5, %v800_v58, -inf }
 0x2a3   : > { %802 = vmax.xlane.f32.xlu0 %v801_v60 }
 0x2b7   : > { %641 = vrot.lane.b32.xlu0 %v1885_v50, %s1745_s21 }
 0x2b9   : > { %708 = vrot.lane.b32.xlu2 %v1885_v50, %s1746_s22 }
 0x2bf   : > { %639 = vrot.lane.b32.xlu0 %v1885_v50, %s1747_s24 }
 0x2c1   : > { %972 = vrot.lane.b32.xlu2 %v1885_v50, %s1748_s26 }
 0x2c7   : > { %706 = vrot.lane.b32.xlu0 %v1885_v50, %s1749_s27 }
 0x2c9   : > { %906 = vrot.lane.b32.xlu2 %v1885_v50, %s1750_s28 }
 0x2cf   : > { %840 = vrot.lane.b32.xlu0 %v1885_v50, %s1751_s30 }
 0x2d1   : > { %1038 = vrot.lane.b32.xlu2 %v1885_v50, %s1752_s14 }
 0x2d7   : > { %812 = vrot.lane.b32.xlu0 %v1887_v51, %s1742_s18  ;;  %s1756_s18 = smov 72  }
 0x2df   : > { %970 = vrot.lane.b32.xlu0 %v1885_v50, %s1753_s15 }
 0x2e7   : > { %904 = vrot.lane.b32.xlu0 %v1885_v50, %s1754_s16 }
 0x314   : > { %v607_v61 = vpop.xlane.xlu2 %606 }
 0x315   : > { %v608_v1 = vsub.f32 %v604_v56, %v607_v61 }
 0x316   : > { %v803_v62 = vpop.xlane.xlu0 %802 }
 0x317   : > { %v804_v63 = vsub.f32 %v800_v58, %v803_v62  ;;  %v609_v3 = vmul.f32 1.442695, %v608_v1 }
 0x319   : > { %v805_v2 = vmul.f32 1.442695, %v804_v63 }
 0x31b   : > { %1617 = vpow2.f32 %v805_v2 }
 0x31c   : > { %1619 = vpow2.f32 %v609_v3  ;;  %v709_v11 = vpop.permute.xlu2 %708 }
 0x321   : > { %v1618_v4 = vpop.eup %1617 }
 0x322   : > { %v807_v5 = vsel %vm579_vm5, %v1618_v4, 0.0  ;;  %v1620_v6 = vpop.eup %1619 }
 0x323   : > { %808 = vadd.xlane.f32.xlu1 %v807_v5  ;;  %v611_v9 = vsel %vm579_vm5, %v1620_v6, 0.0 }
 0x324   : > { %v973_v13 = vpop.permute.xlu2 %972 }
 0x329   : > { %v642_v7 = vpop.permute.xlu0 %641 }
 0x32a   : > { %1532 = vmatpush.xpose.msk.msrb.mxu3 %vm579_vm5, %v642_v7 }
 0x32b   : > { %612 = vadd.xlane.f32.xlu1 %v611_v9 }
 0x32c   : > { %v907_v16 = vpop.permute.xlu2 %906 }
 0x331   : > { %v640_v10 = vpop.permute.xlu0 %639 }
 0x334   : > { %v1039_v22 = vpop.permute.xlu2 %1038 }
 0x339   : > { %v707_v12 = vpop.permute.xlu0 %706 }
 0x341   : > { %v841_v14 = vpop.permute.xlu0 %840 }
 0x344   : > { %838 = vrot.lane.b32.xlu1 %v1885_v50, %s1755_s17 }
 0x349   : > { %v813_v15 = vpop.permute.xlu0 %812 }
 0x34a   : > { %833 = vmatpush.msra.mxu0 %v813_v15 }
 0x34c   : > { %1544 = vmatpush.xpose.msk.msrb.mxu0 %vm579_vm5, %v907_v16  ;;  %1036 = vrot.lane.b32.xlu1 %v1885_v50, %s1756_s18 }
 0x351   : > { %v971_v19 = vpop.permute.xlu0 %970 }
 0x359   : > { %v905_v25 = vpop.permute.xlu0 %904 }
 0x396   : > { %v809_v17 = vpop.xlane.xlu1 %808 }
 0x397   : > { %1621 = vrcp.f32 %v809_v17 }
 0x39d   : > { %v1622_v18 = vpop.eup %1621 }
 0x39e   : > { %v811_v20 = vmul.f32 %v1622_v18, %v1618_v4  ;;  %v613_v21 = vpop.xlane.xlu1 %612 }
 0x39f   : > { %1623 = vrcp.f32 %v613_v21 }
 0x3a0   : > { %1540 = vmatmul.msk.f32.vlgmr.msra.gmra.mxu0 %vm579_vm5, %v811_v20 }
 0x3a1   : > { %1550 = vmatpush.xpose.msk.msra.mxu0 %vm579_vm5, %v1039_v22 }
 0x3a5   : > { %v1624_v23 = vpop.eup %1623 }
 0x3a6   : > { %v615_v24 = vmul.f32 %v1624_v23, %v1620_v6 }
 0x3a8   : > { %1531 = vmatmul.msk.f32.vlgmr.msra.gmra.mxu3 %vm579_vm5, %v615_v24  ;;  %1545 = vmatmul.msk.f32.vlgmr.msrb.gmra.mxu0 %vm579_vm5, %v905_v25 }
 0x3a9   : > { %1535 = vmatpush.xpose.msk.msra.mxu3 %vm579_vm5, %v709_v11 }
 0x3b0   : > { %1533 = vmatmul.msk.f32.vlgmr.msrb.gmra.mxu3 %vm579_vm5, %v640_v10 }
 0x3b1   : > { %1541 = vmatpush.xpose.msk.msrb.mxu3 %vm579_vm5, %v841_v14 }
 0x3b6   : > { %v839_v26 = vpop.permute.xlu1 %838 }
 0x3b8   : > { %1536 = vmatmul.msk.f32.vlgmr.msra.gmra.mxu3 %vm579_vm5, %v707_v12 }
 0x3b9   : > { %1547 = vmatpush.xpose.msk.msra.mxu3 %vm579_vm5, %v973_v13 }
 0x3be   : > { %v1037_v27 = vpop.permute.xlu1 %1036 }
 0x3bf   : > { %1551 = vmatmul.msk.f32.vlgmr.msra.gmra.mxu0 %vm579_vm5, %v1037_v27 }
 0x3c0   : > { %1542 = vmatmul.msk.f32.vlgmr.msrb.gmra.mxu3 %vm579_vm5, %v839_v26 }
 0x3c8   : > { %1548 = vmatmul.msk.f32.vlgmr.msra.gmra.mxu3 %vm579_vm5, %v971_v19 }
 0x41d   : > { %v1944_v28 = vpop.f32.mrf.mxu0 }
 0x425   : > { %v929_v29 = vpop.f32.mrf.mxu0 }
 0x426   : > { %v932_v30 = vmul.f32 0.35355338, %v929_v29 }
 0x428   : > { %v933_v31 = vsel %vm579_vm5, %v932_v30, -inf }
 0x429   : > { %934 = vmax.xlane.f32.xlu0 %v933_v31 }
 0x42b   : > { %v1947_v32 = vpop.f32.mrf.mxu3 }
 0x433   : > { %v664_v33 = vpop.f32.mrf.mxu3 }
 0x434   : > { %v667_v34 = vmul.f32 0.35355338, %v664_v33 }
 0x436   : > { %v668_v35 = vsel %vm579_vm5, %v667_v34, -inf }
 0x437   : > { %669 = vmax.xlane.f32.xlu0 %v668_v35 }
 0x43b   : > { %v731_v36 = vpop.f32.mrf.mxu3 }
 0x43c   : > { %v734_v37 = vmul.f32 0.35355338, %v731_v36  ;;  %v1061_v38 = vpop.f32.mrf.mxu0 }
 0x43d   : > { %v1064_v39 = vmul.f32 0.35355338, %v1061_v38 }
 0x43e   : > { %v735_v40 = vsel %vm579_vm5, %v734_v37, -inf }
 0x43f   : > { %736 = vmax.xlane.f32.xlu2 %v735_v40  ;;  %v1065_v41 = vsel %vm579_vm5, %v1064_v39, -inf }
 0x440   : > { %1066 = vmax.xlane.f32.xlu1 %v1065_v41 }
 0x443   : > { %v863_v42 = vpop.f32.mrf.mxu3 }
 0x444   : > { %v866_v43 = vmul.f32 0.35355338, %v863_v42 }
 0x446   : > { %v867_v44 = vsel %vm579_vm5, %v866_v43, -inf }
 0x448   : > { %868 = vmax.xlane.f32.xlu1 %v867_v44 }
 0x44b   : > { %878 = vrot.lane.b32.xlu0 %v1887_v51, %s1755_s17  ;;  %v995_v45 = vpop.f32.mrf.mxu3 }
 0x44c   : > { %v998_v46 = vmul.f32 0.35355338, %v995_v45 }
 0x44e   : > { %v999_v47 = vsel %vm579_vm5, %v998_v46, -inf }
 0x457   : > { %746 = vrot.lane.b32.xlu2 %v1887_v51, %s1749_s27 }
 0x461   : > { %680 = vrot.lane.b32.xlu1 %v1887_v51, %s1747_s24 }
 0x480   : > { %1000 = vmax.xlane.f32.xlu2 %v999_v47  ;;  %v1150_v47 = vld [vmem:[%s2176_s5 + $0x38] sm:$0xff] }
 0x498   : > { %944 = vrot.lane.b32.xlu2 %v1887_v51, %s1754_s16 }
 0x49c   : > { %v935_v48 = vpop.xlane.xlu0 %934 }
 0x49d   : > { %v936_v49 = vsub.f32 %v932_v30, %v935_v48  ;;  %v1149_v48 = vld [vmem:[%s2176_s5 + $0x30] sm:$0xff] }
 0x49f   : > { %v937_v50 = vmul.f32 1.442695, %v936_v49  ;;  %v1148_v49 = vld [vmem:[%s2176_s5 + $0x28] sm:$0xff] }
 0x4a1   : > { %1625 = vpow2.f32 %v937_v50  ;;  %v1147_v50 = vld [vmem:[%s2176_s5 + $0x20] sm:$0xff] }
 0x4a7   : > { %v1626_v52 = vpop.eup %1625 }
 0x4a8   : > { %v939_v53 = vsel %vm579_vm5, %v1626_v52, 0.0 }
 0x4a9   : > { %940 = vadd.xlane.f32.xlu0 %v939_v53  ;;  %v1145_v53 = vld [vmem:[%s2176_s5 + $0x10] sm:$0xff] }
 0x4aa   : > { %v670_v54 = vpop.xlane.xlu0 %669 }
 0x4ab   : > { %v671_v55 = vsub.f32 %v667_v34, %v670_v54  ;;  %v1144_v54 = vld [vmem:[%s2176_s5 + $0x8] sm:$0xff] }
 0x4ad   : > { %v672_v56 = vmul.f32 1.442695, %v671_v55  ;;  %v1143_v55 = vld [vmem:[%s2176_s5] sm:$0xff] }
 0x4af   : > { %1627 = vpow2.f32 %v672_v56 }
 0x4b2   : > { %v737_v57 = vpop.xlane.xlu2 %736 }
 0x4b3   : > { %v738_v58 = vsub.f32 %v734_v37, %v737_v57  ;;  %v1067_v59 = vpop.xlane.xlu1 %1066 }
 0x4b4   : > { %v1068_v60 = vsub.f32 %v1064_v39, %v1067_v59 }
 0x4b5   : > { %v1628_v61 = vpop.eup %1627  ;;  %v739_v62 = vmul.f32 1.442695, %v738_v58 }
 0x4b6   : > { %v1069_v63 = vmul.f32 1.442695, %v1068_v60  ;;  %v674_v1 = vsel %vm579_vm5, %v1628_v61, 0.0 }
 0x4b7   : > { %1629 = vpow2.f32 %v739_v62  ;;  %675 = vadd.xlane.f32.xlu0 %v674_v1 }
 0x4b8   : > { %1631 = vpow2.f32 %v1069_v63 }
 0x4ba   : > { %v747_v13 = vpop.permute.xlu2 %746 }
 0x4bb   : > { %v869_v2 = vpop.xlane.xlu1 %868 }
 0x4bc   : > { %v870_v3 = vsub.f32 %v866_v43, %v869_v2 }
 0x4bd   : > { %v1630_v4 = vpop.eup %1629  ;;  %v879_v20 = vpop.permute.xlu0 %878 }
 0x4be   : > { %v1632_v5 = vpop.eup %1631  ;;  %v871_v6 = vmul.f32 1.442695, %v870_v3  ;;  %v741_v9 = vsel %vm579_vm5, %v1630_v4, 0.0 }
 0x4bf   : > { %v1071_v7 = vsel %vm579_vm5, %v1632_v5, 0.0 }
 0x4c0   : > { %1633 = vpow2.f32 %v871_v6  ;;  %1072 = vadd.xlane.f32.xlu1 %v1071_v7 }
 0x4c1   : > { %742 = vadd.xlane.f32.xlu2 %v741_v9 }
 0x4c6   : > { %v1634_v10 = vpop.eup %1633 }
 0x4c7   : > { %v873_v11 = vsel %vm579_vm5, %v1634_v10, 0.0 }
 0x4c8   : > { %874 = vadd.xlane.f32.xlu0 %v873_v11 }
 0x4d3   : > { %v681_v12 = vpop.permute.xlu1 %680 }
 0x4d4   : > { %701 = vmatpush.msrb.mxu2 %v681_v12 }
 0x4d6   : > { %767 = vmatpush.msra.mxu2 %v747_v13 }
 0x4d9   : > { %1010 = vrot.lane.b32.xlu2 %v1887_v51, %s1753_s15 }
 0x4e1   : > { %1111 = vrot.lane.b32.xlu2 %v1944_v28, %s1750_s28 }
 0x4f3   : > { %v1001_v14 = vpop.xlane.xlu2 %1000 }
 0x4f4   : > { %v1002_v15 = vsub.f32 %v998_v46, %v1001_v14 }
 0x4f6   : > { %v1003_v16 = vmul.f32 1.442695, %v1002_v15 }
 0x4f8   : > { %1635 = vpow2.f32 %v1003_v16 }
 0x4fb   : > { %v945_v17 = vpop.permute.xlu2 %944 }
 0x4fc   : > { %965 = vmatpush.msrb.mxu1 %v945_v17  ;;  %v1225_v17 = vld [vmem:[#allocation4 + $0x70] sm:$0xff] }
 0x4fe   : > { %v1636_v18 = vpop.eup %1635 }
 0x4ff   : > { %v1005_v19 = vsel %vm579_vm5, %v1636_v18, 0.0 }
 0x500   : > { %1006 = vadd.xlane.f32.xlu0 %v1005_v19  ;;  %v1223_v19 = vld [vmem:[#allocation4 + $0x60] sm:$0xff] }
 0x514   : > { %1076 = vrot.lane.b32.xlu0 %v1887_v51, %s1756_s18 }
 0x51c   : > { %v941_v21 = vpop.xlane.xlu0 %940 }
 0x51d   : > { %1637 = vrcp.f32 %v941_v21  ;;  %v1222_v21 = vld [vmem:[#allocation4 + $0x58] sm:$0xff] }
 0x523   : > { %v1638_v22 = vpop.eup %1637 }
 0x524   : > { %v943_v23 = vmul.f32 %v1638_v22, %v1626_v52  ;;  %v1146_v52 = vld [vmem:[%s2176_s5 + $0x18] sm:$0xff]  ;;  %v1219_v22 = vld [vmem:[#allocation4 + $0x40] sm:$0xff] }
 0x526   : > { %1546 = vmatmul.msk.f32.vlgmr.msrb.gmra.mxu1 %vm579_vm5, %v943_v23  ;;  %v1220_v23 = vld [vmem:[#allocation4 + $0x48] sm:$0xff] }
 0x52a   : > { %v676_v24 = vpop.xlane.xlu0 %675 }
 0x52b   : > { %1639 = vrcp.f32 %v676_v24  ;;  %v1217_v24 = vld [vmem:[#allocation4 + $0x30] sm:$0xff] }
 0x531   : > { %v1640_v25 = vpop.eup %1639 }
 0x532   : > { %v678_v26 = vmul.f32 %v1640_v25, %v1628_v61  ;;  %v1218_v25 = vld [vmem:[#allocation4 + $0x38] sm:$0xff] }
 0x533   : > { %v1073_v36 = vpop.xlane.xlu1 %1072 }
 0x534   : > { %v743_v27 = vpop.xlane.xlu2 %742  ;;  %1534 = vmatmul.msk.f32.vlgmr.msrb.gmra.mxu2 %vm579_vm5, %v678_v26  ;;  %v1215_v26 = vld [vmem:[#allocation4 + $0x20] sm:$0xff] }
 0x535   : > { %1641 = vrcp.f32 %v743_v27  ;;  %899 = vmatpush.msrb.mxu2 %v879_v20  ;;  %v1221_v20 = vld [vmem:[#allocation4 + $0x50] sm:$0xff]  ;;  %v1216_v27 = vld [vmem:[#allocation4 + $0x28] sm:$0xff] }
 0x53b   : > { %v1642_v28 = vpop.eup %1641  ;;  %v875_v29 = vpop.xlane.xlu0 %874 }
 0x53c   : > { %v745_v30 = vmul.f32 %v1642_v28, %v1630_v4  ;;  %1643 = vrcp.f32 %v875_v29  ;;  %v1011_v51 = vpop.permute.xlu2 %1010  ;;  %v1213_v28 = vld [vmem:[#allocation4 + $0x10] sm:$0xff]  ;;  %v1214_v29 = vld [vmem:[#allocation4 + $0x18] sm:$0xff] }
 0x53e   : > { %1537 = vmatmul.msk.f32.vlgmr.msra.gmra.mxu2 %vm579_vm5, %v745_v30  ;;  %v1211_v30 = vld [vmem:[#allocation4] sm:$0xff] }
 0x53f   : > { %1031 = vmatpush.msra.mxu2 %v1011_v51  ;;  %v1212_v51 = vld [vmem:[#allocation4 + $0x8] sm:$0xff] }
 0x542   : > { %v1644_v31 = vpop.eup %1643 }
 0x543   : > { %v877_v33 = vmul.f32 %v1644_v31, %v1634_v10 }
 0x544   : > { %v1112_v56 = vpop.permute.xlu2 %1111 }
 0x546   : > { %1543 = vmatmul.msk.f32.vlgmr.msrb.gmra.mxu2 %vm579_vm5, %v877_v33 }
 0x547   : > { %1166 = vmatpush.msrb.mxu2 %v1150_v47 }
 0x549   : > { %1167 = vmatpush.msrb.mxu2 %v1149_v48 }
 0x54b   : > { %1168 = vmatpush.msrb.mxu2 %v1148_v49 }
 0x54d   : > { %1169 = vmatpush.msrb.mxu2 %v1147_v50 }
 0x54f   : > { %1170 = vmatpush.msrb.mxu2 %v1146_v52  ;;  %v1227_v52 = vld [vmem:[%s2181_s10] sm:$0x3] }
 0x551   : > { %1171 = vmatpush.msrb.mxu2 %v1145_v53  ;;  %v1394_v53 = vld [vmem:[%s2182_s11 + $0xf8] sm:$0xff] }
 0x552   : > { %1419 = vmatpush.msrb.mxu3 %v1394_v53 }
 0x553   : > { %1172 = vmatpush.msrb.mxu2 %v1144_v54 }
 0x555   : > { %1173 = vmatpush.msrb.mxu2 %v1143_v55  ;;  %v1393_v55 = vld [vmem:[%s2182_s11 + $0xf0] sm:$0xff] }
 0x556   : > { %1420 = vmatpush.msrb.mxu3 %v1393_v55  ;;  %v1363_v55 = vld [vmem:[%s2182_s11] sm:$0xff] }
 0x573   : > { %v1007_v34 = vpop.xlane.xlu0 %1006 }
 0x574   : > { %1645 = vrcp.f32 %v1007_v34 }
 0x575   : > { %1647 = vrcp.f32 %v1073_v36 }
 0x57a   : > { %v1646_v35 = vpop.eup %1645 }
 0x57b   : > { %v1009_v37 = vmul.f32 %v1646_v35, %v1636_v18  ;;  %v1648_v38 = vpop.eup %1647  ;;  %v1226_v18 = vld [vmem:[#allocation4 + $0x78] sm:$0xff] }
 0x57c   : > { %v1075_v39 = vmul.f32 %v1648_v38, %v1632_v5  ;;  %1264 = vmatpush.msrb.mxu0 %v1226_v18  ;;  %v1386_v18 = vld [vmem:[%s2182_s11 + $0xb8] sm:$0xff] }
 0x57d   : > { %1549 = vmatmul.msk.f32.vlgmr.msra.gmra.mxu2 %vm579_vm5, %v1009_v37 }
 0x57e   : > { %1244 = vmatpush.msra.mxu2 %v1225_v17  ;;  %v1373_v17 = vld [vmem:[%s2182_s11 + $0x50] sm:$0xff] }
 0x580   : > { %1245 = vmatpush.msra.mxu2 %v1223_v19 }
 0x582   : > { %1246 = vmatpush.msra.mxu2 %v1221_v20  ;;  %v1385_v20 = vld [vmem:[%s2182_s11 + $0xb0] sm:$0xff] }
 0x584   : > { %1247 = vmatpush.msra.mxu2 %v1219_v22  ;;  %v1371_v22 = vld [vmem:[%s2182_s11 + $0x40] sm:$0xff] }
 0x586   : > { %v1077_v40 = vpop.permute.xlu0 %1076  ;;  %1248 = vmatpush.msra.mxu2 %v1217_v24 }
 0x587   : > { %1097 = vmatpush.msra.mxu1 %v1077_v40 }
 0x588   : > { %1552 = vmatmul.msk.f32.vlgmr.msra.gmra.mxu1 %vm579_vm5, %v1075_v39  ;;  %1249 = vmatpush.msra.mxu2 %v1215_v26  ;;  %v1383_v26 = vld [vmem:[%s2182_s11 + $0xa0] sm:$0xff] }
 0x58a   : > { %1250 = vmatpush.msra.mxu2 %v1213_v28 }
 0x58c   : > { %1251 = vmatpush.msra.mxu2 %v1211_v30  ;;  %v1382_v30 = vld [vmem:[%s2182_s11 + $0x98] sm:$0xff] }
 0x5a3   : > { %v967_v42 = vpop.f32.mrf.mxu1 }
 0x5b7   : > { %v703_v41 = vpop.f32.mrf.mxu2 }
 0x5b8   : > { %1103 = vrot.lane.b32.xlu2 %v703_v41, %s1752_s14  ;;  %v1610_v41 = vld [vmem:[%s2178_s7] ss:$0 sm:$0xff] }
 0x5c0   : > { %1119 = vrot.lane.b32.xlu2 %v967_v42, %s1744_s20 }
 0x5c1   : > { %v769_v43 = vpop.f32.mrf.mxu2 }
 0x5c2   : > { %1107 = vrot.lane.b32.xlu0 %v769_v43, %s1748_s26 }
 0x5c9   : > { %v901_v44 = vpop.f32.mrf.mxu2 }
 0x5ca   : > { %1115 = vrot.lane.b32.xlu0 %v901_v44, %s1751_s30 }
 0x600   : > { %v1033_v45 = vpop.f32.mrf.mxu2 }
 0x601   : > { %1123 = vrot.lane.b32.xlu1 %v1033_v45, %s1746_s22 }
 0x605   : > { %v1099_v46 = vpop.f32.mrf.mxu1 }
 0x606   : > { %1127 = vrot.lane.b32.xlu0 %v1099_v46, %s1745_s21  ;;  %v1757_v46 = vmov 1.4142135   ;;  %s469_s21 = scalar_lea.vmem %s2184_s13, %s1525_s23 }
 0x612   : > { %v1104_v58 = vpop.permute.xlu2 %1103 }
 0x613   : > { %v1130_v59 = vsel %vm579_vm5, %v1947_v32, %v1104_v58  ;;  %v1609_v32 = vld [vmem:[%s2177_s6] ss:$0 sm:$0xff] }
 0x61a   : > { %v1120_v2 = vpop.permute.xlu2 %1119 }
 0x634   : > { %v1108_v57 = vpop.permute.xlu0 %1107 }
 0x635   : > { %v1132_v60 = vsel %vm1131_vm6, %v1130_v59, %v1108_v57  ;;  %v1392_v57 = vld [vmem:[%s2182_s11 + $0xe8] sm:$0xff] }
 0x636   : > { %v1134_v62 = vsel %vm1133_vm7, %v1132_v60, %v1112_v56  ;;  %v1230_v56 = vperm.slane %v1227_v52, 1  ;;  %1421 = vmatpush.msrb.mxu3 %v1392_v57  ;;  %v1378_v60 = vld [vmem:[%s2182_s11 + $0x78] sm:$0xff] }
 0x637   : > { %1399 = vmatpush.msrb.mxu1 %v1378_v60 }
 0x63c   : > { %v1116_v61 = vpop.permute.xlu0 %1115 }
 0x63d   : > { %v1136_v63 = vsel %vm1135_vm8, %v1134_v62, %v1116_v61  ;;  %v1391_v61 = vld [vmem:[%s2182_s11 + $0xe0] sm:$0xff] }
 0x63e   : > { %v1138_v3 = vsel %vm1137_vm9, %v1136_v63, %v1120_v2  ;;  %1422 = vmatpush.msrb.mxu3 %v1391_v61  ;;  %v1377_v63 = vld [vmem:[%s2182_s11 + $0x70] sm:$0xff] }
 0x63f   : > { %1400 = vmatpush.msrb.mxu1 %v1377_v63 }
 0x673   : > { %v1124_v1 = vpop.permute.xlu1 %1123 }
 0x674   : > { %v1140_v4 = vsel %vm1139_vm10, %v1138_v3, %v1124_v1  ;;  %v1390_v1 = vld [vmem:[%s2182_s11 + $0xd8] sm:$0xff]  ;;  %v1229_v3 = vperm.slane %v1227_v52, 0  ;;  %v1364_v52 = vld [vmem:[%s2182_s11 + $0x8] sm:$0xff] }
 0x675   : > { %1423 = vmatpush.msrb.mxu3 %v1390_v1 }
 0x678   : > { %v1128_v5 = vpop.permute.xlu0 %1127 }
 0x679   : > { %v1142_v6 = vsel %vm1141_vm11, %v1140_v4, %v1128_v5  ;;  %v1376_v4 = vld [vmem:[%s2182_s11 + $0x68] sm:$0xff]  ;;  %v1389_v5 = vld [vmem:[%s2182_s11 + $0xd0] sm:$0xff] }
 0x67a   : > { %1553 = vmatmul.msk.f32.vlgmr.msrb.gmra.mxu2 %vm473_vm0, %v1142_v6  ;;  %1401 = vmatpush.msrb.mxu1 %v1376_v4 }
 0x67b   : > { %1424 = vmatpush.msrb.mxu3 %v1389_v5 }
 0x6fd   : > { %v1175_v7 = vpop.f32.mrf.mxu2 }
 0x6fe   : > { %v1176_v9 = vadd.f32 %v1609_v32, %v1175_v7  ;;  %v1375_v7 = vld [vmem:[%s2182_s11 + $0x60] sm:$0xff] }
 0x6ff   : > { %1402 = vmatpush.msrb.mxu1 %v1375_v7 }
 0x700   : > { %v2017_v10 = vadd.f32 %v1176_v9, %v1864_v0  ;;  %v1224_v0 = vld [vmem:[#allocation4 + $0x68] sm:$0xff] }
 0x701   : > { %1265 = vmatpush.msrb.mxu0 %v1224_v0  ;;  %v1388_v9 = vld [vmem:[%s2182_s11 + $0xc8] sm:$0xff] }
 0x702   : > { %v1181_v11 = vsel %vm473_vm0, %v2017_v10, 0.0  ;;  %1425 = vmatpush.msrb.mxu3 %v1388_v9  ;;  %v1372_v0 = vld [vmem:[%s2182_s11 + $0x48] sm:$0xff] }
 0x703   : > { %1182 = vadd.xlane.f32.xlu2 %v1181_v11  ;;  %1266 = vmatpush.msrb.mxu0 %v1222_v21 }
 0x705   : > { %1267 = vmatpush.msrb.mxu0 %v1220_v23  ;;  %v1384_v23 = vld [vmem:[%s2182_s11 + $0xa8] sm:$0xff] }
 0x707   : > { %1268 = vmatpush.msrb.mxu0 %v1218_v25  ;;  %v1370_v25 = vld [vmem:[%s2182_s11 + $0x38] sm:$0xff] }
 0x709   : > { %1269 = vmatpush.msrb.mxu0 %v1216_v27 }
 0x70b   : > { %1270 = vmatpush.msrb.mxu0 %v1214_v29  ;;  %v1369_v29 = vld [vmem:[%s2182_s11 + $0x30] sm:$0xff] }
 0x70d   : > { %1271 = vmatpush.msrb.mxu0 %v1212_v51 }
 0x776   : > { %v1183_v12 = vpop.xlane.xlu2 %1182 }
 0x777   : > { %v1184_v13 = vmul.f32 %v1183_v12, %v1868_v8 }
 0x779   : > { %v1185_v14 = vsub.f32 %v2017_v10, %v1184_v13  ;;  %v1374_v13 = vld [vmem:[%s2182_s11 + $0x58] sm:$0xff] }
 0x77a   : > { %1403 = vmatpush.msrb.mxu1 %v1374_v13 }
 0x77b   : > { %v1186_v15 = vmul.f32 %v1185_v14, %v1185_v14 }
 0x77c   : > { %1404 = vmatpush.msrb.mxu1 %v1373_v17 }
 0x77d   : > { %v1187_v16 = vsel %vm473_vm0, %v1186_v15, 0.0 }
 0x77e   : > { %1188 = vadd.xlane.f32.xlu0 %v1187_v16  ;;  %1405 = vmatpush.msrb.mxu1 %v1372_v0 }
 0x780   : > { %1406 = vmatpush.msrb.mxu1 %v1371_v22 }
 0x782   : > { %1407 = vmatpush.msrb.mxu1 %v1370_v25  ;;  %v1758_v25 = vmov -1.0  }
 0x784   : > { %1408 = vmatpush.msrb.mxu1 %v1369_v29 }
 0x7f1   : > { %v1189_v31 = vpop.xlane.xlu0 %1188 }
 0x7f2   : > { %v1190_v33 = vmul.f32 %v1189_v31, %v1868_v8  ;;  %v1611_v8 = vld [vmem:[%s2179_s8] ss:$0 sm:$0xff]  ;;  %v1368_v31 = vld [vmem:[%s2182_s11 + $0x28] sm:$0xff] }
 0x7f3   : > { %1409 = vmatpush.msrb.mxu1 %v1368_v31 }
 0x7f4   : > { %v1191_v34 = vadd.f32 1e-05, %v1190_v33  ;;  %v1381_v33 = vld [vmem:[%s2182_s11 + $0x90] sm:$0xff] }
 0x7f6   : > { %1649 = vrsqrt.f32 %v1191_v34  ;;  %vm1198_vm13 = vweird.f32 %v1191_v34 }
 0x7f7   : > { %1651 = vrcp.f32 %v1757_v46 }
 0x7fc   : > { %v1650_v35 = vpop.eup %1649 }
 0x7fd   : > { %v1193_v36 = vmul.f32 %v1650_v35, %v1191_v34  ;;  %vm1199_vm12 = vweird.f32 %v1650_v35  ;;  %v1652_v47 = vpop.eup %1651 }
 0x7fe   : > { %vm1200_vm14 = vmor %vm1198_vm13, %vm1199_vm12  ;;  %v1279_v48 = vmul.f32 1.4142135, %v1652_v47  ;;  %vm1283_vm15 = vweird.f32 %v1652_v47 }
 0x7ff   : > { %v1194_v37 = vmul.f32 %v1650_v35, %v1193_v36 }
 0x800   : > { %v1280_v49 = vsub.f32 1.0, %v1279_v48 }
 0x801   : > { %v1195_v38 = vmul.f32 0.5, %v1194_v37  ;;  %v1367_v37 = vld [vmem:[%s2182_s11 + $0x20] sm:$0xff] }
 0x802   : > { %v1281_v50 = vmul.f32 %v1652_v47, %v1280_v49  ;;  %1410 = vmatpush.msrb.mxu1 %v1367_v37 }
 0x803   : > { %v1196_v39 = vsub.f32 1.5, %v1195_v38  ;;  %v1380_v38 = vld [vmem:[%s2182_s11 + $0x88] sm:$0xff] }
 0x804   : > { %v1282_v54 = vadd.f32 %v1652_v47, %v1281_v50 }
 0x805   : > { %v1197_v40 = vmul.f32 %v1650_v35, %v1196_v39 }
 0x806   : > { %v1284_v59 = vsel %vm1283_vm15, %v1652_v47, %v1282_v54 }
 0x807   : > { %v1201_v42 = vsel %vm1200_vm14, %v1650_v35, %v1197_v40 }
 0x808   : > { %v1202_v43 = vmul.f32 %v1201_v42, %v1185_v14  ;;  %v1387_v14 = vld [vmem:[%s2182_s11 + $0xc0] sm:$0xff] }
 0x809   : > { %1426 = vmatpush.msrb.mxu3 %v1387_v14  ;;  %v1379_v42 = vld [vmem:[%s2182_s11 + $0x80] sm:$0xff] }
 0x80a   : > { %v1206_v44 = vmul.f32 %v1610_v41, %v1202_v43  ;;  %v1366_v41 = vld [vmem:[%s2182_s11 + $0x18] sm:$0xff] }
 0x80b   : > { %1427 = vmatpush.msrb.mxu3 %v1386_v18  ;;  %1411 = vmatpush.msrb.mxu1 %v1366_v41 }
 0x80c   : > { %v1210_v45 = vadd.f32 %v1611_v8, %v1206_v44 }
 0x80d   : > { %1428 = vmatpush.msrb.mxu3 %v1385_v20 }
 0x80e   : > { %1554 = vmatmul.msk.f32.vlgmr.msra.gmra.mxu2 %vm473_vm0, %v1210_v45  ;;  %1555 = vmatmul.msk.f32.vlgmr.msrb.gmra.mxu0 %vm473_vm0, %v1210_v45  ;;  %v1365_v45 = vld [vmem:[%s2182_s11 + $0x10] sm:$0xff] }
 0x80f   : > { %1429 = vmatpush.msrb.mxu3 %v1384_v23  ;;  %1412 = vmatpush.msrb.mxu1 %v1365_v45 }
 0x811   : > { %1430 = vmatpush.msrb.mxu3 %v1383_v26  ;;  %1413 = vmatpush.msrb.mxu1 %v1364_v52 }
 0x813   : > { %1431 = vmatpush.msrb.mxu3 %v1382_v30  ;;  %1414 = vmatpush.msrb.mxu1 %v1363_v55 }
 0x815   : > { %1432 = vmatpush.msrb.mxu3 %v1381_v33 }
 0x817   : > { %1433 = vmatpush.msrb.mxu3 %v1380_v38 }
 0x819   : > { %1434 = vmatpush.msrb.mxu3 %v1379_v42 }
 0x88b   : > { %v1273_v58 = vpop.f32.mrf.mxu0 }
 0x88c   : > { %v2051_v62 = vadd.f32 %v1273_v58, %v1230_v56 }
 0x88e   : > { %v2060_v2 = vmul.f32 %v1284_v59, %v2051_v62  ;;  %v1277_v30 = vmul.f32 0.5, %v2051_v62 }
 0x890   : > { %v2069_v6 = vand.u32 2147483647, %v2060_v2  ;;  %vm1288_vm9 = vcmp.ge.f32.partialorder %v2060_v2, 0.0 }
 0x891   : > { %v1253_v32 = vpop.f32.mrf.mxu2  ;;  %v1290_v26 = vsel %vm1288_vm9, 1.0, %v1758_v25 }
 0x892   : > { %v1294_v11 = vmul.f32 0.3275911, %v2069_v6  ;;  %v2078_v12 = vadd.f32 %v1253_v32, %v1229_v3  ;;  %v1346_v47 = vsub.f32 0.0, %v2069_v6 }
 0x894   : > { %v1296_v15 = vadd.f32 1.0, %v1294_v11  ;;  %v2087_v16 = vmul.f32 %v1284_v59, %v2078_v12  ;;  %v1348_v57 = vmul.f32 %v1346_v47, %v2069_v6 }
 0x896   : > { %1653 = vrcp.f32 %v1296_v15  ;;  %v2096_v19 = vand.u32 2147483647, %v2087_v16  ;;  %v1323_v34 = vand.u32 2147483648, %v1296_v15  ;;  %v1321_v36 = vand.u32 2147483647, %v1296_v15 }
 0x897   : > { %vm1317_vm2 = vweird.f32 %v1296_v15  ;;  %v1351_v4 = vmul.f32 1.442695, %v1348_v57  ;;  %vm1287_vm10 = vcmp.ge.f32.partialorder %v2087_v16, 0.0 }
 0x898   : > { %v1293_v21 = vmul.f32 0.3275911, %v2096_v19  ;;  %v1324_v43 = vor.u32 1.1754944e-38, %v1323_v34  ;;  %vm1322_vm4 = vcmp.eq.f32.partialorder %v1321_v36, 8.507059e+37  ;;  %v1345_v3 = vsub.f32 0.0, %v2096_v19 }
 0x899   : > { %v1289_v2 = vsel %vm1287_vm10, 1.0, %v1758_v25  ;;  %v1276_v36 = vmul.f32 0.5, %v2078_v12 }
 0x89a   : > { %v1295_v24 = vadd.f32 1.0, %v1293_v21  ;;  %v1347_v11 = vmul.f32 %v1345_v3, %v2096_v19 }
 0x89c   : > { %v1654_v27 = vpop.eup %1653  ;;  %1655 = vrcp.f32 %v1295_v24  ;;  %v1308_v50 = vand.u32 2147483648, %v1295_v24  ;;  %v1306_v54 = vand.u32 2147483647, %v1295_v24  ;;  %vm1302_vm6 = vweird.f32 %v1295_v24 }
 0x89d   : > { %v1313_v28 = vmul.f32 %v1654_v27, %v1296_v15  ;;  %vm1318_vm1 = vweird.f32 %v1654_v27  ;;  %1657 = vpow2.f32 %v1351_v4  ;;  %v1349_v17 = vmul.f32 1.442695, %v1347_v11 }
 0x89e   : > { %vm1319_vm3 = vmor %vm1317_vm2, %vm1318_vm1  ;;  %v1309_v60 = vor.u32 1.1754944e-38, %v1308_v50  ;;  %vm1307_vm8 = vcmp.eq.f32.partialorder %v1306_v54, 8.507059e+37 }
 0x89f   : > { %v1314_v51 = vsub.f32 1.0, %v1313_v28  ;;  %1659 = vpow2.f32 %v1349_v17 }
 0x8a1   : > { %v1315_v35 = vmul.f32 %v1654_v27, %v1314_v51 }
 0x8a2   : > { %v1656_v39 = vpop.eup %1655 }
 0x8a3   : > { %v1316_v40 = vadd.f32 %v1654_v27, %v1315_v35  ;;  %v1298_v8 = vmul.f32 %v1656_v39, %v1295_v24  ;;  %vm1303_vm5 = vweird.f32 %v1656_v39  ;;  %v1658_v20 = vpop.eup %1657 }
 0x8a4   : > { %vm1304_vm7 = vmor %vm1302_vm6, %vm1303_vm5 }
 0x8a5   : > { %v1320_v44 = vsel %vm1319_vm3, %v1654_v27, %v1316_v40  ;;  %v1299_v48 = vsub.f32 1.0, %v1298_v8  ;;  %v1660_v29 = vpop.eup %1659 }
 0x8a6   : > { %v1325_v46 = vsel %vm1322_vm4, %v1324_v43, %v1320_v44 }
 0x8a7   : > { %v1328_v49 = vmul.f32 1.0614054, %v1325_v46  ;;  %v1300_v53 = vmul.f32 %v1656_v39, %v1299_v48 }
 0x8a9   : > { %v1330_v56 = vadd.f32 -1.4531521, %v1328_v49  ;;  %v1301_v58 = vadd.f32 %v1656_v39, %v1300_v53 }
 0x8ab   : > { %v1332_v59 = vmul.f32 %v1330_v56, %v1325_v46  ;;  %v1305_v61 = vsel %vm1304_vm7, %v1656_v39, %v1301_v58  ;;  %v1612_v39 = vld [vmem:[%s2183_s12] ss:$0 sm:$0xff] }
 0x8ac   : > { %v1310_v1 = vsel %vm1307_vm8, %v1309_v60, %v1305_v61 }
 0x8ad   : > { %v1334_v63 = vadd.f32 1.4214138, %v1332_v59  ;;  %v1327_v5 = vmul.f32 1.0614054, %v1310_v1 }
 0x8af   : > { %v1336_v32 = vmul.f32 %v1334_v63, %v1325_v46  ;;  %v1329_v7 = vadd.f32 -1.4531521, %v1327_v5 }
 0x8b1   : > { %v1338_v9 = vadd.f32 -0.28449672, %v1336_v32  ;;  %v1331_v6 = vmul.f32 %v1329_v7, %v1310_v1 }
 0x8b3   : > { %v1340_v13 = vmul.f32 %v1338_v9, %v1325_v46  ;;  %v1333_v14 = vadd.f32 1.4214138, %v1331_v6 }
 0x8b5   : > { %v1342_v15 = vadd.f32 0.2548296, %v1340_v13  ;;  %v1335_v18 = vmul.f32 %v1333_v14, %v1310_v1 }
 0x8b7   : > { %v1344_v0 = vmul.f32 %v1342_v15, %v1325_v46  ;;  %v1337_v21 = vadd.f32 -0.28449672, %v1335_v18 }
 0x8b9   : > { %v1354_v22 = vmul.f32 %v1658_v20, %v1344_v0  ;;  %v1339_v23 = vmul.f32 %v1337_v21, %v1310_v1 }
 0x8bb   : > { %v1356_v24 = vsub.f32 1.0, %v1354_v22  ;;  %v1341_v27 = vadd.f32 0.2548296, %v1339_v23 }
 0x8bd   : > { %v1358_v19 = vmul.f32 %v1356_v24, %v1290_v26  ;;  %v1343_v28 = vmul.f32 %v1341_v27, %v1310_v1 }
 0x8bf   : > { %v1360_v51 = vadd.f32 1.0, %v1358_v19  ;;  %v1353_v31 = vmul.f32 %v1660_v29, %v1343_v28 }
 0x8c1   : > { %v1362_v33 = vmul.f32 %v1360_v51, %v1277_v30  ;;  %v1355_v34 = vsub.f32 1.0, %v1353_v31 }
 0x8c3   : > { %1435 = vmatmul.f32.vlgmr.msrb.gmra.mxu3 %v1362_v33  ;;  %v1357_v35 = vmul.f32 %v1355_v34, %v1289_v2 }
 0x8c5   : > { %v1359_v37 = vadd.f32 1.0, %v1357_v35 }
 0x8c7   : > { %v1361_v38 = vmul.f32 %v1359_v37, %v1276_v36 }
 0x8c9   : > { %1415 = vmatmul.f32.vlgmr.msrb.gmra.mxu1 %v1361_v38 }
 0x946   : > { %v1416_v62 = vpop.f32.mrf.mxu1  ;;  %v1436_v41 = vpop.f32.mrf.mxu3 }
 0x947   : > { %v1417_v40 = vadd.f32 %v1612_v39, %v1416_v62 }
 0x949   : > { %v1437_v16 = vadd.f32 %v1436_v41, %v1417_v40 }
 0x94b   : > { %v1439_v42 = vadd.f32 %v1437_v16, %v2017_v10 }
 0x94d   : > { %1440 = vst.msk [vmem:[%s469_s21] sm:$0xff] %vm473_vm0, %v1439_v42 }
 0x94e PF: > { %s25_s25 = sadd.s32 1, %s1735_s25  }
 0x94f   : > { %p22_p7 = scmp.ge.s32.totalorder %s25_s25, 4  }
 0x951   :  { %24 = sbr.rel (!%p22_p7) target bundleno = 2 (0x2), region = 111 }
 0x956   :  { %1460 = vsyncpa [#allocation3], 1 }
 0x957   :  { %1462 = vsyncpa [#allocation3 + $0x1], 1 }
 0x958   :  { %1463 = vsyncpa [#allocation5], 1 }

// kernel: _lambda_.17
= control target key start
LH: loop header
LB: loop body
LE: loop exit
PB: predicated region body
PF: predicated region fallthrough
CT: control target
= control target key end

     0   :  { %s622_s12 = smov 0   ;;  %s954_s0 = inlined_call_operand.vmem [shape: f32[2,5,256], index: 0, kind: input, shape index: {}]   ;;  %s955_s1 = inlined_call_operand.vmem [shape: f32[3,256,64], index: 1, kind: input, shape index: {}]   ;;  %s956_s2 = inlined_call_operand.vmem [shape: f32[1,64], index: 2, kind: input, shape index: {}]   ;;  %s957_s3 = inlined_call_operand.vmem [shape: f32[2,4,128], index: 3, kind: output, shape index: {}]  }
   0x1 LB: > { %s500_s13 = sadd.s32 4294967295, %s599_s12   ;;  %p504_p0 = scmp.ge.s32.totalorder %s599_s12, 1  ;;  %s599_s12 = sphi %s622_s12, %s13_s12  }
   0x2   : > { %p137_p1 = scmp.lt.s32.totalorder %s599_s12, 3 }
   0x4   : > { %p138_p2 = pnand %p504_p0, %p137_p1 }
   0x5   : > { %p713_p3 = scmp.lt.s32.totalorder (!%p138_p2), %s500_s13, 1  ;;  %s601_s11 = smov (!%p138_p2), 64  }
   0x6   : > { %141 = sbr.rel (%p138_p2) target bundleno = 356 (0x164), region = 32 }
   0xb   : > { %v523_v0 = vld [vmem:[%s955_s1 + $0x178] sm:$0xff]  ;;  %v522_v1 = vld [vmem:[%s955_s1 + $0x170] sm:$0xff]  ;;  %v521_v4 = vld [vmem:[%s955_s1 + $0x168] sm:$0xff]  ;;  %s960_s13 = smov (!%p713_p3, %s500_s13), 1  ;;  %vm444_vm8 = vcmask 523264  }
   0xc   : > { %v539_v2 = vld [vmem:[%s955_s1 + $0x1f8] sm:$0xff]  ;;  %208 = vmatpush.msra.mxu0 %v523_v0  ;;  %v538_v3 = vld [vmem:[%s955_s1 + $0x1f0] sm:$0xff]  ;;  %v537_v5 = vld [vmem:[%s955_s1 + $0x1e8] sm:$0xff]  ;;  %s574_s26 = sshll.u32 %s960_s13, 4  ;;  %s507_s14 = sshll.u32 %s960_s13, 2 }
   0xd   : > { %228 = vmatpush.msra.mxu1 %v539_v2  ;;  %v520_v6 = vld [vmem:[%s955_s1 + $0x160] sm:$0xff]  ;;  %v519_v8 = vld [vmem:[%s955_s1 + $0x158] sm:$0xff]  ;;  %v518_v11 = vld [vmem:[%s955_s1 + $0x150] sm:$0xff]  ;;  %s164_s20 = scalar_lea.vmem %s954_s0, %s574_s26  ;;  %s168_s17 = scalar_lea.vmem %s957_s3, %s507_s14 }
   0xe   : > { %209 = vmatpush.msra.mxu0 %v522_v1  ;;  %v536_v7 = vld [vmem:[%s955_s1 + $0x1e0] sm:$0xff]  ;;  %v535_v9 = vld [vmem:[%s955_s1 + $0x1d8] sm:$0xff]  ;;  %v534_v12 = vld [vmem:[%s955_s1 + $0x1d0] sm:$0xff] }
   0xf   : > { %229 = vmatpush.msra.mxu1 %v538_v3  ;;  %v555_v10 = vld [vmem:[%s955_s1 + $0x278] sm:$0xff]  ;;  %v554_v14 = vld [vmem:[%s955_s1 + $0x270] sm:$0xff]  ;;  %v517_v16 = vld [vmem:[%s955_s1 + $0x148] sm:$0xff] }
  0x10   : > { %210 = vmatpush.msra.mxu0 %v521_v4  ;;  %313 = vmatpush.msra.mxu2 %v555_v10  ;;  %v571_v13 = vld [vmem:[%s955_s1 + $0x2f8] sm:$0xff]  ;;  %v570_v15 = vld [vmem:[%s955_s1 + $0x2f0] sm:$0xff]  ;;  %v533_v17 = vld [vmem:[%s955_s1 + $0x1c8] sm:$0xff] }
  0x11   : > { %230 = vmatpush.msra.mxu1 %v537_v5  ;;  %333 = vmatpush.msra.mxu3 %v571_v13  ;;  %v553_v18 = vld [vmem:[%s955_s1 + $0x268] sm:$0xff]  ;;  %v552_v20 = vld [vmem:[%s955_s1 + $0x260] sm:$0xff]  ;;  %v551_v24 = vld [vmem:[%s955_s1 + $0x258] sm:$0xff] }
  0x12   : > { %211 = vmatpush.msra.mxu0 %v520_v6  ;;  %314 = vmatpush.msra.mxu2 %v554_v14  ;;  %v569_v19 = vld [vmem:[%s955_s1 + $0x2e8] sm:$0xff]  ;;  %v516_v21 = vld [vmem:[%s955_s1 + $0x140] sm:$0xff]  ;;  %v515_v25 = vld [vmem:[%s955_s1 + $0x138] sm:$0xff] }
  0x13   : > { %231 = vmatpush.msra.mxu1 %v536_v7  ;;  %v532_v22 = vld [vmem:[%s955_s1 + $0x1c0] sm:$0xff]  ;;  %334 = vmatpush.msra.mxu3 %v570_v15  ;;  %v531_v26 = vld [vmem:[%s955_s1 + $0x1b8] sm:$0xff]  ;;  %v550_v28 = vld [vmem:[%s955_s1 + $0x250] sm:$0xff] }
  0x14   : > { %212 = vmatpush.msra.mxu0 %v519_v8  ;;  %315 = vmatpush.msra.mxu2 %v553_v18  ;;  %v568_v23 = vld [vmem:[%s955_s1 + $0x2e0] sm:$0xff]  ;;  %v567_v27 = vld [vmem:[%s955_s1 + $0x2d8] sm:$0xff]  ;;  %v514_v29 = vld [vmem:[%s955_s1 + $0x130] sm:$0xff] }
  0x15   : > { %232 = vmatpush.msra.mxu1 %v535_v9  ;;  %335 = vmatpush.msra.mxu3 %v569_v19  ;;  %v530_v30 = vld [vmem:[%s955_s1 + $0x1b0] sm:$0xff]  ;;  %v549_v32 = vld [vmem:[%s955_s1 + $0x248] sm:$0xff]  ;;  %v548_v36 = vld [vmem:[%s955_s1 + $0x240] sm:$0xff] }
  0x16   : > { %213 = vmatpush.msra.mxu0 %v518_v11  ;;  %316 = vmatpush.msra.mxu2 %v552_v20  ;;  %v566_v31 = vld [vmem:[%s955_s1 + $0x2d0] sm:$0xff]  ;;  %v513_v33 = vld [vmem:[%s955_s1 + $0x128] sm:$0xff]  ;;  %v512_v37 = vld [vmem:[%s955_s1 + $0x120] sm:$0xff] }
  0x17   : > { %233 = vmatpush.msra.mxu1 %v534_v12  ;;  %336 = vmatpush.msra.mxu3 %v568_v23  ;;  %v529_v34 = vld [vmem:[%s955_s1 + $0x1a8] sm:$0xff]  ;;  %v528_v38 = vld [vmem:[%s955_s1 + $0x1a0] sm:$0xff]  ;;  %v547_v40 = vld [vmem:[%s955_s1 + $0x238] sm:$0xff] }
  0x18   : > { %214 = vmatpush.msra.mxu0 %v517_v16  ;;  %317 = vmatpush.msra.mxu2 %v551_v24  ;;  %v565_v35 = vld [vmem:[%s955_s1 + $0x2c8] sm:$0xff]  ;;  %v564_v39 = vld [vmem:[%s955_s1 + $0x2c0] sm:$0xff]  ;;  %v511_v41 = vld [vmem:[%s955_s1 + $0x118] sm:$0xff] }
  0x19   : > { %234 = vmatpush.msra.mxu1 %v533_v17  ;;  %337 = vmatpush.msra.mxu3 %v567_v27  ;;  %v527_v42 = vld [vmem:[%s955_s1 + $0x198] sm:$0xff]  ;;  %v546_v44 = vld [vmem:[%s955_s1 + $0x230] sm:$0xff]  ;;  %v545_v48 = vld [vmem:[%s955_s1 + $0x228] sm:$0xff] }
  0x1a   : > { %215 = vmatpush.msra.mxu0 %v516_v21  ;;  %318 = vmatpush.msra.mxu2 %v550_v28  ;;  %v563_v43 = vld [vmem:[%s955_s1 + $0x2b8] sm:$0xff]  ;;  %v510_v45 = vld [vmem:[%s955_s1 + $0x110] sm:$0xff]  ;;  %v509_v49 = vld [vmem:[%s955_s1 + $0x108] sm:$0xff] }
  0x1b   : > { %235 = vmatpush.msra.mxu1 %v532_v22  ;;  %338 = vmatpush.msra.mxu3 %v566_v31  ;;  %v526_v46 = vld [vmem:[%s955_s1 + $0x190] sm:$0xff]  ;;  %v525_v50 = vld [vmem:[%s955_s1 + $0x188] sm:$0xff]  ;;  %v544_v52 = vld [vmem:[%s955_s1 + $0x220] sm:$0xff] }
  0x1c   : > { %216 = vmatpush.msra.mxu0 %v515_v25  ;;  %319 = vmatpush.msra.mxu2 %v549_v32  ;;  %v562_v47 = vld [vmem:[%s955_s1 + $0x2b0] sm:$0xff]  ;;  %v561_v51 = vld [vmem:[%s955_s1 + $0x2a8] sm:$0xff]  ;;  %v508_v53 = vld [vmem:[%s955_s1 + $0x100] sm:$0xff] }
  0x1d   : > { %236 = vmatpush.msra.mxu1 %v531_v26  ;;  %339 = vmatpush.msra.mxu3 %v565_v35  ;;  %v524_v54 = vld [vmem:[%s955_s1 + $0x180] sm:$0xff]  ;;  %v813_v56 = vld [vmem:[%s164_s20 + $0x8] sm:$0x1f]  ;;  %v263_v57 = vld [vmem:[%s955_s1 + $0x78] sm:$0xff] }
  0x1e   : > { %217 = vmatpush.msra.mxu0 %v514_v29  ;;  %320 = vmatpush.msra.mxu2 %v548_v36  ;;  %v811_v55 = vld [vmem:[%s164_s20] sm:$0x1f]  ;;  %v279_v58 = vld [vmem:[%s955_s1 + $0xf8] sm:$0xff]  ;;  %v262_v61 = vld [vmem:[%s955_s1 + $0x70] sm:$0xff]  ;;  %v356_v35 = vrot.slane %v813_v56, 1 }
  0x1f   : > { %237 = vmatpush.msra.mxu1 %v530_v30  ;;  %340 = vmatpush.msra.mxu3 %v564_v39  ;;  %v560_v59 = vld [vmem:[%s955_s1 + $0x2a0] sm:$0xff]  ;;  %v543_v60 = vld [vmem:[%s955_s1 + $0x218] sm:$0xff]  ;;  %v278_v62 = vld [vmem:[%s955_s1 + $0xf0] sm:$0xff] }
  0x20   : > { %218 = vmatpush.msra.mxu0 %v513_v33  ;;  %321 = vmatpush.msra.mxu2 %v547_v40  ;;  %v559_v63 = vld [vmem:[%s955_s1 + $0x298] sm:$0xff]  ;;  %v542_v0 = vld [vmem:[%s955_s1 + $0x210] sm:$0xff]  ;;  %v261_v1 = vld [vmem:[%s955_s1 + $0x68] sm:$0xff]  ;;  %v355_v33 = vrot.slane %v811_v55, 1 }
  0x21   : > { %238 = vmatpush.msra.mxu1 %v529_v34  ;;  %341 = vmatpush.msra.mxu3 %v563_v43  ;;  %v277_v2 = vld [vmem:[%s955_s1 + $0xe8] sm:$0xff]  ;;  %v558_v3 = vld [vmem:[%s955_s1 + $0x290] sm:$0xff]  ;;  %v260_v5 = vld [vmem:[%s955_s1 + $0x60] sm:$0xff] }
  0x22   : > { %219 = vmatpush.msra.mxu0 %v512_v37  ;;  %322 = vmatpush.msra.mxu2 %v546_v44  ;;  %v541_v4 = vld [vmem:[%s955_s1 + $0x208] sm:$0xff]  ;;  %v276_v6 = vld [vmem:[%s955_s1 + $0xe0] sm:$0xff]  ;;  %v259_v9 = vld [vmem:[%s955_s1 + $0x58] sm:$0xff] }
  0x23   : > { %239 = vmatpush.msra.mxu1 %v528_v38  ;;  %342 = vmatpush.msra.mxu3 %v562_v47  ;;  %v557_v7 = vld [vmem:[%s955_s1 + $0x288] sm:$0xff]  ;;  %v540_v8 = vld [vmem:[%s955_s1 + $0x200] sm:$0xff]  ;;  %v275_v10 = vld [vmem:[%s955_s1 + $0xd8] sm:$0xff] }
  0x24   : > { %220 = vmatpush.msra.mxu0 %v511_v41  ;;  %323 = vmatpush.msra.mxu2 %v545_v48  ;;  %v556_v11 = vld [vmem:[%s955_s1 + $0x280] sm:$0xff]  ;;  %v258_v12 = vld [vmem:[%s955_s1 + $0x50] sm:$0xff]  ;;  %v257_v14 = vld [vmem:[%s955_s1 + $0x48] sm:$0xff] }
  0x25   : > { %240 = vmatpush.msra.mxu1 %v527_v42  ;;  %343 = vmatpush.msra.mxu3 %v561_v51  ;;  %v274_v13 = vld [vmem:[%s955_s1 + $0xd0] sm:$0xff]  ;;  %v273_v15 = vld [vmem:[%s955_s1 + $0xc8] sm:$0xff]  ;;  %v256_v16 = vld [vmem:[%s955_s1 + $0x40] sm:$0xff] }
  0x26   : > { %221 = vmatpush.msra.mxu0 %v510_v45  ;;  %324 = vmatpush.msra.mxu2 %v544_v52  ;;  %v272_v17 = vld [vmem:[%s955_s1 + $0xc0] sm:$0xff]  ;;  %v255_v18 = vld [vmem:[%s955_s1 + $0x38] sm:$0xff]  ;;  %v254_v20 = vld [vmem:[%s955_s1 + $0x30] sm:$0xff] }
  0x27   : > { %241 = vmatpush.msra.mxu1 %v526_v46  ;;  %344 = vmatpush.msra.mxu3 %v560_v59  ;;  %v271_v19 = vld [vmem:[%s955_s1 + $0xb8] sm:$0xff]  ;;  %v270_v21 = vld [vmem:[%s955_s1 + $0xb0] sm:$0xff]  ;;  %v253_v22 = vld [vmem:[%s955_s1 + $0x28] sm:$0xff] }
  0x28   : > { %222 = vmatpush.msra.mxu0 %v509_v49  ;;  %325 = vmatpush.msra.mxu2 %v543_v60  ;;  %v269_v23 = vld [vmem:[%s955_s1 + $0xa8] sm:$0xff]  ;;  %v252_v24 = vld [vmem:[%s955_s1 + $0x20] sm:$0xff]  ;;  %v251_v26 = vld [vmem:[%s955_s1 + $0x18] sm:$0xff] }
  0x29   : > { %242 = vmatpush.msra.mxu1 %v525_v50  ;;  %345 = vmatpush.msra.mxu3 %v559_v63  ;;  %v268_v25 = vld [vmem:[%s955_s1 + $0xa0] sm:$0xff]  ;;  %v267_v27 = vld [vmem:[%s955_s1 + $0x98] sm:$0xff]  ;;  %v250_v28 = vld [vmem:[%s955_s1 + $0x10] sm:$0xff] }
  0x2a   : > { %223 = vmatpush.msra.mxu0 %v508_v53  ;;  %326 = vmatpush.msra.mxu2 %v542_v0  ;;  %v266_v29 = vld [vmem:[%s955_s1 + $0x90] sm:$0xff]  ;;  %v249_v30 = vld [vmem:[%s955_s1 + $0x8] sm:$0xff]  ;;  %v248_v32 = vld [vmem:[%s955_s1] sm:$0xff] }
  0x2b   : > { %243 = vmatpush.msra.mxu1 %v524_v54  ;;  %224 = vmatmul.f32.vlgmr.msra.gmra.mxu0 %v811_v55  ;;  %v265_v31 = vld [vmem:[%s955_s1 + $0x88] sm:$0xff]  ;;  %v264_v34 = vld [vmem:[%s955_s1 + $0x80] sm:$0xff] }
  0x2c   : > { %244 = vmatmul.f32.vlgmr.msra.gmra.mxu1 %v813_v56  ;;  %359 = vmatpush.msrb.mxu0 %v263_v57  ;;  %v584_v36 = vld [vmem:[%s956_s2] ss:$0 sm:$0xff] }
  0x2d   : > { %379 = vmatpush.msrb.mxu1 %v279_v58  ;;  %346 = vmatpush.msra.mxu3 %v558_v3 }
  0x2e   : > { %360 = vmatpush.msrb.mxu0 %v262_v61  ;;  %327 = vmatpush.msra.mxu2 %v541_v4 }
  0x2f   : > { %380 = vmatpush.msrb.mxu1 %v278_v62  ;;  %347 = vmatpush.msra.mxu3 %v557_v7 }
  0x30   : > { %361 = vmatpush.msrb.mxu0 %v261_v1  ;;  %328 = vmatpush.msra.mxu2 %v540_v8 }
  0x31   : > { %381 = vmatpush.msrb.mxu1 %v277_v2  ;;  %348 = vmatpush.msra.mxu3 %v556_v11 }
  0x32   : > { %362 = vmatpush.msrb.mxu0 %v260_v5  ;;  %329 = vmatmul.f32.vlgmr.msra.gmra.mxu2 %v811_v55 }
  0x33   : > { %382 = vmatpush.msrb.mxu1 %v276_v6  ;;  %349 = vmatmul.f32.vlgmr.msra.gmra.mxu3 %v813_v56 }
  0x34   : > { %363 = vmatpush.msrb.mxu0 %v259_v9 }
  0x35   : > { %383 = vmatpush.msrb.mxu1 %v275_v10 }
  0x36   : > { %364 = vmatpush.msrb.mxu0 %v258_v12 }
  0x37   : > { %384 = vmatpush.msrb.mxu1 %v274_v13 }
  0x38   : > { %365 = vmatpush.msrb.mxu0 %v257_v14 }
  0x39   : > { %385 = vmatpush.msrb.mxu1 %v273_v15 }
  0x3a   : > { %366 = vmatpush.msrb.mxu0 %v256_v16 }
  0x3b   : > { %386 = vmatpush.msrb.mxu1 %v272_v17 }
  0x3c   : > { %367 = vmatpush.msrb.mxu0 %v255_v18 }
  0x3d   : > { %387 = vmatpush.msrb.mxu1 %v271_v19 }
  0x3e   : > { %368 = vmatpush.msrb.mxu0 %v254_v20 }
  0x3f   : > { %388 = vmatpush.msrb.mxu1 %v270_v21 }
  0x40   : > { %369 = vmatpush.msrb.mxu0 %v253_v22 }
  0x41   : > { %389 = vmatpush.msrb.mxu1 %v269_v23 }
  0x42   : > { %370 = vmatpush.msrb.mxu0 %v252_v24 }
  0x43   : > { %390 = vmatpush.msrb.mxu1 %v268_v25 }
  0x44   : > { %371 = vmatpush.msrb.mxu0 %v251_v26 }
  0x45   : > { %391 = vmatpush.msrb.mxu1 %v267_v27 }
  0x46   : > { %372 = vmatpush.msrb.mxu0 %v250_v28 }
  0x47   : > { %392 = vmatpush.msrb.mxu1 %v266_v29 }
  0x48   : > { %373 = vmatpush.msrb.mxu0 %v249_v30 }
  0x49   : > { %393 = vmatpush.msrb.mxu1 %v265_v31 }
  0x4a   : > { %374 = vmatpush.msrb.mxu0 %v248_v32 }
  0x4b   : > { %394 = vmatpush.msrb.mxu1 %v264_v34  ;;  %375 = vmatmul.f32.vlgmr.msrb.gmra.mxu0 %v355_v33 }
  0x4c   : > { %395 = vmatmul.f32.vlgmr.msrb.gmra.mxu1 %v356_v35 }
  0xa8   : > { %v225_v37 = vpop.f32.mrf.mxu0 }
  0xa9   : > { %v245_v38 = vpop.f32.mrf.mxu1  ;;  %v226_v39 = vadd.f32 %v584_v36, %v225_v37 }
  0xab   : > { %v246_v40 = vadd.f32 %v245_v38, %v226_v39 }
  0xad   : > { %v400_v0 = vsub.f32 0.0, %v246_v40 }
  0xaf   : > { %v401_v1 = vmul.f32 1.442695, %v400_v0 }
  0xb5   : > { %v330_v41 = vpop.f32.mrf.mxu2 }
  0xb6   : > { %v350_v42 = vpop.f32.mrf.mxu3 }
  0xb7   : > { %v351_v43 = vadd.f32 %v350_v42, %v330_v41 }
  0xc8   : > { %v376_v44 = vpop.f32.mrf.mxu0 }
  0xc9   : > { %v396_v45 = vpop.f32.mrf.mxu1  ;;  %v377_v46 = vadd.f32 %v376_v44, %v351_v43 }
  0xcb   : > { %v397_v47 = vadd.f32 %v396_v45, %v377_v46 }
  0xcd   : > { %v399_v48 = vadd.f32 %v584_v36, %v397_v47 }
  0xcf   : > { %v420_v49 = vsub.f32 0.0, %v399_v48 }
  0xd1   : > { %v421_v50 = vmul.f32 1.442695, %v420_v49 }
  0xd3   : > { %585 = vpow2.f32 %v421_v50 }
  0xd9   : > { %v586_v51 = vpop.eup %585 }
  0xda   : > { %v423_v52 = vadd.f32 1.0, %v586_v51 }
  0xdc   : > { %587 = vrcp.f32 %v423_v52  ;;  %v435_v56 = vand.u32 2147483648, %v423_v52  ;;  %v433_v58 = vand.u32 2147483647, %v423_v52  ;;  %vm429_vm1 = vweird.f32 %v423_v52 }
  0xdd   : > { %589 = vpow2.f32 %v401_v1 }
  0xde   : > { %v436_v60 = vor.u32 1.1754944e-38, %v435_v56  ;;  %vm434_vm3 = vcmp.eq.f32.partialorder %v433_v58, 8.507059e+37 }
  0xe2   : > { %v588_v53 = vpop.eup %587 }
  0xe3   : > { %v425_v54 = vmul.f32 %v588_v53, %v423_v52  ;;  %vm430_vm0 = vweird.f32 %v588_v53  ;;  %v590_v2 = vpop.eup %589 }
  0xe4   : > { %vm431_vm2 = vmor %vm429_vm1, %vm430_vm0  ;;  %v403_v3 = vadd.f32 1.0, %v590_v2 }
  0xe5   : > { %v426_v55 = vsub.f32 1.0, %v425_v54 }
  0xe6   : > { %591 = vrcp.f32 %v403_v3  ;;  %vm409_vm4 = vweird.f32 %v403_v3  ;;  %v415_v8 = vand.u32 2147483648, %v403_v3  ;;  %v413_v10 = vand.u32 2147483647, %v403_v3 }
  0xe7   : > { %v427_v57 = vmul.f32 %v588_v53, %v426_v55 }
  0xe8   : > { %v416_v11 = vor.u32 1.1754944e-38, %v415_v8  ;;  %vm414_vm7 = vcmp.eq.f32.partialorder %v413_v10, 8.507059e+37 }
  0xe9   : > { %v428_v59 = vadd.f32 %v588_v53, %v427_v57 }
  0xeb   : > { %v432_v61 = vsel %vm431_vm2, %v588_v53, %v428_v59 }
  0xec   : > { %v437_v62 = vsel %vm434_vm3, %v436_v60, %v432_v61  ;;  %v592_v4 = vpop.eup %591 }
  0xed   : > { %v439_v63 = vmul.f32 %v437_v62, %v399_v48  ;;  %v405_v5 = vmul.f32 %v592_v4, %v403_v3  ;;  %vm410_vm5 = vweird.f32 %v592_v4 }
  0xee   : > { %vm411_vm6 = vmor %vm409_vm4, %vm410_vm5 }
  0xef   : > { %441 = vrot.lane.b32.xlu0 %v439_v63, %s601_s11  ;;  %v406_v6 = vsub.f32 1.0, %v405_v5 }
  0xf1   : > { %v407_v7 = vmul.f32 %v592_v4, %v406_v6 }
  0xf3   : > { %v408_v9 = vadd.f32 %v592_v4, %v407_v7 }
  0xf5   : > { %v412_v12 = vsel %vm411_vm6, %v592_v4, %v408_v9 }
  0xf6   : > { %v417_v13 = vsel %vm414_vm7, %v416_v11, %v412_v12 }
  0xf7   : > { %v419_v14 = vmul.f32 %v417_v13, %v246_v40 }
 0x161   : > { %v442_v15 = vpop.permute.xlu0 %441 }
 0x162   : > { %v445_v16 = vsel %vm444_vm8, %v419_v14, %v442_v15 }
 0x163   : > { %446 = vst [vmem:[%s168_s17] sm:$0xf] %v445_v16 }
 0x164 PF: > { %s13_s12 = sadd.s32 1, %s599_s12  }
 0x165   : > { %p10_p4 = scmp.ge.s32.totalorder %s13_s12, 4  }
 0x167   :  { %12 = sbr.rel (!%p10_p4) target bundleno = 1 (0x1), region = 64 }

// kernel: _lambda_.15
= control target key start
LH: loop header
LB: loop body
LE: loop exit
PB: predicated region body
PF: predicated region fallthrough
CT: control target
= control target key end

     0   :  { %s3473_s0 = inlined_call_operand.vmem [shape: f32[2,4,128], index: 0, kind: input, shape index: {}]   ;;  %s3474_s1 = inlined_call_operand.hbm [shape: f32[1,128], index: 1, kind: input, shape index: {}]   ;;  %s3475_s2 = inlined_call_operand.hbm [shape: f32[1,128], index: 2, kind: input, shape index: {}]   ;;  %s3476_s3 = inlined_call_operand.vmem [shape: f32[128,384], index: 3, kind: input, shape index: {}]   ;;  %s3477_s4 = inlined_call_operand.vmem [shape: f32[1,384], index: 4, kind: input, shape index: {}]   ;;  %s3478_s5 = inlined_call_operand.hbm [shape: f32[128,128], index: 5, kind: input, shape index: {}]   ;;  %s3479_s6 = inlined_call_operand.hbm [shape: f32[1,128], index: 6, kind: input, shape index: {}]   ;;  %s3480_s7 = inlined_call_operand.hbm [shape: f32[1,128], index: 7, kind: input, shape index: {}]   ;;  %s3481_s8 = inlined_call_operand.hbm [shape: f32[1,128], index: 8, kind: input, shape index: {}]   ;;  %s3482_s9 = inlined_call_operand.vmem [shape: f32[128,512], index: 9, kind: input, shape index: {}]   ;;  %s3483_s10 = inlined_call_operand.hbm [shape: f32[1,512], index: 10, kind: input, shape index: {}]   ;;  %s3484_s11 = inlined_call_operand.vmem [shape: f32[512,128], index: 11, kind: input, shape index: {}]   ;;  %s3485_s12 = inlined_call_operand.hbm [shape: f32[1,128], index: 12, kind: input, shape index: {}]   ;;  %s3486_s13 = inlined_call_operand.vmem [shape: f32[2,4,128], index: 13, kind: output, shape index: {}]  }
   0x1   :  { %3487 = sst [smem:[#allocation20_spill]] %s3475_s2 }
   0x2   :  { %3488 = sst [smem:[#allocation21_spill]] %s3479_s6 }
   0x3   :  { %18 = vsyncpa [#allocation3], 0 }
   0x4   :  { %19 = vsyncpa [#allocation5], 0 }
   0x5   :  { %20 = vsyncpa [#allocation8], 0 }
   0x6   :  { %21 = vsyncpa [#allocation11], 0 }
   0x7   :  { %22 = vsyncpa [#allocation14], 0  ;;  %s2543_s25 = smov 0  }
   0x8 LB: > { %s3489_s2 = sld [smem:[#allocation20_spill]]  ;;  %s2552_s29 = sadd.s32 4294967295, %s2451_s25   ;;  %s2451_s25 = sphi %s2543_s25, %s28_s25  }
   0x9   : > { %p1967_p0 = scmp.ge.s32.totalorder %s2451_s25, 1  ;;  %p337_p1 = scmp.lt.s32.totalorder %s2451_s25, 3 }
   0xa   : > { %p2079_p2 = scmp.eq.s32.totalorder %s2552_s29, 0  ;;  %s2453_s14 = smov [#allocation4]  }
   0xb   : > { %p2557_p3 = pnand %p1967_p0, %p337_p1  ;;  %s363_s15 = sshll.u32 %s2453_s14, 4  ;;  %s364_s15 = int_to_ptr.vmem [resolvable:$true] %s363_s15 }
   0xc   : > { %s3491_s6 = sld [smem:[#allocation21_spill]]  ;;  %s417_s21 = sshll.u32 %s3481_s8, 4  ;;  %s418_s21 = int_to_ptr.hbm [resolvable:$true] %s417_s21 }
   0xd   : > { %p2054_p4 = pneg %p2557_p3  ;;  %s2454_s23 = smov [#allocation7]  }
   0xe   : > { %s361_s28 = sshll.u32 %s3489_s2, 4  ;;  %s395_s24 = sshll.u32 %s2454_s23, 4  ;;  %s362_s28 = int_to_ptr.hbm [resolvable:$true] %s361_s28  ;;  %s396_s24 = int_to_ptr.vmem [resolvable:$true] %s395_s24 }
   0xf   : > { %p2571_p5 = pnand %p2079_p2, %p2054_p4  ;;  %s2455_s26 = smov [#allocation10]  }
  0x10   : > { %s419_s27 = sshll.u32 %s2455_s26, 4  ;;  %s349_s17 = sshll.u32 %s3474_s1, 4  ;;  %s420_s27 = int_to_ptr.vmem [resolvable:$true] %s419_s27  ;;  %s350_s17 = int_to_ptr.hbm [resolvable:$true] %s349_s17 }
  0x11   : > { %2060 = dma.hbm_to_vmem [thread:$0]  (!%p2571_p5), %s362_s28, 16, %s364_s15, [#allocation5]  }
  0x12   : > { %s393_s18 = sshll.u32 %s3491_s6, 4  ;;  %s378_s23 = sshll.u32 %s3478_s5, 4  ;;  %s394_s18 = int_to_ptr.hbm [resolvable:$true] %s393_s18  ;;  %s379_s23 = int_to_ptr.hbm [resolvable:$true] %s378_s23 }
  0x13   : > { %2066 = dma.hbm_to_vmem [thread:$0]  (!%p2571_p5), %s394_s18, 16, %s396_s24, [#allocation8]  }
  0x14   : > { %2072 = dma.hbm_to_vmem [thread:$0]  (!%p2571_p5), %s418_s21, 16, %s420_s27, [#allocation11]  }
  0x15   : > { %s2456_s2 = smov [#allocation2]   ;;  %s2457_s28 = smov [#allocation6]  }
  0x16   : > { %s351_s6 = sshll.u32 %s2456_s2, 4  ;;  %s380_s15 = sshll.u32 %s2457_s28, 4  ;;  %s352_s6 = int_to_ptr.vmem [resolvable:$true] %s351_s6  ;;  %s381_s15 = int_to_ptr.vmem [resolvable:$true] %s380_s15 }
  0x17   : > { %2057 = dma.hbm_to_vmem [thread:$0]  (!%p2571_p5), %s350_s17, 16, %s352_s6, [#allocation3]  }
  0x18   : > { %s2458_s18 = smov 128   ;;  %s2459_s24 = smov 8  }
  0x19   : > { %2063 = dma.hbm_to_vmem [thread:$0]  (!%p2571_p5), %s379_s23, 2048, %s381_s15, [#allocation5], %s2458_s18, %s2458_s18, %s2459_s24  }
  0x1a   : > { %s405_s27 = sshll.u32 %s3480_s7, 4  ;;  %s2460_s2 = smov [#allocation9]   ;;  %s406_s27 = int_to_ptr.hbm [resolvable:$true] %s405_s27 }
  0x1b   : > { %s407_s14 = sshll.u32 %s2460_s2, 4  ;;  %s432_s6 = sshll.u32 %s3483_s10, 4  ;;  %s408_s14 = int_to_ptr.vmem [resolvable:$true] %s407_s14  ;;  %s433_s6 = int_to_ptr.hbm [resolvable:$true] %s432_s6 }
  0x1c   : > { %2069 = dma.hbm_to_vmem [thread:$0]  (!%p2571_p5), %s406_s27, 16, %s408_s14, [#allocation8]  }
  0x1d   : > { %s2461_s17 = smov [#allocation12]   ;;  %s447_s15 = sshll.u32 %s3485_s12, 4  ;;  %s448_s15 = int_to_ptr.hbm [resolvable:$true] %s447_s15 }
  0x1e   : > { %s434_s20 = sshll.u32 %s2461_s17, 4  ;;  %s2462_s18 = smov [#allocation13]   ;;  %s435_s20 = int_to_ptr.vmem [resolvable:$true] %s434_s20 }
  0x1f   : > { %2075 = dma.hbm_to_vmem [thread:$0]  (!%p2571_p5), %s433_s6, 64, %s435_s20, [#allocation11]  }
  0x20   : > { %s449_s24 = sshll.u32 %s2462_s18, 4  ;;  %469 = sbr.rel (%p2557_p3) target bundleno = 2447 (0x98f), region = 72  ;;  %s450_s24 = int_to_ptr.vmem [resolvable:$true] %s449_s24 }
  0x21   : > { %2078 = dma.hbm_to_vmem [thread:$0]  (!%p2571_p5), %s448_s15, 16, %s450_s24, [#allocation14]  }
  0x25   : > { %2430 = dma.done.wait (%p2079_p2), [#allocation3], 16  }
  0x26   : > { %2432 = vsyncadd (%p2079_p2), [#allocation3], 4294967280 }
  0x27   : > { %2434 = dma.done.wait (%p2079_p2), [#allocation5], 2064  }
  0x28   : > { %2436 = vsyncadd (%p2079_p2), [#allocation5], 4294965232 }
  0x29   : > { %2438 = dma.done.wait (%p2079_p2), [#allocation8], 32  }
  0x2a   : > { %2440 = vsyncadd (%p2079_p2), [#allocation8], 4294967264 }
  0x2b   : > { %2442 = dma.done.wait (%p2079_p2), [#allocation11], 80  }
  0x2c   : > { %2444 = vsyncadd (%p2079_p2), [#allocation11], 4294967216 }
  0x2d   : > { %2446 = dma.done.wait (%p2079_p2), [#allocation14], 16  }
  0x2e   : > { %2448 = vsyncadd (%p2079_p2), [#allocation14], 4294967280  ;;  %p547_p6 = scmp.lt.s32.totalorder %s2552_s29, 1  ;;  %vm558_vm0 = vcmask 1043456   ;;  %v2463_v2 = vmov 128.0   ;;  %v641_v3 = vld [vmem:[%s3476_s3 + $0x168] sm:$0xff] }
  0x2f   : > { %2129 = vrcp.f32 %v2463_v2  ;;  %v642_v4 = vld [vmem:[%s3476_s3 + $0x170] sm:$0xff]  ;;  %v643_v5 = vld [vmem:[%s3476_s3 + $0x178] sm:$0xff]  ;;  %652 = vmatpush.msra.mxu0 %v641_v3  ;;  %v640_v8 = vld [vmem:[%s3476_s3 + $0x160] sm:$0xff]  ;;  %vm712_vm5 = vcmask 130048   ;;  %s2464_s14 = smov 80   ;;  %s2465_s16 = smov 112  }
  0x30   : > { %s3500_s29 = smov (!%p547_p6, %s2552_s29), 1  ;;  %672 = vmatpush.msra.mxu1 %v642_v4  ;;  %v638_v6 = vld [vmem:[%s3476_s3 + $0x150] sm:$0xff]  ;;  %v639_v7 = vld [vmem:[%s3476_s3 + $0x158] sm:$0xff]  ;;  %692 = vmatpush.msra.mxu2 %v643_v5  ;;  %v636_v21 = vld [vmem:[%s3476_s3 + $0x140] sm:$0xff]  ;;  %s2466_s19 = smov 64   ;;  %vm740_vm6 = vcmask 27648  }
  0x31   : > { %s1986_s30 = sshll.u32 %s3500_s29, 2  ;;  %653 = vmatpush.msra.mxu0 %v638_v6  ;;  %v635_v20 = vld [vmem:[%s3476_s3 + $0x138] sm:$0xff]  ;;  %v637_v22 = vld [vmem:[%s3476_s3 + $0x148] sm:$0xff]  ;;  %v632_v23 = vld [vmem:[%s3476_s3 + $0x120] sm:$0xff]  ;;  %s2467_s6 = smov 96   ;;  %vm752_vm7 = vcmask 31744  }
  0x32   : > { %s550_s26 = scalar_lea.vmem %s3473_s0, %s1986_s30  ;;  %673 = vmatpush.msra.mxu1 %v639_v7  ;;  %693 = vmatpush.msra.mxu2 %v640_v8  ;;  %v633_v24 = vld [vmem:[%s3476_s3 + $0x128] sm:$0xff]  ;;  %v634_v25 = vld [vmem:[%s3476_s3 + $0x130] sm:$0xff]  ;;  %v631_v28 = vld [vmem:[%s3476_s3 + $0x118] sm:$0xff]  ;;  %s2468_s17 = smov 48   ;;  %vm1277_vm8 = vcmask 261120   ;;  %vm1279_vm9 = vcmask 392192  }
  0x33   : > { %v2638_v0 = vld [vmem:[%s550_s26] sm:$0xf]  ;;  %654 = vmatpush.msra.mxu0 %v635_v20  ;;  %v629_v26 = vld [vmem:[%s3476_s3 + $0x108] sm:$0xff]  ;;  %v630_v27 = vld [vmem:[%s3476_s3 + $0x110] sm:$0xff]  ;;  %s2469_s20 = smov 32   ;;  %s2470_s28 = smov 16  }
  0x34   : > { %v559_v1 = vsel %vm558_vm0, %v2638_v0, 0.0  ;;  %674 = vmatpush.msra.mxu1 %v636_v21  ;;  %694 = vmatpush.msra.mxu2 %v637_v22  ;;  %v626_v29 = vld [vmem:[%s3476_s3 + $0xf0] sm:$0xff]  ;;  %v627_v30 = vld [vmem:[%s3476_s3 + $0xf8] sm:$0xff]  ;;  %v628_v31 = vld [vmem:[%s3476_s3 + $0x100] sm:$0xff]  ;;  %vm1281_vm10 = vcmask 523264   ;;  %vm1283_vm11 = vcmask 654336   ;;  %s554_s18 = scalar_lea.vmem %s3486_s13, %s1986_s30 }
  0x35   : > { %560 = vadd.xlane.f32.xlu0 %v559_v1  ;;  %v2130_v9 = vpop.eup %2129  ;;  %655 = vmatpush.msra.mxu0 %v632_v23  ;;  %v623_v32 = vld [vmem:[%s3476_s3 + $0xd8] sm:$0xff]  ;;  %v624_v33 = vld [vmem:[%s3476_s3 + $0xe0] sm:$0xff]  ;;  %v625_v34 = vld [vmem:[%s3476_s3 + $0xe8] sm:$0xff]  ;;  %vm1285_vm12 = vcmask 785408   ;;  %vm1287_vm13 = vcmask 916480  }
  0x36   : > { %v563_v10 = vmul.f32 128.0, %v2130_v9  ;;  %vm567_vm1 = vweird.f32 %v2130_v9  ;;  %675 = vmatpush.msra.mxu1 %v633_v24  ;;  %695 = vmatpush.msra.mxu2 %v634_v25  ;;  %v620_v35 = vld [vmem:[%s3476_s3 + $0xc0] sm:$0xff]  ;;  %v621_v36 = vld [vmem:[%s3476_s3 + $0xc8] sm:$0xff]  ;;  %v622_v37 = vld [vmem:[%s3476_s3 + $0xd0] sm:$0xff] }
  0x37   : > { %656 = vmatpush.msra.mxu0 %v629_v26  ;;  %v617_v38 = vld [vmem:[%s3476_s3 + $0xa8] sm:$0xff]  ;;  %v618_v39 = vld [vmem:[%s3476_s3 + $0xb0] sm:$0xff]  ;;  %v619_v40 = vld [vmem:[%s3476_s3 + $0xb8] sm:$0xff] }
  0x38   : > { %v564_v11 = vsub.f32 1.0, %v563_v10  ;;  %676 = vmatpush.msra.mxu1 %v630_v27  ;;  %696 = vmatpush.msra.mxu2 %v631_v28  ;;  %v614_v41 = vld [vmem:[%s3476_s3 + $0x90] sm:$0xff]  ;;  %v615_v42 = vld [vmem:[%s3476_s3 + $0x98] sm:$0xff]  ;;  %v616_v43 = vld [vmem:[%s3476_s3 + $0xa0] sm:$0xff] }
  0x39   : > { %657 = vmatpush.msra.mxu0 %v626_v29  ;;  %v611_v44 = vld [vmem:[%s3476_s3 + $0x78] sm:$0xff]  ;;  %v612_v45 = vld [vmem:[%s3476_s3 + $0x80] sm:$0xff]  ;;  %v613_v46 = vld [vmem:[%s3476_s3 + $0x88] sm:$0xff] }
  0x3a   : > { %v565_v12 = vmul.f32 %v2130_v9, %v564_v11  ;;  %677 = vmatpush.msra.mxu1 %v627_v30  ;;  %697 = vmatpush.msra.mxu2 %v628_v31  ;;  %v608_v47 = vld [vmem:[%s3476_s3 + $0x60] sm:$0xff]  ;;  %v609_v48 = vld [vmem:[%s3476_s3 + $0x68] sm:$0xff]  ;;  %v610_v49 = vld [vmem:[%s3476_s3 + $0x70] sm:$0xff] }
  0x3b   : > { %658 = vmatpush.msra.mxu0 %v623_v32  ;;  %v605_v50 = vld [vmem:[%s3476_s3 + $0x48] sm:$0xff]  ;;  %v606_v51 = vld [vmem:[%s3476_s3 + $0x50] sm:$0xff]  ;;  %v607_v52 = vld [vmem:[%s3476_s3 + $0x58] sm:$0xff] }
  0x3c   : > { %v566_v13 = vadd.f32 %v2130_v9, %v565_v12  ;;  %678 = vmatpush.msra.mxu1 %v624_v33  ;;  %698 = vmatpush.msra.mxu2 %v625_v34  ;;  %v602_v53 = vld [vmem:[%s3476_s3 + $0x30] sm:$0xff]  ;;  %v603_v54 = vld [vmem:[%s3476_s3 + $0x38] sm:$0xff]  ;;  %v604_v55 = vld [vmem:[%s3476_s3 + $0x40] sm:$0xff] }
  0x3d   : > { %659 = vmatpush.msra.mxu0 %v620_v35  ;;  %v599_v56 = vld [vmem:[%s3476_s3 + $0x18] sm:$0xff]  ;;  %v600_v57 = vld [vmem:[%s3476_s3 + $0x20] sm:$0xff]  ;;  %v601_v58 = vld [vmem:[%s3476_s3 + $0x28] sm:$0xff] }
  0x3e   : > { %v2660_v14 = vsel %vm567_vm1, %v2130_v9, %v566_v13  ;;  %679 = vmatpush.msra.mxu1 %v621_v36  ;;  %699 = vmatpush.msra.mxu2 %v622_v37  ;;  %v596_v59 = vld [vmem:[%s3476_s3] sm:$0xff]  ;;  %v597_v60 = vld [vmem:[%s3476_s3 + $0x8] sm:$0xff]  ;;  %v598_v61 = vld [vmem:[%s3476_s3 + $0x10] sm:$0xff] }
  0x3f   : > { %660 = vmatpush.msra.mxu0 %v617_v38  ;;  %v2123_v8 = vld [vmem:[#allocation2] ss:$0 sm:$0xff]  ;;  %v2124_v11 = vld [vmem:[#allocation4] ss:$0 sm:$0xff] }
  0x40   : > { %680 = vmatpush.msra.mxu1 %v618_v39  ;;  %700 = vmatpush.msra.mxu2 %v619_v40 }
  0x41   : > { %661 = vmatpush.msra.mxu0 %v614_v41 }
  0x42   : > { %681 = vmatpush.msra.mxu1 %v615_v42  ;;  %701 = vmatpush.msra.mxu2 %v616_v43 }
  0x43   : > { %662 = vmatpush.msra.mxu0 %v611_v44 }
  0x44   : > { %682 = vmatpush.msra.mxu1 %v612_v45  ;;  %702 = vmatpush.msra.mxu2 %v613_v46 }
  0x45   : > { %663 = vmatpush.msra.mxu0 %v608_v47 }
  0x46   : > { %683 = vmatpush.msra.mxu1 %v609_v48  ;;  %703 = vmatpush.msra.mxu2 %v610_v49 }
  0x47   : > { %664 = vmatpush.msra.mxu0 %v605_v50 }
  0x48   : > { %684 = vmatpush.msra.mxu1 %v606_v51  ;;  %704 = vmatpush.msra.mxu2 %v607_v52 }
  0x49   : > { %665 = vmatpush.msra.mxu0 %v602_v53 }
  0x4a   : > { %685 = vmatpush.msra.mxu1 %v603_v54  ;;  %705 = vmatpush.msra.mxu2 %v604_v55 }
  0x4b   : > { %666 = vmatpush.msra.mxu0 %v599_v56 }
  0x4c   : > { %686 = vmatpush.msra.mxu1 %v600_v57  ;;  %706 = vmatpush.msra.mxu2 %v601_v58 }
  0x4d   : > { %667 = vmatpush.msra.mxu0 %v596_v59 }
  0x4e   : > { %687 = vmatpush.msra.mxu1 %v597_v60  ;;  %707 = vmatpush.msra.mxu2 %v598_v61 }
  0xa8   : > { %v561_v15 = vpop.xlane.xlu0 %560 }
  0xa9   : > { %v569_v16 = vmul.f32 %v2660_v14, %v561_v15  ;;  %v644_v15 = vld [vmem:[%s3477_s4] sm:$0x7] }
  0xab   : > { %v2664_v17 = vsub.f32 %v2638_v0, %v569_v16  ;;  %v647_v16 = vperm.slane %v644_v15, 1 }
  0xad   : > { %v571_v18 = vmul.f32 %v2664_v17, %v2664_v17 }
  0xaf   : > { %v572_v19 = vsel %vm558_vm0, %v571_v18, 0.0 }
  0xb0   : > { %573 = vadd.xlane.f32.xlu0 %v572_v19  ;;  %v646_v19 = vperm.slane %v644_v15, 0 }
 0x123   : > { %v574_v62 = vpop.xlane.xlu0 %573 }
 0x124   : > { %v575_v63 = vmul.f32 %v574_v62, %v2660_v14 }
 0x126   : > { %v576_v1 = vadd.f32 1e-05, %v575_v63 }
 0x128   : > { %2131 = vrsqrt.f32 %v576_v1  ;;  %vm583_vm3 = vweird.f32 %v576_v1 }
 0x12e   : > { %v2132_v2 = vpop.eup %2131 }
 0x12f   : > { %v578_v3 = vmul.f32 %v2132_v2, %v576_v1  ;;  %vm584_vm2 = vweird.f32 %v2132_v2 }
 0x130   : > { %vm585_vm4 = vmor %vm583_vm3, %vm584_vm2 }
 0x131   : > { %v579_v4 = vmul.f32 %v2132_v2, %v578_v3 }
 0x133   : > { %v580_v5 = vmul.f32 0.5, %v579_v4 }
 0x135   : > { %v581_v6 = vsub.f32 1.5, %v580_v5 }
 0x137   : > { %v582_v7 = vmul.f32 %v2132_v2, %v581_v6 }
 0x139   : > { %v586_v9 = vsel %vm585_vm4, %v2132_v2, %v582_v7 }
 0x13a   : > { %v587_v10 = vmul.f32 %v586_v9, %v2664_v17  ;;  %v648_v17 = vperm.slane %v644_v15, 2 }
 0x13c   : > { %v591_v12 = vmul.f32 %v2123_v8, %v587_v10 }
 0x13e   : > { %v595_v13 = vadd.f32 %v2124_v11, %v591_v12 }
 0x140   : > { %668 = vmatmul.f32.vlgmr.msra.gmra.mxu0 %v595_v13  ;;  %688 = vmatmul.f32.vlgmr.msra.gmra.mxu1 %v595_v13 }
 0x141   : > { %708 = vmatmul.f32.vlgmr.msra.gmra.mxu2 %v595_v13 }
 0x1bd   : > { %v689_v18 = vpop.f32.mrf.mxu1  ;;  %v669_v21 = vpop.f32.mrf.mxu0 }
 0x1be   : > { %v2800_v20 = vadd.f32 %v689_v18, %v647_v16  ;;  %v670_v22 = vadd.f32 %v669_v21, %v646_v19 }
 0x1c0   : > { %915 = vrot.lane.b32.xlu2 %v2800_v20, %s2464_s14  ;;  %781 = vrot.lane.b32.xlu1 %v2800_v20, %s2465_s16 }
 0x1c1   : > { %1988 = vmatpush.xpose.msk.msrb.mxu0 %vm712_vm5, %v2800_v20 }
 0x1c4   : > { %v709_v23 = vpop.f32.mrf.mxu2  ;;  %1989 = vmatmul.msk.f32.vlgmr.msrb.gmra.mxu0 %vm712_vm5, %v670_v22 }
 0x1c5   : > { %v2809_v24 = vadd.f32 %v709_v23, %v648_v17 }
 0x1c7   : > { %819 = vrot.lane.b32.xlu0 %v2809_v24, %s2465_s16  ;;  %1990 = vmatpush.msk.msrb.mxu2 %vm558_vm0, %v2809_v24 }
 0x1c8   : > { %779 = vrot.lane.b32.xlu1 %v670_v22, %s2465_s16 }
 0x1cf   : > { %982 = vrot.lane.b32.xlu0 %v2800_v20, %s2466_s19 }
 0x1d0   : > { %848 = vrot.lane.b32.xlu1 %v2800_v20, %s2467_s6 }
 0x1d7   : > { %1047 = vrot.lane.b32.xlu0 %v670_v22, %s2468_s17 }
 0x1d8   : > { %846 = vrot.lane.b32.xlu1 %v670_v22, %s2467_s6 }
 0x1df   : > { %1114 = vrot.lane.b32.xlu0 %v670_v22, %s2469_s20 }
 0x1e0   : > { %913 = vrot.lane.b32.xlu1 %v670_v22, %s2464_s14 }
 0x1e8   : > { %1049 = vrot.lane.b32.xlu1 %v2800_v20, %s2468_s17 }
 0x1f0   : > { %1116 = vrot.lane.b32.xlu1 %v2800_v20, %s2469_s20 }
 0x1f8   : > { %1181 = vrot.lane.b32.xlu1 %v670_v22, %s2470_s28 }
 0x21a   : > { %v916_v26 = vpop.permute.xlu2 %915 }
 0x232   : > { %v782_v25 = vpop.permute.xlu1 %781 }
 0x233   : > { %1992 = vmatpush.xpose.msk.msrb.mxu1 %vm712_vm5, %v782_v25 }
 0x237   : > { %2000 = vmatpush.xpose.msk.msra.mxu1 %vm712_vm5, %v916_v26 }
 0x239   : > { %v820_v27 = vpop.permute.xlu0 %819 }
 0x23a   : > { %1994 = vmatpush.msk.msra.mxu3 %vm558_vm0, %v820_v27  ;;  %v780_v28 = vpop.permute.xlu1 %779 }
 0x23b   : > { %1993 = vmatmul.msk.f32.vlgmr.msrb.gmra.mxu1 %vm712_vm5, %v780_v28 }
 0x241   : > { %v983_v32 = vpop.permute.xlu0 %982  ;;  %v736_v46 = vpop.f32.mrf.mxu0 }
 0x242   : > { %v849_v29 = vpop.permute.xlu1 %848  ;;  %v739_v47 = vmul.f32 0.25, %v736_v46 }
 0x243   : > { %1996 = vmatpush.xpose.msk.msrb.mxu3 %vm712_vm5, %v849_v29 }
 0x244   : > { %v741_v48 = vsel %vm740_vm6, %v739_v47, -inf }
 0x249   : > { %v1048_v34 = vpop.permute.xlu0 %1047 }
 0x24a   : > { %v847_v30 = vpop.permute.xlu1 %846 }
 0x251   : > { %v1115_v59 = vpop.permute.xlu0 %1114 }
 0x252   : > { %v914_v31 = vpop.permute.xlu1 %913 }
 0x253   : > { %2001 = vmatmul.msk.f32.vlgmr.msra.gmra.mxu1 %vm712_vm5, %v914_v31 }
 0x25a   : > { %v1050_v33 = vpop.permute.xlu1 %1049 }
 0x25b   : > { %2008 = vmatpush.xpose.msk.msrb.mxu1 %vm712_vm5, %v1050_v33 }
 0x25e   : > { %2009 = vmatmul.msk.f32.vlgmr.msrb.gmra.mxu1 %vm712_vm5, %v1048_v34 }
 0x262   : > { %v1117_v54 = vpop.permute.xlu1 %1116 }
 0x26a   : > { %v1182_v58 = vpop.permute.xlu1 %1181 }
 0x2b8   : > { %v804_v35 = vpop.f32.mrf.mxu1 }
 0x2b9   : > { %v807_v36 = vmul.f32 0.25, %v804_v35 }
 0x2bb   : > { %v808_v37 = vsel %vm740_vm6, %v807_v36, -inf }
 0x2bc   : > { %809 = vmax.xlane.f32.xlu2 %v808_v37 }
 0x2d0   : > { %v938_v38 = vpop.f32.mrf.mxu1 }
 0x2d1   : > { %v941_v39 = vmul.f32 0.25, %v938_v38 }
 0x2d3   : > { %v942_v40 = vsel %vm740_vm6, %v941_v39, -inf }
 0x2d4   : > { %980 = vrot.lane.b32.xlu2 %v670_v22, %s2466_s19  ;;  %943 = vmax.xlane.f32.xlu0 %v942_v40 }
 0x2db   : > { %v1072_v49 = vpop.f32.mrf.mxu1 }
 0x2dc   : > { %v1075_v50 = vmul.f32 0.25, %v1072_v49 }
 0x2de   : > { %v1076_v51 = vsel %vm740_vm6, %v1075_v50, -inf }
 0x32f   : > { %v810_v41 = vpop.xlane.xlu2 %809 }
 0x330   : > { %v811_v42 = vsub.f32 %v807_v36, %v810_v41 }
 0x332   : > { %v812_v43 = vmul.f32 1.442695, %v811_v42 }
 0x334   : > { %2133 = vpow2.f32 %v812_v43 }
 0x337   : > { %v981_v52 = vpop.permute.xlu2 %980 }
 0x33a   : > { %v2134_v44 = vpop.eup %2133 }
 0x33b   : > { %v814_v45 = vsel %vm740_vm6, %v2134_v44, 0.0 }
 0x33c   : > { %815 = vadd.xlane.f32.xlu2 %v814_v45 }
 0x347   : > { %v944_v2 = vpop.xlane.xlu0 %943 }
 0x348   : > { %v945_v3 = vsub.f32 %v941_v39, %v944_v2 }
 0x34a   : > { %v946_v4 = vmul.f32 1.442695, %v945_v3 }
 0x354   : > { %1183 = vrot.lane.b32.xlu2 %v2800_v20, %s2470_s28 }
 0x37d   : > { %742 = vmax.xlane.f32.xlu2 %v741_v48 }
 0x385   : > { %1077 = vmax.xlane.f32.xlu2 %v1076_v51 }
 0x3af   : > { %v816_v53 = vpop.xlane.xlu2 %815 }
 0x3b0   : > { %2135 = vrcp.f32 %v816_v53 }
 0x3b6   : > { %v2136_v55 = vpop.eup %2135 }
 0x3b7   : > { %v1184_v56 = vpop.permute.xlu2 %1183  ;;  %v818_v57 = vmul.f32 %v2136_v55, %v2134_v44 }
 0x3b8   : > { %2016 = vmatpush.xpose.msk.msra.mxu1 %vm712_vm5, %v1184_v56 }
 0x3b9   : > { %1995 = vmatmul.msk.f32.vlgmr.msra.gmra.mxu3 %vm752_vm7, %v818_v57 }
 0x3ba   : > { %2004 = vmatpush.xpose.msk.msra.mxu3 %vm712_vm5, %v983_v32 }
 0x3bb   : > { %2017 = vmatmul.msk.f32.vlgmr.msra.gmra.mxu1 %vm712_vm5, %v1182_v58 }
 0x3c1   : > { %1997 = vmatmul.msk.f32.vlgmr.msrb.gmra.mxu3 %vm712_vm5, %v847_v30 }
 0x3c2   : > { %2012 = vmatpush.xpose.msk.msrb.mxu3 %vm712_vm5, %v1117_v54 }
 0x3c9   : > { %2005 = vmatmul.msk.f32.vlgmr.msra.gmra.mxu3 %vm712_vm5, %v981_v52 }
 0x3d1   : > { %2013 = vmatmul.msk.f32.vlgmr.msrb.gmra.mxu3 %vm712_vm5, %v1115_v59 }
 0x3f0   : > { %v743_v60 = vpop.xlane.xlu2 %742 }
 0x3f1   : > { %v744_v61 = vsub.f32 %v739_v47, %v743_v60 }
 0x3f3   : > { %v745_v62 = vmul.f32 1.442695, %v744_v61 }
 0x3f5   : > { %2137 = vpow2.f32 %v745_v62 }
 0x3f6   : > { %2139 = vpow2.f32 %v946_v4 }
 0x3f8   : > { %v1078_v10 = vpop.xlane.xlu2 %1077 }
 0x3f9   : > { %v1079_v15 = vsub.f32 %v1075_v50, %v1078_v10 }
 0x3fb   : > { %v2138_v63 = vpop.eup %2137  ;;  %v1080_v18 = vmul.f32 1.442695, %v1079_v15 }
 0x3fc   : > { %v747_v1 = vsel %vm740_vm6, %v2138_v63, 0.0  ;;  %v2140_v9 = vpop.eup %2139 }
 0x3fd   : > { %748 = vadd.xlane.f32.xlu0 %v747_v1  ;;  %v948_v11 = vsel %vm740_vm6, %v2140_v9, 0.0  ;;  %2141 = vpow2.f32 %v1080_v18  ;;  %v1304_v18 = vld [vmem:[#allocation6 + $0x78] sm:$0xff] }
 0x3fe   : > { %1309 = vmatpush.msra.mxu3 %v1304_v18  ;;  %v1404_v18 = vld [vmem:[%s3482_s9 + $0x150] sm:$0xff] }
 0x403   : > { %v2860_v17 = vpop.eup %2141 }
 0x404   : > { %v1082_v22 = vsel %vm740_vm6, %v2860_v17, 0.0 }
 0x438   : > { %v1206_v5 = vpop.f32.mrf.mxu1 }
 0x439   : > { %v1209_v6 = vmul.f32 0.25, %v1206_v5 }
 0x43b   : > { %v1210_v7 = vsel %vm740_vm6, %v1209_v6, -inf }
 0x43c   : > { %v2855_v8 = vpop.f32.mrf.mxu3  ;;  %1211 = vmax.xlane.f32.xlu2 %v1210_v7 }
 0x444   : > { %v871_v12 = vpop.f32.mrf.mxu3  ;;  %949 = vadd.xlane.f32.xlu2 %v948_v11 }
 0x445   : > { %v874_v13 = vmul.f32 0.25, %v871_v12 }
 0x447   : > { %v875_v16 = vsel %vm740_vm6, %v874_v13, -inf }
 0x448   : > { %876 = vmax.xlane.f32.xlu1 %v875_v16 }
 0x44c   : > { %v1005_v19 = vpop.f32.mrf.mxu3 }
 0x44d   : > { %v1008_v20 = vmul.f32 0.25, %v1005_v19  ;;  %v1303_v19 = vld [vmem:[#allocation6 + $0x70] sm:$0xff] }
 0x44e   : > { %1310 = vmatpush.msra.mxu3 %v1303_v19  ;;  %v1405_v19 = vld [vmem:[%s3482_s9 + $0x158] sm:$0xff] }
 0x44f   : > { %v1009_v21 = vsel %vm740_vm6, %v1008_v20, -inf }
 0x450   : > { %1010 = vmax.xlane.f32.xlu0 %v1009_v21  ;;  %v1301_v21 = vld [vmem:[#allocation6 + $0x60] sm:$0xff] }
 0x454   : > { %v1139_v34 = vpop.f32.mrf.mxu3 }
 0x455   : > { %v1142_v38 = vmul.f32 0.25, %v1139_v34  ;;  %v1289_v34 = vld [vmem:[#allocation6] sm:$0xff] }
 0x457   : > { %v1143_v42 = vsel %vm740_vm6, %v1142_v38, -inf }
 0x458   : > { %1083 = vadd.xlane.f32.xlu0 %v1082_v22  ;;  %v1300_v22 = vld [vmem:[#allocation6 + $0x58] sm:$0xff] }
 0x45c   : > { %953 = vrot.lane.b32.xlu2 %v2809_v24, %s2464_s14 }
 0x46c   : > { %886 = vrot.lane.b32.xlu0 %v2809_v24, %s2467_s6 }
 0x470   : > { %v749_v23 = vpop.xlane.xlu0 %748 }
 0x471   : > { %2143 = vrcp.f32 %v749_v23  ;;  %v1299_v23 = vld [vmem:[#allocation6 + $0x50] sm:$0xff] }
 0x474   : > { %1020 = vrot.lane.b32.xlu0 %v2809_v24, %s2466_s19 }
 0x477   : > { %v2144_v25 = vpop.eup %2143 }
 0x478   : > { %v751_v26 = vmul.f32 %v2144_v25, %v2138_v63  ;;  %v1298_v25 = vld [vmem:[#allocation6 + $0x48] sm:$0xff] }
 0x47a   : > { %1991 = vmatmul.msk.f32.vlgmr.msrb.gmra.mxu2 %vm752_vm7, %v751_v26  ;;  %v1297_v26 = vld [vmem:[#allocation6 + $0x40] sm:$0xff] }
 0x47c   : > { %1221 = vrot.lane.b32.xlu0 %v2809_v24, %s2470_s28 }
 0x484   : > { %1154 = vrot.lane.b32.xlu0 %v2809_v24, %s2469_s20 }
 0x4af   : > { %v1212_v27 = vpop.xlane.xlu2 %1211 }
 0x4b0   : > { %v1213_v28 = vsub.f32 %v1209_v6, %v1212_v27  ;;  %v1296_v27 = vld [vmem:[#allocation6 + $0x38] sm:$0xff] }
 0x4b2   : > { %v1214_v29 = vmul.f32 1.442695, %v1213_v28  ;;  %v1295_v28 = vld [vmem:[#allocation6 + $0x30] sm:$0xff] }
 0x4b4   : > { %2145 = vpow2.f32 %v1214_v29  ;;  %v1294_v29 = vld [vmem:[#allocation6 + $0x28] sm:$0xff] }
 0x4b7   : > { %v950_v30 = vpop.xlane.xlu2 %949 }
 0x4b8   : > { %2147 = vrcp.f32 %v950_v30  ;;  %v1293_v30 = vld [vmem:[#allocation6 + $0x20] sm:$0xff] }
 0x4ba   : > { %v2875_v31 = vpop.eup %2145 }
 0x4bb   : > { %v877_v32 = vpop.xlane.xlu1 %876  ;;  %v1216_v33 = vsel %vm740_vm6, %v2875_v31, 0.0 }
 0x4bc   : > { %v878_v35 = vsub.f32 %v874_v13, %v877_v32  ;;  %1217 = vadd.xlane.f32.xlu1 %v1216_v33  ;;  %v1291_v32 = vld [vmem:[#allocation6 + $0x10] sm:$0xff]  ;;  %v1290_v33 = vld [vmem:[#allocation6 + $0x8] sm:$0xff] }
 0x4be   : > { %v2148_v36 = vpop.eup %2147  ;;  %v879_v37 = vmul.f32 1.442695, %v878_v35 }
 0x4bf   : > { %v952_v39 = vmul.f32 %v2148_v36, %v2140_v9  ;;  %v954_v40 = vpop.permute.xlu2 %953 }
 0x4c0   : > { %2002 = vmatpush.msk.msra.mxu2 %vm558_vm0, %v954_v40  ;;  %2149 = vpow2.f32 %v879_v37 }
 0x4c1   : > { %2003 = vmatmul.msk.f32.vlgmr.msra.gmra.mxu2 %vm752_vm7, %v952_v39 }
 0x4c3   : > { %v1011_v41 = vpop.xlane.xlu0 %1010 }
 0x4c4   : > { %v1012_v43 = vsub.f32 %v1008_v20, %v1011_v41  ;;  %1144 = vmax.xlane.f32.xlu1 %v1143_v42  ;;  %v1302_v20 = vld [vmem:[#allocation6 + $0x68] sm:$0xff] }
 0x4c5   : > { %1311 = vmatpush.msra.mxu3 %v1302_v20  ;;  %v1398_v20 = vld [vmem:[%s3482_s9 + $0x120] sm:$0xff] }
 0x4c6   : > { %v1013_v44 = vmul.f32 1.442695, %v1012_v43  ;;  %v2150_v45 = vpop.eup %2149 }
 0x4c7   : > { %v881_v46 = vsel %vm740_vm6, %v2150_v45, 0.0  ;;  %1312 = vmatpush.msra.mxu3 %v1301_v21  ;;  %v1399_v21 = vld [vmem:[%s3482_s9 + $0x128] sm:$0xff] }
 0x4c8   : > { %2151 = vpow2.f32 %v1013_v44 }
 0x4c9   : > { %1313 = vmatpush.msra.mxu3 %v1300_v22  ;;  %v1401_v22 = vld [vmem:[%s3482_s9 + $0x138] sm:$0xff] }
 0x4cb   : > { %v1084_v49 = vpop.xlane.xlu0 %1083  ;;  %1314 = vmatpush.msra.mxu3 %v1299_v23  ;;  %v1394_v23 = vld [vmem:[%s3482_s9 + $0x100] sm:$0xff] }
 0x4cc   : > { %882 = vadd.xlane.f32.xlu1 %v881_v46 }
 0x4cd   : > { %1315 = vmatpush.msra.mxu3 %v1298_v25  ;;  %v1395_v25 = vld [vmem:[%s3482_s9 + $0x108] sm:$0xff] }
 0x4ce   : > { %v2152_v47 = vpop.eup %2151 }
 0x4cf   : > { %v1015_v48 = vsel %vm740_vm6, %v2152_v47, 0.0  ;;  %1316 = vmatpush.msra.mxu3 %v1297_v26  ;;  %v1396_v26 = vld [vmem:[%s3482_s9 + $0x110] sm:$0xff] }
 0x4d1   : > { %1317 = vmatpush.msra.mxu3 %v1296_v27  ;;  %v1397_v27 = vld [vmem:[%s3482_s9 + $0x118] sm:$0xff] }
 0x4d3   : > { %1318 = vmatpush.msra.mxu3 %v1295_v28  ;;  %v1390_v28 = vld [vmem:[%s3482_s9 + $0xe0] sm:$0xff] }
 0x4d4   : > { %1016 = vadd.xlane.f32.xlu1 %v1015_v48 }
 0x4d5   : > { %1319 = vmatpush.msra.mxu3 %v1294_v29  ;;  %v1391_v29 = vld [vmem:[%s3482_s9 + $0xe8] sm:$0xff] }
 0x4d7   : > { %1320 = vmatpush.msra.mxu3 %v1293_v30  ;;  %v1392_v30 = vld [vmem:[%s3482_s9 + $0xf0] sm:$0xff] }
 0x4de   : > { %v887_v50 = vpop.permute.xlu0 %886 }
 0x4df   : > { %1998 = vmatpush.msk.msra.mxu0 %vm558_vm0, %v887_v50 }
 0x4e6   : > { %v1021_v51 = vpop.permute.xlu0 %1020 }
 0x4e7   : > { %2006 = vmatpush.msk.msrb.mxu0 %vm558_vm0, %v1021_v51 }
 0x4ed   : > { %1087 = vrot.lane.b32.xlu1 %v2809_v24, %s2468_s17 }
 0x4ee   : > { %v1222_v57 = vpop.permute.xlu0 %1221 }
 0x4f5   : > { %1249 = vrot.lane.b32.xlu1 %v2855_v8, %s2470_s28 }
 0x4f6   : > { %v1155_v1 = vpop.permute.xlu0 %1154 }
 0x4fd   : > { %v2890_v56 = vpop.f32.mrf.mxu2 }
 0x52f   : > { %v1218_v52 = vpop.xlane.xlu1 %1217 }
 0x537   : > { %v1145_v53 = vpop.xlane.xlu1 %1144 }
 0x538   : > { %v1146_v54 = vsub.f32 %v1142_v38, %v1145_v53 }
 0x53a   : > { %v1147_v55 = vmul.f32 1.442695, %v1146_v54  ;;  %v1422_v54 = vld [vmem:[%s3482_s9 + $0x1e0] sm:$0xff] }
 0x53c   : > { %2153 = vpow2.f32 %v1147_v55  ;;  %v1423_v55 = vld [vmem:[%s3482_s9 + $0x1e8] sm:$0xff] }
 0x53d   : > { %1456 = vmatpush.msrb.mxu1 %v1423_v55  ;;  %v1368_v55 = vld [vmem:[%s3482_s9 + $0x30] sm:$0xff] }
 0x53f   : > { %v883_v58 = vpop.xlane.xlu1 %882 }
 0x540   : > { %2155 = vrcp.f32 %v883_v58  ;;  %v1419_v58 = vld [vmem:[%s3482_s9 + $0x1c8] sm:$0xff] }
 0x541   : > { %1457 = vmatpush.msrb.mxu1 %v1419_v58  ;;  %v1364_v58 = vld [vmem:[%s3482_s9 + $0x10] sm:$0xff] }
 0x542   : > { %v2154_v59 = vpop.eup %2153 }
 0x543   : > { %v1149_v60 = vsel %vm740_vm6, %v2154_v59, 0.0 }
 0x544   : > { %1150 = vadd.xlane.f32.xlu2 %v1149_v60  ;;  %v977_v61 = vpop.f32.mrf.mxu2  ;;  %v1421_v60 = vld [vmem:[%s3482_s9 + $0x1d8] sm:$0xff] }
 0x545   : > { %1257 = vrot.lane.b32.xlu1 %v977_v61, %s2468_s17 }
 0x546   : > { %v2156_v24 = vpop.eup %2155 }
 0x547   : > { %v885_v62 = vmul.f32 %v2156_v24, %v2150_v45  ;;  %v1017_v63 = vpop.xlane.xlu1 %1016 }
 0x548   : > { %2157 = vrcp.f32 %v1017_v63 }
 0x549   : > { %1999 = vmatmul.msk.f32.vlgmr.msra.gmra.mxu0 %vm752_vm7, %v885_v62  ;;  %2159 = vrcp.f32 %v1084_v49  ;;  %v2125_v49 = vld [vmem:[#allocation7] ss:$0 sm:$0xff] }
 0x54a   : > { %2014 = vmatpush.msk.msra.mxu0 %vm558_vm0, %v1155_v1  ;;  %2161 = vrcp.f32 %v1218_v52 }
 0x54e   : > { %v2158_v2 = vpop.eup %2157 }
 0x54f   : > { %v1019_v3 = vmul.f32 %v2158_v2, %v2152_v47  ;;  %v2160_v4 = vpop.eup %2159  ;;  %v1414_v2 = vld [vmem:[%s3482_s9 + $0x1a0] sm:$0xff] }
 0x550   : > { %v1086_v5 = vmul.f32 %v2160_v4, %v2860_v17  ;;  %v2162_v7 = vpop.eup %2161  ;;  %v1416_v4 = vld [vmem:[%s3482_s9 + $0x1b0] sm:$0xff] }
 0x551   : > { %2007 = vmatmul.msk.f32.vlgmr.msrb.gmra.mxu0 %vm752_vm7, %v1019_v3  ;;  %v1220_v8 = vmul.f32 %v2162_v7, %v2875_v31  ;;  %v1292_v31 = vld [vmem:[#allocation6 + $0x18] sm:$0xff]  ;;  %v1415_v3 = vld [vmem:[%s3482_s9 + $0x1a8] sm:$0xff] }
 0x552   : > { %1321 = vmatpush.msra.mxu3 %v1292_v31  ;;  %1436 = vmatpush.msrb.mxu0 %v1422_v54  ;;  %v1411_v7 = vld [vmem:[%s3482_s9 + $0x188] sm:$0xff]  ;;  %v1393_v31 = vld [vmem:[%s3482_s9 + $0xf8] sm:$0xff] }
 0x553   : > { %1458 = vmatpush.msrb.mxu1 %v1415_v3  ;;  %v1367_v54 = vld [vmem:[%s3482_s9 + $0x28] sm:$0xff] }
 0x554   : > { %1322 = vmatpush.msra.mxu3 %v1291_v32  ;;  %v1386_v32 = vld [vmem:[%s3482_s9 + $0xc0] sm:$0xff] }
 0x555   : > { %1459 = vmatpush.msrb.mxu1 %v1411_v7 }
 0x556   : > { %1323 = vmatpush.msra.mxu3 %v1290_v33  ;;  %v1387_v33 = vld [vmem:[%s3482_s9 + $0xc8] sm:$0xff] }
 0x558   : > { %1324 = vmatpush.msra.mxu3 %v1289_v34  ;;  %v1388_v34 = vld [vmem:[%s3482_s9 + $0xd0] sm:$0xff] }
 0x55f   : > { %v1088_v6 = vpop.permute.xlu1 %1087 }
 0x560   : > { %2010 = vmatpush.msk.msrb.mxu2 %vm558_vm0, %v1088_v6  ;;  %v1410_v6 = vld [vmem:[%s3482_s9 + $0x180] sm:$0xff] }
 0x561   : > { %2011 = vmatmul.msk.f32.vlgmr.msrb.gmra.mxu2 %vm752_vm7, %v1086_v5  ;;  %v1417_v5 = vld [vmem:[%s3482_s9 + $0x1b8] sm:$0xff] }
 0x562   : > { %2018 = vmatpush.msk.msra.mxu2 %vm558_vm0, %v1222_v57  ;;  %v1418_v57 = vld [vmem:[%s3482_s9 + $0x1c0] sm:$0xff] }
 0x563   : > { %1437 = vmatpush.msrb.mxu0 %v1418_v57  ;;  %v1363_v57 = vld [vmem:[%s3482_s9 + $0x8] sm:$0xff] }
 0x565   : > { %1438 = vmatpush.msrb.mxu0 %v1414_v2 }
 0x567   : > { %v1250_v35 = vpop.permute.xlu1 %1249  ;;  %1439 = vmatpush.msrb.mxu0 %v1410_v6  ;;  %v2126_v6 = vld [vmem:[#allocation9] ss:$0 sm:$0xff] }
 0x568   : > { %v1276_v39 = vsel %vm712_vm5, %v2890_v56, %v1250_v35  ;;  %v1424_v56 = vld [vmem:[%s3482_s9 + $0x1f0] sm:$0xff]  ;;  %v1389_v35 = vld [vmem:[%s3482_s9 + $0xd8] sm:$0xff] }
 0x569   : > { %2019 = vmatmul.msk.f32.vlgmr.msra.gmra.mxu2 %vm752_vm7, %v1220_v8  ;;  %v1412_v8 = vld [vmem:[%s3482_s9 + $0x190] sm:$0xff] }
 0x56a   : > { %1476 = vmatpush.msrb.mxu2 %v1424_v56  ;;  %v1369_v56 = vld [vmem:[%s3482_s9 + $0x38] sm:$0xff] }
 0x5b7   : > { %v1151_v9 = vpop.xlane.xlu2 %1150  ;;  %v1258_v37 = vpop.permute.xlu1 %1257 }
 0x5b8   : > { %2163 = vrcp.f32 %v1151_v9  ;;  %v1413_v9 = vld [vmem:[%s3482_s9 + $0x198] sm:$0xff] }
 0x5be   : > { %v2164_v10 = vpop.eup %2163 }
 0x5bf   : > { %v1153_v11 = vmul.f32 %v2164_v10, %v2154_v59  ;;  %v1420_v59 = vld [vmem:[%s3482_s9 + $0x1d0] sm:$0xff]  ;;  %v1406_v10 = vld [vmem:[%s3482_s9 + $0x160] sm:$0xff] }
 0x5c0   : > { %1477 = vmatpush.msrb.mxu2 %v1420_v59  ;;  %1440 = vmatpush.msrb.mxu0 %v1406_v10  ;;  %v1365_v59 = vld [vmem:[%s3482_s9 + $0x18] sm:$0xff] }
 0x5c1   : > { %2015 = vmatmul.msk.f32.vlgmr.msra.gmra.mxu0 %vm752_vm7, %v1153_v11  ;;  %v1407_v11 = vld [vmem:[%s3482_s9 + $0x168] sm:$0xff] }
 0x5c2   : > { %1478 = vmatpush.msrb.mxu2 %v1416_v4  ;;  %1460 = vmatpush.msrb.mxu1 %v1407_v11 }
 0x5c4   : > { %1479 = vmatpush.msrb.mxu2 %v1412_v8 }
 0x5c6   : > { %v910_v12 = vpop.f32.mrf.mxu0 }
 0x5c7   : > { %1253 = vrot.lane.b32.xlu0 %v910_v12, %s2469_s20  ;;  %v1408_v12 = vld [vmem:[%s3482_s9 + $0x170] sm:$0xff] }
 0x5c8   : > { %1480 = vmatpush.msrb.mxu2 %v1408_v12 }
 0x5ca   : > { %1481 = vmatpush.msrb.mxu2 %v1404_v18  ;;  %v1426_v18 = vld [vmem:[#allocation12] sm:$0xf] }
 0x5ce   : > { %v1044_v13 = vpop.f32.mrf.mxu0 }
 0x5cf   : > { %1261 = vrot.lane.b32.xlu0 %v1044_v13, %s2466_s19  ;;  %v1409_v13 = vld [vmem:[%s3482_s9 + $0x178] sm:$0xff] }
 0x5e4   : > { %v1111_v15 = vpop.f32.mrf.mxu2 }
 0x5e5   : > { %1265 = vrot.lane.b32.xlu1 %v1111_v15, %s2464_s14  ;;  %v1402_v15 = vld [vmem:[%s3482_s9 + $0x140] sm:$0xff] }
 0x5e6   : > { %1441 = vmatpush.msrb.mxu0 %v1402_v15 }
 0x5e8   : > { %1442 = vmatpush.msrb.mxu0 %v1398_v20  ;;  %v1428_v20 = vperm.slane %v1426_v18, 0 }
 0x5ea   : > { %1443 = vmatpush.msrb.mxu0 %v1394_v23 }
 0x5ec   : > { %v1245_v16 = vpop.f32.mrf.mxu2  ;;  %1444 = vmatpush.msrb.mxu0 %v1390_v28 }
 0x5ed   : > { %1273 = vrot.lane.b32.xlu2 %v1245_v16, %s2465_s16  ;;  %v1403_v16 = vld [vmem:[%s3482_s9 + $0x148] sm:$0xff] }
 0x5ee   : > { %1461 = vmatpush.msrb.mxu1 %v1403_v16  ;;  %1445 = vmatpush.msrb.mxu0 %v1386_v32  ;;  %v1430_v32 = vperm.slane %v1426_v18, 2 }
 0x5f0   : > { %1462 = vmatpush.msrb.mxu1 %v1399_v21  ;;  %v1429_v21 = vperm.slane %v1426_v18, 1 }
 0x5f2   : > { %1463 = vmatpush.msrb.mxu1 %v1395_v25 }
 0x5f4   : > { %1464 = vmatpush.msrb.mxu1 %v1391_v29 }
 0x5f6   : > { %1465 = vmatpush.msrb.mxu1 %v1387_v33  ;;  %v1431_v33 = vperm.slane %v1426_v18, 3 }
 0x639   : > { %v1254_v36 = vpop.permute.xlu0 %1253 }
 0x63a   : > { %v1278_v40 = vsel %vm1277_vm8, %v1276_v39, %v1254_v36  ;;  %v1382_v36 = vld [vmem:[%s3482_s9 + $0xa0] sm:$0xff]  ;;  %v1385_v39 = vld [vmem:[%s3482_s9 + $0xb8] sm:$0xff] }
 0x63b   : > { %v1280_v42 = vsel %vm1279_vm9, %v1278_v40, %v1258_v37  ;;  %v1383_v37 = vld [vmem:[%s3482_s9 + $0xa8] sm:$0xff]  ;;  %1446 = vmatpush.msrb.mxu0 %v1382_v36  ;;  %v1378_v40 = vld [vmem:[%s3482_s9 + $0x80] sm:$0xff] }
 0x63c   : > { %1466 = vmatpush.msrb.mxu1 %v1383_v37  ;;  %v1696_v36 = vld [vmem:[%s3484_s11 + $0x68] sm:$0xff] }
 0x63d   : > { %1447 = vmatpush.msrb.mxu0 %v1378_v40  ;;  %v1712_v37 = vld [vmem:[%s3484_s11 + $0xe8] sm:$0xff] }
 0x63e   : > { %v1178_v17 = vpop.f32.mrf.mxu0 }
 0x63f   : > { %1269 = vrot.lane.b32.xlu0 %v1178_v17, %s2467_s6  ;;  %v1400_v17 = vld [vmem:[%s3482_s9 + $0x130] sm:$0xff] }
 0x640   : > { %1482 = vmatpush.msrb.mxu2 %v1400_v17 }
 0x641   : > { %v1262_v38 = vpop.permute.xlu0 %1261 }
 0x642   : > { %v1282_v43 = vsel %vm1281_vm10, %v1280_v42, %v1262_v38  ;;  %1483 = vmatpush.msrb.mxu2 %v1396_v26  ;;  %v1384_v38 = vld [vmem:[%s3482_s9 + $0xb0] sm:$0xff]  ;;  %v1698_v26 = vld [vmem:[%s3484_s11 + $0x78] sm:$0xff] }
 0x643   : > { %v1380_v42 = vld [vmem:[%s3482_s9 + $0x90] sm:$0xff] }
 0x644   : > { %1484 = vmatpush.msrb.mxu2 %v1392_v30  ;;  %v1697_v30 = vld [vmem:[%s3484_s11 + $0x70] sm:$0xff] }
 0x646   : > { %1485 = vmatpush.msrb.mxu2 %v1388_v34 }
 0x647   : > { %v1274_v46 = vpop.permute.xlu2 %1273 }
 0x648   : > { %1486 = vmatpush.msrb.mxu2 %v1384_v38 }
 0x64a   : > { %1487 = vmatpush.msrb.mxu2 %v1380_v42 }
 0x657   : > { %v1266_v41 = vpop.permute.xlu1 %1265 }
 0x658   : > { %v1284_v44 = vsel %vm1283_vm11, %v1282_v43, %v1266_v41  ;;  %v1379_v41 = vld [vmem:[%s3482_s9 + $0x88] sm:$0xff]  ;;  %v1381_v43 = vld [vmem:[%s3482_s9 + $0x98] sm:$0xff] }
 0x659   : > { %1467 = vmatpush.msrb.mxu1 %v1379_v41 }
 0x6b1   : > { %v1270_v45 = vpop.permute.xlu0 %1269 }
 0x6b2   : > { %v1286_v47 = vsel %vm1285_vm12, %v1284_v44, %v1270_v45  ;;  %v1374_v44 = vld [vmem:[%s3482_s9 + $0x60] sm:$0xff]  ;;  %v1375_v45 = vld [vmem:[%s3482_s9 + $0x68] sm:$0xff] }
 0x6b3   : > { %v1288_v48 = vsel %vm1287_vm13, %v1286_v47, %v1274_v46  ;;  %v1376_v46 = vld [vmem:[%s3482_s9 + $0x70] sm:$0xff]  ;;  %1448 = vmatpush.msrb.mxu0 %v1374_v44  ;;  %1468 = vmatpush.msrb.mxu1 %v1375_v45  ;;  %v1377_v47 = vld [vmem:[%s3482_s9 + $0x78] sm:$0xff]  ;;  %v1695_v44 = vld [vmem:[%s3484_s11 + $0x60] sm:$0xff] }
 0x6b4   : > { %1325 = vmatmul.f32.vlgmr.msra.gmra.mxu3 %v1288_v48  ;;  %v1370_v48 = vld [vmem:[%s3482_s9 + $0x40] sm:$0xff]  ;;  %1488 = vmatpush.msrb.mxu2 %v1376_v46  ;;  %v1730_v46 = vld [vmem:[%s3484_s11 + $0x178] sm:$0xff] }
 0x6b5   : > { %1449 = vmatpush.msrb.mxu0 %v1370_v48  ;;  %v1711_v45 = vld [vmem:[%s3484_s11 + $0xe0] sm:$0xff] }
 0x737   : > { %v1326_v50 = vpop.f32.mrf.mxu3 }
 0x738   : > { %v1327_v51 = vadd.f32 %v2125_v49, %v1326_v50  ;;  %v1371_v49 = vld [vmem:[%s3482_s9 + $0x48] sm:$0xff]  ;;  %v1372_v50 = vld [vmem:[%s3482_s9 + $0x50] sm:$0xff] }
 0x739   : > { %1469 = vmatpush.msrb.mxu1 %v1371_v49  ;;  %1489 = vmatpush.msrb.mxu2 %v1372_v50  ;;  %v1746_v49 = vld [vmem:[%s3484_s11 + $0x1f8] sm:$0xff] }
 0x73a   : > { %v2912_v52 = vadd.f32 %v1327_v51, %v2638_v0  ;;  %v1425_v0 = vld [vmem:[%s3482_s9 + $0x1f8] sm:$0xff] }
 0x73b   : > { %1496 = vmatpush.msrb.mxu3 %v1425_v0  ;;  %v1373_v51 = vld [vmem:[%s3482_s9 + $0x58] sm:$0xff]  ;;  %v1362_v0 = vld [vmem:[%s3482_s9] sm:$0xff]  ;;  %1470 = vmatpush.msrb.mxu1 %v1367_v54  ;;  %v1729_v54 = vld [vmem:[%s3484_s11 + $0x170] sm:$0xff] }
 0x73c   : > { %v1332_v53 = vsel %vm558_vm0, %v2912_v52, 0.0  ;;  %1490 = vmatpush.msrb.mxu2 %v1368_v55  ;;  %v1694_v50 = vld [vmem:[%s3484_s11 + $0x58] sm:$0xff]  ;;  %v1745_v55 = vld [vmem:[%s3484_s11 + $0x1f0] sm:$0xff] }
 0x73d   : > { %1333 = vadd.xlane.f32.xlu1 %v1332_v53  ;;  %1497 = vmatpush.msrb.mxu3 %v1421_v60  ;;  %v1366_v53 = vld [vmem:[%s3482_s9 + $0x20] sm:$0xff] }
 0x73e   : > { %1450 = vmatpush.msrb.mxu0 %v1366_v53  ;;  %1471 = vmatpush.msrb.mxu1 %v1363_v57  ;;  %v1728_v57 = vld [vmem:[%s3484_s11 + $0x168] sm:$0xff] }
 0x73f   : > { %1498 = vmatpush.msrb.mxu3 %v1417_v5  ;;  %1491 = vmatpush.msrb.mxu2 %v1364_v58 }
 0x740   : > { %1451 = vmatpush.msrb.mxu0 %v1362_v0  ;;  %v1709_v0 = vld [vmem:[%s3484_s11 + $0xd0] sm:$0xff] }
 0x741   : > { %1499 = vmatpush.msrb.mxu3 %v1413_v9  ;;  %v2127_v9 = vld [vmem:[#allocation10] ss:$0 sm:$0xff]  ;;  %1791 = vmatpush.msra.mxu2 %v1730_v46  ;;  %v1722_v46 = vld [vmem:[%s3484_s11 + $0x138] sm:$0xff] }
 0x742   : > { %1751 = vmatpush.msra.mxu0 %v1698_v26 }
 0x743   : > { %1500 = vmatpush.msrb.mxu3 %v1409_v13  ;;  %1792 = vmatpush.msra.mxu2 %v1729_v54 }
 0x744   : > { %1752 = vmatpush.msra.mxu0 %v1697_v30 }
 0x745   : > { %1501 = vmatpush.msrb.mxu3 %v1405_v19  ;;  %1793 = vmatpush.msra.mxu2 %v1728_v57  ;;  %v1721_v57 = vld [vmem:[%s3484_s11 + $0x130] sm:$0xff] }
 0x746   : > { %1753 = vmatpush.msra.mxu0 %v1696_v36 }
 0x747   : > { %1502 = vmatpush.msrb.mxu3 %v1401_v22 }
 0x748   : > { %1754 = vmatpush.msra.mxu0 %v1695_v44  ;;  %v1687_v44 = vld [vmem:[%s3484_s11 + $0x20] sm:$0xff] }
 0x749   : > { %1503 = vmatpush.msrb.mxu3 %v1397_v27  ;;  %v1714_v27 = vld [vmem:[%s3484_s11 + $0xf8] sm:$0xff] }
 0x74a   : > { %1771 = vmatpush.msra.mxu1 %v1714_v27  ;;  %1755 = vmatpush.msra.mxu0 %v1694_v50 }
 0x74b   : > { %1504 = vmatpush.msrb.mxu3 %v1393_v31  ;;  %v1713_v31 = vld [vmem:[%s3484_s11 + $0xf0] sm:$0xff] }
 0x74c   : > { %1772 = vmatpush.msra.mxu1 %v1713_v31  ;;  %v1688_v31 = vld [vmem:[%s3484_s11 + $0x28] sm:$0xff] }
 0x74d   : > { %1505 = vmatpush.msrb.mxu3 %v1389_v35 }
 0x74e   : > { %1773 = vmatpush.msra.mxu1 %v1712_v37  ;;  %v1704_v37 = vld [vmem:[%s3484_s11 + $0xa8] sm:$0xff] }
 0x74f   : > { %1506 = vmatpush.msrb.mxu3 %v1385_v39 }
 0x750   : > { %1774 = vmatpush.msra.mxu1 %v1711_v45  ;;  %v1703_v45 = vld [vmem:[%s3484_s11 + $0xa0] sm:$0xff] }
 0x751   : > { %1507 = vmatpush.msrb.mxu3 %v1381_v43 }
 0x753   : > { %1508 = vmatpush.msrb.mxu3 %v1377_v47 }
 0x755   : > { %1509 = vmatpush.msrb.mxu3 %v1373_v51  ;;  %v1710_v51 = vld [vmem:[%s3484_s11 + $0xd8] sm:$0xff] }
 0x756   : > { %1775 = vmatpush.msra.mxu1 %v1710_v51  ;;  %v1738_v51 = vld [vmem:[%s3484_s11 + $0x1b8] sm:$0xff] }
 0x757   : > { %1510 = vmatpush.msrb.mxu3 %v1369_v56  ;;  %v1693_v56 = vld [vmem:[%s3484_s11 + $0x50] sm:$0xff] }
 0x758   : > { %1756 = vmatpush.msra.mxu0 %v1693_v56  ;;  %1776 = vmatpush.msra.mxu1 %v1709_v0  ;;  %v1686_v56 = vld [vmem:[%s3484_s11 + $0x18] sm:$0xff] }
 0x759   : > { %1511 = vmatpush.msrb.mxu3 %v1365_v59  ;;  %v1744_v59 = vld [vmem:[%s3484_s11 + $0x1e8] sm:$0xff]  ;;  %v1702_v0 = vld [vmem:[%s3484_s11 + $0x98] sm:$0xff] }
 0x75b   : > { %1811 = vmatpush.msra.mxu3 %v1746_v49 }
 0x75d   : > { %1812 = vmatpush.msra.mxu3 %v1745_v55 }
 0x75f   : > { %1813 = vmatpush.msra.mxu3 %v1744_v59 }
 0x7b0   : > { %v1334_v61 = vpop.xlane.xlu1 %1333 }
 0x7b1   : > { %v1335_v24 = vmul.f32 %v1334_v61, %v2660_v14 }
 0x7b3   : > { %v2942_v62 = vsub.f32 %v2912_v52, %v1335_v24 }
 0x7b5   : > { %v1337_v63 = vmul.f32 %v2942_v62, %v2942_v62 }
 0x7b7   : > { %v1338_v1 = vsel %vm558_vm0, %v1337_v63, 0.0 }
 0x7b8   : > { %1339 = vadd.xlane.f32.xlu0 %v1338_v1 }
 0x82b   : > { %v1340_v60 = vpop.xlane.xlu0 %1339 }
 0x82c   : > { %v1341_v61 = vmul.f32 %v1340_v60, %v2660_v14  ;;  %v2471_v14 = vmov 1.4142135   ;;  %v1692_v60 = vld [vmem:[%s3484_s11 + $0x48] sm:$0xff] }
 0x82d   : > { %1757 = vmatpush.msra.mxu0 %v1692_v60 }
 0x82e   : > { %v1342_v24 = vadd.f32 1e-05, %v1341_v61 }
 0x830   : > { %2165 = vrsqrt.f32 %v1342_v24  ;;  %vm1349_vm15 = vweird.f32 %v1342_v24 }
 0x831   : > { %2167 = vrcp.f32 %v2471_v14 }
 0x836   : > { %v2166_v63 = vpop.eup %2165 }
 0x837   : > { %v1344_v1 = vmul.f32 %v2166_v63, %v1342_v24  ;;  %vm1350_vm14 = vweird.f32 %v2166_v63  ;;  %v2168_v12 = vpop.eup %2167  ;;  %v1708_v24 = vld [vmem:[%s3484_s11 + $0xc8] sm:$0xff] }
 0x838   : > { %vm1351_vm0 = vmor %vm1349_vm15, %vm1350_vm14  ;;  %v1521_v13 = vmul.f32 1.4142135, %v2168_v12  ;;  %vm1525_vm1 = vweird.f32 %v2168_v12  ;;  %1777 = vmatpush.msra.mxu1 %v1708_v24 }
 0x839   : > { %v1345_v2 = vmul.f32 %v2166_v63, %v1344_v1  ;;  %v1743_v1 = vld [vmem:[%s3484_s11 + $0x1e0] sm:$0xff] }
 0x83a   : > { %v1522_v15 = vsub.f32 1.0, %v1521_v13  ;;  %1814 = vmatpush.msra.mxu3 %v1743_v1  ;;  %v1725_v13 = vld [vmem:[%s3484_s11 + $0x150] sm:$0xff] }
 0x83b   : > { %v1346_v3 = vmul.f32 0.5, %v1345_v2  ;;  %v1691_v2 = vld [vmem:[%s3484_s11 + $0x40] sm:$0xff]  ;;  %v1737_v1 = vld [vmem:[%s3484_s11 + $0x1b0] sm:$0xff] }
 0x83c   : > { %v1523_v16 = vmul.f32 %v2168_v12, %v1522_v15  ;;  %1758 = vmatpush.msra.mxu0 %v1691_v2  ;;  %v1741_v15 = vld [vmem:[%s3484_s11 + $0x1d0] sm:$0xff] }
 0x83d   : > { %v1347_v4 = vsub.f32 1.5, %v1346_v3  ;;  %v1707_v3 = vld [vmem:[%s3484_s11 + $0xc0] sm:$0xff] }
 0x83e   : > { %v1524_v19 = vadd.f32 %v2168_v12, %v1523_v16  ;;  %1778 = vmatpush.msra.mxu1 %v1707_v3 }
 0x83f   : > { %v1348_v5 = vmul.f32 %v2166_v63, %v1347_v4 }
 0x841   : > { %v1352_v7 = vsel %vm1351_vm0, %v2166_v63, %v1348_v5  ;;  %v1727_v63 = vld [vmem:[%s3484_s11 + $0x160] sm:$0xff] }
 0x842   : > { %v1353_v8 = vmul.f32 %v1352_v7, %v2942_v62  ;;  %v1526_v62 = vsel %vm1525_vm1, %v2168_v12, %v1524_v19  ;;  %1794 = vmatpush.msra.mxu2 %v1727_v63  ;;  %v1726_v7 = vld [vmem:[%s3484_s11 + $0x158] sm:$0xff]  ;;  %v1689_v19 = vld [vmem:[%s3484_s11 + $0x30] sm:$0xff] }
 0x843   : > { %v1706_v12 = vld [vmem:[%s3484_s11 + $0xb8] sm:$0xff] }
 0x844   : > { %v1357_v10 = vmul.f32 %v2126_v6, %v1353_v8  ;;  %v1742_v8 = vld [vmem:[%s3484_s11 + $0x1d8] sm:$0xff]  ;;  %1795 = vmatpush.msra.mxu2 %v1726_v7  ;;  %1779 = vmatpush.msra.mxu1 %v1706_v12  ;;  %v1720_v7 = vld [vmem:[%s3484_s11 + $0x128] sm:$0xff] }
 0x845   : > { %1815 = vmatpush.msra.mxu3 %v1742_v8  ;;  %v1736_v12 = vld [vmem:[%s3484_s11 + $0x1a8] sm:$0xff] }
 0x846   : > { %v1361_v11 = vadd.f32 %v2127_v9, %v1357_v10  ;;  %v1690_v9 = vld [vmem:[%s3484_s11 + $0x38] sm:$0xff]  ;;  %1796 = vmatpush.msra.mxu2 %v1725_v13 }
 0x847   : > { %1759 = vmatpush.msra.mxu0 %v1690_v9  ;;  %1816 = vmatpush.msra.mxu3 %v1741_v15 }
 0x848   : > { %1452 = vmatmul.f32.vlgmr.msrb.gmra.mxu0 %v1361_v11  ;;  %1472 = vmatmul.f32.vlgmr.msrb.gmra.mxu1 %v1361_v11 }
 0x849   : > { %1492 = vmatmul.f32.vlgmr.msrb.gmra.mxu2 %v1361_v11  ;;  %1512 = vmatmul.f32.vlgmr.msrb.gmra.mxu3 %v1361_v11 }
 0x84a   : > { %1760 = vmatpush.msra.mxu0 %v1689_v19 }
 0x84c   : > { %1761 = vmatpush.msra.mxu0 %v1688_v31  ;;  %v1699_v31 = vld [vmem:[%s3484_s11 + $0x80] sm:$0xff] }
 0x84e   : > { %1762 = vmatpush.msra.mxu0 %v1687_v44 }
 0x850   : > { %1763 = vmatpush.msra.mxu0 %v1686_v56  ;;  %v1716_v56 = vld [vmem:[%s3484_s11 + $0x108] sm:$0xff] }
 0x8c5   : > { %v1453_v17 = vpop.f32.mrf.mxu0  ;;  %v1473_v22 = vpop.f32.mrf.mxu1 }
 0x8c6   : > { %v3117_v23 = vadd.f32 %v1453_v17, %v1428_v20  ;;  %v3119_v25 = vadd.f32 %v1473_v22, %v1429_v21  ;;  %v1705_v20 = vld [vmem:[%s3484_s11 + $0xb0] sm:$0xff]  ;;  %v1740_v22 = vld [vmem:[%s3484_s11 + $0x1c8] sm:$0xff] }
 0x8c7   : > { %1780 = vmatpush.msra.mxu1 %v1705_v20  ;;  %1817 = vmatpush.msra.mxu3 %v1740_v22 }
 0x8c8   : > { %v3128_v28 = vmul.f32 %v1526_v62, %v3117_v23  ;;  %v3131_v29 = vmul.f32 %v1526_v62, %v3119_v25 }
 0x8c9   : > { %1781 = vmatpush.msra.mxu1 %v1704_v37 }
 0x8ca   : > { %v3140_v34 = vand.u32 2147483647, %v3128_v28  ;;  %v3143_v35 = vand.u32 2147483647, %v3131_v29 }
 0x8cb   : > { %1782 = vmatpush.msra.mxu1 %v1703_v45  ;;  %v1733_v45 = vld [vmem:[%s3484_s11 + $0x190] sm:$0xff] }
 0x8cc   : > { %v1543_v38 = vmul.f32 0.3275911, %v3140_v34  ;;  %v1544_v39 = vmul.f32 0.3275911, %v3143_v35  ;;  %v1493_v40 = vpop.f32.mrf.mxu2  ;;  %v1513_v41 = vpop.f32.mrf.mxu3  ;;  %v1647_v17 = vsub.f32 0.0, %v3140_v34  ;;  %v1648_v50 = vsub.f32 0.0, %v3143_v35 }
 0x8cd   : > { %v3153_v42 = vadd.f32 %v1493_v40, %v1430_v32  ;;  %v3155_v43 = vadd.f32 %v1513_v41, %v1431_v33  ;;  %1783 = vmatpush.msra.mxu1 %v1702_v0  ;;  %v1732_v0 = vld [vmem:[%s3484_s11 + $0x188] sm:$0xff] }
 0x8ce   : > { %v3166_v47 = vadd.f32 1.0, %v1543_v38  ;;  %v3168_v48 = vadd.f32 1.0, %v1544_v39  ;;  %v1723_v38 = vld [vmem:[%s3484_s11 + $0x140] sm:$0xff]  ;;  %v1651_v60 = vmul.f32 %v1647_v17, %v3140_v34 }
 0x8cf   : > { %v3180_v53 = vmul.f32 %v1526_v62, %v3153_v42  ;;  %v3200_v58 = vmul.f32 %v1526_v62, %v3155_v43  ;;  %v1724_v62 = vld [vmem:[%s3484_s11 + $0x148] sm:$0xff]  ;;  %v1739_v39 = vld [vmem:[%s3484_s11 + $0x1c0] sm:$0xff] }
 0x8d0   : > { %2169 = vrcp.f32 %v3166_v47  ;;  %v1562_v26 = vand.u32 2147483648, %v3166_v47  ;;  %v1560_v33 = vand.u32 2147483647, %v3166_v47  ;;  %v1577_v36 = vand.u32 2147483648, %v3168_v48  ;;  %1797 = vmatpush.msra.mxu2 %v1724_v62  ;;  %1818 = vmatpush.msra.mxu3 %v1739_v39  ;;  %v1735_v17 = vld [vmem:[%s3484_s11 + $0x1a0] sm:$0xff] }
 0x8d1   : > { %2171 = vrcp.f32 %v3168_v48  ;;  %v3209_v61 = vand.u32 2147483647, %v3180_v53  ;;  %v3228_v5 = vand.u32 2147483647, %v3200_v58  ;;  %vm1556_vm3 = vweird.f32 %v3166_v47 }
 0x8d2   : > { %v1575_v41 = vand.u32 2147483647, %v3168_v48  ;;  %1798 = vmatpush.msra.mxu2 %v1723_v38  ;;  %v1563_v54 = vor.u32 1.1754944e-38, %v1562_v26  ;;  %vm1571_vm6 = vweird.f32 %v3168_v48  ;;  %vm1561_vm7 = vcmp.eq.f32.partialorder %v1560_v33, 8.507059e+37  ;;  %1819 = vmatpush.msra.mxu3 %v1738_v51  ;;  %v1734_v38 = vld [vmem:[%s3484_s11 + $0x198] sm:$0xff] }
 0x8d3   : > { %v1545_v4 = vmul.f32 0.3275911, %v3209_v61  ;;  %v1546_v18 = vmul.f32 0.3275911, %v3228_v5  ;;  %v1578_v63 = vor.u32 1.1754944e-38, %v1577_v36 }
 0x8d4   : > { %1799 = vmatpush.msra.mxu2 %v1722_v46  ;;  %vm1576_vm9 = vcmp.eq.f32.partialorder %v1575_v41, 8.507059e+37  ;;  %1820 = vmatpush.msra.mxu3 %v1737_v1  ;;  %v1655_v36 = vmul.f32 1.442695, %v1651_v60  ;;  %v1715_v1 = vld [vmem:[%s3484_s11 + $0x100] sm:$0xff] }
 0x8d5   : > { %v3245_v14 = vadd.f32 1.0, %v1545_v4  ;;  %v3275_v30 = vadd.f32 1.0, %v1546_v18  ;;  %v1685_v4 = vld [vmem:[%s3484_s11 + $0x10] sm:$0xff]  ;;  %v1719_v18 = vld [vmem:[%s3484_s11 + $0x120] sm:$0xff] }
 0x8d6   : > { %v3230_v6 = vpop.eup %2169  ;;  %1800 = vmatpush.msra.mxu2 %v1721_v57  ;;  %1764 = vmatpush.msra.mxu0 %v1685_v4 }
 0x8d7   : > { %v3241_v10 = vpop.eup %2171  ;;  %v1552_v11 = vmul.f32 %v3230_v6, %v3166_v47  ;;  %2173 = vrcp.f32 %v3245_v14  ;;  %vm1557_vm2 = vweird.f32 %v3230_v6  ;;  %1821 = vmatpush.msra.mxu3 %v1736_v12  ;;  %vm1586_vm11 = vweird.f32 %v3245_v14 }
 0x8d8   : > { %v1567_v16 = vmul.f32 %v3241_v10, %v3168_v48  ;;  %vm1572_vm4 = vweird.f32 %v3241_v10  ;;  %vm3308_vm5 = vmor %vm1556_vm3, %vm1557_vm2  ;;  %2175 = vrcp.f32 %v3275_v30  ;;  %1801 = vmatpush.msra.mxu2 %v1720_v7  ;;  %v1605_v49 = vand.u32 2147483647, %v3275_v30 }
 0x8d9   : > { %v1553_v21 = vsub.f32 1.0, %v1552_v11  ;;  %vm3336_vm8 = vmor %vm1571_vm6, %vm1572_vm4  ;;  %v1590_v11 = vand.u32 2147483647, %v3245_v14  ;;  %1822 = vmatpush.msra.mxu3 %v1735_v17  ;;  %2177 = vpow2.f32 %v1655_v36  ;;  %vm1601_vm15 = vweird.f32 %v3275_v30 }
 0x8da   : > { %v1568_v27 = vsub.f32 1.0, %v1567_v16  ;;  %v1684_v16 = vld [vmem:[%s3484_s11 + $0x8] sm:$0xff]  ;;  %1802 = vmatpush.msra.mxu2 %v1719_v18  ;;  %vm1606_vm1 = vcmp.eq.f32.partialorder %v1605_v49, 8.507059e+37  ;;  %v1650_v12 = vsub.f32 0.0, %v3228_v5  ;;  %vm1531_vm2 = vcmp.ge.f32.partialorder %v3128_v28, 0.0 }
 0x8db   : > { %v1554_v32 = vmul.f32 %v3230_v6, %v1553_v21  ;;  %v1592_v21 = vand.u32 2147483648, %v3245_v14  ;;  %1765 = vmatpush.msra.mxu0 %v1684_v16  ;;  %vm3403_vm12 = vcmp.eq.f32.partialorder %v1590_v11, 8.507059e+37  ;;  %1823 = vmatpush.msra.mxu3 %v1734_v38  ;;  %vm1532_vm3 = vcmp.ge.f32.partialorder %v3131_v29, 0.0 }
 0x8dc   : > { %v1569_v40 = vmul.f32 %v3241_v10, %v1568_v27  ;;  %v1683_v27 = vld [vmem:[%s3484_s11] sm:$0xff]  ;;  %v1517_v49 = vmul.f32 0.5, %v3119_v25  ;;  %vm1533_vm4 = vcmp.ge.f32.partialorder %v3180_v53, 0.0 }
 0x8dd   : > { %v1555_v47 = vadd.f32 %v3230_v6, %v1554_v32  ;;  %v3328_v59 = vpop.eup %2173  ;;  %v1718_v32 = vld [vmem:[%s3484_s11 + $0x118] sm:$0xff]  ;;  %1766 = vmatpush.msra.mxu0 %v1683_v27  ;;  %1824 = vmatpush.msra.mxu3 %v1733_v45 }
 0x8de   : > { %v1570_v55 = vadd.f32 %v3241_v10, %v1569_v40  ;;  %v1582_v34 = vmul.f32 %v3328_v59, %v3245_v14  ;;  %v3377_v19 = vpop.eup %2175  ;;  %vm1587_vm10 = vweird.f32 %v3328_v59  ;;  %v1717_v14 = vld [vmem:[%s3484_s11 + $0x110] sm:$0xff]  ;;  %1803 = vmatpush.msra.mxu2 %v1718_v32 }
 0x8df   : > { %v1559_v48 = vsel %vm3308_vm5, %v3230_v6, %v1555_v47  ;;  %v1701_v6 = vld [vmem:[%s3484_s11 + $0x90] sm:$0xff]  ;;  %v1597_v26 = vmul.f32 %v3377_v19, %v3275_v30  ;;  %vm1588_vm13 = vmor %vm1586_vm11, %vm1587_vm10  ;;  %v1593_v47 = vor.u32 1.1754944e-38, %v1592_v21  ;;  %vm1602_vm14 = vweird.f32 %v3377_v19  ;;  %1825 = vmatpush.msra.mxu3 %v1732_v0 }
 0x8e0   : > { %v3343_v2 = vsel %vm1561_vm7, %v1563_v54, %v1559_v48  ;;  %v1574_v3 = vsel %vm3336_vm8, %v3241_v10, %v1570_v55  ;;  %v1652_v10 = vmul.f32 %v1648_v50, %v3143_v35  ;;  %v1583_v15 = vsub.f32 1.0, %v1582_v34  ;;  %1784 = vmatpush.msra.mxu1 %v1701_v6  ;;  %v1700_v35 = vld [vmem:[%s3484_s11 + $0x88] sm:$0xff]  ;;  %1804 = vmatpush.msra.mxu2 %v1717_v14  ;;  %vm1603_vm0 = vmor %vm1601_vm15, %vm1602_vm14 }
 0x8e1   : > { %v1611_v8 = vmul.f32 1.0614054, %v3343_v2  ;;  %v3360_v9 = vsel %vm1576_vm9, %v1578_v63, %v1574_v3  ;;  %v1598_v44 = vsub.f32 1.0, %v1597_v26  ;;  %v1607_v50 = vand.u32 2147483648, %v3275_v30  ;;  %v1731_v3 = vld [vmem:[%s3484_s11 + $0x180] sm:$0xff] }
 0x8e2   : > { %v1612_v13 = vmul.f32 1.0614054, %v3360_v9  ;;  %v1584_v22 = vmul.f32 %v3328_v59, %v1583_v15  ;;  %1785 = vmatpush.msra.mxu1 %v1700_v35  ;;  %v1657_v37 = vmul.f32 1.442695, %v1652_v10  ;;  %1805 = vmatpush.msra.mxu2 %v1716_v56  ;;  %v2178_v35 = vpop.eup %2177  ;;  %vm1534_vm5 = vcmp.ge.f32.partialorder %v3200_v58, 0.0 }
 0x8e3   : > { %v1615_v20 = vadd.f32 -1.4531521, %v1611_v8  ;;  %v1599_v55 = vmul.f32 %v3377_v19, %v1598_v44  ;;  %v1608_v4 = vor.u32 1.1754944e-38, %v1607_v50  ;;  %1826 = vmatpush.msra.mxu3 %v1731_v3 }
 0x8e4   : > { %v1616_v62 = vadd.f32 -1.4531521, %v1612_v13  ;;  %v1585_v40 = vadd.f32 %v3328_v59, %v1584_v22  ;;  %1786 = vmatpush.msra.mxu1 %v1699_v31  ;;  %2179 = vpow2.f32 %v1657_v37  ;;  %1806 = vmatpush.msra.mxu2 %v1715_v1 }
 0x8e5   : > { %v1619_v33 = vmul.f32 %v1615_v20, %v3343_v2  ;;  %v1600_v63 = vadd.f32 %v3377_v19, %v1599_v55 }
 0x8e6   : > { %v1620_v39 = vmul.f32 %v1616_v62, %v3360_v9  ;;  %v1589_v54 = vsel %vm1588_vm13, %v3328_v59, %v1585_v40  ;;  %v1649_v59 = vsub.f32 0.0, %v3209_v61 }
 0x8e7   : > { %v1623_v46 = vadd.f32 1.4214138, %v1619_v33  ;;  %v3429_v48 = vsel %vm3403_vm12, %v1593_v47, %v1589_v54  ;;  %v1604_v30 = vsel %vm1603_vm0, %v3377_v19, %v1600_v63  ;;  %v1516_v47 = vmul.f32 0.5, %v3117_v23 }
 0x8e8   : > { %v1624_v51 = vadd.f32 1.4214138, %v1620_v39  ;;  %v1613_v24 = vmul.f32 1.0614054, %v3429_v48  ;;  %v1653_v10 = vmul.f32 %v1649_v59, %v3209_v61  ;;  %v1609_v11 = vsel %vm1606_vm1, %v1608_v4, %v1604_v30 }
 0x8e9   : > { %v1627_v57 = vmul.f32 %v1623_v46, %v3343_v2  ;;  %v1614_v16 = vmul.f32 1.0614054, %v1609_v11  ;;  %v1654_v61 = vmul.f32 %v1650_v12, %v3228_v5 }
 0x8ea   : > { %v1628_v60 = vmul.f32 %v1624_v51, %v3360_v9  ;;  %v1617_v7 = vadd.f32 -1.4531521, %v1613_v24  ;;  %v2180_v17 = vpop.eup %2179  ;;  %v1659_v22 = vmul.f32 1.442695, %v1653_v10  ;;  %v2128_v10 = vld [vmem:[#allocation13] ss:$0 sm:$0xff] }
 0x8eb   : > { %v1631_v34 = vadd.f32 -0.28449672, %v1627_v57  ;;  %v1618_v19 = vadd.f32 -1.4531521, %v1614_v16  ;;  %v1661_v39 = vmul.f32 1.442695, %v1654_v61 }
 0x8ec   : > { %v1632_v6 = vadd.f32 -0.28449672, %v1628_v60  ;;  %v1621_v15 = vmul.f32 %v1617_v7, %v3429_v48  ;;  %2181 = vpow2.f32 %v1659_v22  ;;  %v1519_v7 = vmul.f32 0.5, %v3155_v43 }
 0x8ed   : > { %v1635_v8 = vmul.f32 %v1631_v34, %v3343_v2  ;;  %v1622_v31 = vmul.f32 %v1618_v19, %v1609_v11  ;;  %2183 = vpow2.f32 %v1661_v39 }
 0x8ee   : > { %v1636_v13 = vmul.f32 %v1632_v6, %v3360_v9  ;;  %v1625_v21 = vadd.f32 1.4214138, %v1621_v15 }
 0x8ef   : > { %v1639_v18 = vadd.f32 0.2548296, %v1635_v8  ;;  %v1626_v37 = vadd.f32 1.4214138, %v1622_v31 }
 0x8f0   : > { %v1640_v20 = vadd.f32 0.2548296, %v1636_v13  ;;  %v1629_v27 = vmul.f32 %v1625_v21, %v3429_v48 }
 0x8f1   : > { %v1643_v62 = vmul.f32 %v1639_v18, %v3343_v2  ;;  %v2472_v2 = vmov -1.0  }
 0x8f2   : > { %v1644_v26 = vmul.f32 %v1640_v20, %v3360_v9  ;;  %v1633_v36 = vadd.f32 -0.28449672, %v1629_v27  ;;  %v1535_v40 = vsel %vm1531_vm2, 1.0, %v2472_v2  ;;  %v1630_v9 = vmul.f32 %v1626_v37, %v1609_v11  ;;  %v2182_v55 = vpop.eup %2181 }
 0x8f3   : > { %v1663_v32 = vmul.f32 %v2178_v35, %v1643_v62  ;;  %v1536_v14 = vsel %vm1532_vm3, 1.0, %v2472_v2  ;;  %v2184_v23 = vpop.eup %2183  ;;  %v1537_v63 = vsel %vm1533_vm4, 1.0, %v2472_v2  ;;  %v1538_v4 = vsel %vm1534_vm5, 1.0, %v2472_v2 }
 0x8f4   : > { %v1664_v33 = vmul.f32 %v2180_v17, %v1644_v26  ;;  %v1637_v5 = vmul.f32 %v1633_v36, %v3429_v48  ;;  %v1634_v28 = vadd.f32 -0.28449672, %v1630_v9 }
 0x8f5   : > { %v1667_v38 = vsub.f32 1.0, %v1663_v32 }
 0x8f6   : > { %v1668_v41 = vsub.f32 1.0, %v1664_v33  ;;  %v1641_v46 = vadd.f32 0.2548296, %v1637_v5  ;;  %v1638_v54 = vmul.f32 %v1634_v28, %v1609_v11 }
 0x8f7   : > { %v1671_v44 = vmul.f32 %v1667_v38, %v1535_v40 }
 0x8f8   : > { %v1672_v45 = vmul.f32 %v1668_v41, %v1536_v14  ;;  %v1645_v51 = vmul.f32 %v1641_v46, %v3429_v48  ;;  %v1642_v59 = vadd.f32 0.2548296, %v1638_v54  ;;  %v1518_v48 = vmul.f32 0.5, %v3153_v42 }
 0x8f9   : > { %v1675_v29 = vadd.f32 1.0, %v1671_v44 }
 0x8fa   : > { %v1676_v50 = vadd.f32 1.0, %v1672_v45  ;;  %v1665_v57 = vmul.f32 %v2182_v55, %v1645_v51  ;;  %v1646_v24 = vmul.f32 %v1642_v59, %v1609_v11 }
 0x8fb   : > { %v1679_v56 = vmul.f32 %v1675_v29, %v1516_v47 }
 0x8fc   : > { %v1680_v0 = vmul.f32 %v1676_v50, %v1517_v49  ;;  %v1669_v60 = vsub.f32 1.0, %v1665_v57  ;;  %v1666_v25 = vmul.f32 %v2184_v23, %v1646_v24 }
 0x8fd   : > { %1767 = vmatmul.f32.vlgmr.msra.gmra.mxu0 %v1679_v56 }
 0x8fe   : > { %1787 = vmatmul.f32.vlgmr.msra.gmra.mxu1 %v1680_v0  ;;  %v1673_v1 = vmul.f32 %v1669_v60, %v1537_v63  ;;  %v1670_v34 = vsub.f32 1.0, %v1666_v25 }
 0x900   : > { %v1677_v3 = vadd.f32 1.0, %v1673_v1  ;;  %v1674_v53 = vmul.f32 %v1670_v34, %v1538_v4 }
 0x902   : > { %v1681_v6 = vmul.f32 %v1677_v3, %v1518_v48  ;;  %v1678_v30 = vadd.f32 1.0, %v1674_v53 }
 0x904   : > { %1807 = vmatmul.f32.vlgmr.msra.gmra.mxu2 %v1681_v6  ;;  %v1682_v8 = vmul.f32 %v1678_v30, %v1519_v7 }
 0x906   : > { %1827 = vmatmul.f32.vlgmr.msra.gmra.mxu3 %v1682_v8 }
 0x97a   : > { %v1768_v11 = vpop.f32.mrf.mxu0 }
 0x97b   : > { %v1769_v12 = vadd.f32 %v2128_v10, %v1768_v11  ;;  %v1788_v13 = vpop.f32.mrf.mxu1 }
 0x97d   : > { %v1789_v58 = vadd.f32 %v1788_v13, %v1769_v12 }
 0x987   : > { %v1808_v15 = vpop.f32.mrf.mxu2 }
 0x988   : > { %v1809_v16 = vadd.f32 %v1808_v15, %v1789_v58 }
 0x989   : > { %v1828_v42 = vpop.f32.mrf.mxu3 }
 0x98a   : > { %v1829_v35 = vadd.f32 %v1828_v42, %v1809_v16 }
 0x98c   : > { %v1831_v43 = vadd.f32 %v1829_v35, %v2912_v52 }
 0x98e   : > { %1832 = vst [vmem:[%s554_s18] sm:$0xf] %v1831_v43 }
 0x98f PF: > { %s28_s25 = sadd.s32 1, %s2451_s25  }
 0x990   : > { %p25_p7 = scmp.ge.s32.totalorder %s28_s25, 4  }
 0x992   :  { %27 = sbr.rel (!%p25_p7) target bundleno = 8 (0x8), region = 135 }
 0x997   :  { %1852 = vsyncpa [#allocation3], 1 }
 0x998   :  { %1854 = vsyncpa [#allocation3 + $0x1], 1 }
 0x999   :  { %1855 = vsyncpa [#allocation5], 1 }
 0x99a   :  { %1856 = vsyncpa [#allocation8], 1 }
 0x99b   :  { %1857 = vsyncpa [#allocation11], 1 }
 0x99c   :  { %1858 = vsyncpa [#allocation14], 1 }

// kernel: _lambda_.18
= control target key start
LH: loop header
LB: loop body
LE: loop exit
PB: predicated region body
PF: predicated region fallthrough
CT: control target
= control target key end

     0   :  { %s484_s12 = smov 0   ;;  %s656_s0 = inlined_call_operand.vmem [shape: f32[2,9,128], index: 0, kind: input, shape index: {}]   ;;  %s657_s1 = inlined_call_operand.vmem [shape: f32[3,128,32], index: 1, kind: input, shape index: {}]   ;;  %s658_s2 = inlined_call_operand.vmem [shape: f32[1,32], index: 2, kind: input, shape index: {}]   ;;  %s659_s3 = inlined_call_operand.vmem [shape: f32[2,8,64], index: 3, kind: output, shape index: {}]  }
   0x1 LB: > { %s394_s13 = sadd.s32 4294967295, %s461_s12   ;;  %p398_p0 = scmp.ge.s32.totalorder %s461_s12, 1  ;;  %s461_s12 = sphi %s484_s12, %s13_s12  }
   0x2   : > { %p137_p1 = scmp.lt.s32.totalorder %s461_s12, 3 }
   0x4   : > { %p138_p2 = pnand %p398_p0, %p137_p1 }
   0x5   : > { %p160_p3 = scmp.lt.s32.totalorder (!%p138_p2), %s394_s13, 1  ;;  %s463_s16 = smov (!%p138_p2), 32  }
   0x6   : > { %141 = sbr.rel (%p138_p2) target bundleno = 328 (0x148), region = 32 }
   0xb   : > { %v227_v0 = vld [vmem:[%s657_s1 + $0x78] sm:$0xff]  ;;  %v226_v1 = vld [vmem:[%s657_s1 + $0x70] sm:$0xff]  ;;  %v225_v4 = vld [vmem:[%s657_s1 + $0x68] sm:$0xff]  ;;  %s661_s13 = smov (!%p160_p3, %s394_s13), 1  ;;  %vm267_vm0 = vcmask 1046528   ;;  %vm337_vm9 = vcmask 261120  }
   0xc   : > { %272 = vmatpush.msra.mxu2 %v227_v0  ;;  %v433_v2 = vld [vmem:[%s657_s1 + $0x178] sm:$0xff]  ;;  %v432_v3 = vld [vmem:[%s657_s1 + $0x170] sm:$0xff]  ;;  %v431_v5 = vld [vmem:[%s657_s1 + $0x168] sm:$0xff]  ;;  %s436_s8 = sshll.u32 %s661_s13, 4  ;;  %s401_s17 = sshll.u32 %s661_s13, 3  ;;  %vm339_vm10 = vcmask 523264  }
   0xd   : > { %245 = vmatpush.msra.mxu1 %v433_v2  ;;  %v224_v6 = vld [vmem:[%s657_s1 + $0x60] sm:$0xff]  ;;  %v223_v8 = vld [vmem:[%s657_s1 + $0x58] sm:$0xff]  ;;  %v222_v10 = vld [vmem:[%s657_s1 + $0x50] sm:$0xff]  ;;  %s164_s21 = scalar_lea.vmem %s656_s0, %s436_s8  ;;  %s168_s20 = scalar_lea.vmem %s659_s3, %s401_s17 }
   0xe   : > { %273 = vmatpush.msra.mxu2 %v226_v1  ;;  %v430_v7 = vld [vmem:[%s657_s1 + $0x160] sm:$0xff]  ;;  %v429_v9 = vld [vmem:[%s657_s1 + $0x158] sm:$0xff]  ;;  %v428_v11 = vld [vmem:[%s657_s1 + $0x150] sm:$0xff] }
   0xf   : > { %246 = vmatpush.msra.mxu1 %v432_v3  ;;  %v221_v12 = vld [vmem:[%s657_s1 + $0x48] sm:$0xff]  ;;  %v417_v14 = vld [vmem:[%s657_s1 + $0xf8] sm:$0xff]  ;;  %v416_v15 = vld [vmem:[%s657_s1 + $0xf0] sm:$0xff] }
  0x10   : > { %274 = vmatpush.msra.mxu2 %v225_v4  ;;  %v427_v13 = vld [vmem:[%s657_s1 + $0x148] sm:$0xff]  ;;  %v220_v16 = vld [vmem:[%s657_s1 + $0x40] sm:$0xff]  ;;  %192 = vmatpush.msra.mxu0 %v417_v14  ;;  %v219_v19 = vld [vmem:[%s657_s1 + $0x38] sm:$0xff] }
  0x11   : > { %247 = vmatpush.msra.mxu1 %v431_v5  ;;  %v426_v17 = vld [vmem:[%s657_s1 + $0x140] sm:$0xff]  ;;  %v415_v18 = vld [vmem:[%s657_s1 + $0xe8] sm:$0xff]  ;;  %v425_v20 = vld [vmem:[%s657_s1 + $0x138] sm:$0xff] }
  0x12   : > { %275 = vmatpush.msra.mxu2 %v224_v6  ;;  %193 = vmatpush.msra.mxu0 %v416_v15  ;;  %v414_v21 = vld [vmem:[%s657_s1 + $0xe0] sm:$0xff]  ;;  %v218_v22 = vld [vmem:[%s657_s1 + $0x30] sm:$0xff]  ;;  %v413_v24 = vld [vmem:[%s657_s1 + $0xd8] sm:$0xff] }
  0x13   : > { %248 = vmatpush.msra.mxu1 %v430_v7  ;;  %v424_v23 = vld [vmem:[%s657_s1 + $0x130] sm:$0xff]  ;;  %v217_v25 = vld [vmem:[%s657_s1 + $0x28] sm:$0xff]  ;;  %v216_v28 = vld [vmem:[%s657_s1 + $0x20] sm:$0xff] }
  0x14   : > { %276 = vmatpush.msra.mxu2 %v223_v8  ;;  %194 = vmatpush.msra.mxu0 %v415_v18  ;;  %v423_v26 = vld [vmem:[%s657_s1 + $0x128] sm:$0xff]  ;;  %v412_v27 = vld [vmem:[%s657_s1 + $0xd0] sm:$0xff]  ;;  %v422_v29 = vld [vmem:[%s657_s1 + $0x120] sm:$0xff] }
  0x15   : > { %249 = vmatpush.msra.mxu1 %v429_v9  ;;  %v411_v30 = vld [vmem:[%s657_s1 + $0xc8] sm:$0xff]  ;;  %v215_v31 = vld [vmem:[%s657_s1 + $0x18] sm:$0xff]  ;;  %v169_v32 = vld [vmem:[%s164_s21] sm:$0xff] }
  0x16   : > { %277 = vmatpush.msra.mxu2 %v222_v10  ;;  %195 = vmatpush.msra.mxu0 %v414_v21  ;;  %v170_v33 = vld [vmem:[%s164_s21 + $0x8] sm:$0x1]  ;;  %v421_v34 = vld [vmem:[%s657_s1 + $0x118] sm:$0xff]  ;;  %v410_v35 = vld [vmem:[%s657_s1 + $0xc0] sm:$0xff]  ;;  %v268_v37 = vrot.slane %v169_v32, 1 }
  0x17   : > { %250 = vmatpush.msra.mxu1 %v428_v11  ;;  %v214_v36 = vld [vmem:[%s657_s1 + $0x10] sm:$0xff]  ;;  %v269_v38 = vrot.slane %v170_v33, 1  ;;  %v409_v40 = vld [vmem:[%s657_s1 + $0xb8] sm:$0xff]  ;;  %v213_v41 = vld [vmem:[%s657_s1 + $0x8] sm:$0xff] }
  0x18   : > { %278 = vmatpush.msra.mxu2 %v221_v12  ;;  %196 = vmatpush.msra.mxu0 %v413_v24  ;;  %v420_v39 = vld [vmem:[%s657_s1 + $0x110] sm:$0xff]  ;;  %v419_v42 = vld [vmem:[%s657_s1 + $0x108] sm:$0xff]  ;;  %v212_v44 = vld [vmem:[%s657_s1] sm:$0xff] }
  0x19   : > { %251 = vmatpush.msra.mxu1 %v427_v13  ;;  %v408_v43 = vld [vmem:[%s657_s1 + $0xb0] sm:$0xff]  ;;  %v270_v45 = vsel %vm267_vm0, %v268_v37, %v269_v38  ;;  %v418_v46 = vld [vmem:[%s657_s1 + $0x100] sm:$0xff]  ;;  %v407_v47 = vld [vmem:[%s657_s1 + $0xa8] sm:$0xff] }
  0x1a   : > { %279 = vmatpush.msra.mxu2 %v220_v16  ;;  %197 = vmatpush.msra.mxu0 %v412_v27  ;;  %v406_v48 = vld [vmem:[%s657_s1 + $0xa0] sm:$0xff]  ;;  %v405_v49 = vld [vmem:[%s657_s1 + $0x98] sm:$0xff]  ;;  %v404_v50 = vld [vmem:[%s657_s1 + $0x90] sm:$0xff] }
  0x1b   : > { %252 = vmatpush.msra.mxu1 %v426_v17  ;;  %v403_v51 = vld [vmem:[%s657_s1 + $0x88] sm:$0xff]  ;;  %v402_v52 = vld [vmem:[%s657_s1 + $0x80] sm:$0xff] }
  0x1c   : > { %280 = vmatpush.msra.mxu2 %v219_v19  ;;  %198 = vmatpush.msra.mxu0 %v411_v30  ;;  %v446_v54 = vld [vmem:[%s658_s2] ss:$0 sm:$0xff] }
  0x1d   : > { %253 = vmatpush.msra.mxu1 %v425_v20 }
  0x1e   : > { %281 = vmatpush.msra.mxu2 %v218_v22  ;;  %199 = vmatpush.msra.mxu0 %v410_v35 }
  0x1f   : > { %254 = vmatpush.msra.mxu1 %v424_v23 }
  0x20   : > { %282 = vmatpush.msra.mxu2 %v217_v25  ;;  %200 = vmatpush.msra.mxu0 %v409_v40 }
  0x21   : > { %255 = vmatpush.msra.mxu1 %v423_v26 }
  0x22   : > { %283 = vmatpush.msra.mxu2 %v216_v28  ;;  %201 = vmatpush.msra.mxu0 %v408_v43 }
  0x23   : > { %256 = vmatpush.msra.mxu1 %v422_v29 }
  0x24   : > { %284 = vmatpush.msra.mxu2 %v215_v31  ;;  %202 = vmatpush.msra.mxu0 %v407_v47 }
  0x25   : > { %257 = vmatpush.msra.mxu1 %v421_v34 }
  0x26   : > { %285 = vmatpush.msra.mxu2 %v214_v36  ;;  %203 = vmatpush.msra.mxu0 %v406_v48 }
  0x27   : > { %258 = vmatpush.msra.mxu1 %v420_v39 }
  0x28   : > { %286 = vmatpush.msra.mxu2 %v213_v41  ;;  %204 = vmatpush.msra.mxu0 %v405_v49 }
  0x29   : > { %259 = vmatpush.msra.mxu1 %v419_v42 }
  0x2a   : > { %287 = vmatpush.msra.mxu2 %v212_v44  ;;  %205 = vmatpush.msra.mxu0 %v404_v50 }
  0x2b   : > { %288 = vmatmul.f32.vlgmr.msra.gmra.mxu2 %v270_v45  ;;  %260 = vmatpush.msra.mxu1 %v418_v46 }
  0x2c   : > { %261 = vmatmul.f32.vlgmr.msra.gmra.mxu1 %v169_v32  ;;  %206 = vmatpush.msra.mxu0 %v403_v51 }
  0x2e   : > { %207 = vmatpush.msra.mxu0 %v402_v52 }
  0x2f   : > { %208 = vmatmul.f32.vlgmr.msra.gmra.mxu0 %v169_v32 }
  0xa9   : > { %v262_v53 = vpop.f32.mrf.mxu1 }
  0xac   : > { %v209_v9 = vpop.f32.mrf.mxu0 }
  0xad   : > { %v210_v10 = vadd.f32 %v446_v54, %v209_v9 }
  0xae   : > { %v289_v55 = vpop.f32.mrf.mxu2 }
  0xaf   : > { %v290_v56 = vadd.f32 %v289_v55, %v262_v53  ;;  %v293_v11 = vsub.f32 0.0, %v210_v10 }
  0xb1   : > { %v292_v57 = vadd.f32 %v446_v54, %v290_v56  ;;  %v294_v12 = vmul.f32 1.442695, %v293_v11 }
  0xb3   : > { %v313_v58 = vsub.f32 0.0, %v292_v57 }
  0xb5   : > { %v314_v59 = vmul.f32 1.442695, %v313_v58 }
  0xb7   : > { %447 = vpow2.f32 %v314_v59 }
  0xbd   : > { %v448_v60 = vpop.eup %447 }
  0xbe   : > { %v316_v61 = vadd.f32 1.0, %v448_v60 }
  0xc0   : > { %449 = vrcp.f32 %v316_v61  ;;  %v328_v1 = vand.u32 2147483648, %v316_v61  ;;  %v326_v3 = vand.u32 2147483647, %v316_v61  ;;  %vm322_vm2 = vweird.f32 %v316_v61 }
  0xc1   : > { %451 = vpow2.f32 %v294_v12 }
  0xc2   : > { %v329_v5 = vor.u32 1.1754944e-38, %v328_v1  ;;  %vm327_vm4 = vcmp.eq.f32.partialorder %v326_v3, 8.507059e+37 }
  0xc6   : > { %v450_v62 = vpop.eup %449 }
  0xc7   : > { %v318_v63 = vmul.f32 %v450_v62, %v316_v61  ;;  %vm323_vm1 = vweird.f32 %v450_v62  ;;  %v452_v13 = vpop.eup %451 }
  0xc8   : > { %vm324_vm3 = vmor %vm322_vm2, %vm323_vm1  ;;  %v296_v14 = vadd.f32 1.0, %v452_v13 }
  0xc9   : > { %v319_v0 = vsub.f32 1.0, %v318_v63 }
  0xca   : > { %453 = vrcp.f32 %v296_v14  ;;  %vm302_vm5 = vweird.f32 %v296_v14  ;;  %v308_v19 = vand.u32 2147483648, %v296_v14  ;;  %v306_v21 = vand.u32 2147483647, %v296_v14 }
  0xcb   : > { %v320_v2 = vmul.f32 %v450_v62, %v319_v0 }
  0xcc   : > { %v309_v22 = vor.u32 1.1754944e-38, %v308_v19  ;;  %vm307_vm8 = vcmp.eq.f32.partialorder %v306_v21, 8.507059e+37 }
  0xcd   : > { %v321_v4 = vadd.f32 %v450_v62, %v320_v2 }
  0xcf   : > { %v325_v6 = vsel %vm324_vm3, %v450_v62, %v321_v4 }
  0xd0   : > { %v330_v7 = vsel %vm327_vm4, %v329_v5, %v325_v6  ;;  %v454_v15 = vpop.eup %453 }
  0xd1   : > { %v332_v8 = vmul.f32 %v330_v7, %v292_v57  ;;  %v298_v16 = vmul.f32 %v454_v15, %v296_v14  ;;  %vm303_vm6 = vweird.f32 %v454_v15 }
  0xd2   : > { %vm304_vm7 = vmor %vm302_vm5, %vm303_vm6 }
  0xd3   : > { %334 = vrot.lane.b32.xlu0 %v332_v8, %s463_s16  ;;  %v299_v17 = vsub.f32 1.0, %v298_v16 }
  0xd5   : > { %v300_v18 = vmul.f32 %v454_v15, %v299_v17 }
  0xd7   : > { %v301_v20 = vadd.f32 %v454_v15, %v300_v18 }
  0xd9   : > { %v305_v23 = vsel %vm304_vm7, %v454_v15, %v301_v20 }
  0xda   : > { %v310_v24 = vsel %vm307_vm8, %v309_v22, %v305_v23 }
  0xdb   : > { %v312_v25 = vmul.f32 %v310_v24, %v210_v10 }
 0x145   : > { %v335_v26 = vpop.permute.xlu0 %334 }
 0x146   : > { %v338_v27 = vsel %vm337_vm9, %v312_v25, %v335_v26 }
 0x147   : > { %340 = vst.msk [vmem:[%s168_s20] sm:$0xff] %vm339_vm10, %v338_v27 }
 0x148 PF: > { %s13_s12 = sadd.s32 1, %s461_s12  }
 0x149   : > { %p10_p4 = scmp.ge.s32.totalorder %s13_s12, 4  }
 0x14b   :  { %12 = sbr.rel (!%p10_p4) target bundleno = 1 (0x1), region = 64 }

// kernel: _lambda_.16
= control target key start
LH: loop header
LB: loop body
LE: loop exit
PB: predicated region body
PF: predicated region fallthrough
CT: control target
= control target key end

     0   :  { %s1976_s25 = smov 0   ;;  %s2896_s0 = inlined_call_operand.vmem [shape: f32[2,4,128], index: 0, kind: input, shape index: {}]   ;;  %s2897_s1 = inlined_call_operand.vmem [shape: f32[1,128], index: 1, kind: input, shape index: {}]   ;;  %s2898_s2 = inlined_call_operand.vmem [shape: f32[1,128], index: 2, kind: input, shape index: {}]   ;;  %s2899_s3 = inlined_call_operand.vmem [shape: f32[128,384], index: 3, kind: input, shape index: {}]   ;;  %s2900_s4 = inlined_call_operand.vmem [shape: f32[1,384], index: 4, kind: input, shape index: {}]   ;;  %s2901_s5 = inlined_call_operand.vmem [shape: f32[128,128], index: 5, kind: input, shape index: {}]   ;;  %s2902_s6 = inlined_call_operand.vmem [shape: f32[1,128], index: 6, kind: input, shape index: {}]   ;;  %s2903_s7 = inlined_call_operand.vmem [shape: f32[1,128], index: 7, kind: input, shape index: {}]   ;;  %s2904_s8 = inlined_call_operand.vmem [shape: f32[1,128], index: 8, kind: input, shape index: {}]   ;;  %s2905_s9 = inlined_call_operand.vmem [shape: f32[128,512], index: 9, kind: input, shape index: {}]   ;;  %s2906_s10 = inlined_call_operand.vmem [shape: f32[1,512], index: 10, kind: input, shape index: {}]   ;;  %s2907_s11 = inlined_call_operand.vmem [shape: f32[512,128], index: 11, kind: input, shape index: {}]   ;;  %s2908_s12 = inlined_call_operand.vmem [shape: f32[1,128], index: 12, kind: input, shape index: {}]   ;;  %s2909_s13 = inlined_call_operand.vmem [shape: f32[2,4,128], index: 13, kind: output, shape index: {}]  }
   0x1 LB: > { %s1767_s26 = sadd.s32 4294967295, %s1894_s25   ;;  %p1771_p0 = scmp.ge.s32.totalorder %s1894_s25, 1  ;;  %s1894_s25 = sphi %s1976_s25, %s23_s25  }
   0x2   : > { %p386_p1 = scmp.lt.s32.totalorder %s1894_s25, 3 }
   0x4   : > { %p387_p2 = pnand %p1771_p0, %p386_p1 }
   0x5   : > { %p428_p3 = scmp.lt.s32.totalorder (!%p387_p2), %s1767_s26, 1  ;;  %s1897_s18 = smov (!%p387_p2), 80  }
   0x6   : > { %390 = sbr.rel (%p387_p2) target bundleno = 2410 (0x96a), region = 72  ;;  %s1898_s19 = smov (!%p387_p2), 112  }
   0x7   : > { %s1899_s20 = smov (!%p387_p2), 64   ;;  %s1900_s21 = smov (!%p387_p2), 96  }
   0x8   : > { %s1901_s22 = smov (!%p387_p2), 48   ;;  %s1902_s23 = smov (!%p387_p2), 32  }
   0x9   : > { %s1903_s24 = smov (!%p387_p2), 16  }
   0xb   : > { %s2917_s26 = smov (!%p428_p3, %s1767_s26), 1  ;;  %vm439_vm0 = vcmask 1043456   ;;  %v1896_v2 = vmov 128.0   ;;  %v522_v3 = vld [vmem:[%s2899_s3 + $0x168] sm:$0xff]  ;;  %v523_v4 = vld [vmem:[%s2899_s3 + $0x170] sm:$0xff]  ;;  %v524_v5 = vld [vmem:[%s2899_s3 + $0x178] sm:$0xff] }
   0xc   : > { %s1772_s27 = sshll.u32 %s2917_s26, 2  ;;  %1832 = vrcp.f32 %v1896_v2  ;;  %533 = vmatpush.msra.mxu0 %v522_v3  ;;  %553 = vmatpush.msra.mxu1 %v523_v4  ;;  %v519_v6 = vld [vmem:[%s2899_s3 + $0x150] sm:$0xff]  ;;  %v520_v7 = vld [vmem:[%s2899_s3 + $0x158] sm:$0xff]  ;;  %v521_v8 = vld [vmem:[%s2899_s3 + $0x160] sm:$0xff]  ;;  %vm593_vm5 = vcmask 130048   ;;  %vm621_vm6 = vcmask 27648  }
   0xd   : > { %s431_s30 = scalar_lea.vmem %s2896_s0, %s1772_s27  ;;  %573 = vmatpush.msra.mxu2 %v524_v5  ;;  %v516_v20 = vld [vmem:[%s2899_s3 + $0x138] sm:$0xff]  ;;  %v517_v21 = vld [vmem:[%s2899_s3 + $0x140] sm:$0xff]  ;;  %v518_v22 = vld [vmem:[%s2899_s3 + $0x148] sm:$0xff]  ;;  %vm633_vm7 = vcmask 31744   ;;  %vm1158_vm8 = vcmask 261120   ;;  %vm1160_vm9 = vcmask 392192   ;;  %s435_s17 = scalar_lea.vmem %s2909_s13, %s1772_s27 }
   0xe   : > { %v1992_v0 = vld [vmem:[%s431_s30] sm:$0xf]  ;;  %534 = vmatpush.msra.mxu0 %v519_v6  ;;  %554 = vmatpush.msra.mxu1 %v520_v7  ;;  %v514_v24 = vld [vmem:[%s2899_s3 + $0x128] sm:$0xff]  ;;  %v515_v25 = vld [vmem:[%s2899_s3 + $0x130] sm:$0xff]  ;;  %vm1162_vm10 = vcmask 523264   ;;  %vm1164_vm11 = vcmask 654336  }
   0xf   : > { %v440_v1 = vsel %vm439_vm0, %v1992_v0, 0.0  ;;  %574 = vmatpush.msra.mxu2 %v521_v8  ;;  %v513_v23 = vld [vmem:[%s2899_s3 + $0x120] sm:$0xff]  ;;  %v510_v26 = vld [vmem:[%s2899_s3 + $0x108] sm:$0xff]  ;;  %v511_v27 = vld [vmem:[%s2899_s3 + $0x110] sm:$0xff]  ;;  %vm1166_vm12 = vcmask 785408   ;;  %vm1168_vm13 = vcmask 916480  }
  0x10   : > { %441 = vadd.xlane.f32.xlu0 %v440_v1  ;;  %535 = vmatpush.msra.mxu0 %v516_v20  ;;  %v512_v28 = vld [vmem:[%s2899_s3 + $0x118] sm:$0xff]  ;;  %v507_v29 = vld [vmem:[%s2899_s3 + $0xf0] sm:$0xff]  ;;  %v509_v31 = vld [vmem:[%s2899_s3 + $0x100] sm:$0xff] }
  0x11   : > { %555 = vmatpush.msra.mxu1 %v517_v21  ;;  %575 = vmatpush.msra.mxu2 %v518_v22  ;;  %v508_v30 = vld [vmem:[%s2899_s3 + $0xf8] sm:$0xff]  ;;  %v505_v33 = vld [vmem:[%s2899_s3 + $0xe0] sm:$0xff]  ;;  %v506_v34 = vld [vmem:[%s2899_s3 + $0xe8] sm:$0xff] }
  0x12   : > { %v1833_v9 = vpop.eup %1832  ;;  %536 = vmatpush.msra.mxu0 %v513_v23  ;;  %v504_v32 = vld [vmem:[%s2899_s3 + $0xd8] sm:$0xff]  ;;  %v501_v35 = vld [vmem:[%s2899_s3 + $0xc0] sm:$0xff]  ;;  %v502_v36 = vld [vmem:[%s2899_s3 + $0xc8] sm:$0xff] }
  0x13   : > { %v444_v10 = vmul.f32 128.0, %v1833_v9  ;;  %vm448_vm1 = vweird.f32 %v1833_v9  ;;  %556 = vmatpush.msra.mxu1 %v514_v24  ;;  %576 = vmatpush.msra.mxu2 %v515_v25  ;;  %v503_v37 = vld [vmem:[%s2899_s3 + $0xd0] sm:$0xff]  ;;  %v498_v38 = vld [vmem:[%s2899_s3 + $0xa8] sm:$0xff]  ;;  %v500_v40 = vld [vmem:[%s2899_s3 + $0xb8] sm:$0xff] }
  0x14   : > { %537 = vmatpush.msra.mxu0 %v510_v26  ;;  %v499_v39 = vld [vmem:[%s2899_s3 + $0xb0] sm:$0xff]  ;;  %v496_v42 = vld [vmem:[%s2899_s3 + $0x98] sm:$0xff]  ;;  %v497_v43 = vld [vmem:[%s2899_s3 + $0xa0] sm:$0xff] }
  0x15   : > { %v445_v11 = vsub.f32 1.0, %v444_v10  ;;  %557 = vmatpush.msra.mxu1 %v511_v27  ;;  %577 = vmatpush.msra.mxu2 %v512_v28  ;;  %v495_v41 = vld [vmem:[%s2899_s3 + $0x90] sm:$0xff]  ;;  %v492_v44 = vld [vmem:[%s2899_s3 + $0x78] sm:$0xff]  ;;  %v493_v45 = vld [vmem:[%s2899_s3 + $0x80] sm:$0xff] }
  0x16   : > { %538 = vmatpush.msra.mxu0 %v507_v29  ;;  %v494_v46 = vld [vmem:[%s2899_s3 + $0x88] sm:$0xff]  ;;  %v489_v47 = vld [vmem:[%s2899_s3 + $0x60] sm:$0xff]  ;;  %v491_v49 = vld [vmem:[%s2899_s3 + $0x70] sm:$0xff] }
  0x17   : > { %v446_v12 = vmul.f32 %v1833_v9, %v445_v11  ;;  %558 = vmatpush.msra.mxu1 %v508_v30  ;;  %578 = vmatpush.msra.mxu2 %v509_v31  ;;  %v490_v48 = vld [vmem:[%s2899_s3 + $0x68] sm:$0xff]  ;;  %v487_v51 = vld [vmem:[%s2899_s3 + $0x50] sm:$0xff]  ;;  %v488_v52 = vld [vmem:[%s2899_s3 + $0x58] sm:$0xff] }
  0x18   : > { %539 = vmatpush.msra.mxu0 %v504_v32  ;;  %v486_v50 = vld [vmem:[%s2899_s3 + $0x48] sm:$0xff]  ;;  %v483_v53 = vld [vmem:[%s2899_s3 + $0x30] sm:$0xff]  ;;  %v484_v54 = vld [vmem:[%s2899_s3 + $0x38] sm:$0xff] }
  0x19   : > { %v447_v13 = vadd.f32 %v1833_v9, %v446_v12  ;;  %559 = vmatpush.msra.mxu1 %v505_v33  ;;  %579 = vmatpush.msra.mxu2 %v506_v34  ;;  %v485_v55 = vld [vmem:[%s2899_s3 + $0x40] sm:$0xff]  ;;  %v480_v56 = vld [vmem:[%s2899_s3 + $0x18] sm:$0xff]  ;;  %v482_v58 = vld [vmem:[%s2899_s3 + $0x28] sm:$0xff] }
  0x1a   : > { %540 = vmatpush.msra.mxu0 %v501_v35  ;;  %v481_v57 = vld [vmem:[%s2899_s3 + $0x20] sm:$0xff]  ;;  %v478_v60 = vld [vmem:[%s2899_s3 + $0x8] sm:$0xff]  ;;  %v479_v61 = vld [vmem:[%s2899_s3 + $0x10] sm:$0xff] }
  0x1b   : > { %v2014_v14 = vsel %vm448_vm1, %v1833_v9, %v447_v13  ;;  %560 = vmatpush.msra.mxu1 %v502_v36  ;;  %580 = vmatpush.msra.mxu2 %v503_v37  ;;  %v477_v59 = vld [vmem:[%s2899_s3] sm:$0xff] }
  0x1c   : > { %541 = vmatpush.msra.mxu0 %v498_v38  ;;  %v1826_v8 = vld [vmem:[%s2897_s1] ss:$0 sm:$0xff] }
  0x1d   : > { %561 = vmatpush.msra.mxu1 %v499_v39  ;;  %581 = vmatpush.msra.mxu2 %v500_v40  ;;  %v1827_v11 = vld [vmem:[%s2898_s2] ss:$0 sm:$0xff] }
  0x1e   : > { %542 = vmatpush.msra.mxu0 %v495_v41 }
  0x1f   : > { %562 = vmatpush.msra.mxu1 %v496_v42  ;;  %582 = vmatpush.msra.mxu2 %v497_v43 }
  0x20   : > { %543 = vmatpush.msra.mxu0 %v492_v44 }
  0x21   : > { %563 = vmatpush.msra.mxu1 %v493_v45  ;;  %583 = vmatpush.msra.mxu2 %v494_v46 }
  0x22   : > { %544 = vmatpush.msra.mxu0 %v489_v47 }
  0x23   : > { %564 = vmatpush.msra.mxu1 %v490_v48  ;;  %584 = vmatpush.msra.mxu2 %v491_v49 }
  0x24   : > { %545 = vmatpush.msra.mxu0 %v486_v50 }
  0x25   : > { %565 = vmatpush.msra.mxu1 %v487_v51  ;;  %585 = vmatpush.msra.mxu2 %v488_v52 }
  0x26   : > { %546 = vmatpush.msra.mxu0 %v483_v53 }
  0x27   : > { %566 = vmatpush.msra.mxu1 %v484_v54  ;;  %586 = vmatpush.msra.mxu2 %v485_v55 }
  0x28   : > { %547 = vmatpush.msra.mxu0 %v480_v56 }
  0x29   : > { %567 = vmatpush.msra.mxu1 %v481_v57  ;;  %587 = vmatpush.msra.mxu2 %v482_v58 }
  0x2a   : > { %548 = vmatpush.msra.mxu0 %v477_v59 }
  0x2b   : > { %568 = vmatpush.msra.mxu1 %v478_v60  ;;  %588 = vmatpush.msra.mxu2 %v479_v61 }
  0x83   : > { %v442_v15 = vpop.xlane.xlu0 %441 }
  0x84   : > { %v450_v16 = vmul.f32 %v2014_v14, %v442_v15  ;;  %v525_v15 = vld [vmem:[%s2900_s4] sm:$0x7] }
  0x85   : > { %v529_v21 = vperm.slane %v525_v15, 2 }
  0x86   : > { %v2018_v17 = vsub.f32 %v1992_v0, %v450_v16  ;;  %v528_v16 = vperm.slane %v525_v15, 1 }
  0x88   : > { %v452_v18 = vmul.f32 %v2018_v17, %v2018_v17 }
  0x8a   : > { %v453_v19 = vsel %vm439_vm0, %v452_v18, 0.0 }
  0x8b   : > { %454 = vadd.xlane.f32.xlu0 %v453_v19  ;;  %v527_v19 = vperm.slane %v525_v15, 0 }
  0xfe   : > { %v455_v62 = vpop.xlane.xlu0 %454 }
  0xff   : > { %v456_v63 = vmul.f32 %v455_v62, %v2014_v14 }
 0x101   : > { %v457_v1 = vadd.f32 1e-05, %v456_v63 }
 0x103   : > { %1834 = vrsqrt.f32 %v457_v1  ;;  %vm464_vm3 = vweird.f32 %v457_v1 }
 0x109   : > { %v1835_v2 = vpop.eup %1834 }
 0x10a   : > { %v459_v3 = vmul.f32 %v1835_v2, %v457_v1  ;;  %vm465_vm2 = vweird.f32 %v1835_v2 }
 0x10b   : > { %vm466_vm4 = vmor %vm464_vm3, %vm465_vm2 }
 0x10c   : > { %v460_v4 = vmul.f32 %v1835_v2, %v459_v3 }
 0x10e   : > { %v461_v5 = vmul.f32 0.5, %v460_v4 }
 0x110   : > { %v462_v6 = vsub.f32 1.5, %v461_v5 }
 0x112   : > { %v463_v7 = vmul.f32 %v1835_v2, %v462_v6 }
 0x114   : > { %v467_v9 = vsel %vm466_vm4, %v1835_v2, %v463_v7 }
 0x115   : > { %v468_v10 = vmul.f32 %v467_v9, %v2018_v17 }
 0x117   : > { %v472_v12 = vmul.f32 %v1826_v8, %v468_v10 }
 0x119   : > { %v476_v13 = vadd.f32 %v1827_v11, %v472_v12 }
 0x11b   : > { %549 = vmatmul.f32.vlgmr.msra.gmra.mxu0 %v476_v13  ;;  %569 = vmatmul.f32.vlgmr.msra.gmra.mxu1 %v476_v13 }
 0x11c   : > { %589 = vmatmul.f32.vlgmr.msra.gmra.mxu2 %v476_v13 }
 0x198   : > { %v570_v18 = vpop.f32.mrf.mxu1  ;;  %v550_v17 = vpop.f32.mrf.mxu0 }
 0x199   : > { %v2160_v20 = vadd.f32 %v570_v18, %v528_v16  ;;  %v551_v22 = vadd.f32 %v550_v17, %v527_v19 }
 0x19b   : > { %796 = vrot.lane.b32.xlu2 %v2160_v20, %s1897_s18  ;;  %662 = vrot.lane.b32.xlu1 %v2160_v20, %s1898_s19 }
 0x19c   : > { %1774 = vmatpush.xpose.msk.msrb.mxu0 %vm593_vm5, %v2160_v20 }
 0x19f   : > { %v590_v23 = vpop.f32.mrf.mxu2  ;;  %1775 = vmatmul.msk.f32.vlgmr.msrb.gmra.mxu0 %vm593_vm5, %v551_v22 }
 0x1a0   : > { %v2169_v24 = vadd.f32 %v590_v23, %v529_v21 }
 0x1a2   : > { %700 = vrot.lane.b32.xlu0 %v2169_v24, %s1898_s19  ;;  %1776 = vmatpush.msk.msrb.mxu2 %vm439_vm0, %v2169_v24 }
 0x1a3   : > { %660 = vrot.lane.b32.xlu1 %v551_v22, %s1898_s19 }
 0x1aa   : > { %863 = vrot.lane.b32.xlu0 %v2160_v20, %s1899_s20 }
 0x1ab   : > { %729 = vrot.lane.b32.xlu1 %v2160_v20, %s1900_s21 }
 0x1b2   : > { %928 = vrot.lane.b32.xlu0 %v551_v22, %s1901_s22 }
 0x1b3   : > { %727 = vrot.lane.b32.xlu1 %v551_v22, %s1900_s21 }
 0x1ba   : > { %995 = vrot.lane.b32.xlu0 %v551_v22, %s1902_s23 }
 0x1bb   : > { %794 = vrot.lane.b32.xlu1 %v551_v22, %s1897_s18 }
 0x1c3   : > { %930 = vrot.lane.b32.xlu1 %v2160_v20, %s1901_s22 }
 0x1cb   : > { %997 = vrot.lane.b32.xlu1 %v2160_v20, %s1902_s23 }
 0x1d3   : > { %1062 = vrot.lane.b32.xlu1 %v551_v22, %s1903_s24 }
 0x1f5   : > { %v797_v26 = vpop.permute.xlu2 %796 }
 0x20d   : > { %v663_v25 = vpop.permute.xlu1 %662 }
 0x20e   : > { %1778 = vmatpush.xpose.msk.msrb.mxu1 %vm593_vm5, %v663_v25 }
 0x212   : > { %1786 = vmatpush.xpose.msk.msra.mxu1 %vm593_vm5, %v797_v26 }
 0x214   : > { %v701_v27 = vpop.permute.xlu0 %700 }
 0x215   : > { %1780 = vmatpush.msk.msra.mxu3 %vm439_vm0, %v701_v27  ;;  %v661_v28 = vpop.permute.xlu1 %660 }
 0x216   : > { %1779 = vmatmul.msk.f32.vlgmr.msrb.gmra.mxu1 %vm593_vm5, %v661_v28 }
 0x21c   : > { %v864_v32 = vpop.permute.xlu0 %863  ;;  %v617_v46 = vpop.f32.mrf.mxu0 }
 0x21d   : > { %v730_v29 = vpop.permute.xlu1 %729  ;;  %v620_v47 = vmul.f32 0.25, %v617_v46 }
 0x21e   : > { %1782 = vmatpush.xpose.msk.msrb.mxu3 %vm593_vm5, %v730_v29 }
 0x21f   : > { %v622_v48 = vsel %vm621_vm6, %v620_v47, -inf }
 0x224   : > { %v929_v34 = vpop.permute.xlu0 %928 }
 0x225   : > { %v728_v30 = vpop.permute.xlu1 %727 }
 0x22c   : > { %v996_v59 = vpop.permute.xlu0 %995 }
 0x22d   : > { %v795_v31 = vpop.permute.xlu1 %794 }
 0x22e   : > { %1787 = vmatmul.msk.f32.vlgmr.msra.gmra.mxu1 %vm593_vm5, %v795_v31 }
 0x235   : > { %v931_v33 = vpop.permute.xlu1 %930 }
 0x236   : > { %1794 = vmatpush.xpose.msk.msrb.mxu1 %vm593_vm5, %v931_v33 }
 0x239   : > { %1795 = vmatmul.msk.f32.vlgmr.msrb.gmra.mxu1 %vm593_vm5, %v929_v34 }
 0x23d   : > { %v998_v54 = vpop.permute.xlu1 %997 }
 0x245   : > { %v1063_v58 = vpop.permute.xlu1 %1062 }
 0x293   : > { %v685_v35 = vpop.f32.mrf.mxu1 }
 0x294   : > { %v688_v36 = vmul.f32 0.25, %v685_v35 }
 0x296   : > { %v689_v37 = vsel %vm621_vm6, %v688_v36, -inf }
 0x297   : > { %690 = vmax.xlane.f32.xlu2 %v689_v37 }
 0x2ab   : > { %v819_v38 = vpop.f32.mrf.mxu1 }
 0x2ac   : > { %v822_v39 = vmul.f32 0.25, %v819_v38 }
 0x2ae   : > { %v823_v40 = vsel %vm621_vm6, %v822_v39, -inf }
 0x2af   : > { %861 = vrot.lane.b32.xlu2 %v551_v22, %s1899_s20  ;;  %824 = vmax.xlane.f32.xlu0 %v823_v40 }
 0x2b6   : > { %v953_v49 = vpop.f32.mrf.mxu1 }
 0x2b7   : > { %v956_v50 = vmul.f32 0.25, %v953_v49 }
 0x2b9   : > { %v957_v51 = vsel %vm621_vm6, %v956_v50, -inf }
 0x30a   : > { %v691_v41 = vpop.xlane.xlu2 %690 }
 0x30b   : > { %v692_v42 = vsub.f32 %v688_v36, %v691_v41 }
 0x30d   : > { %v693_v43 = vmul.f32 1.442695, %v692_v42 }
 0x30f   : > { %1836 = vpow2.f32 %v693_v43 }
 0x312   : > { %v862_v52 = vpop.permute.xlu2 %861 }
 0x315   : > { %v1837_v44 = vpop.eup %1836 }
 0x316   : > { %v695_v45 = vsel %vm621_vm6, %v1837_v44, 0.0 }
 0x317   : > { %696 = vadd.xlane.f32.xlu2 %v695_v45 }
 0x322   : > { %v825_v2 = vpop.xlane.xlu0 %824 }
 0x323   : > { %v826_v3 = vsub.f32 %v822_v39, %v825_v2 }
 0x325   : > { %v827_v4 = vmul.f32 1.442695, %v826_v3 }
 0x32f   : > { %1064 = vrot.lane.b32.xlu2 %v2160_v20, %s1903_s24 }
 0x358   : > { %623 = vmax.xlane.f32.xlu2 %v622_v48 }
 0x360   : > { %958 = vmax.xlane.f32.xlu2 %v957_v51 }
 0x38a   : > { %v697_v53 = vpop.xlane.xlu2 %696 }
 0x38b   : > { %1838 = vrcp.f32 %v697_v53 }
 0x391   : > { %v1839_v55 = vpop.eup %1838 }
 0x392   : > { %v1065_v56 = vpop.permute.xlu2 %1064  ;;  %v699_v57 = vmul.f32 %v1839_v55, %v1837_v44 }
 0x393   : > { %1802 = vmatpush.xpose.msk.msra.mxu1 %vm593_vm5, %v1065_v56 }
 0x394   : > { %1781 = vmatmul.msk.f32.vlgmr.msra.gmra.mxu3 %vm633_vm7, %v699_v57 }
 0x395   : > { %1790 = vmatpush.xpose.msk.msra.mxu3 %vm593_vm5, %v864_v32 }
 0x396   : > { %1803 = vmatmul.msk.f32.vlgmr.msra.gmra.mxu1 %vm593_vm5, %v1063_v58 }
 0x39c   : > { %1783 = vmatmul.msk.f32.vlgmr.msrb.gmra.mxu3 %vm593_vm5, %v728_v30 }
 0x39d   : > { %1798 = vmatpush.xpose.msk.msrb.mxu3 %vm593_vm5, %v998_v54 }
 0x3a4   : > { %1791 = vmatmul.msk.f32.vlgmr.msra.gmra.mxu3 %vm593_vm5, %v862_v52 }
 0x3ac   : > { %1799 = vmatmul.msk.f32.vlgmr.msrb.gmra.mxu3 %vm593_vm5, %v996_v59 }
 0x3cb   : > { %v624_v60 = vpop.xlane.xlu2 %623 }
 0x3cc   : > { %v625_v61 = vsub.f32 %v620_v47, %v624_v60 }
 0x3ce   : > { %v626_v62 = vmul.f32 1.442695, %v625_v61 }
 0x3d0   : > { %1840 = vpow2.f32 %v626_v62 }
 0x3d1   : > { %1842 = vpow2.f32 %v827_v4 }
 0x3d3   : > { %v959_v10 = vpop.xlane.xlu2 %958 }
 0x3d4   : > { %v960_v15 = vsub.f32 %v956_v50, %v959_v10 }
 0x3d6   : > { %v1841_v63 = vpop.eup %1840  ;;  %v961_v18 = vmul.f32 1.442695, %v960_v15 }
 0x3d7   : > { %v628_v1 = vsel %vm621_vm6, %v1841_v63, 0.0  ;;  %v1843_v9 = vpop.eup %1842 }
 0x3d8   : > { %629 = vadd.xlane.f32.xlu0 %v628_v1  ;;  %v829_v11 = vsel %vm621_vm6, %v1843_v9, 0.0  ;;  %1844 = vpow2.f32 %v961_v18  ;;  %v1185_v18 = vld [vmem:[%s2901_s5 + $0x78] sm:$0xff] }
 0x3d9   : > { %1190 = vmatpush.msra.mxu3 %v1185_v18  ;;  %v1285_v18 = vld [vmem:[%s2905_s9 + $0x150] sm:$0xff] }
 0x3de   : > { %v2220_v21 = vpop.eup %1844 }
 0x3df   : > { %v963_v22 = vsel %vm621_vm6, %v2220_v21, 0.0 }
 0x413   : > { %v1087_v5 = vpop.f32.mrf.mxu1 }
 0x414   : > { %v1090_v6 = vmul.f32 0.25, %v1087_v5 }
 0x416   : > { %v1091_v7 = vsel %vm621_vm6, %v1090_v6, -inf }
 0x417   : > { %v2215_v8 = vpop.f32.mrf.mxu3  ;;  %1092 = vmax.xlane.f32.xlu2 %v1091_v7 }
 0x41f   : > { %v752_v12 = vpop.f32.mrf.mxu3  ;;  %830 = vadd.xlane.f32.xlu2 %v829_v11 }
 0x420   : > { %v755_v13 = vmul.f32 0.25, %v752_v12 }
 0x422   : > { %v756_v16 = vsel %vm621_vm6, %v755_v13, -inf }
 0x423   : > { %757 = vmax.xlane.f32.xlu1 %v756_v16 }
 0x427   : > { %v886_v19 = vpop.f32.mrf.mxu3 }
 0x428   : > { %v889_v20 = vmul.f32 0.25, %v886_v19  ;;  %v1184_v19 = vld [vmem:[%s2901_s5 + $0x70] sm:$0xff] }
 0x429   : > { %1191 = vmatpush.msra.mxu3 %v1184_v19  ;;  %v1286_v19 = vld [vmem:[%s2905_s9 + $0x158] sm:$0xff] }
 0x42a   : > { %v890_v17 = vsel %vm621_vm6, %v889_v20, -inf }
 0x42b   : > { %891 = vmax.xlane.f32.xlu0 %v890_v17  ;;  %v1182_v17 = vld [vmem:[%s2901_s5 + $0x60] sm:$0xff] }
 0x42f   : > { %v1020_v34 = vpop.f32.mrf.mxu3 }
 0x430   : > { %v1023_v38 = vmul.f32 0.25, %v1020_v34  ;;  %v1170_v34 = vld [vmem:[%s2901_s5] sm:$0xff] }
 0x432   : > { %v1024_v42 = vsel %vm621_vm6, %v1023_v38, -inf }
 0x433   : > { %964 = vadd.xlane.f32.xlu0 %v963_v22  ;;  %v1181_v22 = vld [vmem:[%s2901_s5 + $0x58] sm:$0xff] }
 0x437   : > { %834 = vrot.lane.b32.xlu2 %v2169_v24, %s1897_s18 }
 0x447   : > { %767 = vrot.lane.b32.xlu0 %v2169_v24, %s1900_s21 }
 0x44b   : > { %v630_v23 = vpop.xlane.xlu0 %629 }
 0x44c   : > { %1846 = vrcp.f32 %v630_v23  ;;  %v1180_v23 = vld [vmem:[%s2901_s5 + $0x50] sm:$0xff] }
 0x44f   : > { %901 = vrot.lane.b32.xlu0 %v2169_v24, %s1899_s20 }
 0x452   : > { %v1847_v25 = vpop.eup %1846 }
 0x453   : > { %v632_v26 = vmul.f32 %v1847_v25, %v1841_v63  ;;  %v1179_v25 = vld [vmem:[%s2901_s5 + $0x48] sm:$0xff] }
 0x455   : > { %1777 = vmatmul.msk.f32.vlgmr.msrb.gmra.mxu2 %vm633_vm7, %v632_v26  ;;  %v1178_v26 = vld [vmem:[%s2901_s5 + $0x40] sm:$0xff] }
 0x457   : > { %1102 = vrot.lane.b32.xlu0 %v2169_v24, %s1903_s24 }
 0x45f   : > { %1035 = vrot.lane.b32.xlu0 %v2169_v24, %s1902_s23 }
 0x48a   : > { %v1093_v27 = vpop.xlane.xlu2 %1092 }
 0x48b   : > { %v1094_v28 = vsub.f32 %v1090_v6, %v1093_v27  ;;  %v1177_v27 = vld [vmem:[%s2901_s5 + $0x38] sm:$0xff] }
 0x48d   : > { %v1095_v29 = vmul.f32 1.442695, %v1094_v28  ;;  %v1176_v28 = vld [vmem:[%s2901_s5 + $0x30] sm:$0xff] }
 0x48f   : > { %1848 = vpow2.f32 %v1095_v29  ;;  %v1175_v29 = vld [vmem:[%s2901_s5 + $0x28] sm:$0xff] }
 0x492   : > { %v831_v30 = vpop.xlane.xlu2 %830 }
 0x493   : > { %1850 = vrcp.f32 %v831_v30  ;;  %v1174_v30 = vld [vmem:[%s2901_s5 + $0x20] sm:$0xff] }
 0x495   : > { %v2235_v31 = vpop.eup %1848 }
 0x496   : > { %v758_v32 = vpop.xlane.xlu1 %757  ;;  %v1097_v33 = vsel %vm621_vm6, %v2235_v31, 0.0 }
 0x497   : > { %v759_v35 = vsub.f32 %v755_v13, %v758_v32  ;;  %1098 = vadd.xlane.f32.xlu1 %v1097_v33  ;;  %v1172_v32 = vld [vmem:[%s2901_s5 + $0x10] sm:$0xff]  ;;  %v1171_v33 = vld [vmem:[%s2901_s5 + $0x8] sm:$0xff] }
 0x499   : > { %v1851_v36 = vpop.eup %1850  ;;  %v760_v37 = vmul.f32 1.442695, %v759_v35 }
 0x49a   : > { %v833_v39 = vmul.f32 %v1851_v36, %v1843_v9  ;;  %v835_v40 = vpop.permute.xlu2 %834 }
 0x49b   : > { %1788 = vmatpush.msk.msra.mxu2 %vm439_vm0, %v835_v40  ;;  %1852 = vpow2.f32 %v760_v37 }
 0x49c   : > { %1789 = vmatmul.msk.f32.vlgmr.msra.gmra.mxu2 %vm633_vm7, %v833_v39 }
 0x49e   : > { %v892_v41 = vpop.xlane.xlu0 %891 }
 0x49f   : > { %v893_v43 = vsub.f32 %v889_v20, %v892_v41  ;;  %1025 = vmax.xlane.f32.xlu1 %v1024_v42  ;;  %v1183_v20 = vld [vmem:[%s2901_s5 + $0x68] sm:$0xff] }
 0x4a0   : > { %1192 = vmatpush.msra.mxu3 %v1183_v20  ;;  %v1279_v20 = vld [vmem:[%s2905_s9 + $0x120] sm:$0xff] }
 0x4a1   : > { %v894_v44 = vmul.f32 1.442695, %v893_v43  ;;  %v1853_v45 = vpop.eup %1852 }
 0x4a2   : > { %v762_v46 = vsel %vm621_vm6, %v1853_v45, 0.0  ;;  %1193 = vmatpush.msra.mxu3 %v1182_v17  ;;  %v1280_v17 = vld [vmem:[%s2905_s9 + $0x128] sm:$0xff] }
 0x4a3   : > { %1854 = vpow2.f32 %v894_v44 }
 0x4a4   : > { %1194 = vmatpush.msra.mxu3 %v1181_v22  ;;  %v1282_v22 = vld [vmem:[%s2905_s9 + $0x138] sm:$0xff] }
 0x4a6   : > { %v965_v49 = vpop.xlane.xlu0 %964  ;;  %1195 = vmatpush.msra.mxu3 %v1180_v23  ;;  %v1275_v23 = vld [vmem:[%s2905_s9 + $0x100] sm:$0xff] }
 0x4a7   : > { %763 = vadd.xlane.f32.xlu1 %v762_v46 }
 0x4a8   : > { %1196 = vmatpush.msra.mxu3 %v1179_v25  ;;  %v1276_v25 = vld [vmem:[%s2905_s9 + $0x108] sm:$0xff] }
 0x4a9   : > { %v1855_v47 = vpop.eup %1854 }
 0x4aa   : > { %v896_v48 = vsel %vm621_vm6, %v1855_v47, 0.0  ;;  %1197 = vmatpush.msra.mxu3 %v1178_v26  ;;  %v1277_v26 = vld [vmem:[%s2905_s9 + $0x110] sm:$0xff] }
 0x4ac   : > { %1198 = vmatpush.msra.mxu3 %v1177_v27  ;;  %v1278_v27 = vld [vmem:[%s2905_s9 + $0x118] sm:$0xff] }
 0x4ae   : > { %1199 = vmatpush.msra.mxu3 %v1176_v28  ;;  %v1271_v28 = vld [vmem:[%s2905_s9 + $0xe0] sm:$0xff] }
 0x4af   : > { %897 = vadd.xlane.f32.xlu1 %v896_v48 }
 0x4b0   : > { %1200 = vmatpush.msra.mxu3 %v1175_v29  ;;  %v1272_v29 = vld [vmem:[%s2905_s9 + $0xe8] sm:$0xff] }
 0x4b2   : > { %1201 = vmatpush.msra.mxu3 %v1174_v30  ;;  %v1273_v30 = vld [vmem:[%s2905_s9 + $0xf0] sm:$0xff] }
 0x4b9   : > { %v768_v50 = vpop.permute.xlu0 %767 }
 0x4ba   : > { %1784 = vmatpush.msk.msra.mxu0 %vm439_vm0, %v768_v50 }
 0x4c1   : > { %v902_v51 = vpop.permute.xlu0 %901 }
 0x4c2   : > { %1792 = vmatpush.msk.msrb.mxu0 %vm439_vm0, %v902_v51 }
 0x4c8   : > { %968 = vrot.lane.b32.xlu1 %v2169_v24, %s1901_s22 }
 0x4c9   : > { %v1103_v57 = vpop.permute.xlu0 %1102 }
 0x4d0   : > { %1130 = vrot.lane.b32.xlu1 %v2215_v8, %s1903_s24 }
 0x4d1   : > { %v1036_v1 = vpop.permute.xlu0 %1035 }
 0x4d8   : > { %v2250_v56 = vpop.f32.mrf.mxu2 }
 0x50a   : > { %v1099_v52 = vpop.xlane.xlu1 %1098 }
 0x512   : > { %v1026_v53 = vpop.xlane.xlu1 %1025 }
 0x513   : > { %v1027_v54 = vsub.f32 %v1023_v38, %v1026_v53 }
 0x515   : > { %v1028_v55 = vmul.f32 1.442695, %v1027_v54  ;;  %v1303_v54 = vld [vmem:[%s2905_s9 + $0x1e0] sm:$0xff] }
 0x517   : > { %1856 = vpow2.f32 %v1028_v55  ;;  %v1304_v55 = vld [vmem:[%s2905_s9 + $0x1e8] sm:$0xff] }
 0x518   : > { %1337 = vmatpush.msrb.mxu1 %v1304_v55  ;;  %v1249_v55 = vld [vmem:[%s2905_s9 + $0x30] sm:$0xff] }
 0x51a   : > { %v764_v58 = vpop.xlane.xlu1 %763 }
 0x51b   : > { %1858 = vrcp.f32 %v764_v58  ;;  %v1300_v58 = vld [vmem:[%s2905_s9 + $0x1c8] sm:$0xff] }
 0x51c   : > { %1338 = vmatpush.msrb.mxu1 %v1300_v58  ;;  %v1245_v58 = vld [vmem:[%s2905_s9 + $0x10] sm:$0xff] }
 0x51d   : > { %v1857_v59 = vpop.eup %1856 }
 0x51e   : > { %v1030_v60 = vsel %vm621_vm6, %v1857_v59, 0.0 }
 0x51f   : > { %1031 = vadd.xlane.f32.xlu2 %v1030_v60  ;;  %v858_v61 = vpop.f32.mrf.mxu2  ;;  %v1302_v60 = vld [vmem:[%s2905_s9 + $0x1d8] sm:$0xff] }
 0x520   : > { %1138 = vrot.lane.b32.xlu1 %v858_v61, %s1901_s22 }
 0x521   : > { %v1859_v24 = vpop.eup %1858 }
 0x522   : > { %v766_v62 = vmul.f32 %v1859_v24, %v1853_v45  ;;  %v898_v63 = vpop.xlane.xlu1 %897 }
 0x523   : > { %1860 = vrcp.f32 %v898_v63 }
 0x524   : > { %1785 = vmatmul.msk.f32.vlgmr.msra.gmra.mxu0 %vm633_vm7, %v766_v62  ;;  %1862 = vrcp.f32 %v965_v49  ;;  %v1828_v49 = vld [vmem:[%s2902_s6] ss:$0 sm:$0xff] }
 0x525   : > { %1800 = vmatpush.msk.msra.mxu0 %vm439_vm0, %v1036_v1  ;;  %1864 = vrcp.f32 %v1099_v52 }
 0x529   : > { %v1861_v2 = vpop.eup %1860 }
 0x52a   : > { %v900_v3 = vmul.f32 %v1861_v2, %v1855_v47  ;;  %v1863_v4 = vpop.eup %1862  ;;  %v1295_v2 = vld [vmem:[%s2905_s9 + $0x1a0] sm:$0xff] }
 0x52b   : > { %v967_v5 = vmul.f32 %v1863_v4, %v2220_v21  ;;  %v1865_v7 = vpop.eup %1864  ;;  %v1297_v4 = vld [vmem:[%s2905_s9 + $0x1b0] sm:$0xff] }
 0x52c   : > { %1793 = vmatmul.msk.f32.vlgmr.msrb.gmra.mxu0 %vm633_vm7, %v900_v3  ;;  %v1101_v8 = vmul.f32 %v1865_v7, %v2235_v31  ;;  %v1173_v31 = vld [vmem:[%s2901_s5 + $0x18] sm:$0xff]  ;;  %v1296_v3 = vld [vmem:[%s2905_s9 + $0x1a8] sm:$0xff] }
 0x52d   : > { %1202 = vmatpush.msra.mxu3 %v1173_v31  ;;  %1317 = vmatpush.msrb.mxu0 %v1303_v54  ;;  %v1292_v7 = vld [vmem:[%s2905_s9 + $0x188] sm:$0xff]  ;;  %v1274_v31 = vld [vmem:[%s2905_s9 + $0xf8] sm:$0xff] }
 0x52e   : > { %1339 = vmatpush.msrb.mxu1 %v1296_v3  ;;  %v1248_v54 = vld [vmem:[%s2905_s9 + $0x28] sm:$0xff] }
 0x52f   : > { %1203 = vmatpush.msra.mxu3 %v1172_v32  ;;  %v1267_v32 = vld [vmem:[%s2905_s9 + $0xc0] sm:$0xff] }
 0x530   : > { %1340 = vmatpush.msrb.mxu1 %v1292_v7 }
 0x531   : > { %1204 = vmatpush.msra.mxu3 %v1171_v33  ;;  %v1268_v33 = vld [vmem:[%s2905_s9 + $0xc8] sm:$0xff] }
 0x533   : > { %1205 = vmatpush.msra.mxu3 %v1170_v34  ;;  %v1269_v34 = vld [vmem:[%s2905_s9 + $0xd0] sm:$0xff] }
 0x53a   : > { %v969_v6 = vpop.permute.xlu1 %968 }
 0x53b   : > { %1796 = vmatpush.msk.msrb.mxu2 %vm439_vm0, %v969_v6  ;;  %v1291_v6 = vld [vmem:[%s2905_s9 + $0x180] sm:$0xff] }
 0x53c   : > { %1797 = vmatmul.msk.f32.vlgmr.msrb.gmra.mxu2 %vm633_vm7, %v967_v5  ;;  %v1298_v5 = vld [vmem:[%s2905_s9 + $0x1b8] sm:$0xff] }
 0x53d   : > { %1804 = vmatpush.msk.msra.mxu2 %vm439_vm0, %v1103_v57  ;;  %v1299_v57 = vld [vmem:[%s2905_s9 + $0x1c0] sm:$0xff] }
 0x53e   : > { %1318 = vmatpush.msrb.mxu0 %v1299_v57  ;;  %v1244_v57 = vld [vmem:[%s2905_s9 + $0x8] sm:$0xff] }
 0x540   : > { %1319 = vmatpush.msrb.mxu0 %v1295_v2 }
 0x542   : > { %v1131_v35 = vpop.permute.xlu1 %1130  ;;  %1320 = vmatpush.msrb.mxu0 %v1291_v6  ;;  %v1829_v6 = vld [vmem:[%s2903_s7] ss:$0 sm:$0xff] }
 0x543   : > { %v1157_v39 = vsel %vm593_vm5, %v2250_v56, %v1131_v35  ;;  %v1305_v56 = vld [vmem:[%s2905_s9 + $0x1f0] sm:$0xff]  ;;  %v1270_v35 = vld [vmem:[%s2905_s9 + $0xd8] sm:$0xff] }
 0x544   : > { %1805 = vmatmul.msk.f32.vlgmr.msra.gmra.mxu2 %vm633_vm7, %v1101_v8  ;;  %v1293_v8 = vld [vmem:[%s2905_s9 + $0x190] sm:$0xff] }
 0x545   : > { %1357 = vmatpush.msrb.mxu2 %v1305_v56  ;;  %v1250_v56 = vld [vmem:[%s2905_s9 + $0x38] sm:$0xff] }
 0x592   : > { %v1032_v9 = vpop.xlane.xlu2 %1031  ;;  %v1139_v37 = vpop.permute.xlu1 %1138 }
 0x593   : > { %1866 = vrcp.f32 %v1032_v9  ;;  %v1294_v9 = vld [vmem:[%s2905_s9 + $0x198] sm:$0xff] }
 0x599   : > { %v1867_v10 = vpop.eup %1866 }
 0x59a   : > { %v1034_v11 = vmul.f32 %v1867_v10, %v1857_v59  ;;  %v1301_v59 = vld [vmem:[%s2905_s9 + $0x1d0] sm:$0xff]  ;;  %v1287_v10 = vld [vmem:[%s2905_s9 + $0x160] sm:$0xff] }
 0x59b   : > { %1358 = vmatpush.msrb.mxu2 %v1301_v59  ;;  %1321 = vmatpush.msrb.mxu0 %v1287_v10  ;;  %v1246_v59 = vld [vmem:[%s2905_s9 + $0x18] sm:$0xff] }
 0x59c   : > { %1801 = vmatmul.msk.f32.vlgmr.msra.gmra.mxu0 %vm633_vm7, %v1034_v11  ;;  %v1288_v11 = vld [vmem:[%s2905_s9 + $0x168] sm:$0xff] }
 0x59d   : > { %1359 = vmatpush.msrb.mxu2 %v1297_v4  ;;  %1341 = vmatpush.msrb.mxu1 %v1288_v11  ;;  %v1904_v11 = vmov 1.4142135  }
 0x59f   : > { %1360 = vmatpush.msrb.mxu2 %v1293_v8 }
 0x5a1   : > { %v791_v12 = vpop.f32.mrf.mxu0 }
 0x5a2   : > { %1134 = vrot.lane.b32.xlu0 %v791_v12, %s1902_s23  ;;  %v1289_v12 = vld [vmem:[%s2905_s9 + $0x170] sm:$0xff] }
 0x5a3   : > { %1361 = vmatpush.msrb.mxu2 %v1289_v12 }
 0x5a5   : > { %1362 = vmatpush.msrb.mxu2 %v1285_v18 }
 0x5a9   : > { %v925_v13 = vpop.f32.mrf.mxu0 }
 0x5aa   : > { %1142 = vrot.lane.b32.xlu0 %v925_v13, %s1899_s20  ;;  %v1290_v13 = vld [vmem:[%s2905_s9 + $0x178] sm:$0xff] }
 0x5bf   : > { %v992_v15 = vpop.f32.mrf.mxu2 }
 0x5c0   : > { %1146 = vrot.lane.b32.xlu1 %v992_v15, %s1897_s18  ;;  %v1283_v15 = vld [vmem:[%s2905_s9 + $0x140] sm:$0xff] }
 0x5c1   : > { %1322 = vmatpush.msrb.mxu0 %v1283_v15 }
 0x5c3   : > { %1323 = vmatpush.msrb.mxu0 %v1279_v20 }
 0x5c5   : > { %1324 = vmatpush.msrb.mxu0 %v1275_v23 }
 0x5c7   : > { %v1126_v16 = vpop.f32.mrf.mxu2  ;;  %1325 = vmatpush.msrb.mxu0 %v1271_v28 }
 0x5c8   : > { %1154 = vrot.lane.b32.xlu2 %v1126_v16, %s1898_s19  ;;  %v1284_v16 = vld [vmem:[%s2905_s9 + $0x148] sm:$0xff] }
 0x5c9   : > { %1342 = vmatpush.msrb.mxu1 %v1284_v16  ;;  %1326 = vmatpush.msrb.mxu0 %v1267_v32 }
 0x5cb   : > { %1343 = vmatpush.msrb.mxu1 %v1280_v17 }
 0x5cd   : > { %1344 = vmatpush.msrb.mxu1 %v1276_v25 }
 0x5cf   : > { %1345 = vmatpush.msrb.mxu1 %v1272_v29 }
 0x5d1   : > { %1346 = vmatpush.msrb.mxu1 %v1268_v33 }
 0x614   : > { %v1135_v36 = vpop.permute.xlu0 %1134 }
 0x615   : > { %v1159_v40 = vsel %vm1158_vm8, %v1157_v39, %v1135_v36  ;;  %v1263_v36 = vld [vmem:[%s2905_s9 + $0xa0] sm:$0xff]  ;;  %v1266_v39 = vld [vmem:[%s2905_s9 + $0xb8] sm:$0xff] }
 0x616   : > { %v1161_v42 = vsel %vm1160_vm9, %v1159_v40, %v1139_v37  ;;  %v1264_v37 = vld [vmem:[%s2905_s9 + $0xa8] sm:$0xff]  ;;  %1327 = vmatpush.msrb.mxu0 %v1263_v36  ;;  %v1259_v40 = vld [vmem:[%s2905_s9 + $0x80] sm:$0xff] }
 0x617   : > { %1347 = vmatpush.msrb.mxu1 %v1264_v37  ;;  %v1577_v36 = vld [vmem:[%s2907_s11 + $0x68] sm:$0xff] }
 0x618   : > { %1328 = vmatpush.msrb.mxu0 %v1259_v40  ;;  %v1593_v37 = vld [vmem:[%s2907_s11 + $0xe8] sm:$0xff] }
 0x619   : > { %v1059_v21 = vpop.f32.mrf.mxu0 }
 0x61a   : > { %1150 = vrot.lane.b32.xlu0 %v1059_v21, %s1900_s21  ;;  %v1281_v21 = vld [vmem:[%s2905_s9 + $0x130] sm:$0xff] }
 0x61b   : > { %1363 = vmatpush.msrb.mxu2 %v1281_v21 }
 0x61c   : > { %v1143_v38 = vpop.permute.xlu0 %1142 }
 0x61d   : > { %v1163_v43 = vsel %vm1162_vm10, %v1161_v42, %v1143_v38  ;;  %1364 = vmatpush.msrb.mxu2 %v1277_v26  ;;  %v1265_v38 = vld [vmem:[%s2905_s9 + $0xb0] sm:$0xff]  ;;  %v1579_v26 = vld [vmem:[%s2907_s11 + $0x78] sm:$0xff] }
 0x61e   : > { %v1261_v42 = vld [vmem:[%s2905_s9 + $0x90] sm:$0xff] }
 0x61f   : > { %1365 = vmatpush.msrb.mxu2 %v1273_v30  ;;  %v1578_v30 = vld [vmem:[%s2907_s11 + $0x70] sm:$0xff] }
 0x621   : > { %1366 = vmatpush.msrb.mxu2 %v1269_v34 }
 0x622   : > { %v1155_v46 = vpop.permute.xlu2 %1154 }
 0x623   : > { %1367 = vmatpush.msrb.mxu2 %v1265_v38 }
 0x625   : > { %1368 = vmatpush.msrb.mxu2 %v1261_v42 }
 0x632   : > { %v1147_v41 = vpop.permute.xlu1 %1146 }
 0x633   : > { %v1165_v44 = vsel %vm1164_vm11, %v1163_v43, %v1147_v41  ;;  %v1260_v41 = vld [vmem:[%s2905_s9 + $0x88] sm:$0xff]  ;;  %v1262_v43 = vld [vmem:[%s2905_s9 + $0x98] sm:$0xff] }
 0x634   : > { %1348 = vmatpush.msrb.mxu1 %v1260_v41 }
 0x68c   : > { %v1151_v45 = vpop.permute.xlu0 %1150 }
 0x68d   : > { %v1167_v47 = vsel %vm1166_vm12, %v1165_v44, %v1151_v45  ;;  %v1255_v44 = vld [vmem:[%s2905_s9 + $0x60] sm:$0xff]  ;;  %v1256_v45 = vld [vmem:[%s2905_s9 + $0x68] sm:$0xff] }
 0x68e   : > { %v1169_v48 = vsel %vm1168_vm13, %v1167_v47, %v1155_v46  ;;  %v1257_v46 = vld [vmem:[%s2905_s9 + $0x70] sm:$0xff]  ;;  %1329 = vmatpush.msrb.mxu0 %v1255_v44  ;;  %1349 = vmatpush.msrb.mxu1 %v1256_v45  ;;  %v1258_v47 = vld [vmem:[%s2905_s9 + $0x78] sm:$0xff]  ;;  %v1576_v44 = vld [vmem:[%s2907_s11 + $0x60] sm:$0xff] }
 0x68f   : > { %1206 = vmatmul.f32.vlgmr.msra.gmra.mxu3 %v1169_v48  ;;  %v1251_v48 = vld [vmem:[%s2905_s9 + $0x40] sm:$0xff]  ;;  %1369 = vmatpush.msrb.mxu2 %v1257_v46  ;;  %v1611_v46 = vld [vmem:[%s2907_s11 + $0x178] sm:$0xff] }
 0x690   : > { %1330 = vmatpush.msrb.mxu0 %v1251_v48  ;;  %v1592_v45 = vld [vmem:[%s2907_s11 + $0xe0] sm:$0xff] }
 0x712   : > { %v1207_v50 = vpop.f32.mrf.mxu3 }
 0x713   : > { %v1208_v51 = vadd.f32 %v1828_v49, %v1207_v50  ;;  %v1252_v49 = vld [vmem:[%s2905_s9 + $0x48] sm:$0xff]  ;;  %v1253_v50 = vld [vmem:[%s2905_s9 + $0x50] sm:$0xff] }
 0x714   : > { %1350 = vmatpush.msrb.mxu1 %v1252_v49  ;;  %1370 = vmatpush.msrb.mxu2 %v1253_v50  ;;  %v1627_v49 = vld [vmem:[%s2907_s11 + $0x1f8] sm:$0xff] }
 0x715   : > { %v2323_v52 = vadd.f32 %v1208_v51, %v1992_v0  ;;  %v1306_v0 = vld [vmem:[%s2905_s9 + $0x1f8] sm:$0xff] }
 0x716   : > { %1377 = vmatpush.msrb.mxu3 %v1306_v0  ;;  %v1254_v51 = vld [vmem:[%s2905_s9 + $0x58] sm:$0xff]  ;;  %v1243_v0 = vld [vmem:[%s2905_s9] sm:$0xff]  ;;  %1351 = vmatpush.msrb.mxu1 %v1248_v54  ;;  %v1610_v54 = vld [vmem:[%s2907_s11 + $0x170] sm:$0xff] }
 0x717   : > { %v1213_v53 = vsel %vm439_vm0, %v2323_v52, 0.0  ;;  %1371 = vmatpush.msrb.mxu2 %v1249_v55  ;;  %v1575_v50 = vld [vmem:[%s2907_s11 + $0x58] sm:$0xff]  ;;  %v1626_v55 = vld [vmem:[%s2907_s11 + $0x1f0] sm:$0xff] }
 0x718   : > { %1214 = vadd.xlane.f32.xlu1 %v1213_v53  ;;  %1378 = vmatpush.msrb.mxu3 %v1302_v60  ;;  %v1247_v53 = vld [vmem:[%s2905_s9 + $0x20] sm:$0xff] }
 0x719   : > { %1331 = vmatpush.msrb.mxu0 %v1247_v53  ;;  %1352 = vmatpush.msrb.mxu1 %v1244_v57  ;;  %v1609_v57 = vld [vmem:[%s2907_s11 + $0x168] sm:$0xff] }
 0x71a   : > { %1379 = vmatpush.msrb.mxu3 %v1298_v5  ;;  %1372 = vmatpush.msrb.mxu2 %v1245_v58 }
 0x71b   : > { %1332 = vmatpush.msrb.mxu0 %v1243_v0  ;;  %v1590_v0 = vld [vmem:[%s2907_s11 + $0xd0] sm:$0xff] }
 0x71c   : > { %1380 = vmatpush.msrb.mxu3 %v1294_v9  ;;  %1672 = vmatpush.msra.mxu2 %v1611_v46  ;;  %v1603_v46 = vld [vmem:[%s2907_s11 + $0x138] sm:$0xff] }
 0x71d   : > { %1632 = vmatpush.msra.mxu0 %v1579_v26 }
 0x71e   : > { %1381 = vmatpush.msrb.mxu3 %v1290_v13  ;;  %1673 = vmatpush.msra.mxu2 %v1610_v54 }
 0x71f   : > { %1633 = vmatpush.msra.mxu0 %v1578_v30 }
 0x720   : > { %1382 = vmatpush.msrb.mxu3 %v1286_v19  ;;  %1674 = vmatpush.msra.mxu2 %v1609_v57  ;;  %v1602_v57 = vld [vmem:[%s2907_s11 + $0x130] sm:$0xff] }
 0x721   : > { %1634 = vmatpush.msra.mxu0 %v1577_v36 }
 0x722   : > { %1383 = vmatpush.msrb.mxu3 %v1282_v22 }
 0x723   : > { %1635 = vmatpush.msra.mxu0 %v1576_v44  ;;  %v1568_v44 = vld [vmem:[%s2907_s11 + $0x20] sm:$0xff] }
 0x724   : > { %1384 = vmatpush.msrb.mxu3 %v1278_v27  ;;  %v1595_v27 = vld [vmem:[%s2907_s11 + $0xf8] sm:$0xff] }
 0x725   : > { %1652 = vmatpush.msra.mxu1 %v1595_v27  ;;  %1636 = vmatpush.msra.mxu0 %v1575_v50 }
 0x726   : > { %1385 = vmatpush.msrb.mxu3 %v1274_v31  ;;  %v1594_v31 = vld [vmem:[%s2907_s11 + $0xf0] sm:$0xff] }
 0x727   : > { %1653 = vmatpush.msra.mxu1 %v1594_v31  ;;  %v1569_v31 = vld [vmem:[%s2907_s11 + $0x28] sm:$0xff] }
 0x728   : > { %1386 = vmatpush.msrb.mxu3 %v1270_v35 }
 0x729   : > { %1654 = vmatpush.msra.mxu1 %v1593_v37  ;;  %v1585_v37 = vld [vmem:[%s2907_s11 + $0xa8] sm:$0xff] }
 0x72a   : > { %1387 = vmatpush.msrb.mxu3 %v1266_v39 }
 0x72b   : > { %1655 = vmatpush.msra.mxu1 %v1592_v45  ;;  %v1584_v45 = vld [vmem:[%s2907_s11 + $0xa0] sm:$0xff] }
 0x72c   : > { %1388 = vmatpush.msrb.mxu3 %v1262_v43 }
 0x72e   : > { %1389 = vmatpush.msrb.mxu3 %v1258_v47 }
 0x730   : > { %1390 = vmatpush.msrb.mxu3 %v1254_v51  ;;  %v1591_v51 = vld [vmem:[%s2907_s11 + $0xd8] sm:$0xff] }
 0x731   : > { %1656 = vmatpush.msra.mxu1 %v1591_v51  ;;  %v1619_v51 = vld [vmem:[%s2907_s11 + $0x1b8] sm:$0xff] }
 0x732   : > { %1391 = vmatpush.msrb.mxu3 %v1250_v56  ;;  %v1574_v56 = vld [vmem:[%s2907_s11 + $0x50] sm:$0xff] }
 0x733   : > { %1637 = vmatpush.msra.mxu0 %v1574_v56  ;;  %1657 = vmatpush.msra.mxu1 %v1590_v0  ;;  %v1567_v56 = vld [vmem:[%s2907_s11 + $0x18] sm:$0xff] }
 0x734   : > { %1392 = vmatpush.msrb.mxu3 %v1246_v59  ;;  %v1625_v59 = vld [vmem:[%s2907_s11 + $0x1e8] sm:$0xff]  ;;  %v1583_v0 = vld [vmem:[%s2907_s11 + $0x98] sm:$0xff] }
 0x736   : > { %1692 = vmatpush.msra.mxu3 %v1627_v49 }
 0x738   : > { %1693 = vmatpush.msra.mxu3 %v1626_v55 }
 0x73a   : > { %1694 = vmatpush.msra.mxu3 %v1625_v59 }
 0x78b   : > { %v1215_v61 = vpop.xlane.xlu1 %1214 }
 0x78c   : > { %v1216_v24 = vmul.f32 %v1215_v61, %v2014_v14 }
 0x78e   : > { %v2353_v62 = vsub.f32 %v2323_v52, %v1216_v24 }
 0x790   : > { %v1218_v63 = vmul.f32 %v2353_v62, %v2353_v62 }
 0x792   : > { %v1219_v1 = vsel %vm439_vm0, %v1218_v63, 0.0 }
 0x793   : > { %1220 = vadd.xlane.f32.xlu0 %v1219_v1 }
 0x806   : > { %v1221_v60 = vpop.xlane.xlu0 %1220 }
 0x807   : > { %v1222_v61 = vmul.f32 %v1221_v60, %v2014_v14  ;;  %v1830_v14 = vld [vmem:[%s2904_s8] ss:$0 sm:$0xff]  ;;  %v1573_v60 = vld [vmem:[%s2907_s11 + $0x48] sm:$0xff] }
 0x808   : > { %1638 = vmatpush.msra.mxu0 %v1573_v60 }
 0x809   : > { %v1223_v24 = vadd.f32 1e-05, %v1222_v61 }
 0x80b   : > { %1868 = vrsqrt.f32 %v1223_v24  ;;  %vm1230_vm15 = vweird.f32 %v1223_v24 }
 0x80c   : > { %1870 = vrcp.f32 %v1904_v11 }
 0x811   : > { %v1869_v63 = vpop.eup %1868 }
 0x812   : > { %v1225_v1 = vmul.f32 %v1869_v63, %v1223_v24  ;;  %vm1231_vm14 = vweird.f32 %v1869_v63  ;;  %v1871_v12 = vpop.eup %1870  ;;  %v1589_v24 = vld [vmem:[%s2907_s11 + $0xc8] sm:$0xff] }
 0x813   : > { %vm1232_vm0 = vmor %vm1230_vm15, %vm1231_vm14  ;;  %v1402_v13 = vmul.f32 1.4142135, %v1871_v12  ;;  %vm1406_vm1 = vweird.f32 %v1871_v12  ;;  %1658 = vmatpush.msra.mxu1 %v1589_v24 }
 0x814   : > { %v1226_v2 = vmul.f32 %v1869_v63, %v1225_v1  ;;  %v1624_v1 = vld [vmem:[%s2907_s11 + $0x1e0] sm:$0xff] }
 0x815   : > { %v1403_v15 = vsub.f32 1.0, %v1402_v13  ;;  %1695 = vmatpush.msra.mxu3 %v1624_v1  ;;  %v1606_v13 = vld [vmem:[%s2907_s11 + $0x150] sm:$0xff] }
 0x816   : > { %v1227_v3 = vmul.f32 0.5, %v1226_v2  ;;  %v1572_v2 = vld [vmem:[%s2907_s11 + $0x40] sm:$0xff]  ;;  %v1618_v1 = vld [vmem:[%s2907_s11 + $0x1b0] sm:$0xff] }
 0x817   : > { %v1404_v16 = vmul.f32 %v1871_v12, %v1403_v15  ;;  %1639 = vmatpush.msra.mxu0 %v1572_v2  ;;  %v1622_v15 = vld [vmem:[%s2907_s11 + $0x1d0] sm:$0xff] }
 0x818   : > { %v1228_v4 = vsub.f32 1.5, %v1227_v3  ;;  %v1588_v3 = vld [vmem:[%s2907_s11 + $0xc0] sm:$0xff] }
 0x819   : > { %v1405_v18 = vadd.f32 %v1871_v12, %v1404_v16  ;;  %1659 = vmatpush.msra.mxu1 %v1588_v3 }
 0x81a   : > { %v1229_v5 = vmul.f32 %v1869_v63, %v1228_v4 }
 0x81b   : > { %v1407_v21 = vsel %vm1406_vm1, %v1871_v12, %v1405_v18  ;;  %v1587_v12 = vld [vmem:[%s2907_s11 + $0xb8] sm:$0xff]  ;;  %v1570_v18 = vld [vmem:[%s2907_s11 + $0x30] sm:$0xff] }
 0x81c   : > { %v1233_v7 = vsel %vm1232_vm0, %v1869_v63, %v1229_v5  ;;  %v1608_v63 = vld [vmem:[%s2907_s11 + $0x160] sm:$0xff]  ;;  %1660 = vmatpush.msra.mxu1 %v1587_v12  ;;  %v1617_v12 = vld [vmem:[%s2907_s11 + $0x1a8] sm:$0xff] }
 0x81d   : > { %v1234_v8 = vmul.f32 %v1233_v7, %v2353_v62  ;;  %v1307_v62 = vld [vmem:[%s2906_s10] sm:$0xf]  ;;  %1675 = vmatpush.msra.mxu2 %v1608_v63  ;;  %v1607_v7 = vld [vmem:[%s2907_s11 + $0x158] sm:$0xff] }
 0x81e   : > { %v1309_v19 = vperm.slane %v1307_v62, 0  ;;  %v1310_v20 = vperm.slane %v1307_v62, 1  ;;  %v1311_v32 = vperm.slane %v1307_v62, 2  ;;  %v1312_v33 = vperm.slane %v1307_v62, 3 }
 0x81f   : > { %v1238_v9 = vmul.f32 %v1829_v6, %v1234_v8  ;;  %v1623_v8 = vld [vmem:[%s2907_s11 + $0x1d8] sm:$0xff]  ;;  %1676 = vmatpush.msra.mxu2 %v1607_v7  ;;  %v1601_v7 = vld [vmem:[%s2907_s11 + $0x128] sm:$0xff] }
 0x820   : > { %1696 = vmatpush.msra.mxu3 %v1623_v8 }
 0x821   : > { %v1242_v10 = vadd.f32 %v1830_v14, %v1238_v9  ;;  %v1571_v14 = vld [vmem:[%s2907_s11 + $0x38] sm:$0xff]  ;;  %1677 = vmatpush.msra.mxu2 %v1606_v13 }
 0x822   : > { %1640 = vmatpush.msra.mxu0 %v1571_v14  ;;  %1697 = vmatpush.msra.mxu3 %v1622_v15 }
 0x823   : > { %1333 = vmatmul.f32.vlgmr.msrb.gmra.mxu0 %v1242_v10  ;;  %1353 = vmatmul.f32.vlgmr.msrb.gmra.mxu1 %v1242_v10 }
 0x824   : > { %1373 = vmatmul.f32.vlgmr.msrb.gmra.mxu2 %v1242_v10  ;;  %1393 = vmatmul.f32.vlgmr.msrb.gmra.mxu3 %v1242_v10 }
 0x825   : > { %1641 = vmatpush.msra.mxu0 %v1570_v18 }
 0x827   : > { %1642 = vmatpush.msra.mxu0 %v1569_v31  ;;  %v1580_v31 = vld [vmem:[%s2907_s11 + $0x80] sm:$0xff] }
 0x829   : > { %1643 = vmatpush.msra.mxu0 %v1568_v44 }
 0x82b   : > { %1644 = vmatpush.msra.mxu0 %v1567_v56  ;;  %v1597_v56 = vld [vmem:[%s2907_s11 + $0x108] sm:$0xff] }
 0x8a0   : > { %v1334_v17 = vpop.f32.mrf.mxu0  ;;  %v1354_v22 = vpop.f32.mrf.mxu1 }
 0x8a1   : > { %v2537_v23 = vadd.f32 %v1334_v17, %v1309_v19  ;;  %v2539_v25 = vadd.f32 %v1354_v22, %v1310_v20  ;;  %v1586_v19 = vld [vmem:[%s2907_s11 + $0xb0] sm:$0xff]  ;;  %v1621_v22 = vld [vmem:[%s2907_s11 + $0x1c8] sm:$0xff] }
 0x8a2   : > { %1661 = vmatpush.msra.mxu1 %v1586_v19  ;;  %1698 = vmatpush.msra.mxu3 %v1621_v22 }
 0x8a3   : > { %v2548_v28 = vmul.f32 %v1407_v21, %v2537_v23  ;;  %v2551_v29 = vmul.f32 %v1407_v21, %v2539_v25 }
 0x8a4   : > { %1662 = vmatpush.msra.mxu1 %v1585_v37 }
 0x8a5   : > { %v2560_v34 = vand.u32 2147483647, %v2548_v28  ;;  %v2563_v35 = vand.u32 2147483647, %v2551_v29 }
 0x8a6   : > { %1663 = vmatpush.msra.mxu1 %v1584_v45  ;;  %v1614_v45 = vld [vmem:[%s2907_s11 + $0x190] sm:$0xff] }
 0x8a7   : > { %v1424_v38 = vmul.f32 0.3275911, %v2560_v34  ;;  %v1425_v39 = vmul.f32 0.3275911, %v2563_v35  ;;  %v1374_v40 = vpop.f32.mrf.mxu2  ;;  %v1394_v41 = vpop.f32.mrf.mxu3  ;;  %v1528_v17 = vsub.f32 0.0, %v2560_v34  ;;  %v1529_v50 = vsub.f32 0.0, %v2563_v35 }
 0x8a8   : > { %v2573_v42 = vadd.f32 %v1374_v40, %v1311_v32  ;;  %v2575_v43 = vadd.f32 %v1394_v41, %v1312_v33  ;;  %1664 = vmatpush.msra.mxu1 %v1583_v0  ;;  %v1613_v0 = vld [vmem:[%s2907_s11 + $0x188] sm:$0xff] }
 0x8a9   : > { %v2586_v47 = vadd.f32 1.0, %v1424_v38  ;;  %v2588_v48 = vadd.f32 1.0, %v1425_v39  ;;  %v1604_v38 = vld [vmem:[%s2907_s11 + $0x140] sm:$0xff]  ;;  %v1532_v60 = vmul.f32 %v1528_v17, %v2560_v34 }
 0x8aa   : > { %v2600_v53 = vmul.f32 %v1407_v21, %v2573_v42  ;;  %v2620_v58 = vmul.f32 %v1407_v21, %v2575_v43  ;;  %v1605_v21 = vld [vmem:[%s2907_s11 + $0x148] sm:$0xff]  ;;  %v1620_v39 = vld [vmem:[%s2907_s11 + $0x1c0] sm:$0xff] }
 0x8ab   : > { %1872 = vrcp.f32 %v2586_v47  ;;  %v1443_v26 = vand.u32 2147483648, %v2586_v47  ;;  %v1441_v33 = vand.u32 2147483647, %v2586_v47  ;;  %v1458_v36 = vand.u32 2147483648, %v2588_v48  ;;  %1678 = vmatpush.msra.mxu2 %v1605_v21  ;;  %1699 = vmatpush.msra.mxu3 %v1620_v39  ;;  %v1616_v17 = vld [vmem:[%s2907_s11 + $0x1a0] sm:$0xff] }
 0x8ac   : > { %1874 = vrcp.f32 %v2588_v48  ;;  %v2629_v61 = vand.u32 2147483647, %v2600_v53  ;;  %v2648_v5 = vand.u32 2147483647, %v2620_v58  ;;  %vm1437_vm3 = vweird.f32 %v2586_v47 }
 0x8ad   : > { %v1456_v41 = vand.u32 2147483647, %v2588_v48  ;;  %1679 = vmatpush.msra.mxu2 %v1604_v38  ;;  %v1444_v54 = vor.u32 1.1754944e-38, %v1443_v26  ;;  %vm1452_vm6 = vweird.f32 %v2588_v48  ;;  %vm1442_vm7 = vcmp.eq.f32.partialorder %v1441_v33, 8.507059e+37  ;;  %1700 = vmatpush.msra.mxu3 %v1619_v51  ;;  %v1615_v38 = vld [vmem:[%s2907_s11 + $0x198] sm:$0xff] }
 0x8ae   : > { %v1426_v4 = vmul.f32 0.3275911, %v2629_v61  ;;  %v1427_v62 = vmul.f32 0.3275911, %v2648_v5  ;;  %v1459_v63 = vor.u32 1.1754944e-38, %v1458_v36 }
 0x8af   : > { %1680 = vmatpush.msra.mxu2 %v1603_v46  ;;  %vm1457_vm9 = vcmp.eq.f32.partialorder %v1456_v41, 8.507059e+37  ;;  %1701 = vmatpush.msra.mxu3 %v1618_v1  ;;  %v1536_v36 = vmul.f32 1.442695, %v1532_v60  ;;  %v1596_v1 = vld [vmem:[%s2907_s11 + $0x100] sm:$0xff] }
 0x8b0   : > { %v2665_v11 = vadd.f32 1.0, %v1426_v4  ;;  %v2695_v30 = vadd.f32 1.0, %v1427_v62  ;;  %v1566_v4 = vld [vmem:[%s2907_s11 + $0x10] sm:$0xff]  ;;  %v1600_v62 = vld [vmem:[%s2907_s11 + $0x120] sm:$0xff] }
 0x8b1   : > { %v2650_v6 = vpop.eup %1872  ;;  %1681 = vmatpush.msra.mxu2 %v1602_v57  ;;  %1645 = vmatpush.msra.mxu0 %v1566_v4 }
 0x8b2   : > { %v2661_v9 = vpop.eup %1874  ;;  %v1433_v10 = vmul.f32 %v2650_v6, %v2586_v47  ;;  %1876 = vrcp.f32 %v2665_v11  ;;  %vm1438_vm2 = vweird.f32 %v2650_v6  ;;  %1702 = vmatpush.msra.mxu3 %v1617_v12  ;;  %vm1467_vm11 = vweird.f32 %v2665_v11 }
 0x8b3   : > { %v1448_v16 = vmul.f32 %v2661_v9, %v2588_v48  ;;  %vm1453_vm4 = vweird.f32 %v2661_v9  ;;  %vm2728_vm5 = vmor %vm1437_vm3, %vm1438_vm2  ;;  %1878 = vrcp.f32 %v2695_v30  ;;  %1682 = vmatpush.msra.mxu2 %v1601_v7  ;;  %v1486_v49 = vand.u32 2147483647, %v2695_v30 }
 0x8b4   : > { %v1434_v20 = vsub.f32 1.0, %v1433_v10  ;;  %vm2756_vm8 = vmor %vm1452_vm6, %vm1453_vm4  ;;  %v1471_v10 = vand.u32 2147483647, %v2665_v11  ;;  %1703 = vmatpush.msra.mxu3 %v1616_v17  ;;  %1880 = vpow2.f32 %v1536_v36  ;;  %vm1482_vm15 = vweird.f32 %v2695_v30 }
 0x8b5   : > { %v1449_v27 = vsub.f32 1.0, %v1448_v16  ;;  %v1565_v16 = vld [vmem:[%s2907_s11 + $0x8] sm:$0xff]  ;;  %1683 = vmatpush.msra.mxu2 %v1600_v62  ;;  %vm1487_vm1 = vcmp.eq.f32.partialorder %v1486_v49, 8.507059e+37  ;;  %v1531_v12 = vsub.f32 0.0, %v2648_v5  ;;  %vm1412_vm2 = vcmp.ge.f32.partialorder %v2548_v28, 0.0 }
 0x8b6   : > { %v1435_v32 = vmul.f32 %v2650_v6, %v1434_v20  ;;  %v1473_v20 = vand.u32 2147483648, %v2665_v11  ;;  %1646 = vmatpush.msra.mxu0 %v1565_v16  ;;  %vm2823_vm12 = vcmp.eq.f32.partialorder %v1471_v10, 8.507059e+37  ;;  %1704 = vmatpush.msra.mxu3 %v1615_v38  ;;  %vm1413_vm3 = vcmp.ge.f32.partialorder %v2551_v29, 0.0 }
 0x8b7   : > { %v1450_v40 = vmul.f32 %v2661_v9, %v1449_v27  ;;  %v1564_v27 = vld [vmem:[%s2907_s11] sm:$0xff]  ;;  %v1398_v49 = vmul.f32 0.5, %v2539_v25  ;;  %vm1414_vm4 = vcmp.ge.f32.partialorder %v2600_v53, 0.0 }
 0x8b8   : > { %v1436_v47 = vadd.f32 %v2650_v6, %v1435_v32  ;;  %v2748_v59 = vpop.eup %1876  ;;  %v1599_v32 = vld [vmem:[%s2907_s11 + $0x118] sm:$0xff]  ;;  %1647 = vmatpush.msra.mxu0 %v1564_v27  ;;  %1705 = vmatpush.msra.mxu3 %v1614_v45 }
 0x8b9   : > { %v1451_v55 = vadd.f32 %v2661_v9, %v1450_v40  ;;  %v1463_v34 = vmul.f32 %v2748_v59, %v2665_v11  ;;  %v2797_v18 = vpop.eup %1878  ;;  %vm1468_vm10 = vweird.f32 %v2748_v59  ;;  %v1598_v11 = vld [vmem:[%s2907_s11 + $0x110] sm:$0xff]  ;;  %1684 = vmatpush.msra.mxu2 %v1599_v32 }
 0x8ba   : > { %v1440_v48 = vsel %vm2728_vm5, %v2650_v6, %v1436_v47  ;;  %v1582_v6 = vld [vmem:[%s2907_s11 + $0x90] sm:$0xff]  ;;  %v1478_v26 = vmul.f32 %v2797_v18, %v2695_v30  ;;  %vm1469_vm13 = vmor %vm1467_vm11, %vm1468_vm10  ;;  %v1474_v47 = vor.u32 1.1754944e-38, %v1473_v20  ;;  %vm1483_vm14 = vweird.f32 %v2797_v18  ;;  %1706 = vmatpush.msra.mxu3 %v1613_v0 }
 0x8bb   : > { %v2763_v2 = vsel %vm1442_vm7, %v1444_v54, %v1440_v48  ;;  %v1455_v3 = vsel %vm2756_vm8, %v2661_v9, %v1451_v55  ;;  %v1533_v9 = vmul.f32 %v1529_v50, %v2563_v35  ;;  %v1464_v15 = vsub.f32 1.0, %v1463_v34  ;;  %1665 = vmatpush.msra.mxu1 %v1582_v6  ;;  %v1581_v35 = vld [vmem:[%s2907_s11 + $0x88] sm:$0xff]  ;;  %1685 = vmatpush.msra.mxu2 %v1598_v11  ;;  %vm1484_vm0 = vmor %vm1482_vm15, %vm1483_vm14 }
 0x8bc   : > { %v1492_v8 = vmul.f32 1.0614054, %v2763_v2  ;;  %v2780_v14 = vsel %vm1457_vm9, %v1459_v63, %v1455_v3  ;;  %v1479_v44 = vsub.f32 1.0, %v1478_v26  ;;  %v1488_v50 = vand.u32 2147483648, %v2695_v30  ;;  %v1612_v3 = vld [vmem:[%s2907_s11 + $0x180] sm:$0xff] }
 0x8bd   : > { %v1493_v13 = vmul.f32 1.0614054, %v2780_v14  ;;  %v1465_v22 = vmul.f32 %v2748_v59, %v1464_v15  ;;  %1666 = vmatpush.msra.mxu1 %v1581_v35  ;;  %v1538_v37 = vmul.f32 1.442695, %v1533_v9  ;;  %1686 = vmatpush.msra.mxu2 %v1597_v56  ;;  %v1881_v35 = vpop.eup %1880  ;;  %vm1415_vm5 = vcmp.ge.f32.partialorder %v2620_v58, 0.0 }
 0x8be   : > { %v1496_v19 = vadd.f32 -1.4531521, %v1492_v8  ;;  %v1480_v55 = vmul.f32 %v2797_v18, %v1479_v44  ;;  %v1489_v4 = vor.u32 1.1754944e-38, %v1488_v50  ;;  %1707 = vmatpush.msra.mxu3 %v1612_v3 }
 0x8bf   : > { %v1497_v21 = vadd.f32 -1.4531521, %v1493_v13  ;;  %v1466_v40 = vadd.f32 %v2748_v59, %v1465_v22  ;;  %1667 = vmatpush.msra.mxu1 %v1580_v31  ;;  %1882 = vpow2.f32 %v1538_v37  ;;  %1687 = vmatpush.msra.mxu2 %v1596_v1 }
 0x8c0   : > { %v1500_v33 = vmul.f32 %v1496_v19, %v2763_v2  ;;  %v1481_v63 = vadd.f32 %v2797_v18, %v1480_v55 }
 0x8c1   : > { %v1501_v39 = vmul.f32 %v1497_v21, %v2780_v14  ;;  %v1470_v54 = vsel %vm1469_vm13, %v2748_v59, %v1466_v40  ;;  %v1530_v59 = vsub.f32 0.0, %v2629_v61 }
 0x8c2   : > { %v1504_v46 = vadd.f32 1.4214138, %v1500_v33  ;;  %v2849_v48 = vsel %vm2823_vm12, %v1474_v47, %v1470_v54  ;;  %v1485_v30 = vsel %vm1484_vm0, %v2797_v18, %v1481_v63  ;;  %v1397_v47 = vmul.f32 0.5, %v2537_v23 }
 0x8c3   : > { %v1505_v51 = vadd.f32 1.4214138, %v1501_v39  ;;  %v1494_v24 = vmul.f32 1.0614054, %v2849_v48  ;;  %v1534_v9 = vmul.f32 %v1530_v59, %v2629_v61  ;;  %v1490_v10 = vsel %vm1487_vm1, %v1489_v4, %v1485_v30 }
 0x8c4   : > { %v1508_v57 = vmul.f32 %v1504_v46, %v2763_v2  ;;  %v1495_v16 = vmul.f32 1.0614054, %v1490_v10  ;;  %v1535_v61 = vmul.f32 %v1531_v12, %v2648_v5 }
 0x8c5   : > { %v1509_v60 = vmul.f32 %v1505_v51, %v2780_v14  ;;  %v1498_v7 = vadd.f32 -1.4531521, %v1494_v24  ;;  %v1883_v17 = vpop.eup %1882  ;;  %v1540_v22 = vmul.f32 1.442695, %v1534_v9  ;;  %v1831_v9 = vld [vmem:[%s2908_s12] ss:$0 sm:$0xff] }
 0x8c6   : > { %v1512_v34 = vadd.f32 -0.28449672, %v1508_v57  ;;  %v1499_v18 = vadd.f32 -1.4531521, %v1495_v16  ;;  %v1542_v39 = vmul.f32 1.442695, %v1535_v61 }
 0x8c7   : > { %v1513_v6 = vadd.f32 -0.28449672, %v1509_v60  ;;  %v1502_v15 = vmul.f32 %v1498_v7, %v2849_v48  ;;  %1884 = vpow2.f32 %v1540_v22  ;;  %v1400_v7 = vmul.f32 0.5, %v2575_v43 }
 0x8c8   : > { %v1516_v8 = vmul.f32 %v1512_v34, %v2763_v2  ;;  %v1503_v31 = vmul.f32 %v1499_v18, %v1490_v10  ;;  %1886 = vpow2.f32 %v1542_v39 }
 0x8c9   : > { %v1517_v13 = vmul.f32 %v1513_v6, %v2780_v14  ;;  %v1506_v20 = vadd.f32 1.4214138, %v1502_v15 }
 0x8ca   : > { %v1520_v62 = vadd.f32 0.2548296, %v1516_v8  ;;  %v1507_v37 = vadd.f32 1.4214138, %v1503_v31 }
 0x8cb   : > { %v1521_v19 = vadd.f32 0.2548296, %v1517_v13  ;;  %v1510_v27 = vmul.f32 %v1506_v20, %v2849_v48 }
 0x8cc   : > { %v1524_v21 = vmul.f32 %v1520_v62, %v2763_v2  ;;  %v1905_v2 = vmov -1.0  }
 0x8cd   : > { %v1525_v26 = vmul.f32 %v1521_v19, %v2780_v14  ;;  %v1514_v36 = vadd.f32 -0.28449672, %v1510_v27  ;;  %v1416_v40 = vsel %vm1412_vm2, 1.0, %v1905_v2  ;;  %v1511_v14 = vmul.f32 %v1507_v37, %v1490_v10  ;;  %v1885_v55 = vpop.eup %1884 }
 0x8ce   : > { %v1544_v32 = vmul.f32 %v1881_v35, %v1524_v21  ;;  %v1417_v11 = vsel %vm1413_vm3, 1.0, %v1905_v2  ;;  %v1887_v23 = vpop.eup %1886  ;;  %v1418_v63 = vsel %vm1414_vm4, 1.0, %v1905_v2  ;;  %v1419_v4 = vsel %vm1415_vm5, 1.0, %v1905_v2 }
 0x8cf   : > { %v1545_v33 = vmul.f32 %v1883_v17, %v1525_v26  ;;  %v1518_v5 = vmul.f32 %v1514_v36, %v2849_v48  ;;  %v1515_v28 = vadd.f32 -0.28449672, %v1511_v14 }
 0x8d0   : > { %v1548_v38 = vsub.f32 1.0, %v1544_v32 }
 0x8d1   : > { %v1549_v41 = vsub.f32 1.0, %v1545_v33  ;;  %v1522_v46 = vadd.f32 0.2548296, %v1518_v5  ;;  %v1519_v54 = vmul.f32 %v1515_v28, %v1490_v10 }
 0x8d2   : > { %v1552_v44 = vmul.f32 %v1548_v38, %v1416_v40 }
 0x8d3   : > { %v1553_v45 = vmul.f32 %v1549_v41, %v1417_v11  ;;  %v1526_v51 = vmul.f32 %v1522_v46, %v2849_v48  ;;  %v1523_v59 = vadd.f32 0.2548296, %v1519_v54  ;;  %v1399_v48 = vmul.f32 0.5, %v2573_v42 }
 0x8d4   : > { %v1556_v29 = vadd.f32 1.0, %v1552_v44 }
 0x8d5   : > { %v1557_v50 = vadd.f32 1.0, %v1553_v45  ;;  %v1546_v57 = vmul.f32 %v1885_v55, %v1526_v51  ;;  %v1527_v24 = vmul.f32 %v1523_v59, %v1490_v10 }
 0x8d6   : > { %v1560_v56 = vmul.f32 %v1556_v29, %v1397_v47 }
 0x8d7   : > { %v1561_v0 = vmul.f32 %v1557_v50, %v1398_v49  ;;  %v1550_v60 = vsub.f32 1.0, %v1546_v57  ;;  %v1547_v25 = vmul.f32 %v1887_v23, %v1527_v24 }
 0x8d8   : > { %1648 = vmatmul.f32.vlgmr.msra.gmra.mxu0 %v1560_v56 }
 0x8d9   : > { %1668 = vmatmul.f32.vlgmr.msra.gmra.mxu1 %v1561_v0  ;;  %v1554_v1 = vmul.f32 %v1550_v60, %v1418_v63  ;;  %v1551_v34 = vsub.f32 1.0, %v1547_v25 }
 0x8db   : > { %v1558_v3 = vadd.f32 1.0, %v1554_v1  ;;  %v1555_v53 = vmul.f32 %v1551_v34, %v1419_v4 }
 0x8dd   : > { %v1562_v6 = vmul.f32 %v1558_v3, %v1399_v48  ;;  %v1559_v30 = vadd.f32 1.0, %v1555_v53 }
 0x8df   : > { %1688 = vmatmul.f32.vlgmr.msra.gmra.mxu2 %v1562_v6  ;;  %v1563_v8 = vmul.f32 %v1559_v30, %v1400_v7 }
 0x8e1   : > { %1708 = vmatmul.f32.vlgmr.msra.gmra.mxu3 %v1563_v8 }
 0x955   : > { %v1649_v58 = vpop.f32.mrf.mxu0 }
 0x956   : > { %v1650_v10 = vadd.f32 %v1831_v9, %v1649_v58  ;;  %v1669_v12 = vpop.f32.mrf.mxu1 }
 0x958   : > { %v1670_v42 = vadd.f32 %v1669_v12, %v1650_v10 }
 0x962   : > { %v1689_v13 = vpop.f32.mrf.mxu2 }
 0x963   : > { %v1690_v15 = vadd.f32 %v1689_v13, %v1670_v42 }
 0x964   : > { %v1709_v16 = vpop.f32.mrf.mxu3 }
 0x965   : > { %v1710_v35 = vadd.f32 %v1709_v16, %v1690_v15 }
 0x967   : > { %v1712_v43 = vadd.f32 %v1710_v35, %v2323_v52 }
 0x969   : > { %1713 = vst [vmem:[%s435_s17] sm:$0xf] %v1712_v43 }
 0x96a PF: > { %s23_s25 = sadd.s32 1, %s1894_s25  }
 0x96b   : > { %p20_p4 = scmp.ge.s32.totalorder %s23_s25, 4  }
 0x96d   :  { %22 = sbr.rel (!%p20_p4) target bundleno = 1 (0x1), region = 102 }

// kernel: _lambda_.19
= control target key start
LH: loop header
LB: loop body
LE: loop exit
PB: predicated region body
PF: predicated region fallthrough
CT: control target
= control target key end

     0   :  { %8 = vsyncpa [#allocation3], 0  ;;  %s558_s0 = inlined_call_operand.vmem [shape: f32[2,16,64], index: 0, kind: input, shape index: {}]   ;;  %s559_s1 = inlined_call_operand.vmem [shape: f32[64,32], index: 1, kind: input, shape index: {}]   ;;  %s560_s2 = inlined_call_operand.vmem [shape: f32[1,32], index: 2, kind: input, shape index: {}]   ;;  %s561_s3 = inlined_call_operand.hbm [shape: f32[2,16,32], index: 3, kind: output, shape index: {}]  }
   0x1   :  { %10 = vsyncpa [#allocation3 + $0x1], 0  ;;  %s446_s12 = smov 0   ;;  %s448_s13 = smov 0  }
   0x2   :  { %s450_s14 = smov 0   ;;  %s452_s15 = smov 0  }
   0x3 LB: > { %s467_s16 = sadd.s32 4294967295, %s422_s15   ;;  %s294_s17 = sadd.s32 4294967294, %s422_s15   ;;  %s422_s15 = sphi %s452_s15, %s567_s15   ;;  %s418_s14 = sphi %s450_s14, %s566_s14   ;;  %s414_s13 = sphi %s448_s13, %s565_s13   ;;  %s410_s12 = sphi %s446_s12, %s564_s12  }
   0x4   : > { %s471_s18 = sadd.s32 1, %s422_s15   ;;  %s91_s19 = sadd.s32 1, %s418_s14 }
   0x5   : > { %s88_s20 = ssub.s32 %s422_s15, %s471_s18  ;;  %p101_p0 = scmp.ne.s32.totalorder %s418_s14, %s414_s13 }
   0x6   : > { %p89_p1 = scmp.eq.s32.totalorder %s88_s20, 0  ;;  %p102_p2 = scmp.eq.s32.totalorder %s467_s16, 1 }
   0x7   : > { %p107_p3 = scmp.ne.s32.totalorder %s414_s13, %s410_s12  ;;  %p108_p4 = scmp.eq.s32.totalorder %s294_s17, 1 }
   0x8   : > { %s482_s21 = scalar_select %p89_p1, %s418_s14, %s91_s19  }
   0x9   : > { %p484_p5 = por %p102_p2, %p101_p0  ;;  %p488_p6 = por %p108_p4, %p107_p3 }
   0xa   : > { %p297_p7 = scmp.ge.s32.totalorder %s422_s15, 1  ;;  %p140_p8 = scmp.lt.s32.totalorder %s422_s15, 3 }
   0xc   : > { %p141_p9 = pnand %p297_p7, %p140_p8 }
   0xd   : > { %p164_p10 = scmp.lt.s32.totalorder (!%p141_p9), %s467_s16, 1  ;;  %s161_s27 = sand.u32 (!%p141_p9), 1, %s414_s13  }
   0xe   : > { %144 = sbr.rel (%p141_p9) target bundleno = 168 (0xa8), region = 32  ;;  %s298_s28 = sshll.u32 (!%p141_p9), %s161_s27, 4 }
   0xf   : > { %s309_s29 = sshll.u32 (!%p141_p9), %s467_s16, 4 }
  0x10   : > { %s228_s5 = scalar_lea.hbm (!%p141_p9), %s561_s3, %s309_s29 }
  0x11   : > { %s231_s10 = sshll.u32 (!%p141_p9), %s228_s5, 4  ;;  %s232_s10 = int_to_ptr.hbm [resolvable:$true] %s231_s10 }
  0x12   : > { %s374_s11 = sshra.s32 (!%p141_p9), %s232_s10, 4  ;;  %s375_s11 = int_to_ptr.hbm [resolvable:$true] %s374_s11 }
  0x13   : > { %v178_v0 = vld [vmem:[%s559_s1 + $0x38] sm:$0xff]  ;;  %v177_v1 = vld [vmem:[%s559_s1 + $0x30] sm:$0xff]  ;;  %v176_v2 = vld [vmem:[%s559_s1 + $0x28] sm:$0xff]  ;;  %s165_s30 = scalar_select %p164_p10, %s467_s16, 1  ;;  %vm183_vm0 = vcmask 523264   ;;  %vm213_vm1 = vcmask 261120  }
  0x14   : > { %198 = vmatpush.msra.mxu0 %v178_v0  ;;  %310 = vmatpush.msra.mxu1 %v178_v0  ;;  %v175_v3 = vld [vmem:[%s559_s1 + $0x20] sm:$0xff]  ;;  %v174_v4 = vld [vmem:[%s559_s1 + $0x18] sm:$0xff]  ;;  %v173_v5 = vld [vmem:[%s559_s1 + $0x10] sm:$0xff]  ;;  %s217_s16 = scalar_lea.sflag [#allocation3], %s161_s27  ;;  %s376_s17 = scalar_lea.hbm %s375_s11, 16 }
  0x15   : > { %s308_s8 = sshll.u32 %s165_s30, 4  ;;  %v172_v6 = vld [vmem:[%s559_s1 + $0x8] sm:$0xff]  ;;  %v171_v7 = vld [vmem:[%s559_s1] sm:$0xff]  ;;  %p377_p11 = scmp.ne.s32.totalorder %s375_s11, %s376_s17 }
  0x16   : > { %199 = vmatpush.msra.mxu0 %v177_v1  ;;  %311 = vmatpush.msra.mxu1 %v177_v1  ;;  %s168_s24 = scalar_lea.vmem %s558_s0, %s308_s8  ;;  %v359_v10 = vld [vmem:[%s560_s2] ss:$0 sm:$0xff]  ;;  %s163_s8 = scalar_lea.vmem [#allocation2], %s298_s28 }
  0x17   : > { %v169_v8 = vld [vmem:[%s168_s24] sm:$0xff]  ;;  %v170_v9 = vld [vmem:[%s168_s24 + $0x8] sm:$0xff]  ;;  %s229_s9 = sshll.u32 %s163_s8, 4  ;;  %p378_p12 = pnand %p377_p11, %p484_p5  ;;  %s230_s9 = int_to_ptr.vmem [resolvable:$true] %s229_s9 }
  0x18   : > { %200 = vmatpush.msra.mxu0 %v176_v2  ;;  %312 = vmatpush.msra.mxu1 %v176_v2  ;;  %s380_s24 = scalar_lea.hbm %s561_s3, 32  ;;  %p381_p0 = scmp.lt.s32.totalorder %s375_s11, %s561_s3 }
  0x19   : > { %p379_p13 = pneg %p378_p12  ;;  %p382_p1 = scmp.lt.s32.totalorder %s380_s24, %s376_s17 }
  0x1a   : > { %201 = vmatpush.msra.mxu0 %v175_v3  ;;  %313 = vmatpush.msra.mxu1 %v175_v3 }
  0x1b   : > { %p383_p2 = por %p382_p1, %p381_p0 }
  0x1c   : > { %202 = vmatpush.msra.mxu0 %v174_v4  ;;  %314 = vmatpush.msra.mxu1 %v174_v4 }
  0x1d   : > { %p384_p3 = pnand %p383_p2, %p379_p13 }
  0x1e   : > { %203 = vmatpush.msra.mxu0 %v173_v5  ;;  %315 = vmatpush.msra.mxu1 %v173_v5 }
  0x20   : > { %204 = vmatpush.msra.mxu0 %v172_v6  ;;  %316 = vmatpush.msra.mxu1 %v172_v6 }
  0x22   : > { %205 = vmatpush.msra.mxu0 %v171_v7  ;;  %317 = vmatpush.msra.mxu1 %v171_v7 }
  0x23   : > { %301 = vmatmul.msk.f32.vlgmr.msra.gmra.mxu0 %vm183_vm0, %v169_v8  ;;  %302 = vmatmul.msk.f32.vlgmr.msra.gmra.mxu1 %vm183_vm0, %v170_v9 }
  0xa0   : > { %v207_v11 = vpop.f32.mrf.mxu0  ;;  %v210_v12 = vpop.f32.mrf.mxu1 }
  0xa1   : > { %v208_v13 = vadd.f32 %v359_v10, %v207_v11  ;;  %v211_v14 = vadd.f32 %v359_v10, %v210_v12 }
  0xa3   : > { %214 = vst.msk [vmem:[%s163_s8] sm:$0xff] %vm213_vm1, %v208_v13 }
  0xa4   : > { %215 = vst.msk [vmem:[%s163_s8 + $0x8] sm:$0xff] %vm213_vm1, %v211_v14 }
  0xa5   : > { %387 = shalt.err (!%p384_p3)
}
  0xa6   : > { %s424_s27 = smov 128   ;;  %s425_s28 = smov 8  }
  0xa7   : > { %318 = dma.vmem_to_hbm [thread:$0]  (%p484_p5), %s230_s9, 256, %s232_s10, %s217_s16, %s424_s27, %s424_s27, %s425_s28  }
  0xa8 PF: > { %p324_p4 = scmp.ge.s32.totalorder %s422_s15, 2  ;;  %s246_s29 = sand.u32 1, %s410_s12  }
  0xa9   : > { %s247_s30 = scalar_lea.sflag [#allocation3], %s246_s29 }
  0xaa   : > { %p321_p7 = pnand %p324_p4, %p488_p6 }
  0xac   : > { %p322_p8 = pneg %p321_p7 }
  0xae   : > { %405 = dma.done.wait (%p322_p8), %s247_s30, 256  }
  0xaf   : > { %407 = vsyncadd (%p322_p8), %s247_s30, 4294967040  ;;  %p13_p9 = scmp.ge.s32.totalorder %s471_s18, 4   ;;  %s564_s12 = smov %s414_s13 }
  0xb0   : > { %s565_s13 = smov %s418_s14  ;;  %s566_s14 = smov %s482_s21 }
  0xb1   : > { %s567_s15 = smov %s471_s18  ;;  %15 = sbr.rel (!%p13_p9) target bundleno = 3 (0x3), region = 67 }
  0xb6   :  { %253 = vsyncpa [#allocation3], 1 }
  0xb7   :  { %255 = vsyncpa [#allocation3 + $0x1], 1 }

</bundles_post_ra>
